<compile_context>
chip_gen: v6e
topology: v6e:2x2x1
jax: 0.10.0
libtpu: 0.0.40
codegen_flags: <defaults>
</compile_context>

<pallas_src>
import functools

import jax
import jax.numpy as jnp
from jax.experimental import pallas as pl
from jax.experimental.pallas import tpu as pltpu

HIDDEN = 256  # hard-coded in the PyTorch module (nn.GRU(obs_dim, 256, 1))


def _round_up(x, m):
    return ((x + m - 1) // m) * m


# ----------------------------------------------------------------------------
# Fused kernel: big input projection -> GRU recurrence -> ReLU -> Linear.
# Inputs are already time-major / padded / bias-folded by the wrapper.
# ----------------------------------------------------------------------------
def gru_fc_kernel(x_ref, wih_ref, whh_ref, bgi_ref, bhn_ref,
                  wfc1_ref, wfc2_ref, bfc_ref, out_ref, gi_ref,
                  *, T, B2P, BP, H):
    # Phase 1: input-to-hidden projection for ALL time steps in one matmul.
    # x_ref: (T*B2P, D) time-major rows; gi_ref scratch: (T*B2P, 3H).
    gi_ref[...] = (
        jnp.dot(x_ref[...], wih_ref[...], preferred_element_type=jnp.float32)
        + bgi_ref[...]
    )

    # Hoist the (broadcast of the) n-gate hidden bias out of the loop
    # (broadcast_in_dim is not CSE'd by JAX).
    b_hn = jnp.broadcast_to(bhn_ref[...], (B2P, H))

    # Phase 2: serial GRU recurrence; h lives in vregs (carry), gi streams
    # from the VMEM scratch via aligned dynamic slices.
    def step(t, h):
        start = pl.multiple_of(t * B2P, B2P)
        gi = gi_ref[pl.ds(start, B2P), :]                      # (B2P, 3H)
        gh = jnp.dot(h, whh_ref[...], preferred_element_type=jnp.float32)
        r = jax.nn.sigmoid(gi[:, :H] + gh[:, :H])
        z = jax.nn.sigmoid(gi[:, H:2 * H] + gh[:, H:2 * H])
        n = jnp.tanh(gi[:, 2 * H:] + r * (gh[:, 2 * H:] + b_hn))
        return (1.0 - z) * n + z * h

    h0 = jnp.zeros((B2P, H), jnp.float32)
    h = jax.lax.fori_loop(0, T, step, h0, unroll=True)

    # Phase 3: Encoder ReLU + fused final Linear (split weights, no concat).
    f = jnp.maximum(h, 0.0)                                    # (B2P, H)
    out_ref[...] = (
        jnp.dot(f[:BP], wfc1_ref[...], preferred_element_type=jnp.float32)
        + jnp.dot(f[BP:], wfc2_ref[...], preferred_element_type=jnp.float32)
        + bfc_ref[...]
    )


# ----------------------------------------------------------------------------
# ForwardModel.forward
# ----------------------------------------------------------------------------
@jax.jit
def forward_model(obs, obs_next, params):
    # obs, obs_next: (B, T, obs_dim)  (PyTorch batch_first convention)
    B, T, D = obs.shape
    H = HIDDEN
    A = params["w_fc_t"].shape[1]
    BP = _round_up(max(B, 8), 8)           # sublane-pad each encoder batch
    A_PAD = _round_up(max(A, 128), 128)    # lane-dense FC output

    # Pad each input to BP rows (so the fea_1/fea_2 split is sublane-aligned),
    # stack along batch (shared encoder weights), flatten to time-major rows:
    # row index = t * 2*BP + b.  Tiny layout plumbing; XLA fuses it.
    pad = ((0, BP - B), (0, 0), (0, 0))
    xs = jnp.concatenate([jnp.pad(obs, pad), jnp.pad(obs_next, pad)], axis=0)
    x2d = jnp.transpose(xs, (1, 0, 2)).reshape(T * 2 * BP, D)

    # Fold r/z biases (b_ih + b_hh) and the n-gate input bias into the big
    # input projection; only b_hh_n stays inside the recurrence.
    b_ih, b_hh = params["b_ih"], params["b_hh"]
    b_gi = jnp.concatenate(
        [b_ih[:, :2 * H] + b_hh[:, :2 * H], b_ih[:, 2 * H:]], axis=-1)
    b_hn = b_hh[:, 2 * H:]

    # Split + lane-pad the final Linear so it fuses into the kernel epilogue
    # without materializing the (B, 512) concat.
    w_fc_t = params["w_fc_t"]
    wfc1 = jnp.pad(w_fc_t[:H], ((0, 0), (0, A_PAD - A)))
    wfc2 = jnp.pad(w_fc_t[H:], ((0, 0), (0, A_PAD - A)))
    bfc = jnp.pad(params["b_fc"], ((0, 0), (0, A_PAD - A)))

    kernel = functools.partial(gru_fc_kernel, T=T, B2P=2 * BP, BP=BP, H=H)
    y_pad = pl.pallas_call(
        kernel,
        out_shape=jax.ShapeDtypeStruct((BP, A_PAD), jnp.float32),
        # Single invocation (no grid): all operands resident in VMEM
        # (~1.5 MiB total incl. the gi scratch -> fine even on v7x's 64 MiB).
        scratch_shapes=[pltpu.VMEM((T * 2 * BP, 3 * H), jnp.float32)],
    )(x2d, params["w_ih_t"], params["w_hh_t"], b_gi, b_hn, wfc1, wfc2, bfc)

    # TODO(synk): if batch grows, add a "parallel" grid axis over batch tiles
    # (or a core_map over the 2-TC v7x mesh) instead of one monolithic call.
    return y_pad[:B, :A]


# Pure-JAX reference (same math, lax.scan GRU) for the sanity check.
def forward_model_ref(obs, obs_next, params):
    H = HIDDEN

    def gru_ref(x):  # x: (B2, T, D)
        B2 = x.shape[0]
        h0 = jnp.zeros((B2, H), jnp.float32)

        def step(h, x_t):
            gi = x_t @ params["w_ih_t"] + params["b_ih"]
            gh = h @ params["w_hh_t"] + params["b_hh"]
            r = jax.nn.sigmoid(gi[:, :H] + gh[:, :H])
            z = jax.nn.sigmoid(gi[:, H:2 * H] + gh[:, H:2 * H])
            n = jnp.tanh(gi[:, 2 * H:] + r * gh[:, 2 * H:])
            return (1.0 - z) * n + z * h, None

        h, _ = jax.lax.scan(step, h0, jnp.transpose(x, (1, 0, 2)))
        return jnp.maximum(h, 0.0)

    B = obs.shape[0]
    feats = gru_ref(jnp.concatenate([obs, obs_next], axis=0))
    cat = jnp.concatenate([feats[:B], feats[B:]], axis=-1)
    return cat @ params["w_fc_t"] + params["b_fc"]


def init_params(key, obs_dim, act_dim):
    H = HIDDEN
    k = jax.random.split(key, 6)
    s_gru = 1.0 / jnp.sqrt(H)
    s_fc = 1.0 / jnp.sqrt(2 * H)
    # PyTorch stores weight_ih_l0 as (3H, D); we keep the transpose for x @ W.
    return {
        "w_ih_t": jax.random.uniform(k[0], (obs_dim, 3 * H), jnp.float32, -s_gru, s_gru),
        "w_hh_t": jax.random.uniform(k[1], (H, 3 * H), jnp.float32, -s_gru, s_gru),
        "b_ih": jax.random.uniform(k[2], (1, 3 * H), jnp.float32, -s_gru, s_gru),
        "b_hh": jax.random.uniform(k[3], (1, 3 * H), jnp.float32, -s_gru, s_gru),
        # nn.Linear(512, act_dim): weight (act_dim, 512); store transpose.
        "w_fc_t": jax.random.uniform(k[4], (2 * H, act_dim), jnp.float32, -s_fc, s_fc),
        "b_fc": jax.random.uniform(k[5], (1, act_dim), jnp.float32, -s_fc, s_fc),
    }


if __name__ == "__main__":
    B, T, OBS_DIM, ACT_DIM = 2, 8, 32, 4

    key = jax.random.PRNGKey(0)
    k_obs, k_next, k_par = jax.random.split(key, 3)
    obs = jax.random.normal(k_obs, (B, T, OBS_DIM), jnp.float32)
    obs_next = jax.random.normal(k_next, (B, T, OBS_DIM), jnp.float32)
    params = init_params(k_par, OBS_DIM, ACT_DIM)

    y = forward_model(obs, obs_next, params)
    jax.block_until_ready(y)

    y_ref = forward_model_ref(obs, obs_next, params)
    assert y.shape == (B, ACT_DIM)
    assert jnp.allclose(y, y_ref, rtol=1e-2, atol=1e-2), "mismatch vs JAX reference"

    print("KERNEL_OK")
</pallas_src>

<mosaic_0001>
module attributes {stable_mosaic.version = 11 : i64} {
  func.func @gru_fc_kernel(%arg0: memref<128x32xf32, #tpu.memory_space<vmem>>, %arg1: memref<32x768xf32, #tpu.memory_space<vmem>>, %arg2: memref<256x768xf32, #tpu.memory_space<vmem>>, %arg3: memref<1x768xf32, #tpu.memory_space<vmem>>, %arg4: memref<1x256xf32, #tpu.memory_space<vmem>>, %arg5: memref<256x128xf32, #tpu.memory_space<vmem>>, %arg6: memref<256x128xf32, #tpu.memory_space<vmem>>, %arg7: memref<1x128xf32, #tpu.memory_space<vmem>>, %arg8: memref<8x128xf32, #tpu.memory_space<vmem>>, %arg9: memref<128x768xf32, #tpu.memory_space<vmem>>) attributes {dimension_semantics = [], scalar_prefetch = 0 : i64, scratch_operands = 1 : i64, tpu.core_type = #tpu.core_type<tc>} {
    %c0 = arith.constant 0 : index
    %c0_0 = arith.constant 0 : index
    %0 = vector.load %arg0[%c0, %c0_0] : memref<128x32xf32, #tpu.memory_space<vmem>>, vector<128x32xf32>
    %c0_1 = arith.constant 0 : index
    %c0_2 = arith.constant 0 : index
    %1 = vector.load %arg1[%c0_1, %c0_2] : memref<32x768xf32, #tpu.memory_space<vmem>>, vector<32x768xf32>
    %cst = arith.constant dense<0.000000e+00> : vector<128x768xf32>
    %2 = tpu.matmul %0, %1, %cst {dimension_numbers = #tpu.dot_dimension_numbers<[1], [0], [0], [1], [0, 0, 1, 1], [], []>} : vector<128x32xf32>, vector<32x768xf32>, vector<128x768xf32> -> vector<128x768xf32>
    %c0_3 = arith.constant 0 : index
    %c0_4 = arith.constant 0 : index
    %3 = vector.load %arg3[%c0_3, %c0_4] : memref<1x768xf32, #tpu.memory_space<vmem>>, vector<1x768xf32>
    %4 = vector.broadcast %3 : vector<1x768xf32> to vector<128x768xf32>
    %5 = arith.addf %2, %4 : vector<128x768xf32>
    %c0_5 = arith.constant 0 : index
    %c0_6 = arith.constant 0 : index
    %6 = vector.load %arg9[%c0_5, %c0_6] : memref<128x768xf32, #tpu.memory_space<vmem>>, vector<128x768xf32>
    tpu.vector_store %arg9[%c0_5, %c0_6], %5 {strides = array<i32>} : memref<128x768xf32, #tpu.memory_space<vmem>>, vector<128x768xf32>,
    %c0_7 = arith.constant 0 : index
    %c0_8 = arith.constant 0 : index
    %7 = vector.load %arg4[%c0_7, %c0_8] : memref<1x256xf32, #tpu.memory_space<vmem>>, vector<1x256xf32>
    %8 = vector.shape_cast %7 : vector<1x256xf32> to vector<1x256xf32>
    %9 = vector.broadcast %8 : vector<1x256xf32> to vector<16x256xf32>
    %cst_9 = arith.constant 0.000000e+00 : f32
    %10 = vector.broadcast %cst_9 : f32 to vector<16x256xf32>
    %c0_i32 = arith.constant 0 : i32
    %c16_i32 = arith.constant 16 : i32
    %11 = arith.muli %c0_i32, %c16_i32 : i32
    %12 = tpu.assume_multiple %11, 16 : i32
    %13 = arith.index_cast %12 : i32 to index
    %c0_10 = arith.constant 0 : index
    %14 = vector.load %arg9[%13, %c0_10] : memref<128x768xf32, #tpu.memory_space<vmem>>, vector<16x768xf32>
    %c0_11 = arith.constant 0 : index
    %c0_12 = arith.constant 0 : index
    %15 = vector.load %arg2[%c0_11, %c0_12] : memref<256x768xf32, #tpu.memory_space<vmem>>, vector<256x768xf32>
    %cst_13 = arith.constant dense<0.000000e+00> : vector<16x768xf32>
    %16 = tpu.matmul %10, %15, %cst_13 {dimension_numbers = #tpu.dot_dimension_numbers<[1], [0], [0], [1], [0, 0, 1, 1], [], []>} : vector<16x256xf32>, vector<256x768xf32>, vector<16x768xf32> -> vector<16x768xf32>
    %17 = vector.extract_strided_slice %14 {offsets = [0, 0], sizes = [16, 256], strides = [1, 1]} : vector<16x768xf32> to vector<16x256xf32>
    %18 = vector.extract_strided_slice %16 {offsets = [0, 0], sizes = [16, 256], strides = [1, 1]} : vector<16x768xf32> to vector<16x256xf32>
    %19 = arith.addf %17, %18 : vector<16x256xf32>
    %20 = arith.negf %19 : vector<16x256xf32>
    %21 = math.exp %20 : vector<16x256xf32>
    %cst_14 = arith.constant 1.000000e+00 : f32
    %22 = vector.broadcast %cst_14 : f32 to vector<16x256xf32>
    %23 = arith.addf %22, %21 : vector<16x256xf32>
    %24 = arith.divf %22, %23 : vector<16x256xf32>
    %25 = vector.extract_strided_slice %14 {offsets = [0, 256], sizes = [16, 256], strides = [1, 1]} : vector<16x768xf32> to vector<16x256xf32>
    %26 = vector.extract_strided_slice %16 {offsets = [0, 256], sizes = [16, 256], strides = [1, 1]} : vector<16x768xf32> to vector<16x256xf32>
    %27 = arith.addf %25, %26 : vector<16x256xf32>
    %28 = arith.negf %27 : vector<16x256xf32>
    %29 = math.exp %28 : vector<16x256xf32>
    %cst_15 = arith.constant 1.000000e+00 : f32
    %30 = vector.broadcast %cst_15 : f32 to vector<16x256xf32>
    %31 = arith.addf %30, %29 : vector<16x256xf32>
    %32 = arith.divf %30, %31 : vector<16x256xf32>
    %33 = vector.extract_strided_slice %14 {offsets = [0, 512], sizes = [16, 256], strides = [1, 1]} : vector<16x768xf32> to vector<16x256xf32>
    %34 = vector.extract_strided_slice %16 {offsets = [0, 512], sizes = [16, 256], strides = [1, 1]} : vector<16x768xf32> to vector<16x256xf32>
    %35 = arith.addf %34, %9 : vector<16x256xf32>
    %36 = arith.mulf %24, %35 : vector<16x256xf32>
    %37 = arith.addf %33, %36 : vector<16x256xf32>
    %38 = math.tanh %37 : vector<16x256xf32>
    %cst_16 = arith.constant 1.000000e+00 : f32
    %39 = vector.broadcast %cst_16 : f32 to vector<16x256xf32>
    %40 = arith.subf %39, %32 : vector<16x256xf32>
    %41 = arith.mulf %40, %38 : vector<16x256xf32>
    %42 = arith.mulf %32, %10 : vector<16x256xf32>
    %43 = arith.addf %41, %42 : vector<16x256xf32>
    %c1_i32 = arith.constant 1 : i32
    %c16_i32_17 = arith.constant 16 : i32
    %44 = arith.muli %c1_i32, %c16_i32_17 : i32
    %45 = tpu.assume_multiple %44, 16 : i32
    %46 = arith.index_cast %45 : i32 to index
    %c0_18 = arith.constant 0 : index
    %47 = vector.load %arg9[%46, %c0_18] : memref<128x768xf32, #tpu.memory_space<vmem>>, vector<16x768xf32>
    %c0_19 = arith.constant 0 : index
    %c0_20 = arith.constant 0 : index
    %48 = vector.load %arg2[%c0_19, %c0_20] : memref<256x768xf32, #tpu.memory_space<vmem>>, vector<256x768xf32>
    %cst_21 = arith.constant dense<0.000000e+00> : vector<16x768xf32>
    %49 = tpu.matmul %43, %48, %cst_21 {dimension_numbers = #tpu.dot_dimension_numbers<[1], [0], [0], [1], [0, 0, 1, 1], [], []>} : vector<16x256xf32>, vector<256x768xf32>, vector<16x768xf32> -> vector<16x768xf32>
    %50 = vector.extract_strided_slice %47 {offsets = [0, 0], sizes = [16, 256], strides = [1, 1]} : vector<16x768xf32> to vector<16x256xf32>
    %51 = vector.extract_strided_slice %49 {offsets = [0, 0], sizes = [16, 256], strides = [1, 1]} : vector<16x768xf32> to vector<16x256xf32>
    %52 = arith.addf %50, %51 : vector<16x256xf32>
    %53 = arith.negf %52 : vector<16x256xf32>
    %54 = math.exp %53 : vector<16x256xf32>
    %cst_22 = arith.constant 1.000000e+00 : f32
    %55 = vector.broadcast %cst_22 : f32 to vector<16x256xf32>
    %56 = arith.addf %55, %54 : vector<16x256xf32>
    %57 = arith.divf %55, %56 : vector<16x256xf32>
    %58 = vector.extract_strided_slice %47 {offsets = [0, 256], sizes = [16, 256], strides = [1, 1]} : vector<16x768xf32> to vector<16x256xf32>
    %59 = vector.extract_strided_slice %49 {offsets = [0, 256], sizes = [16, 256], strides = [1, 1]} : vector<16x768xf32> to vector<16x256xf32>
    %60 = arith.addf %58, %59 : vector<16x256xf32>
    %61 = arith.negf %60 : vector<16x256xf32>
    %62 = math.exp %61 : vector<16x256xf32>
    %cst_23 = arith.constant 1.000000e+00 : f32
    %63 = vector.broadcast %cst_23 : f32 to vector<16x256xf32>
    %64 = arith.addf %63, %62 : vector<16x256xf32>
    %65 = arith.divf %63, %64 : vector<16x256xf32>
    %66 = vector.extract_strided_slice %47 {offsets = [0, 512], sizes = [16, 256], strides = [1, 1]} : vector<16x768xf32> to vector<16x256xf32>
    %67 = vector.extract_strided_slice %49 {offsets = [0, 512], sizes = [16, 256], strides = [1, 1]} : vector<16x768xf32> to vector<16x256xf32>
    %68 = arith.addf %67, %9 : vector<16x256xf32>
    %69 = arith.mulf %57, %68 : vector<16x256xf32>
    %70 = arith.addf %66, %69 : vector<16x256xf32>
    %71 = math.tanh %70 : vector<16x256xf32>
    %cst_24 = arith.constant 1.000000e+00 : f32
    %72 = vector.broadcast %cst_24 : f32 to vector<16x256xf32>
    %73 = arith.subf %72, %65 : vector<16x256xf32>
    %74 = arith.mulf %73, %71 : vector<16x256xf32>
    %75 = arith.mulf %65, %43 : vector<16x256xf32>
    %76 = arith.addf %74, %75 : vector<16x256xf32>
    %c2_i32 = arith.constant 2 : i32
    %c16_i32_25 = arith.constant 16 : i32
    %77 = arith.muli %c2_i32, %c16_i32_25 : i32
    %78 = tpu.assume_multiple %77, 16 : i32
    %79 = arith.index_cast %78 : i32 to index
    %c0_26 = arith.constant 0 : index
    %80 = vector.load %arg9[%79, %c0_26] : memref<128x768xf32, #tpu.memory_space<vmem>>, vector<16x768xf32>
    %c0_27 = arith.constant 0 : index
    %c0_28 = arith.constant 0 : index
    %81 = vector.load %arg2[%c0_27, %c0_28] : memref<256x768xf32, #tpu.memory_space<vmem>>, vector<256x768xf32>
    %cst_29 = arith.constant dense<0.000000e+00> : vector<16x768xf32>
    %82 = tpu.matmul %76, %81, %cst_29 {dimension_numbers = #tpu.dot_dimension_numbers<[1], [0], [0], [1], [0, 0, 1, 1], [], []>} : vector<16x256xf32>, vector<256x768xf32>, vector<16x768xf32> -> vector<16x768xf32>
    %83 = vector.extract_strided_slice %80 {offsets = [0, 0], sizes = [16, 256], strides = [1, 1]} : vector<16x768xf32> to vector<16x256xf32>
    %84 = vector.extract_strided_slice %82 {offsets = [0, 0], sizes = [16, 256], strides = [1, 1]} : vector<16x768xf32> to vector<16x256xf32>
    %85 = arith.addf %83, %84 : vector<16x256xf32>
    %86 = arith.negf %85 : vector<16x256xf32>
    %87 = math.exp %86 : vector<16x256xf32>
    %cst_30 = arith.constant 1.000000e+00 : f32
    %88 = vector.broadcast %cst_30 : f32 to vector<16x256xf32>
    %89 = arith.addf %88, %87 : vector<16x256xf32>
    %90 = arith.divf %88, %89 : vector<16x256xf32>
    %91 = vector.extract_strided_slice %80 {offsets = [0, 256], sizes = [16, 256], strides = [1, 1]} : vector<16x768xf32> to vector<16x256xf32>
    %92 = vector.extract_strided_slice %82 {offsets = [0, 256], sizes = [16, 256], strides = [1, 1]} : vector<16x768xf32> to vector<16x256xf32>
    %93 = arith.addf %91, %92 : vector<16x256xf32>
    %94 = arith.negf %93 : vector<16x256xf32>
    %95 = math.exp %94 : vector<16x256xf32>
    %cst_31 = arith.constant 1.000000e+00 : f32
    %96 = vector.broadcast %cst_31 : f32 to vector<16x256xf32>
    %97 = arith.addf %96, %95 : vector<16x256xf32>
    %98 = arith.divf %96, %97 : vector<16x256xf32>
    %99 = vector.extract_strided_slice %80 {offsets = [0, 512], sizes = [16, 256], strides = [1, 1]} : vector<16x768xf32> to vector<16x256xf32>
    %100 = vector.extract_strided_slice %82 {offsets = [0, 512], sizes = [16, 256], strides = [1, 1]} : vector<16x768xf32> to vector<16x256xf32>
    %101 = arith.addf %100, %9 : vector<16x256xf32>
    %102 = arith.mulf %90, %101 : vector<16x256xf32>
    %103 = arith.addf %99, %102 : vector<16x256xf32>
    %104 = math.tanh %103 : vector<16x256xf32>
    %cst_32 = arith.constant 1.000000e+00 : f32
    %105 = vector.broadcast %cst_32 : f32 to vector<16x256xf32>
    %106 = arith.subf %105, %98 : vector<16x256xf32>
    %107 = arith.mulf %106, %104 : vector<16x256xf32>
    %108 = arith.mulf %98, %76 : vector<16x256xf32>
    %109 = arith.addf %107, %108 : vector<16x256xf32>
    %c3_i32 = arith.constant 3 : i32
    %c16_i32_33 = arith.constant 16 : i32
    %110 = arith.muli %c3_i32, %c16_i32_33 : i32
    %111 = tpu.assume_multiple %110, 16 : i32
    %112 = arith.index_cast %111 : i32 to index
    %c0_34 = arith.constant 0 : index
    %113 = vector.load %arg9[%112, %c0_34] : memref<128x768xf32, #tpu.memory_space<vmem>>, vector<16x768xf32>
    %c0_35 = arith.constant 0 : index
    %c0_36 = arith.constant 0 : index
    %114 = vector.load %arg2[%c0_35, %c0_36] : memref<256x768xf32, #tpu.memory_space<vmem>>, vector<256x768xf32>
    %cst_37 = arith.constant dense<0.000000e+00> : vector<16x768xf32>
    %115 = tpu.matmul %109, %114, %cst_37 {dimension_numbers = #tpu.dot_dimension_numbers<[1], [0], [0], [1], [0, 0, 1, 1], [], []>} : vector<16x256xf32>, vector<256x768xf32>, vector<16x768xf32> -> vector<16x768xf32>
    %116 = vector.extract_strided_slice %113 {offsets = [0, 0], sizes = [16, 256], strides = [1, 1]} : vector<16x768xf32> to vector<16x256xf32>
    %117 = vector.extract_strided_slice %115 {offsets = [0, 0], sizes = [16, 256], strides = [1, 1]} : vector<16x768xf32> to vector<16x256xf32>
    %118 = arith.addf %116, %117 : vector<16x256xf32>
    %119 = arith.negf %118 : vector<16x256xf32>
    %120 = math.exp %119 : vector<16x256xf32>
    %cst_38 = arith.constant 1.000000e+00 : f32
    %121 = vector.broadcast %cst_38 : f32 to vector<16x256xf32>
    %122 = arith.addf %121, %120 : vector<16x256xf32>
    %123 = arith.divf %121, %122 : vector<16x256xf32>
    %124 = vector.extract_strided_slice %113 {offsets = [0, 256], sizes = [16, 256], strides = [1, 1]} : vector<16x768xf32> to vector<16x256xf32>
    %125 = vector.extract_strided_slice %115 {offsets = [0, 256], sizes = [16, 256], strides = [1, 1]} : vector<16x768xf32> to vector<16x256xf32>
    %126 = arith.addf %124, %125 : vector<16x256xf32>
    %127 = arith.negf %126 : vector<16x256xf32>
    %128 = math.exp %127 : vector<16x256xf32>
    %cst_39 = arith.constant 1.000000e+00 : f32
    %129 = vector.broadcast %cst_39 : f32 to vector<16x256xf32>
    %130 = arith.addf %129, %128 : vector<16x256xf32>
    %131 = arith.divf %129, %130 : vector<16x256xf32>
    %132 = vector.extract_strided_slice %113 {offsets = [0, 512], sizes = [16, 256], strides = [1, 1]} : vector<16x768xf32> to vector<16x256xf32>
    %133 = vector.extract_strided_slice %115 {offsets = [0, 512], sizes = [16, 256], strides = [1, 1]} : vector<16x768xf32> to vector<16x256xf32>
    %134 = arith.addf %133, %9 : vector<16x256xf32>
    %135 = arith.mulf %123, %134 : vector<16x256xf32>
    %136 = arith.addf %132, %135 : vector<16x256xf32>
    %137 = math.tanh %136 : vector<16x256xf32>
    %cst_40 = arith.constant 1.000000e+00 : f32
    %138 = vector.broadcast %cst_40 : f32 to vector<16x256xf32>
    %139 = arith.subf %138, %131 : vector<16x256xf32>
    %140 = arith.mulf %139, %137 : vector<16x256xf32>
    %141 = arith.mulf %131, %109 : vector<16x256xf32>
    %142 = arith.addf %140, %141 : vector<16x256xf32>
    %c4_i32 = arith.constant 4 : i32
    %c16_i32_41 = arith.constant 16 : i32
    %143 = arith.muli %c4_i32, %c16_i32_41 : i32
    %144 = tpu.assume_multiple %143, 16 : i32
    %145 = arith.index_cast %144 : i32 to index
    %c0_42 = arith.constant 0 : index
    %146 = vector.load %arg9[%145, %c0_42] : memref<128x768xf32, #tpu.memory_space<vmem>>, vector<16x768xf32>
    %c0_43 = arith.constant 0 : index
    %c0_44 = arith.constant 0 : index
    %147 = vector.load %arg2[%c0_43, %c0_44] : memref<256x768xf32, #tpu.memory_space<vmem>>, vector<256x768xf32>
    %cst_45 = arith.constant dense<0.000000e+00> : vector<16x768xf32>
    %148 = tpu.matmul %142, %147, %cst_45 {dimension_numbers = #tpu.dot_dimension_numbers<[1], [0], [0], [1], [0, 0, 1, 1], [], []>} : vector<16x256xf32>, vector<256x768xf32>, vector<16x768xf32> -> vector<16x768xf32>
    %149 = vector.extract_strided_slice %146 {offsets = [0, 0], sizes = [16, 256], strides = [1, 1]} : vector<16x768xf32> to vector<16x256xf32>
    %150 = vector.extract_strided_slice %148 {offsets = [0, 0], sizes = [16, 256], strides = [1, 1]} : vector<16x768xf32> to vector<16x256xf32>
    %151 = arith.addf %149, %150 : vector<16x256xf32>
    %152 = arith.negf %151 : vector<16x256xf32>
    %153 = math.exp %152 : vector<16x256xf32>
    %cst_46 = arith.constant 1.000000e+00 : f32
    %154 = vector.broadcast %cst_46 : f32 to vector<16x256xf32>
    %155 = arith.addf %154, %153 : vector<16x256xf32>
    %156 = arith.divf %154, %155 : vector<16x256xf32>
    %157 = vector.extract_strided_slice %146 {offsets = [0, 256], sizes = [16, 256], strides = [1, 1]} : vector<16x768xf32> to vector<16x256xf32>
    %158 = vector.extract_strided_slice %148 {offsets = [0, 256], sizes = [16, 256], strides = [1, 1]} : vector<16x768xf32> to vector<16x256xf32>
    %159 = arith.addf %157, %158 : vector<16x256xf32>
    %160 = arith.negf %159 : vector<16x256xf32>
    %161 = math.exp %160 : vector<16x256xf32>
    %cst_47 = arith.constant 1.000000e+00 : f32
    %162 = vector.broadcast %cst_47 : f32 to vector<16x256xf32>
    %163 = arith.addf %162, %161 : vector<16x256xf32>
    %164 = arith.divf %162, %163 : vector<16x256xf32>
    %165 = vector.extract_strided_slice %146 {offsets = [0, 512], sizes = [16, 256], strides = [1, 1]} : vector<16x768xf32> to vector<16x256xf32>
    %166 = vector.extract_strided_slice %148 {offsets = [0, 512], sizes = [16, 256], strides = [1, 1]} : vector<16x768xf32> to vector<16x256xf32>
    %167 = arith.addf %166, %9 : vector<16x256xf32>
    %168 = arith.mulf %156, %167 : vector<16x256xf32>
    %169 = arith.addf %165, %168 : vector<16x256xf32>
    %170 = math.tanh %169 : vector<16x256xf32>
    %cst_48 = arith.constant 1.000000e+00 : f32
    %171 = vector.broadcast %cst_48 : f32 to vector<16x256xf32>
    %172 = arith.subf %171, %164 : vector<16x256xf32>
    %173 = arith.mulf %172, %170 : vector<16x256xf32>
    %174 = arith.mulf %164, %142 : vector<16x256xf32>
    %175 = arith.addf %173, %174 : vector<16x256xf32>
    %c5_i32 = arith.constant 5 : i32
    %c16_i32_49 = arith.constant 16 : i32
    %176 = arith.muli %c5_i32, %c16_i32_49 : i32
    %177 = tpu.assume_multiple %176, 16 : i32
    %178 = arith.index_cast %177 : i32 to index
    %c0_50 = arith.constant 0 : index
    %179 = vector.load %arg9[%178, %c0_50] : memref<128x768xf32, #tpu.memory_space<vmem>>, vector<16x768xf32>
    %c0_51 = arith.constant 0 : index
    %c0_52 = arith.constant 0 : index
    %180 = vector.load %arg2[%c0_51, %c0_52] : memref<256x768xf32, #tpu.memory_space<vmem>>, vector<256x768xf32>
    %cst_53 = arith.constant dense<0.000000e+00> : vector<16x768xf32>
    %181 = tpu.matmul %175, %180, %cst_53 {dimension_numbers = #tpu.dot_dimension_numbers<[1], [0], [0], [1], [0, 0, 1, 1], [], []>} : vector<16x256xf32>, vector<256x768xf32>, vector<16x768xf32> -> vector<16x768xf32>
    %182 = vector.extract_strided_slice %179 {offsets = [0, 0], sizes = [16, 256], strides = [1, 1]} : vector<16x768xf32> to vector<16x256xf32>
    %183 = vector.extract_strided_slice %181 {offsets = [0, 0], sizes = [16, 256], strides = [1, 1]} : vector<16x768xf32> to vector<16x256xf32>
    %184 = arith.addf %182, %183 : vector<16x256xf32>
    %185 = arith.negf %184 : vector<16x256xf32>
    %186 = math.exp %185 : vector<16x256xf32>
    %cst_54 = arith.constant 1.000000e+00 : f32
    %187 = vector.broadcast %cst_54 : f32 to vector<16x256xf32>
    %188 = arith.addf %187, %186 : vector<16x256xf32>
    %189 = arith.divf %187, %188 : vector<16x256xf32>
    %190 = vector.extract_strided_slice %179 {offsets = [0, 256], sizes = [16, 256], strides = [1, 1]} : vector<16x768xf32> to vector<16x256xf32>
    %191 = vector.extract_strided_slice %181 {offsets = [0, 256], sizes = [16, 256], strides = [1, 1]} : vector<16x768xf32> to vector<16x256xf32>
    %192 = arith.addf %190, %191 : vector<16x256xf32>
    %193 = arith.negf %192 : vector<16x256xf32>
    %194 = math.exp %193 : vector<16x256xf32>
    %cst_55 = arith.constant 1.000000e+00 : f32
    %195 = vector.broadcast %cst_55 : f32 to vector<16x256xf32>
    %196 = arith.addf %195, %194 : vector<16x256xf32>
    %197 = arith.divf %195, %196 : vector<16x256xf32>
    %198 = vector.extract_strided_slice %179 {offsets = [0, 512], sizes = [16, 256], strides = [1, 1]} : vector<16x768xf32> to vector<16x256xf32>
    %199 = vector.extract_strided_slice %181 {offsets = [0, 512], sizes = [16, 256], strides = [1, 1]} : vector<16x768xf32> to vector<16x256xf32>
    %200 = arith.addf %199, %9 : vector<16x256xf32>
    %201 = arith.mulf %189, %200 : vector<16x256xf32>
    %202 = arith.addf %198, %201 : vector<16x256xf32>
    %203 = math.tanh %202 : vector<16x256xf32>
    %cst_56 = arith.constant 1.000000e+00 : f32
    %204 = vector.broadcast %cst_56 : f32 to vector<16x256xf32>
    %205 = arith.subf %204, %197 : vector<16x256xf32>
    %206 = arith.mulf %205, %203 : vector<16x256xf32>
    %207 = arith.mulf %197, %175 : vector<16x256xf32>
    %208 = arith.addf %206, %207 : vector<16x256xf32>
    %c6_i32 = arith.constant 6 : i32
    %c16_i32_57 = arith.constant 16 : i32
    %209 = arith.muli %c6_i32, %c16_i32_57 : i32
    %210 = tpu.assume_multiple %209, 16 : i32
    %211 = arith.index_cast %210 : i32 to index
    %c0_58 = arith.constant 0 : index
    %212 = vector.load %arg9[%211, %c0_58] : memref<128x768xf32, #tpu.memory_space<vmem>>, vector<16x768xf32>
    %c0_59 = arith.constant 0 : index
    %c0_60 = arith.constant 0 : index
    %213 = vector.load %arg2[%c0_59, %c0_60] : memref<256x768xf32, #tpu.memory_space<vmem>>, vector<256x768xf32>
    %cst_61 = arith.constant dense<0.000000e+00> : vector<16x768xf32>
    %214 = tpu.matmul %208, %213, %cst_61 {dimension_numbers = #tpu.dot_dimension_numbers<[1], [0], [0], [1], [0, 0, 1, 1], [], []>} : vector<16x256xf32>, vector<256x768xf32>, vector<16x768xf32> -> vector<16x768xf32>
    %215 = vector.extract_strided_slice %212 {offsets = [0, 0], sizes = [16, 256], strides = [1, 1]} : vector<16x768xf32> to vector<16x256xf32>
    %216 = vector.extract_strided_slice %214 {offsets = [0, 0], sizes = [16, 256], strides = [1, 1]} : vector<16x768xf32> to vector<16x256xf32>
    %217 = arith.addf %215, %216 : vector<16x256xf32>
    %218 = arith.negf %217 : vector<16x256xf32>
    %219 = math.exp %218 : vector<16x256xf32>
    %cst_62 = arith.constant 1.000000e+00 : f32
    %220 = vector.broadcast %cst_62 : f32 to vector<16x256xf32>
    %221 = arith.addf %220, %219 : vector<16x256xf32>
    %222 = arith.divf %220, %221 : vector<16x256xf32>
    %223 = vector.extract_strided_slice %212 {offsets = [0, 256], sizes = [16, 256], strides = [1, 1]} : vector<16x768xf32> to vector<16x256xf32>
    %224 = vector.extract_strided_slice %214 {offsets = [0, 256], sizes = [16, 256], strides = [1, 1]} : vector<16x768xf32> to vector<16x256xf32>
    %225 = arith.addf %223, %224 : vector<16x256xf32>
    %226 = arith.negf %225 : vector<16x256xf32>
    %227 = math.exp %226 : vector<16x256xf32>
    %cst_63 = arith.constant 1.000000e+00 : f32
    %228 = vector.broadcast %cst_63 : f32 to vector<16x256xf32>
    %229 = arith.addf %228, %227 : vector<16x256xf32>
    %230 = arith.divf %228, %229 : vector<16x256xf32>
    %231 = vector.extract_strided_slice %212 {offsets = [0, 512], sizes = [16, 256], strides = [1, 1]} : vector<16x768xf32> to vector<16x256xf32>
    %232 = vector.extract_strided_slice %214 {offsets = [0, 512], sizes = [16, 256], strides = [1, 1]} : vector<16x768xf32> to vector<16x256xf32>
    %233 = arith.addf %232, %9 : vector<16x256xf32>
    %234 = arith.mulf %222, %233 : vector<16x256xf32>
    %235 = arith.addf %231, %234 : vector<16x256xf32>
    %236 = math.tanh %235 : vector<16x256xf32>
    %cst_64 = arith.constant 1.000000e+00 : f32
    %237 = vector.broadcast %cst_64 : f32 to vector<16x256xf32>
    %238 = arith.subf %237, %230 : vector<16x256xf32>
    %239 = arith.mulf %238, %236 : vector<16x256xf32>
    %240 = arith.mulf %230, %208 : vector<16x256xf32>
    %241 = arith.addf %239, %240 : vector<16x256xf32>
    %c7_i32 = arith.constant 7 : i32
    %c16_i32_65 = arith.constant 16 : i32
    %242 = arith.muli %c7_i32, %c16_i32_65 : i32
    %243 = tpu.assume_multiple %242, 16 : i32
    %244 = arith.index_cast %243 : i32 to index
    %c0_66 = arith.constant 0 : index
    %245 = vector.load %arg9[%244, %c0_66] : memref<128x768xf32, #tpu.memory_space<vmem>>, vector<16x768xf32>
    %c0_67 = arith.constant 0 : index
    %c0_68 = arith.constant 0 : index
    %246 = vector.load %arg2[%c0_67, %c0_68] : memref<256x768xf32, #tpu.memory_space<vmem>>, vector<256x768xf32>
    %cst_69 = arith.constant dense<0.000000e+00> : vector<16x768xf32>
    %247 = tpu.matmul %241, %246, %cst_69 {dimension_numbers = #tpu.dot_dimension_numbers<[1], [0], [0], [1], [0, 0, 1, 1], [], []>} : vector<16x256xf32>, vector<256x768xf32>, vector<16x768xf32> -> vector<16x768xf32>
    %248 = vector.extract_strided_slice %245 {offsets = [0, 0], sizes = [16, 256], strides = [1, 1]} : vector<16x768xf32> to vector<16x256xf32>
    %249 = vector.extract_strided_slice %247 {offsets = [0, 0], sizes = [16, 256], strides = [1, 1]} : vector<16x768xf32> to vector<16x256xf32>
    %250 = arith.addf %248, %249 : vector<16x256xf32>
    %251 = arith.negf %250 : vector<16x256xf32>
    %252 = math.exp %251 : vector<16x256xf32>
    %cst_70 = arith.constant 1.000000e+00 : f32
    %253 = vector.broadcast %cst_70 : f32 to vector<16x256xf32>
    %254 = arith.addf %253, %252 : vector<16x256xf32>
    %255 = arith.divf %253, %254 : vector<16x256xf32>
    %256 = vector.extract_strided_slice %245 {offsets = [0, 256], sizes = [16, 256], strides = [1, 1]} : vector<16x768xf32> to vector<16x256xf32>
    %257 = vector.extract_strided_slice %247 {offsets = [0, 256], sizes = [16, 256], strides = [1, 1]} : vector<16x768xf32> to vector<16x256xf32>
    %258 = arith.addf %256, %257 : vector<16x256xf32>
    %259 = arith.negf %258 : vector<16x256xf32>
    %260 = math.exp %259 : vector<16x256xf32>
    %cst_71 = arith.constant 1.000000e+00 : f32
    %261 = vector.broadcast %cst_71 : f32 to vector<16x256xf32>
    %262 = arith.addf %261, %260 : vector<16x256xf32>
    %263 = arith.divf %261, %262 : vector<16x256xf32>
    %264 = vector.extract_strided_slice %245 {offsets = [0, 512], sizes = [16, 256], strides = [1, 1]} : vector<16x768xf32> to vector<16x256xf32>
    %265 = vector.extract_strided_slice %247 {offsets = [0, 512], sizes = [16, 256], strides = [1, 1]} : vector<16x768xf32> to vector<16x256xf32>
    %266 = arith.addf %265, %9 : vector<16x256xf32>
    %267 = arith.mulf %255, %266 : vector<16x256xf32>
    %268 = arith.addf %264, %267 : vector<16x256xf32>
    %269 = math.tanh %268 : vector<16x256xf32>
    %cst_72 = arith.constant 1.000000e+00 : f32
    %270 = vector.broadcast %cst_72 : f32 to vector<16x256xf32>
    %271 = arith.subf %270, %263 : vector<16x256xf32>
    %272 = arith.mulf %271, %269 : vector<16x256xf32>
    %273 = arith.mulf %263, %241 : vector<16x256xf32>
    %274 = arith.addf %272, %273 : vector<16x256xf32>
    %c8_i32 = arith.constant 8 : i32
    %cst_73 = arith.constant 0.000000e+00 : f32
    %275 = vector.broadcast %cst_73 : f32 to vector<16x256xf32>
    %276 = arith.maximumf %274, %275 : vector<16x256xf32>
    %277 = vector.extract_strided_slice %276 {offsets = [0, 0], sizes = [8, 256], strides = [1, 1]} : vector<16x256xf32> to vector<8x256xf32>
    %c0_74 = arith.constant 0 : index
    %c0_75 = arith.constant 0 : index
    %278 = vector.load %arg5[%c0_74, %c0_75] : memref<256x128xf32, #tpu.memory_space<vmem>>, vector<256x128xf32>
    %cst_76 = arith.constant dense<0.000000e+00> : vector<8x128xf32>
    %279 = tpu.matmul %277, %278, %cst_76 {dimension_numbers = #tpu.dot_dimension_numbers<[1], [0], [0], [1], [0, 0, 1, 1], [], []>} : vector<8x256xf32>, vector<256x128xf32>, vector<8x128xf32> -> vector<8x128xf32>
    %280 = vector.extract_strided_slice %276 {offsets = [8, 0], sizes = [8, 256], strides = [1, 1]} : vector<16x256xf32> to vector<8x256xf32>
    %c0_77 = arith.constant 0 : index
    %c0_78 = arith.constant 0 : index
    %281 = vector.load %arg6[%c0_77, %c0_78] : memref<256x128xf32, #tpu.memory_space<vmem>>, vector<256x128xf32>
    %cst_79 = arith.constant dense<0.000000e+00> : vector<8x128xf32>
    %282 = tpu.matmul %280, %281, %cst_79 {dimension_numbers = #tpu.dot_dimension_numbers<[1], [0], [0], [1], [0, 0, 1, 1], [], []>} : vector<8x256xf32>, vector<256x128xf32>, vector<8x128xf32> -> vector<8x128xf32>
    %283 = arith.addf %279, %282 : vector<8x128xf32>
    %c0_80 = arith.constant 0 : index
    %c0_81 = arith.constant 0 : index
    %284 = vector.load %arg7[%c0_80, %c0_81] : memref<1x128xf32, #tpu.memory_space<vmem>>, vector<1x128xf32>
    %285 = vector.broadcast %284 : vector<1x128xf32> to vector<8x128xf32>
    %286 = arith.addf %283, %285 : vector<8x128xf32>
    %c0_82 = arith.constant 0 : index
    %c0_83 = arith.constant 0 : index
    %287 = vector.load %arg8[%c0_82, %c0_83] : memref<8x128xf32, #tpu.memory_space<vmem>>, vector<8x128xf32>
    tpu.vector_store %arg8[%c0_82, %c0_83], %286 {strides = array<i32>} : memref<8x128xf32, #tpu.memory_space<vmem>>, vector<8x128xf32>,
    return
  }
}

</mosaic_0001>

<bundles_post_ra>
// kernel: forward_model.1
= control target key start
LH: loop header
LB: loop body
LE: loop exit
PB: predicated region body
PF: predicated region fallthrough
CT: control target
= control target key end

     0   :  { %v11487_v3 = vmov 0.0   ;;  %vm101_vm0 = vcmask 261120   ;;  %s11474_s1 = inlined_call_operand.vmem [shape: f32[32,768], index: 1, kind: input, shape index: {}]   ;;  %s11475_s0 = inlined_call_operand.vmem [shape: f32[128,32], index: 0, kind: input, shape index: {}]   ;;  %s11476_s2 = inlined_call_operand.vmem [shape: f32[256,768], index: 2, kind: input, shape index: {}]   ;;  %s11477_s3 = inlined_call_operand.vmem [shape: f32[1,768], index: 3, kind: input, shape index: {}]   ;;  %s11478_s4 = inlined_call_operand.vmem [shape: f32[1,256], index: 4, kind: input, shape index: {}]   ;;  %s11479_s6 = inlined_call_operand.vmem [shape: f32[256,128], index: 6, kind: input, shape index: {}]   ;;  %s11480_s5 = inlined_call_operand.vmem [shape: f32[256,128], index: 5, kind: input, shape index: {}]   ;;  %s11481_s7 = inlined_call_operand.vmem [shape: f32[1,128], index: 7, kind: input, shape index: {}]   ;;  %s11482_s8 = inlined_call_operand.vmem [shape: f32[8,128], index: 8, kind: output, shape index: {}]  }
   0x1   :  { %v64_v0 = vld [vmem:[%s11474_s1 + $0x98] sm:$0xff]  ;;  %v66_v1 = vld [vmem:[%s11474_s1 + $0xa8] sm:$0xff]  ;;  %v63_v2 = vld [vmem:[%s11474_s1 + $0x90] sm:$0xff]  ;;  %214 = vmatprep.mubr.f32.mxu0 %v11487_v3  ;;  %375 = vmatprep.mubr.f32.mxu1 %v11487_v3 }
   0x2   :  { %174 = vmatprep.subr.mxu0 %v64_v0  ;;  %335 = vmatprep.subr.mxu1 %v66_v1  ;;  %v65_v4 = vld [vmem:[%s11474_s1 + $0xa0] sm:$0xff]  ;;  %v58_v5 = vld [vmem:[%s11474_s1 + $0x68] sm:$0xff]  ;;  %v60_v6 = vld [vmem:[%s11474_s1 + $0x78] sm:$0xff] }
   0x3   :  { %175 = vmatpush1.msra.mxu0 %v63_v2  ;;  %336 = vmatpush1.msra.mxu1 %v65_v4  ;;  %v57_v7 = vld [vmem:[%s11474_s1 + $0x60] sm:$0xff]  ;;  %v59_v8 = vld [vmem:[%s11474_s1 + $0x70] sm:$0xff]  ;;  %v52_v9 = vld [vmem:[%s11474_s1 + $0x38] sm:$0xff] }
   0x4   :  { %176 = vmatprep.subr.mxu0 %v58_v5  ;;  %337 = vmatprep.subr.mxu1 %v60_v6  ;;  %v54_v10 = vld [vmem:[%s11474_s1 + $0x48] sm:$0xff]  ;;  %v51_v11 = vld [vmem:[%s11474_s1 + $0x30] sm:$0xff]  ;;  %v53_v12 = vld [vmem:[%s11474_s1 + $0x40] sm:$0xff] }
   0x5   :  { %177 = vmatpush1.msra.mxu0 %v57_v7  ;;  %338 = vmatpush1.msra.mxu1 %v59_v8  ;;  %v46_v13 = vld [vmem:[%s11474_s1 + $0x8] sm:$0xff]  ;;  %v48_v14 = vld [vmem:[%s11474_s1 + $0x18] sm:$0xff]  ;;  %v45_v15 = vld [vmem:[%s11474_s1] sm:$0xff] }
   0x6   :  { %178 = vmatprep.subr.mxu0 %v52_v9  ;;  %339 = vmatprep.subr.mxu1 %v54_v10  ;;  %v47_v16 = vld [vmem:[%s11474_s1 + $0x10] sm:$0xff]  ;;  %v5082_v17 = vld [vmem:[%s11475_s0] sm:$0xff]  ;;  %v68_v18 = vld [vmem:[%s11474_s1 + $0xb8] sm:$0xff] }
   0x7   :  { %179 = vmatpush1.msra.mxu0 %v51_v11  ;;  %340 = vmatpush1.msra.mxu1 %v53_v12  ;;  %v847_v19 = vld [vmem:[%s11476_s2 + $0x2d8] sm:$0xff]  ;;  %v67_v20 = vld [vmem:[%s11474_s1 + $0xb0] sm:$0xff]  ;;  %v841_v22 = vld [vmem:[%s11476_s2 + $0x2a8] sm:$0xff] }
   0x8   :  { %180 = vmatprep.subr.mxu0 %v46_v13  ;;  %341 = vmatprep.subr.mxu1 %v48_v14  ;;  %v846_v21 = vld [vmem:[%s11476_s2 + $0x2d0] sm:$0xff]  ;;  %v840_v23 = vld [vmem:[%s11476_s2 + $0x2a0] sm:$0xff]  ;;  %v5109_v24 = vld [vmem:[%s11475_s0 + $0x8] sm:$0xff] }
   0x9   :  { %181 = vmatpush1.msra.mxu0 %v45_v15  ;;  %342 = vmatpush1.msra.mxu1 %v47_v16  ;;  %v835_v25 = vld [vmem:[%s11476_s2 + $0x278] sm:$0xff]  ;;  %v834_v26 = vld [vmem:[%s11476_s2 + $0x270] sm:$0xff]  ;;  %v829_v27 = vld [vmem:[%s11476_s2 + $0x248] sm:$0xff] }
   0xa   :  { %3833 = vmatmul.mubr.msk.f32.vlgmr.msra.gmra.mxu0 %vm101_vm0, %v5082_v17  ;;  %3849 = vmatmul.mubr.msk.f32.vlgmr.msra.gmra.mxu1 %vm101_vm0, %v5082_v17  ;;  %v62_v28 = vld [vmem:[%s11474_s1 + $0x88] sm:$0xff]  ;;  %v5133_v29 = vld [vmem:[%s11476_s2 + $0x240] sm:$0xff]  ;;  %v5138_v30 = vld [vmem:[%s11475_s0 + $0x10] sm:$0xff] }
   0xb   :  { %496 = vmatprep.subr.mxu0 %v68_v18  ;;  %948 = vmatprep.subr.mxu1 %v847_v19  ;;  %v5144_v31 = vld [vmem:[%s11476_s2 + $0x218] sm:$0xff]  ;;  %v5149_v32 = vld [vmem:[%s11476_s2 + $0x210] sm:$0xff]  ;;  %v5157_v33 = vld [vmem:[%s11476_s2 + $0x1e8] sm:$0xff] }
   0xc   :  { %497 = vmatpush1.msra.mxu0 %v67_v20  ;;  %949 = vmatpush1.msra.mxu1 %v846_v21  ;;  %v5165_v34 = vld [vmem:[%s11476_s2 + $0x1e0] sm:$0xff]  ;;  %v5170_v35 = vld [vmem:[%s11475_s0 + $0x18] sm:$0xff]  ;;  %v5184_v37 = vld [vmem:[%s11476_s2 + $0x1b0] sm:$0xff] }
   0xd   :  { %950 = vmatprep.subr.mxu1 %v841_v22  ;;  %220 = vmatprep.mubr.f32.mxu0 %v11487_v3  ;;  %v5177_v36 = vld [vmem:[%s11476_s2 + $0x1b8] sm:$0xff]  ;;  %v5192_v38 = vld [vmem:[%s11476_s2 + $0x188] sm:$0xff]  ;;  %v5200_v39 = vld [vmem:[%s11476_s2 + $0x180] sm:$0xff] }
   0xe   :  { %381 = vmatprep.mubr.f32.mxu1 %v11487_v3  ;;  %951 = vmatpush1.msra.mxu1 %v840_v23  ;;  %v5205_v40 = vld [vmem:[%s11475_s0 + $0x20] sm:$0xff]  ;;  %v5212_v41 = vld [vmem:[%s11476_s2 + $0x158] sm:$0xff]  ;;  %v5222_v43 = vld [vmem:[%s11476_s2 + $0x150] sm:$0xff] }
   0xf   :  { %3834 = vmatmul.mubr.msk.f32.gmra.mxu0 %vm101_vm0, %v5109_v24  ;;  %3850 = vmatmul.mubr.msk.f32.gmra.mxu1 %vm101_vm0, %v5109_v24  ;;  %v61_v42 = vld [vmem:[%s11474_s1 + $0x80] sm:$0xff]  ;;  %v5230_v44 = vld [vmem:[%s11476_s2 + $0x128] sm:$0xff]  ;;  %v5251_v47 = vld [vmem:[%s11476_s2 + $0xf8] sm:$0xff] }
  0x10   :  { %952 = vmatprep.subr.mxu1 %v835_v25  ;;  %226 = vmatprep.mubr.f32.mxu0 %v11487_v3  ;;  %v5238_v45 = vld [vmem:[%s11476_s2 + $0x120] sm:$0xff]  ;;  %v5244_v46 = vld [vmem:[%s11475_s0 + $0x28] sm:$0xff]  ;;  %v5258_v48 = vld [vmem:[%s11476_s2 + $0xf0] sm:$0xff] }
  0x11   :  { %953 = vmatpush1.msra.mxu1 %v834_v26  ;;  %387 = vmatprep.mubr.f32.mxu1 %v11487_v3  ;;  %v5267_v49 = vld [vmem:[%s11476_s2 + $0xc8] sm:$0xff]  ;;  %v56_v50 = vld [vmem:[%s11474_s1 + $0x58] sm:$0xff]  ;;  %v5277_v51 = vld [vmem:[%s11476_s2 + $0xc0] sm:$0xff] }
  0x12   :  { %954 = vmatprep.subr.mxu1 %v829_v27  ;;  %498 = vmatprep.subr.mxu0 %v62_v28  ;;  %v5282_v52 = vld [vmem:[%s11475_s0 + $0x30] sm:$0xff]  ;;  %v5289_v53 = vld [vmem:[%s11476_s2 + $0x98] sm:$0xff]  ;;  %v5303_v55 = vld [vmem:[%s11476_s2 + $0x68] sm:$0xff] }
  0x13   :  { %955 = vmatpush1.msra.mxu1 %v5133_v29  ;;  %3835 = vmatmul.mubr.msk.f32.gmra.mxu0 %vm101_vm0, %v5138_v30  ;;  %v5295_v54 = vld [vmem:[%s11476_s2 + $0x90] sm:$0xff]  ;;  %v5311_v56 = vld [vmem:[%s11476_s2 + $0x60] sm:$0xff]  ;;  %v5316_v57 = vld [vmem:[%s11475_s0 + $0x38] sm:$0xff] }
  0x14   :  { %3851 = vmatmul.mubr.msk.f32.gmra.mxu1 %vm101_vm0, %v5138_v30  ;;  %956 = vmatprep.subr.mxu1 %v5144_v31  ;;  %12017 = vst [vmem:[#allocation3_spill] sm:$0xff] %v5311_v56  ;;  %v5323_v58 = vld [vmem:[%s11476_s2 + $0x38] sm:$0xff]  ;;  %v5330_v59 = vld [vmem:[%s11476_s2 + $0x30] sm:$0xff]  ;;  %v5338_v60 = vld [vmem:[%s11476_s2 + $0x8] sm:$0xff] }
  0x15   :  { %957 = vmatpush1.msra.mxu1 %v5149_v32  ;;  %232 = vmatprep.mubr.f32.mxu0 %v11487_v3  ;;  %12018 = vst [vmem:[#allocation4_spill] sm:$0xff] %v5323_v58  ;;  %12019 = vst [vmem:[#allocation5_spill] sm:$0xff] %v5330_v59  ;;  %v5346_v61 = vld [vmem:[%s11476_s2] sm:$0xff]  ;;  %v5358_v63 = vld [vmem:[%s11476_s2 + $0x5d8] sm:$0xff] }
  0x16   :  { %958 = vmatprep.subr.mxu1 %v5157_v33  ;;  %393 = vmatprep.mubr.f32.mxu1 %v11487_v3  ;;  %12020 = vst [vmem:[#allocation6_spill] sm:$0xff] %v5338_v60  ;;  %12021 = vst [vmem:[#allocation7_spill] sm:$0xff] %v5346_v61  ;;  %v5351_v62 = vld [vmem:[%s11475_s0 + $0x40] sm:$0xff]  ;;  %v55_v0 = vld [vmem:[%s11474_s1 + $0x50] sm:$0xff] }
  0x17   :  { %959 = vmatpush1.msra.mxu1 %v5165_v34  ;;  %3836 = vmatmul.mubr.msk.f32.gmra.mxu0 %vm101_vm0, %v5170_v35  ;;  %12022 = vst [vmem:[#allocation8_spill] sm:$0xff] %v5358_v63  ;;  %v5368_v1 = vld [vmem:[%s11476_s2 + $0x5d0] sm:$0xff]  ;;  %v5376_v2 = vld [vmem:[%s11476_s2 + $0x5a8] sm:$0xff]  ;;  %v5384_v4 = vld [vmem:[%s11476_s2 + $0x5a0] sm:$0xff] }
  0x18   :  { %3852 = vmatmul.mubr.msk.f32.gmra.mxu1 %vm101_vm0, %v5170_v35  ;;  %960 = vmatprep.subr.mxu1 %v5177_v36  ;;  %12023 = vst [vmem:[#allocation9_spill] sm:$0xff] %v5368_v1  ;;  %12024 = vst [vmem:[#allocation10_spill] sm:$0xff] %v5376_v2  ;;  %v5390_v5 = vld [vmem:[%s11475_s0 + $0x48] sm:$0xff]  ;;  %v5397_v6 = vld [vmem:[%s11476_s2 + $0x578] sm:$0xff] }
  0x19   :  { %961 = vmatpush1.msra.mxu1 %v5184_v37  ;;  %238 = vmatprep.mubr.f32.mxu0 %v11487_v3  ;;  %12025 = vst [vmem:[#allocation11_spill] sm:$0xff] %v5384_v4  ;;  %12026 = vst [vmem:[#allocation12_spill] sm:$0xff] %v5397_v6  ;;  %v5404_v7 = vld [vmem:[%s11476_s2 + $0x570] sm:$0xff]  ;;  %v5413_v8 = vld [vmem:[%s11476_s2 + $0x548] sm:$0xff] }
  0x1a   :  { %962 = vmatprep.subr.mxu1 %v5192_v38  ;;  %399 = vmatprep.mubr.f32.mxu1 %v11487_v3  ;;  %12027 = vst [vmem:[#allocation13_spill] sm:$0xff] %v5404_v7  ;;  %12028 = vst [vmem:[#allocation14_spill] sm:$0xff] %v5413_v8  ;;  %v50_v9 = vld [vmem:[%s11474_s1 + $0x28] sm:$0xff]  ;;  %v5423_v10 = vld [vmem:[%s11476_s2 + $0x540] sm:$0xff] }
  0x1b   :  { %963 = vmatpush1.msra.mxu1 %v5200_v39  ;;  %3837 = vmatmul.mubr.msk.f32.gmra.mxu0 %vm101_vm0, %v5205_v40  ;;  %12029 = vst [vmem:[#allocation15_spill] sm:$0xff] %v5423_v10  ;;  %v5428_v11 = vld [vmem:[%s11475_s0 + $0x50] sm:$0xff]  ;;  %v5435_v12 = vld [vmem:[%s11476_s2 + $0x518] sm:$0xff]  ;;  %v5449_v14 = vld [vmem:[%s11476_s2 + $0x4e8] sm:$0xff] }
  0x1c   :  { %3853 = vmatmul.mubr.msk.f32.gmra.mxu1 %vm101_vm0, %v5205_v40  ;;  %964 = vmatprep.subr.mxu1 %v5212_v41  ;;  %12030 = vst [vmem:[#allocation16_spill] sm:$0xff] %v5435_v12  ;;  %v5441_v13 = vld [vmem:[%s11476_s2 + $0x510] sm:$0xff]  ;;  %12032 = vst [vmem:[#allocation18_spill] sm:$0xff] %v5449_v14  ;;  %v5457_v15 = vld [vmem:[%s11476_s2 + $0x4e0] sm:$0xff] }
  0x1d   :  { %499 = vmatpush1.msra.mxu0 %v61_v42  ;;  %965 = vmatpush1.msra.mxu1 %v5222_v43  ;;  %12031 = vst [vmem:[#allocation17_spill] sm:$0xff] %v5441_v13  ;;  %12033 = vst [vmem:[#allocation19_spill] sm:$0xff] %v5457_v15  ;;  %v5462_v16 = vld [vmem:[%s11475_s0 + $0x58] sm:$0xff]  ;;  %v5476_v19 = vld [vmem:[%s11476_s2 + $0x4b0] sm:$0xff] }
  0x1e   :  { %966 = vmatprep.subr.mxu1 %v5230_v44  ;;  %244 = vmatprep.mubr.f32.mxu0 %v11487_v3  ;;  %v5469_v18 = vld [vmem:[%s11476_s2 + $0x4b8] sm:$0xff]  ;;  %12035 = vst [vmem:[#allocation21_spill] sm:$0xff] %v5476_v19  ;;  %v5484_v20 = vld [vmem:[%s11476_s2 + $0x488] sm:$0xff]  ;;  %v5492_v21 = vld [vmem:[%s11476_s2 + $0x480] sm:$0xff] }
  0x1f   :  { %405 = vmatprep.mubr.f32.mxu1 %v11487_v3  ;;  %967 = vmatpush1.msra.mxu1 %v5238_v45  ;;  %12034 = vst [vmem:[#allocation20_spill] sm:$0xff] %v5469_v18  ;;  %12036 = vst [vmem:[#allocation22_spill] sm:$0xff] %v5484_v20  ;;  %v5497_v22 = vld [vmem:[%s11475_s0 + $0x60] sm:$0xff]  ;;  %v5504_v23 = vld [vmem:[%s11476_s2 + $0x458] sm:$0xff] }
  0x20   :  { %3838 = vmatmul.mubr.msk.f32.gmra.mxu0 %vm101_vm0, %v5244_v46  ;;  %3854 = vmatmul.mubr.msk.f32.gmra.mxu1 %vm101_vm0, %v5244_v46  ;;  %12037 = vst [vmem:[#allocation23_spill] sm:$0xff] %v5492_v21  ;;  %12038 = vst [vmem:[#allocation24_spill] sm:$0xff] %v5504_v23  ;;  %v49_v25 = vld [vmem:[%s11474_s1 + $0x20] sm:$0xff]  ;;  %v5514_v26 = vld [vmem:[%s11476_s2 + $0x450] sm:$0xff] }
  0x21   :  { %968 = vmatprep.subr.mxu1 %v5251_v47  ;;  %250 = vmatprep.mubr.f32.mxu0 %v11487_v3  ;;  %12039 = vst [vmem:[#allocation25_spill] sm:$0xff] %v5514_v26  ;;  %v5522_v27 = vld [vmem:[%s11476_s2 + $0x428] sm:$0xff]  ;;  %v5530_v28 = vld [vmem:[%s11476_s2 + $0x420] sm:$0xff] }
  0x22   :  { %969 = vmatpush1.msra.mxu1 %v5258_v48  ;;  %411 = vmatprep.mubr.f32.mxu1 %v11487_v3  ;;  %12040 = vst [vmem:[#allocation26_spill] sm:$0xff] %v5522_v27  ;;  %12041 = vst [vmem:[#allocation27_spill] sm:$0xff] %v5530_v28  ;;  %v5536_v42 = vld [vmem:[%s11475_s0 + $0x68] sm:$0xff] }
  0x23   :  { %970 = vmatprep.subr.mxu1 %v5267_v49  ;;  %500 = vmatprep.subr.mxu0 %v56_v50  ;;  %v5543_v50 = vld [vmem:[%s11476_s2 + $0x3f8] sm:$0xff] }
  0x24   :  { %971 = vmatpush1.msra.mxu1 %v5277_v51  ;;  %3839 = vmatmul.mubr.msk.f32.gmra.mxu0 %vm101_vm0, %v5282_v52  ;;  %12042 = vst [vmem:[#allocation28_spill] sm:$0xff] %v5543_v50 }
  0x25   :  { %3855 = vmatmul.mubr.msk.f32.gmra.mxu1 %vm101_vm0, %v5282_v52  ;;  %972 = vmatprep.subr.mxu1 %v5289_v53 }
  0x26   :  { %973 = vmatpush1.msra.mxu1 %v5295_v54  ;;  %256 = vmatprep.mubr.f32.mxu0 %v11487_v3 }
  0x27   :  { %974 = vmatprep.subr.mxu1 %v5303_v55  ;;  %417 = vmatprep.mubr.f32.mxu1 %v11487_v3 }
  0x28   :  { %975 = vmatpush1.msra.mxu1 %v5311_v56  ;;  %3840 = vmatmul.mubr.msk.f32.gmra.mxu0 %vm101_vm0, %v5316_v57  ;;  %v5942_v56 = vld [vmem:[%s11476_s2 + $0x18] sm:$0xff] }
  0x29   :  { %3856 = vmatmul.mubr.msk.f32.gmra.mxu1 %vm101_vm0, %v5316_v57  ;;  %976 = vmatprep.subr.mxu1 %v5323_v58  ;;  %v5912_v58 = vld [vmem:[%s11476_s2 + $0x70] sm:$0xff]  ;;  %12059 = vst [vmem:[#allocation44_spill] sm:$0xff] %v5942_v56 }
  0x2a   :  { %977 = vmatpush1.msra.mxu1 %v5330_v59  ;;  %262 = vmatprep.mubr.f32.mxu0 %v11487_v3  ;;  %v773_v59 = vld [vmem:[%s11476_s2 + $0x88] sm:$0xff]  ;;  %12057 = vst [vmem:[#allocation42_spill] sm:$0xff] %v5912_v58 }
  0x2b   :  { %978 = vmatprep.subr.mxu1 %v5338_v60  ;;  %423 = vmatprep.mubr.f32.mxu1 %v11487_v3  ;;  %v5903_v60 = vld [vmem:[%s11476_s2 + $0x78] sm:$0xff] }
  0x2c   :  { %979 = vmatpush1.msra.mxu1 %v5346_v61  ;;  %3841 = vmatmul.mubr.msk.f32.gmra.mxu0 %vm101_vm0, %v5351_v62  ;;  %v5873_v61 = vld [vmem:[%s11476_s2 + $0xd0] sm:$0xff]  ;;  %12056 = vst [vmem:[#allocation41_spill] sm:$0xff] %v5903_v60 }
  0x2d   :  { %3857 = vmatmul.mubr.msk.f32.gmra.mxu1 %vm101_vm0, %v5351_v62  ;;  %980 = vmatprep.subr.mxu1 %v5358_v63  ;;  %v785_v63 = vld [vmem:[%s11476_s2 + $0xe8] sm:$0xff] }
  0x2e   :  { %501 = vmatpush1.msra.mxu0 %v55_v0  ;;  %981 = vmatpush2.msra.mxu1 %v5368_v1  ;;  %v5550_v0 = vld [vmem:[%s11476_s2 + $0x3f0] sm:$0xff]  ;;  %v5864_v1 = vld [vmem:[%s11476_s2 + $0xd8] sm:$0xff] }
  0x2f   :  { %982 = vmatprep.subr.mxu1 %v5376_v2  ;;  %268 = vmatprep.mubr.f32.mxu0 %v11487_v3  ;;  %12043 = vst [vmem:[#allocation29_spill] sm:$0xff] %v5550_v0  ;;  %v5834_v2 = vld [vmem:[%s11476_s2 + $0x130] sm:$0xff] }
  0x30   :  { %429 = vmatprep.mubr.f32.mxu1 %v11487_v3  ;;  %983 = vmatpush2.msra.mxu1 %v5384_v4  ;;  %v797_v4 = vld [vmem:[%s11476_s2 + $0x148] sm:$0xff] }
  0x31   :  { %3842 = vmatmul.mubr.msk.f32.gmra.mxu0 %vm101_vm0, %v5390_v5  ;;  %3858 = vmatmul.mubr.msk.f32.gmra.mxu1 %vm101_vm0, %v5390_v5 }
  0x32   :  { %984 = vmatprep.subr.mxu1 %v5397_v6  ;;  %274 = vmatprep.mubr.f32.mxu0 %v11487_v3  ;;  %v5825_v6 = vld [vmem:[%s11476_s2 + $0x138] sm:$0xff] }
  0x33   :  { %985 = vmatpush2.msra.mxu1 %v5404_v7  ;;  %435 = vmatprep.mubr.f32.mxu1 %v11487_v3  ;;  %v5795_v7 = vld [vmem:[%s11476_s2 + $0x190] sm:$0xff] }
  0x34   :  { %986 = vmatprep.subr.mxu1 %v5413_v8  ;;  %502 = vmatprep.subr.mxu0 %v50_v9  ;;  %v5559_v9 = vld [vmem:[%s11476_s2 + $0x3c8] sm:$0xff] }
  0x35   :  { %987 = vmatpush2.msra.mxu1 %v5423_v10  ;;  %3843 = vmatmul.mubr.msk.f32.gmra.mxu0 %vm101_vm0, %v5428_v11  ;;  %12044 = vst [vmem:[#allocation30_spill] sm:$0xff] %v5559_v9  ;;  %v5786_v10 = vld [vmem:[%s11476_s2 + $0x198] sm:$0xff]  ;;  %v809_v8 = vld [vmem:[%s11476_s2 + $0x1a8] sm:$0xff] }
  0x36   :  { %3859 = vmatmul.mubr.msk.f32.gmra.mxu1 %vm101_vm0, %v5428_v11  ;;  %988 = vmatprep.subr.mxu1 %v5435_v12  ;;  %v5756_v12 = vld [vmem:[%s11476_s2 + $0x1f0] sm:$0xff] }
  0x37   :  { %989 = vmatpush2.msra.mxu1 %v5441_v13  ;;  %280 = vmatprep.mubr.f32.mxu0 %v11487_v3  ;;  %v821_v13 = vld [vmem:[%s11476_s2 + $0x208] sm:$0xff] }
  0x38   :  { %990 = vmatprep.subr.mxu1 %v5449_v14  ;;  %441 = vmatprep.mubr.f32.mxu1 %v11487_v3  ;;  %v5747_v14 = vld [vmem:[%s11476_s2 + $0x1f8] sm:$0xff] }
  0x39   :  { %991 = vmatpush2.msra.mxu1 %v5457_v15  ;;  %3844 = vmatmul.mubr.msk.f32.gmra.mxu0 %vm101_vm0, %v5462_v16  ;;  %v5727_v15 = vld [vmem:[%s11476_s2 + $0x228] sm:$0xff] }
  0x3a   :  { %3860 = vmatmul.mubr.msk.f32.gmra.mxu1 %vm101_vm0, %v5462_v16  ;;  %992 = vmatprep.subr.mxu1 %v5469_v18  ;;  %v5717_v18 = vld [vmem:[%s11476_s2 + $0x250] sm:$0xff] }
  0x3b   :  { %993 = vmatpush2.msra.mxu1 %v5476_v19  ;;  %286 = vmatprep.mubr.f32.mxu0 %v11487_v3  ;;  %v5708_v19 = vld [vmem:[%s11476_s2 + $0x258] sm:$0xff] }
  0x3c   :  { %994 = vmatprep.subr.mxu1 %v5484_v20  ;;  %447 = vmatprep.mubr.f32.mxu1 %v11487_v3  ;;  %v838_v20 = vld [vmem:[%s11476_s2 + $0x290] sm:$0xff] }
  0x3d   :  { %995 = vmatpush2.msra.mxu1 %v5492_v21  ;;  %3845 = vmatmul.mubr.msk.f32.gmra.mxu0 %vm101_vm0, %v5497_v22  ;;  %v845_v21 = vld [vmem:[%s11476_s2 + $0x2c8] sm:$0xff] }
  0x3e   :  { %3861 = vmatmul.mubr.msk.f32.gmra.mxu1 %vm101_vm0, %v5497_v22  ;;  %996 = vmatprep.subr.mxu1 %v5504_v23  ;;  %v5618_v23 = vld [vmem:[%s11476_s2 + $0x338] sm:$0xff] }
  0x3f   :  { %503 = vmatpush1.msra.mxu0 %v49_v25  ;;  %997 = vmatpush2.msra.mxu1 %v5514_v26  ;;  %v5564_v25 = vld [vmem:[%s11476_s2 + $0x2e8] sm:$0xff]  ;;  %v5589_v26 = vld [vmem:[%s11476_s2 + $0x390] sm:$0xff]  ;;  %12051 = vst [vmem:[#allocation36_spill] sm:$0xff] %v5618_v23 }
  0x40   :  { %998 = vmatprep.subr.mxu1 %v5522_v27  ;;  %292 = vmatprep.mubr.f32.mxu0 %v11487_v3  ;;  %v5576_v27 = vld [vmem:[%s11475_s0 + $0x70] sm:$0xff]  ;;  %12047 = vst [vmem:[#allocation33_spill] sm:$0xff] %v5589_v26 }
  0x41   :  { %453 = vmatprep.mubr.f32.mxu1 %v11487_v3  ;;  %999 = vmatpush2.msra.mxu1 %v5530_v28  ;;  %v5571_v28 = vld [vmem:[%s11476_s2 + $0x3c0] sm:$0xff] }
  0x42   :  { %3846 = vmatmul.mubr.msk.f32.gmra.mxu0 %vm101_vm0, %v5536_v42  ;;  %3862 = vmatmul.mubr.msk.f32.gmra.mxu1 %vm101_vm0, %v5536_v42  ;;  %12045 = vst [vmem:[#allocation31_spill] sm:$0xff] %v5571_v28 }
  0x43   :  { %1000 = vmatprep.subr.mxu1 %v5543_v50  ;;  %298 = vmatprep.mubr.f32.mxu0 %v11487_v3  ;;  %v5583_v50 = vld [vmem:[%s11476_s2 + $0x398] sm:$0xff] }
  0x44   :  { %1001 = vmatpush2.msra.mxu1 %v5550_v0  ;;  %459 = vmatprep.mubr.f32.mxu1 %v11487_v3  ;;  %12046 = vst [vmem:[#allocation32_spill] sm:$0xff] %v5583_v50  ;;  %v5598_v3 = vld [vmem:[%s11476_s2 + $0x368] sm:$0xff]  ;;  %v12050_v0 = vmov 0.0  }
  0x45   :  { %1002 = vmatprep.subr.mxu1 %v5559_v9  ;;  %1025 = vmatprep.subr.mxu0 %v5564_v25  ;;  %12048 = vst [vmem:[#allocation34_spill] sm:$0xff] %v5598_v3  ;;  %v5606_v9 = vld [vmem:[%s11476_s2 + $0x360] sm:$0xff] }
  0x46   :  { %1003 = vmatpush2.msra.mxu1 %v5571_v28  ;;  %3847 = vmatmul.mubr.msk.f32.gmra.mxu0 %vm101_vm0, %v5576_v27  ;;  %12049 = vst [vmem:[#allocation35_spill] sm:$0xff] %v5606_v9  ;;  %v5611_v28 = vld [vmem:[%s11475_s0 + $0x78] sm:$0xff] }
  0x47   :  { %3863 = vmatmul.mubr.msk.f32.gmra.mxu1 %vm101_vm0, %v5576_v27  ;;  %1004 = vmatprep.subr.mxu1 %v5583_v50  ;;  %v5625_v50 = vld [vmem:[%s11476_s2 + $0x330] sm:$0xff] }
  0x48   :  { %1005 = vmatpush2.msra.mxu1 %v5589_v26  ;;  %304 = vmatprep.mubr.f32.mxu0 %v12050_v0  ;;  %12052 = vst [vmem:[#allocation37_spill] sm:$0xff] %v5625_v50  ;;  %v5633_v26 = vld [vmem:[%s11476_s2 + $0x308] sm:$0xff] }
  0x49   :  { %1006 = vmatprep.subr.mxu1 %v5598_v3  ;;  %465 = vmatprep.mubr.f32.mxu1 %v12050_v0  ;;  %12053 = vst [vmem:[#allocation38_spill] sm:$0xff] %v5633_v26  ;;  %v5641_v3 = vld [vmem:[%s11476_s2 + $0x300] sm:$0xff] }
  0x4a   :  { %1007 = vmatpush2.msra.mxu1 %v5606_v9  ;;  %3848 = vmatmul.mubr.msk.f32.gmra.mxu0 %vm101_vm0, %v5611_v28  ;;  %12054 = vst [vmem:[#allocation39_spill] sm:$0xff] %v5641_v3  ;;  %v5648_v9 = vld [vmem:[%s11476_s2 + $0x2f8] sm:$0xff] }
  0x4b   :  { %3864 = vmatmul.mubr.msk.f32.gmra.mxu1 %vm101_vm0, %v5611_v28  ;;  %1008 = vmatprep.subr.mxu1 %v5618_v23  ;;  %12055 = vst [vmem:[#allocation40_spill] sm:$0xff] %v5648_v9  ;;  %v5655_v23 = vld [vmem:[%s11476_s2 + $0x2e0] sm:$0xff] }
  0x4c   :  { %1009 = vmatpush2.msra.mxu1 %v5625_v50  ;;  %536 = vmatprep.mubr.f32.mxu0 %v12050_v0  ;;  %v850_v50 = vld [vmem:[%s11476_s2 + $0x2f0] sm:$0xff] }
  0x4d   :  { %1010 = vmatprep.subr.mxu1 %v5633_v26  ;;  %1012 = vmatprep.mubr.f32.mxu1 %v12050_v0  ;;  %v5666_v26 = vld [vmem:[%s11476_s2 + $0x2b8] sm:$0xff] }
  0x4e   :  { %1011 = vmatpush2.msra.mxu1 %v5641_v3  ;;  %3865 = vmatmul.mubr.msk.f32.vlgmr.msra.gmra.mxu0 %vm101_vm0, %v5082_v17  ;;  %v5677_v17 = vld [vmem:[%s11476_s2 + $0x2b0] sm:$0xff]  ;;  %v844_v3 = vld [vmem:[%s11476_s2 + $0x2c0] sm:$0xff] }
  0x4f   :  { %1013 = vmatmul.mubr.f32.vlgmr.msra.gmra.mxu1 %v12050_v0  ;;  %1102 = vmatprep.subr.mxu1 %v5648_v9  ;;  %v839_v9 = vld [vmem:[%s11476_s2 + $0x298] sm:$0xff] }
  0x50   :  { %1026 = vmatpush1.msra.mxu0 %v5655_v23  ;;  %1103 = vmatpush1.msra.mxu1 %v850_v50  ;;  %v5688_v50 = vld [vmem:[%s11476_s2 + $0x288] sm:$0xff] }
  0x51   :  { %1027 = vmatprep.subr.mxu0 %v5666_v26  ;;  %1104 = vmatprep.subr.mxu1 %v845_v21  ;;  %v5697_v21 = vld [vmem:[%s11476_s2 + $0x280] sm:$0xff] }
  0x52   :  { %542 = vmatprep.mubr.f32.mxu0 %v12050_v0  ;;  %1018 = vmatprep.mubr.f32.mxu1 %v12050_v0 }
  0x53   :  { %1028 = vmatpush1.msra.mxu0 %v5677_v17  ;;  %1105 = vmatpush1.msra.mxu1 %v844_v3  ;;  %v833_v3 = vld [vmem:[%s11476_s2 + $0x268] sm:$0xff] }
  0x54   :  { %3866 = vmatmul.mubr.msk.f32.gmra.mxu0 %vm101_vm0, %v5109_v24  ;;  %1019 = vmatmul.mubr.f32.gmra.mxu1 %v12050_v0  ;;  %v832_v24 = vld [vmem:[%s11476_s2 + $0x260] sm:$0xff] }
  0x55   :  { %1029 = vmatprep.subr.mxu0 %v5688_v50  ;;  %1106 = vmatprep.subr.mxu1 %v839_v9  ;;  %v827_v9 = vld [vmem:[%s11476_s2 + $0x238] sm:$0xff] }
  0x56   :  { %1030 = vmatpush1.msra.mxu0 %v5697_v21  ;;  %1107 = vmatpush1.msra.mxu1 %v838_v20  ;;  %v5737_v20 = vld [vmem:[%s11476_s2 + $0x220] sm:$0xff] }
  0x57   :  { %1031 = vmatprep.subr.mxu0 %v5708_v19  ;;  %1108 = vmatprep.subr.mxu1 %v833_v3  ;;  %v826_v3 = vld [vmem:[%s11476_s2 + $0x230] sm:$0xff] }
  0x58   :  { %548 = vmatprep.mubr.f32.mxu0 %v12050_v0  ;;  %1032 = vmatpush1.msra.mxu0 %v5717_v18 }
  0x59   :  { %1109 = vmatpush1.msra.mxu1 %v832_v24  ;;  %3867 = vmatmul.mubr.msk.f32.gmra.mxu0 %vm101_vm0, %v5138_v30  ;;  %v820_v30 = vld [vmem:[%s11476_s2 + $0x200] sm:$0xff]  ;;  %v5766_v24 = vld [vmem:[%s11476_s2 + $0x1c8] sm:$0xff] }
  0x5a   :  { %1033 = vmatprep.subr.mxu0 %v5727_v15  ;;  %1110 = vmatprep.subr.mxu1 %v827_v9  ;;  %v815_v9 = vld [vmem:[%s11476_s2 + $0x1d8] sm:$0xff] }
  0x5b   :  { %1034 = vmatpush1.msra.mxu0 %v5737_v20  ;;  %1111 = vmatpush1.msra.mxu1 %v826_v3  ;;  %v5776_v3 = vld [vmem:[%s11476_s2 + $0x1c0] sm:$0xff] }
  0x5c   :  { %1035 = vmatprep.subr.mxu0 %v5747_v14  ;;  %1112 = vmatprep.subr.mxu1 %v821_v13  ;;  %v814_v13 = vld [vmem:[%s11476_s2 + $0x1d0] sm:$0xff] }
  0x5d   :  { %554 = vmatprep.mubr.f32.mxu0 %v12050_v0  ;;  %1036 = vmatpush1.msra.mxu0 %v5756_v12 }
  0x5e   :  { %1113 = vmatpush1.msra.mxu1 %v820_v30  ;;  %3868 = vmatmul.mubr.msk.f32.gmra.mxu0 %vm101_vm0, %v5170_v35  ;;  %v808_v35 = vld [vmem:[%s11476_s2 + $0x1a0] sm:$0xff]  ;;  %v5805_v30 = vld [vmem:[%s11476_s2 + $0x168] sm:$0xff] }
  0x5f   :  { %1037 = vmatprep.subr.mxu0 %v5766_v24  ;;  %1114 = vmatprep.subr.mxu1 %v815_v9  ;;  %v803_v9 = vld [vmem:[%s11476_s2 + $0x178] sm:$0xff] }
  0x60   :  { %1038 = vmatpush1.msra.mxu0 %v5776_v3  ;;  %1115 = vmatpush1.msra.mxu1 %v814_v13  ;;  %v5815_v13 = vld [vmem:[%s11476_s2 + $0x160] sm:$0xff] }
  0x61   :  { %1039 = vmatprep.subr.mxu0 %v5786_v10  ;;  %1116 = vmatprep.subr.mxu1 %v809_v8  ;;  %v802_v8 = vld [vmem:[%s11476_s2 + $0x170] sm:$0xff] }
  0x62   :  { %560 = vmatprep.mubr.f32.mxu0 %v12050_v0  ;;  %1040 = vmatpush1.msra.mxu0 %v5795_v7 }
  0x63   :  { %1117 = vmatpush1.msra.mxu1 %v808_v35  ;;  %3869 = vmatmul.mubr.msk.f32.gmra.mxu0 %vm101_vm0, %v5205_v40  ;;  %v796_v40 = vld [vmem:[%s11476_s2 + $0x140] sm:$0xff]  ;;  %v5844_v35 = vld [vmem:[%s11476_s2 + $0x108] sm:$0xff] }
  0x64   :  { %1041 = vmatprep.subr.mxu0 %v5805_v30  ;;  %1118 = vmatprep.subr.mxu1 %v803_v9  ;;  %v791_v9 = vld [vmem:[%s11476_s2 + $0x118] sm:$0xff] }
  0x65   :  { %1042 = vmatpush1.msra.mxu0 %v5815_v13  ;;  %1119 = vmatpush1.msra.mxu1 %v802_v8  ;;  %v5854_v8 = vld [vmem:[%s11476_s2 + $0x100] sm:$0xff] }
  0x66   :  { %1043 = vmatprep.subr.mxu0 %v5825_v6  ;;  %1120 = vmatprep.subr.mxu1 %v797_v4  ;;  %v790_v4 = vld [vmem:[%s11476_s2 + $0x110] sm:$0xff] }
  0x67   :  { %566 = vmatprep.mubr.f32.mxu0 %v12050_v0  ;;  %1044 = vmatpush1.msra.mxu0 %v5834_v2 }
  0x68   :  { %1121 = vmatpush1.msra.mxu1 %v796_v40  ;;  %3870 = vmatmul.mubr.msk.f32.gmra.mxu0 %vm101_vm0, %v5244_v46  ;;  %v784_v46 = vld [vmem:[%s11476_s2 + $0xe0] sm:$0xff]  ;;  %v5883_v40 = vld [vmem:[%s11476_s2 + $0xa8] sm:$0xff] }
  0x69   :  { %1045 = vmatprep.subr.mxu0 %v5844_v35  ;;  %1122 = vmatprep.subr.mxu1 %v791_v9  ;;  %v779_v9 = vld [vmem:[%s11476_s2 + $0xb8] sm:$0xff] }
  0x6a   :  { %1046 = vmatpush1.msra.mxu0 %v5854_v8  ;;  %1123 = vmatpush1.msra.mxu1 %v790_v4  ;;  %v5893_v4 = vld [vmem:[%s11476_s2 + $0xa0] sm:$0xff] }
  0x6b   :  { %1047 = vmatprep.subr.mxu0 %v5864_v1  ;;  %1124 = vmatprep.subr.mxu1 %v785_v63  ;;  %v778_v63 = vld [vmem:[%s11476_s2 + $0xb0] sm:$0xff] }
  0x6c   :  { %572 = vmatprep.mubr.f32.mxu0 %v12050_v0  ;;  %1048 = vmatpush1.msra.mxu0 %v5873_v61 }
  0x6d   :  { %1125 = vmatpush1.msra.mxu1 %v784_v46  ;;  %3871 = vmatmul.mubr.msk.f32.gmra.mxu0 %vm101_vm0, %v5282_v52  ;;  %v772_v52 = vld [vmem:[%s11476_s2 + $0x80] sm:$0xff]  ;;  %v5922_v46 = vld [vmem:[%s11476_s2 + $0x48] sm:$0xff] }
  0x6e   :  { %1049 = vmatprep.subr.mxu0 %v5883_v40  ;;  %1126 = vmatprep.subr.mxu1 %v779_v9  ;;  %v767_v9 = vld [vmem:[%s11476_s2 + $0x58] sm:$0xff] }
  0x6f   :  { %1050 = vmatpush1.msra.mxu0 %v5893_v4  ;;  %1127 = vmatpush1.msra.mxu1 %v778_v63  ;;  %v5932_v63 = vld [vmem:[%s11476_s2 + $0x40] sm:$0xff] }
  0x70   :  { %1051 = vmatprep.subr.mxu0 %v5903_v60  ;;  %1128 = vmatprep.subr.mxu1 %v773_v59  ;;  %12058 = vst [vmem:[#allocation43_spill] sm:$0xff] %v5932_v63  ;;  %v766_v59 = vld [vmem:[%s11476_s2 + $0x50] sm:$0xff] }
  0x71   :  { %578 = vmatprep.mubr.f32.mxu0 %v12050_v0  ;;  %1052 = vmatpush1.msra.mxu0 %v5912_v58  ;;  %v761_v58 = vld [vmem:[%s11476_s2 + $0x28] sm:$0xff]  ;;  %v5951_v60 = vld [vmem:[%s11476_s2 + $0x10] sm:$0xff] }
  0x72   :  { %1129 = vmatpush1.msra.mxu1 %v772_v52  ;;  %3872 = vmatmul.mubr.msk.f32.gmra.mxu0 %vm101_vm0, %v5316_v57  ;;  %12060 = vst [vmem:[#allocation45_spill] sm:$0xff] %v5951_v60  ;;  %v760_v57 = vld [vmem:[%s11476_s2 + $0x20] sm:$0xff]  ;;  %v5961_v52 = vld [vmem:[%s11476_s2 + $0x5e8] sm:$0xff] }
  0x73   :  { %1053 = vmatprep.subr.mxu0 %v5922_v46  ;;  %1130 = vmatprep.subr.mxu1 %v767_v9  ;;  %v947_v9 = vld [vmem:[%s11476_s2 + $0x5f8] sm:$0xff] }
  0x74   :  { %1054 = vmatpush1.msra.mxu0 %v5932_v63  ;;  %1131 = vmatpush1.msra.mxu1 %v766_v59  ;;  %v5971_v59 = vld [vmem:[%s11476_s2 + $0x5e0] sm:$0xff]  ;;  %v5990_v63 = vld [vmem:[%s11476_s2 + $0x5b0] sm:$0xff] }
  0x75   :  { %1055 = vmatprep.subr.mxu0 %v5942_v56  ;;  %1132 = vmatprep.subr.mxu1 %v761_v58  ;;  %12061 = vst [vmem:[#allocation46_spill] sm:$0xff] %v5971_v59  ;;  %v946_v58 = vld [vmem:[%s11476_s2 + $0x5f0] sm:$0xff]  ;;  %v5981_v56 = vld [vmem:[%s11476_s2 + $0x5b8] sm:$0xff]  ;;  %12063 = vst [vmem:[#allocation48_spill] sm:$0xff] %v5990_v63 }
  0x76   :  { %584 = vmatprep.mubr.f32.mxu0 %v12050_v0  ;;  %1056 = vmatpush1.msra.mxu0 %v5951_v60  ;;  %12062 = vst [vmem:[#allocation47_spill] sm:$0xff] %v5981_v56  ;;  %v941_v60 = vld [vmem:[%s11476_s2 + $0x5c8] sm:$0xff] }
  0x77   :  { %1133 = vmatpush1.msra.mxu1 %v760_v57  ;;  %3873 = vmatmul.mubr.msk.f32.gmra.mxu0 %vm101_vm0, %v5351_v62  ;;  %v940_v62 = vld [vmem:[%s11476_s2 + $0x5c0] sm:$0xff]  ;;  %v6000_v57 = vld [vmem:[%s11476_s2 + $0x588] sm:$0xff] }
  0x78   :  { %1057 = vmatprep.subr.mxu0 %v5961_v52  ;;  %1134 = vmatprep.subr.mxu1 %v947_v9  ;;  %v935_v9 = vld [vmem:[%s11476_s2 + $0x598] sm:$0xff] }
  0x79   :  { %1058 = vmatpush2.msra.mxu0 %v5971_v59  ;;  %1135 = vmatpush2.msra.mxu1 %v946_v58  ;;  %v6010_v58 = vld [vmem:[%s11476_s2 + $0x580] sm:$0xff]  ;;  %v6029_v59 = vld [vmem:[%s11476_s2 + $0x550] sm:$0xff] }
  0x7a   :  { %1059 = vmatprep.subr.mxu0 %v5981_v56  ;;  %1136 = vmatprep.subr.mxu1 %v941_v60  ;;  %12064 = vst [vmem:[#allocation49_spill] sm:$0xff] %v6010_v58  ;;  %v934_v60 = vld [vmem:[%s11476_s2 + $0x590] sm:$0xff]  ;;  %v6020_v56 = vld [vmem:[%s11476_s2 + $0x558] sm:$0xff]  ;;  %12066 = vst [vmem:[#allocation51_spill] sm:$0xff] %v6029_v59 }
  0x7b   :  { %590 = vmatprep.mubr.f32.mxu0 %v12050_v0  ;;  %1060 = vmatpush2.msra.mxu0 %v5990_v63  ;;  %12065 = vst [vmem:[#allocation50_spill] sm:$0xff] %v6020_v56  ;;  %v929_v63 = vld [vmem:[%s11476_s2 + $0x568] sm:$0xff] }
  0x7c   :  { %1137 = vmatpush2.msra.mxu1 %v940_v62  ;;  %3874 = vmatmul.mubr.msk.f32.gmra.mxu0 %vm101_vm0, %v5390_v5  ;;  %v928_v5 = vld [vmem:[%s11476_s2 + $0x560] sm:$0xff]  ;;  %v6039_v62 = vld [vmem:[%s11476_s2 + $0x528] sm:$0xff] }
  0x7d   :  { %1061 = vmatprep.subr.mxu0 %v6000_v57  ;;  %1138 = vmatprep.subr.mxu1 %v935_v9  ;;  %v923_v9 = vld [vmem:[%s11476_s2 + $0x538] sm:$0xff] }
  0x7e   :  { %1062 = vmatpush2.msra.mxu0 %v6010_v58  ;;  %1139 = vmatpush2.msra.mxu1 %v934_v60  ;;  %v6049_v60 = vld [vmem:[%s11476_s2 + $0x520] sm:$0xff]  ;;  %v6068_v58 = vld [vmem:[%s11476_s2 + $0x4f0] sm:$0xff] }
  0x7f   :  { %1063 = vmatprep.subr.mxu0 %v6020_v56  ;;  %1140 = vmatprep.subr.mxu1 %v929_v63  ;;  %12067 = vst [vmem:[#allocation52_spill] sm:$0xff] %v6049_v60  ;;  %v922_v63 = vld [vmem:[%s11476_s2 + $0x530] sm:$0xff]  ;;  %v6059_v56 = vld [vmem:[%s11476_s2 + $0x4f8] sm:$0xff]  ;;  %12069 = vst [vmem:[#allocation54_spill] sm:$0xff] %v6068_v58 }
  0x80   :  { %596 = vmatprep.mubr.f32.mxu0 %v12050_v0  ;;  %1064 = vmatpush2.msra.mxu0 %v6029_v59  ;;  %12068 = vst [vmem:[#allocation53_spill] sm:$0xff] %v6059_v56  ;;  %v917_v59 = vld [vmem:[%s11476_s2 + $0x508] sm:$0xff] }
  0x81   :  { %1141 = vmatpush2.msra.mxu1 %v928_v5  ;;  %3875 = vmatmul.mubr.msk.f32.gmra.mxu0 %vm101_vm0, %v5428_v11  ;;  %v916_v11 = vld [vmem:[%s11476_s2 + $0x500] sm:$0xff]  ;;  %v6078_v5 = vld [vmem:[%s11476_s2 + $0x4c8] sm:$0xff] }
  0x82   :  { %1065 = vmatprep.subr.mxu0 %v6039_v62  ;;  %1142 = vmatprep.subr.mxu1 %v923_v9  ;;  %v911_v9 = vld [vmem:[%s11476_s2 + $0x4d8] sm:$0xff] }
  0x83   :  { %1066 = vmatpush2.msra.mxu0 %v6049_v60  ;;  %1143 = vmatpush2.msra.mxu1 %v922_v63  ;;  %v6088_v63 = vld [vmem:[%s11476_s2 + $0x4c0] sm:$0xff]  ;;  %v6107_v60 = vld [vmem:[%s11476_s2 + $0x490] sm:$0xff] }
  0x84   :  { %1067 = vmatprep.subr.mxu0 %v6059_v56  ;;  %1144 = vmatprep.subr.mxu1 %v917_v59  ;;  %12070 = vst [vmem:[#allocation55_spill] sm:$0xff] %v6088_v63  ;;  %v910_v59 = vld [vmem:[%s11476_s2 + $0x4d0] sm:$0xff]  ;;  %v6098_v56 = vld [vmem:[%s11476_s2 + $0x498] sm:$0xff]  ;;  %12072 = vst [vmem:[#allocation57_spill] sm:$0xff] %v6107_v60 }
  0x85   :  { %602 = vmatprep.mubr.f32.mxu0 %v12050_v0  ;;  %1068 = vmatpush2.msra.mxu0 %v6068_v58  ;;  %12071 = vst [vmem:[#allocation56_spill] sm:$0xff] %v6098_v56  ;;  %v905_v58 = vld [vmem:[%s11476_s2 + $0x4a8] sm:$0xff] }
  0x86   :  { %1145 = vmatpush2.msra.mxu1 %v916_v11  ;;  %3876 = vmatmul.mubr.msk.f32.gmra.mxu0 %vm101_vm0, %v5462_v16  ;;  %v904_v16 = vld [vmem:[%s11476_s2 + $0x4a0] sm:$0xff]  ;;  %v6117_v11 = vld [vmem:[%s11476_s2 + $0x468] sm:$0xff] }
  0x87   :  { %1069 = vmatprep.subr.mxu0 %v6078_v5  ;;  %1146 = vmatprep.subr.mxu1 %v911_v9  ;;  %v899_v9 = vld [vmem:[%s11476_s2 + $0x478] sm:$0xff] }
  0x88   :  { %1070 = vmatpush2.msra.mxu0 %v6088_v63  ;;  %1147 = vmatpush2.msra.mxu1 %v910_v59  ;;  %v6127_v59 = vld [vmem:[%s11476_s2 + $0x460] sm:$0xff]  ;;  %v6146_v63 = vld [vmem:[%s11476_s2 + $0x430] sm:$0xff] }
  0x89   :  { %1071 = vmatprep.subr.mxu0 %v6098_v56  ;;  %1148 = vmatprep.subr.mxu1 %v905_v58  ;;  %12073 = vst [vmem:[#allocation58_spill] sm:$0xff] %v6127_v59  ;;  %v898_v58 = vld [vmem:[%s11476_s2 + $0x470] sm:$0xff]  ;;  %v6137_v56 = vld [vmem:[%s11476_s2 + $0x438] sm:$0xff]  ;;  %12075 = vst [vmem:[#allocation60_spill] sm:$0xff] %v6146_v63 }
  0x8a   :  { %608 = vmatprep.mubr.f32.mxu0 %v12050_v0  ;;  %1072 = vmatpush2.msra.mxu0 %v6107_v60  ;;  %12074 = vst [vmem:[#allocation59_spill] sm:$0xff] %v6137_v56  ;;  %v893_v60 = vld [vmem:[%s11476_s2 + $0x448] sm:$0xff] }
  0x8b   :  { %1149 = vmatpush2.msra.mxu1 %v904_v16  ;;  %3877 = vmatmul.mubr.msk.f32.gmra.mxu0 %vm101_vm0, %v5497_v22  ;;  %v892_v22 = vld [vmem:[%s11476_s2 + $0x440] sm:$0xff]  ;;  %v6156_v16 = vld [vmem:[%s11476_s2 + $0x408] sm:$0xff] }
  0x8c   :  { %1073 = vmatprep.subr.mxu0 %v6117_v11  ;;  %1150 = vmatprep.subr.mxu1 %v899_v9  ;;  %v887_v9 = vld [vmem:[%s11476_s2 + $0x418] sm:$0xff] }
  0x8d   :  { %1074 = vmatpush2.msra.mxu0 %v6127_v59  ;;  %1151 = vmatpush2.msra.mxu1 %v898_v58  ;;  %v6166_v58 = vld [vmem:[%s11476_s2 + $0x400] sm:$0xff]  ;;  %v6185_v59 = vld [vmem:[%s11476_s2 + $0x3d0] sm:$0xff] }
  0x8e   :  { %1075 = vmatprep.subr.mxu0 %v6137_v56  ;;  %1152 = vmatprep.subr.mxu1 %v893_v60  ;;  %12076 = vst [vmem:[#allocation61_spill] sm:$0xff] %v6166_v58  ;;  %v886_v60 = vld [vmem:[%s11476_s2 + $0x410] sm:$0xff]  ;;  %v6176_v56 = vld [vmem:[%s11476_s2 + $0x3d8] sm:$0xff]  ;;  %12078 = vst [vmem:[#allocation63_spill] sm:$0xff] %v6185_v59 }
  0x8f   :  { %614 = vmatprep.mubr.f32.mxu0 %v12050_v0  ;;  %1076 = vmatpush2.msra.mxu0 %v6146_v63  ;;  %12077 = vst [vmem:[#allocation62_spill] sm:$0xff] %v6176_v56  ;;  %v881_v63 = vld [vmem:[%s11476_s2 + $0x3e8] sm:$0xff] }
  0x90   :  { %1153 = vmatpush2.msra.mxu1 %v892_v22  ;;  %3878 = vmatmul.mubr.msk.f32.gmra.mxu0 %vm101_vm0, %v5536_v42  ;;  %v880_v42 = vld [vmem:[%s11476_s2 + $0x3e0] sm:$0xff]  ;;  %v6195_v22 = vld [vmem:[%s11476_s2 + $0x3a8] sm:$0xff] }
  0x91   :  { %1077 = vmatprep.subr.mxu0 %v6156_v16  ;;  %1154 = vmatprep.subr.mxu1 %v887_v9  ;;  %v875_v9 = vld [vmem:[%s11476_s2 + $0x3b8] sm:$0xff] }
  0x92   :  { %1078 = vmatpush2.msra.mxu0 %v6166_v58  ;;  %1155 = vmatpush2.msra.mxu1 %v886_v60  ;;  %v6205_v60 = vld [vmem:[%s11476_s2 + $0x3a0] sm:$0xff]  ;;  %v6224_v58 = vld [vmem:[%s11476_s2 + $0x370] sm:$0xff] }
  0x93   :  { %1079 = vmatprep.subr.mxu0 %v6176_v56  ;;  %1156 = vmatprep.subr.mxu1 %v881_v63  ;;  %12079 = vst [vmem:[#allocation64_spill] sm:$0xff] %v6205_v60  ;;  %v874_v63 = vld [vmem:[%s11476_s2 + $0x3b0] sm:$0xff]  ;;  %v6215_v56 = vld [vmem:[%s11476_s2 + $0x378] sm:$0xff]  ;;  %12081 = vst [vmem:[#allocation66_spill] sm:$0xff] %v6224_v58 }
  0x94   :  { %620 = vmatprep.mubr.f32.mxu0 %v12050_v0  ;;  %1080 = vmatpush2.msra.mxu0 %v6185_v59  ;;  %12080 = vst [vmem:[#allocation65_spill] sm:$0xff] %v6215_v56  ;;  %v869_v59 = vld [vmem:[%s11476_s2 + $0x388] sm:$0xff] }
  0x95   :  { %1157 = vmatpush2.msra.mxu1 %v880_v42  ;;  %3879 = vmatmul.mubr.msk.f32.gmra.mxu0 %vm101_vm0, %v5576_v27  ;;  %v868_v27 = vld [vmem:[%s11476_s2 + $0x380] sm:$0xff]  ;;  %v6234_v42 = vld [vmem:[%s11476_s2 + $0x348] sm:$0xff] }
  0x96   :  { %1081 = vmatprep.subr.mxu0 %v6195_v22  ;;  %1158 = vmatprep.subr.mxu1 %v875_v9  ;;  %v863_v9 = vld [vmem:[%s11476_s2 + $0x358] sm:$0xff] }
  0x97   :  { %1082 = vmatpush2.msra.mxu0 %v6205_v60  ;;  %1159 = vmatpush2.msra.mxu1 %v874_v63  ;;  %v6244_v63 = vld [vmem:[%s11476_s2 + $0x340] sm:$0xff]  ;;  %v6263_v60 = vld [vmem:[%s11476_s2 + $0x310] sm:$0xff] }
  0x98   :  { %1083 = vmatprep.subr.mxu0 %v6215_v56  ;;  %1160 = vmatprep.subr.mxu1 %v869_v59  ;;  %v862_v59 = vld [vmem:[%s11476_s2 + $0x350] sm:$0xff]  ;;  %v6254_v56 = vld [vmem:[%s11476_s2 + $0x318] sm:$0xff] }
  0x99   :  { %626 = vmatprep.mubr.f32.mxu0 %v12050_v0  ;;  %1084 = vmatpush2.msra.mxu0 %v6224_v58  ;;  %v857_v58 = vld [vmem:[%s11476_s2 + $0x328] sm:$0xff] }
  0x9a   :  { %1161 = vmatpush2.msra.mxu1 %v868_v27  ;;  %3880 = vmatmul.mubr.msk.f32.gmra.mxu0 %vm101_vm0, %v5611_v28  ;;  %v856_v28 = vld [vmem:[%s11476_s2 + $0x320] sm:$0xff]  ;;  %v6280_v27 = vld [vmem:[%s11476_s2 + $0x2d8] sm:$0xff] }
  0x9b   :  { %1085 = vmatprep.subr.mxu0 %v6234_v42  ;;  %1162 = vmatprep.subr.mxu1 %v863_v9  ;;  %v6296_v9 = vld [vmem:[%s11476_s2 + $0x2a8] sm:$0xff] }
  0x9c   :  { %1086 = vmatpush2.msra.mxu0 %v6244_v63  ;;  %1163 = vmatpush2.msra.mxu1 %v862_v59  ;;  %v12116_v59 = vld [vmem:[#allocation22_spill] sm:$0xff] }
  0x9d   :  { %1087 = vmatprep.subr.mxu0 %v6254_v56  ;;  %1164 = vmatprep.subr.mxu1 %v857_v58  ;;  %v6287_v58 = vld [vmem:[%s11476_s2 + $0x2d0] sm:$0xff] }
  0x9e   :  { %1088 = vmatpush2.msra.mxu0 %v6263_v60  ;;  %1089 = vmatprep.mubr.f32.mxu0 %v12050_v0 }
  0x9f   :  { %1165 = vmatpush2.msra.mxu1 %v856_v28  ;;  %1166 = vmatprep.mubr.f32.mxu1 %v12050_v0  ;;  %v12117_v28 = vld [vmem:[#allocation56_spill] sm:$0xff] }
  0xa0   :  { %1090 = vmatmul.mubr.f32.vlgmr.msra.gmra.mxu0 %v12050_v0  ;;  %1167 = vmatmul.mubr.f32.vlgmr.msra.gmra.mxu1 %v12050_v0 }
  0xa1   :  { %1095 = vmatprep.mubr.f32.mxu0 %v12050_v0  ;;  %1172 = vmatprep.mubr.f32.mxu1 %v12050_v0 }
  0xa2   :  { %1282 = vmatprep.subr.mxu0 %v6280_v27  ;;  %1359 = vmatprep.subr.mxu1 %v5564_v25  ;;  %v6303_v25 = vld [vmem:[%s11476_s2 + $0x2a0] sm:$0xff] }
  0xa3   :  { %1283 = vmatpush1.msra.mxu0 %v6287_v58  ;;  %1360 = vmatpush1.msra.mxu1 %v5655_v23  ;;  %v6310_v23 = vld [vmem:[%s11476_s2 + $0x278] sm:$0xff] }
  0xa4   :  { %1096 = vmatmul.mubr.f32.gmra.mxu0 %v12050_v0  ;;  %1173 = vmatmul.mubr.f32.gmra.mxu1 %v12050_v0  ;;  %v6324_v0 = vld [vmem:[%s11476_s2 + $0x248] sm:$0xff] }
  0xa5   :  { %1284 = vmatprep.subr.mxu0 %v6296_v9  ;;  %1361 = vmatprep.subr.mxu1 %v5666_v26  ;;  %v6317_v26 = vld [vmem:[%s11476_s2 + $0x270] sm:$0xff] }
  0xa6   :  { %1285 = vmatpush1.msra.mxu0 %v6303_v25  ;;  %1362 = vmatpush1.msra.mxu1 %v5677_v17  ;;  %v12107_v17 = vld [vmem:[#allocation17_spill] sm:$0xff] }
  0xa7   :  { %1286 = vmatprep.subr.mxu0 %v6310_v23  ;;  %1363 = vmatprep.subr.mxu1 %v5688_v50  ;;  %v12108_v50 = vld [vmem:[#allocation52_spill] sm:$0xff] }
  0xa8   :  { %1287 = vmatpush1.msra.mxu0 %v6317_v26  ;;  %1364 = vmatpush1.msra.mxu1 %v5697_v21  ;;  %v12109_v21 = vld [vmem:[#allocation18_spill] sm:$0xff] }
  0xa9   :  { %1288 = vmatprep.subr.mxu0 %v6324_v0  ;;  %1365 = vmatprep.subr.mxu1 %v5708_v19 }
  0xaa   :  { %1289 = vmatpush1.msra.mxu0 %v5133_v29  ;;  %1366 = vmatpush1.msra.mxu1 %v5717_v18  ;;  %v12082_v29 = vld [vmem:[#allocation41_spill] sm:$0xff] }
  0xab   :  { %1290 = vmatprep.subr.mxu0 %v5144_v31  ;;  %1367 = vmatprep.subr.mxu1 %v5727_v15  ;;  %v12083_v31 = vld [vmem:[#allocation3_spill] sm:$0xff]  ;;  %v12106_v15 = vld [vmem:[#allocation16_spill] sm:$0xff] }
  0xac   :  { %1291 = vmatpush1.msra.mxu0 %v5149_v32  ;;  %1368 = vmatpush1.msra.mxu1 %v5737_v20  ;;  %v12084_v32 = vld [vmem:[#allocation42_spill] sm:$0xff]  ;;  %v12110_v20 = vld [vmem:[#allocation53_spill] sm:$0xff] }
  0xad   :  { %1292 = vmatprep.subr.mxu0 %v5157_v33  ;;  %1369 = vmatprep.subr.mxu1 %v5747_v14  ;;  %v12085_v33 = vld [vmem:[#allocation4_spill] sm:$0xff]  ;;  %v12105_v14 = vld [vmem:[#allocation51_spill] sm:$0xff] }
  0xae   :  { %1293 = vmatpush1.msra.mxu0 %v5165_v34  ;;  %1370 = vmatpush1.msra.mxu1 %v5756_v12  ;;  %v12086_v34 = vld [vmem:[#allocation5_spill] sm:$0xff]  ;;  %v12104_v12 = vld [vmem:[#allocation15_spill] sm:$0xff] }
  0xaf   :  { %1294 = vmatprep.subr.mxu0 %v5177_v36  ;;  %1371 = vmatprep.subr.mxu1 %v5766_v24  ;;  %v12087_v36 = vld [vmem:[#allocation43_spill] sm:$0xff] }
  0xb0   :  { %1295 = vmatpush1.msra.mxu0 %v5184_v37  ;;  %1372 = vmatpush1.msra.mxu1 %v5776_v3  ;;  %v12088_v37 = vld [vmem:[#allocation6_spill] sm:$0xff]  ;;  %v12111_v3 = vld [vmem:[#allocation19_spill] sm:$0xff] }
  0xb1   :  { %1296 = vmatprep.subr.mxu0 %v5192_v38  ;;  %1373 = vmatprep.subr.mxu1 %v5786_v10  ;;  %v12089_v38 = vld [vmem:[#allocation44_spill] sm:$0xff] }
  0xb2   :  { %1297 = vmatpush1.msra.mxu0 %v5200_v39  ;;  %1374 = vmatpush1.msra.mxu1 %v5795_v7  ;;  %v12090_v39 = vld [vmem:[#allocation7_spill] sm:$0xff] }
  0xb3   :  { %1298 = vmatprep.subr.mxu0 %v5212_v41  ;;  %1375 = vmatprep.subr.mxu1 %v5805_v30  ;;  %v12091_v41 = vld [vmem:[#allocation45_spill] sm:$0xff]  ;;  %v12112_v30 = vld [vmem:[#allocation54_spill] sm:$0xff] }
  0xb4   :  { %1299 = vmatpush1.msra.mxu0 %v5222_v43  ;;  %1376 = vmatpush1.msra.mxu1 %v5815_v13  ;;  %v12092_v43 = vld [vmem:[#allocation8_spill] sm:$0xff]  ;;  %v6416_v13 = vld [vmem:[%s11477_s3] sm:$0x3f] }
  0xb5   :  { %1300 = vmatprep.subr.mxu0 %v5230_v44  ;;  %1377 = vmatprep.subr.mxu1 %v5825_v6  ;;  %v12093_v44 = vld [vmem:[#allocation9_spill] sm:$0xff] }
  0xb6   :  { %1301 = vmatpush1.msra.mxu0 %v5238_v45  ;;  %1378 = vmatpush1.msra.mxu1 %v5834_v2  ;;  %v12094_v45 = vld [vmem:[#allocation46_spill] sm:$0xff] }
  0xb7   :  { %1302 = vmatprep.subr.mxu0 %v5251_v47  ;;  %1379 = vmatprep.subr.mxu1 %v5844_v35  ;;  %v12095_v47 = vld [vmem:[#allocation10_spill] sm:$0xff] }
  0xb8   :  { %1303 = vmatpush1.msra.mxu0 %v5258_v48  ;;  %1380 = vmatpush1.msra.mxu1 %v5854_v8  ;;  %v12096_v48 = vld [vmem:[#allocation47_spill] sm:$0xff]  ;;  %v12103_v2 = vld [vmem:[#allocation50_spill] sm:$0xff] }
  0xb9   :  { %1304 = vmatprep.subr.mxu0 %v5267_v49  ;;  %1381 = vmatprep.subr.mxu1 %v5864_v1  ;;  %v71_v49 = vlaneseq  ;;  %v12102_v1 = vld [vmem:[#allocation14_spill] sm:$0xff] }
  0xba   :  { %1305 = vmatpush1.msra.mxu0 %v5277_v51  ;;  %1382 = vmatpush1.msra.mxu1 %v5873_v61  ;;  %v12097_v51 = vld [vmem:[#allocation11_spill] sm:$0xff]  ;;  %v12101_v61 = vld [vmem:[#allocation49_spill] sm:$0xff] }
  0xbb   :  { %1306 = vmatprep.subr.mxu0 %v5289_v53  ;;  %1383 = vmatprep.subr.mxu1 %v5883_v40  ;;  %v12098_v53 = vld [vmem:[#allocation48_spill] sm:$0xff]  ;;  %v6392_v6 = vshrl.u32 %v71_v49, 7 }
  0xbc   :  { %1307 = vmatpush1.msra.mxu0 %v5295_v54  ;;  %1384 = vmatpush1.msra.mxu1 %v5893_v4  ;;  %v12099_v54 = vld [vmem:[#allocation12_spill] sm:$0xff] }
  0xbd   :  { %1308 = vmatprep.subr.mxu0 %v5303_v55  ;;  %1385 = vmatprep.subr.mxu1 %v12082_v29  ;;  %v12100_v55 = vld [vmem:[#allocation13_spill] sm:$0xff]  ;;  %v11550_v24 = vsub.s32 0, %v6392_v6  ;;  %v12113_v40 = vld [vmem:[#allocation20_spill] sm:$0xff]  ;;  %v11549_v4 = vsub.s32 1, %v6392_v6 }
  0xbe   :  { %1309 = vmatpush1.msra.mxu0 %v12083_v31  ;;  %1386 = vmatpush1.msra.mxu1 %v12084_v32  ;;  %v12119_v31 = vld [vmem:[#allocation57_spill] sm:$0xff] }
  0xbf   :  { %1310 = vmatprep.subr.mxu0 %v12085_v33  ;;  %1387 = vmatprep.subr.mxu1 %v5922_v46  ;;  %v12114_v46 = vld [vmem:[#allocation21_spill] sm:$0xff]  ;;  %v6436_v29 = vrot.slane %v6416_v13, %v11550_v24  ;;  %v12120_v33 = vld [vmem:[#allocation24_spill] sm:$0xff] }
  0xc0   :  { %1311 = vmatpush1.msra.mxu0 %v12086_v34  ;;  %1388 = vmatpush1.msra.mxu1 %v12087_v36  ;;  %v6445_v34 = vrot.slane %v6416_v13, %v11549_v4 }
  0xc1   :  { %1312 = vmatprep.subr.mxu0 %v12088_v37  ;;  %1389 = vmatprep.subr.mxu1 %v12089_v38  ;;  %v12121_v38 = vld [vmem:[#allocation25_spill] sm:$0xff] }
  0xc2   :  { %1313 = vmatpush1.msra.mxu0 %v12090_v39  ;;  %1390 = vmatpush1.msra.mxu1 %v12091_v41  ;;  %v12122_v39 = vld [vmem:[#allocation58_spill] sm:$0xff] }
  0xc3   :  { %1314 = vmatprep.subr.mxu0 %v12092_v43  ;;  %1391 = vmatprep.subr.mxu1 %v5961_v52  ;;  %v12115_v52 = vld [vmem:[#allocation55_spill] sm:$0xff]  ;;  %v12123_v43 = vld [vmem:[#allocation26_spill] sm:$0xff] }
  0xc4   :  { %1315 = vmatpush2.msra.mxu0 %v12093_v44  ;;  %1392 = vmatpush2.msra.mxu1 %v12094_v45  ;;  %v12124_v44 = vld [vmem:[#allocation59_spill] sm:$0xff] }
  0xc5   :  { %1316 = vmatprep.subr.mxu0 %v12095_v47  ;;  %1393 = vmatprep.subr.mxu1 %v12096_v48  ;;  %v12125_v47 = vld [vmem:[#allocation27_spill] sm:$0xff]  ;;  %v12126_v48 = vld [vmem:[#allocation60_spill] sm:$0xff] }
  0xc6   :  { %1317 = vmatpush2.msra.mxu0 %v12097_v51  ;;  %1394 = vmatpush2.msra.mxu1 %v12098_v53  ;;  %v12127_v51 = vld [vmem:[#allocation28_spill] sm:$0xff] }
  0xc7   :  { %1318 = vmatprep.subr.mxu0 %v12099_v54  ;;  %1395 = vmatprep.subr.mxu1 %v6000_v57 }
  0xc8   :  { %1319 = vmatpush2.msra.mxu0 %v12100_v55  ;;  %1396 = vmatpush2.msra.mxu1 %v12101_v61  ;;  %v12128_v55 = vld [vmem:[#allocation29_spill] sm:$0xff] }
  0xc9   :  { %1320 = vmatprep.subr.mxu0 %v12102_v1  ;;  %1397 = vmatprep.subr.mxu1 %v12103_v2  ;;  %v12129_v61 = vld [vmem:[#allocation61_spill] sm:$0xff]  ;;  %v12130_v2 = vld [vmem:[#allocation30_spill] sm:$0xff] }
  0xca   :  { %v6394_v7 = vpop.f32.mrf.mxu0  ;;  %v6396_v10 = vpop.f32.mrf.mxu1  ;;  %1321 = vmatpush2.msra.mxu0 %v12104_v12  ;;  %1398 = vmatpush2.msra.mxu1 %v12105_v14  ;;  %v12131_v12 = vld [vmem:[#allocation62_spill] sm:$0xff] }
  0xcb   :  { %1322 = vmatprep.subr.mxu0 %v12106_v15  ;;  %1399 = vmatprep.subr.mxu1 %v6039_v62 }
  0xcc   :  { %v6402_v18 = vpop.f32.mrf.mxu0  ;;  %v6404_v19 = vpop.f32.mrf.mxu1  ;;  %1323 = vmatpush2.msra.mxu0 %v12107_v17  ;;  %1400 = vmatpush2.msra.mxu1 %v12108_v50  ;;  %v12133_v17 = vld [vmem:[#allocation63_spill] sm:$0xff] }
  0xcd   :  { %1324 = vmatprep.subr.mxu0 %v12109_v21  ;;  %1401 = vmatprep.subr.mxu1 %v12110_v20  ;;  %v12134_v21 = vld [vmem:[#allocation32_spill] sm:$0xff] }
  0xce   :  { %1325 = vmatpush2.msra.mxu0 %v12111_v3  ;;  %1402 = vmatpush2.msra.mxu1 %v12112_v30  ;;  %v12137_v30 = vld [vmem:[#allocation33_spill] sm:$0xff] }
  0xcf   :  { %v6418_v35 = vpop.f32.mrf.mxu0  ;;  %v6420_v8 = vpop.f32.mrf.mxu1  ;;  %1326 = vmatprep.subr.mxu0 %v12113_v40  ;;  %1403 = vmatprep.subr.mxu1 %v6078_v5  ;;  %v12118_v5 = vld [vmem:[#allocation23_spill] sm:$0xff]  ;;  %v12138_v40 = vld [vmem:[#allocation64_spill] sm:$0xff] }
  0xd0   :  { %1327 = vmatpush2.msra.mxu0 %v12114_v46  ;;  %1404 = vmatpush2.msra.mxu1 %v12115_v52  ;;  %v12139_v52 = vld [vmem:[#allocation34_spill] sm:$0xff] }
  0xd1   :  { %v6427_v57 = vpop.f32.mrf.mxu0  ;;  %v6429_v62 = vpop.f32.mrf.mxu1  ;;  %1328 = vmatprep.subr.mxu0 %v12116_v59  ;;  %1405 = vmatprep.subr.mxu1 %v12117_v28  ;;  %v12140_v59 = vld [vmem:[#allocation65_spill] sm:$0xff] }
  0xd2   :  { %1329 = vmatpush2.msra.mxu0 %v12118_v5  ;;  %1406 = vmatpush2.msra.mxu1 %v12119_v31  ;;  %v12144_v31 = vld [vmem:[#allocation66_spill] sm:$0xff] }
  0xd3   :  { %v228_v32 = vpop.f32.mrf.mxu0  ;;  %1330 = vmatprep.subr.mxu0 %v12120_v33  ;;  %1407 = vmatprep.subr.mxu1 %v6117_v11 }
  0xd4   :  { %v6448_v36 = vadd.f32 %v228_v32, %v6436_v29  ;;  %v6450_v37 = vpop.f32.mrf.mxu1  ;;  %1331 = vmatpush2.msra.mxu0 %v12121_v38  ;;  %1408 = vmatpush2.msra.mxu1 %v12122_v39  ;;  %v12145_v32 = vld [vmem:[#allocation36_spill] sm:$0xff]  ;;  %v12147_v39 = vld [vmem:[#allocation37_spill] sm:$0xff] }
  0xd5   :  { %v230_v41 = vpop.f32.mrf.mxu0  ;;  %1332 = vmatprep.subr.mxu0 %v12123_v43  ;;  %1409 = vmatprep.subr.mxu1 %v12124_v44  ;;  %v12149_v43 = vld [vmem:[#allocation38_spill] sm:$0xff] }
  0xd6   :  { %v6457_v11 = vadd.f32 %v230_v41, %v6445_v34  ;;  %v6459_v45 = vpop.f32.mrf.mxu1  ;;  %1333 = vmatpush2.msra.mxu0 %v12125_v47  ;;  %1410 = vmatpush2.msra.mxu1 %v12126_v48  ;;  %v12151_v48 = vld [vmem:[#allocation39_spill] sm:$0xff] }
  0xd7   :  { %v234_v49 = vpop.f32.mrf.mxu0  ;;  %1334 = vmatprep.subr.mxu0 %v12127_v51  ;;  %1411 = vmatprep.subr.mxu1 %v6156_v16  ;;  %v12132_v16 = vld [vmem:[#allocation31_spill] sm:$0xff] }
  0xd8   :  { %v6466_v53 = vadd.f32 %v234_v49, %v6436_v29  ;;  %v6468_v54 = vpop.f32.mrf.mxu1  ;;  %1335 = vmatpush2.msra.mxu0 %v12128_v55  ;;  %1412 = vmatpush2.msra.mxu1 %v12129_v61  ;;  %v12153_v49 = vld [vmem:[#allocation40_spill] sm:$0xff] }
  0xd9   :  { %v236_v1 = vpop.f32.mrf.mxu0  ;;  %1336 = vmatprep.subr.mxu0 %v12130_v2  ;;  %1413 = vmatprep.subr.mxu1 %v12131_v12 }
  0xda   :  { %v6475_v14 = vadd.f32 %v236_v1, %v6445_v34  ;;  %v6477_v15 = vpop.f32.mrf.mxu1  ;;  %1337 = vmatpush2.msra.mxu0 %v12132_v16  ;;  %1414 = vmatpush2.msra.mxu1 %v12133_v17 }
  0xdb   :  { %v240_v50 = vpop.f32.mrf.mxu0  ;;  %1338 = vmatprep.subr.mxu0 %v12134_v21  ;;  %1415 = vmatprep.subr.mxu1 %v6195_v22  ;;  %v12143_v22 = vld [vmem:[#allocation35_spill] sm:$0xff] }
  0xdc   :  { %v6484_v20 = vadd.f32 %v240_v50, %v6436_v29  ;;  %v6486_v3 = vpop.f32.mrf.mxu1  ;;  %1339 = vmatpush2.msra.mxu0 %v12137_v30  ;;  %1416 = vmatpush2.msra.mxu1 %v12138_v40 }
  0xdd   :  { %12136 = vst [vmem:[#allocation3_spill] sm:$0xff] %v6486_v3  ;;  %v242_v46 = vpop.f32.mrf.mxu0  ;;  %1340 = vmatprep.subr.mxu0 %v12139_v52  ;;  %1417 = vmatprep.subr.mxu1 %v12140_v59  ;;  %v6986_v3 = vld [vmem:[%s11476_s2 + $0xb0] sm:$0xff] }
  0xde   :  { %12135 = vst [vmem:[#allocation41_spill] sm:$0xff] %v6484_v20  ;;  %v6493_v28 = vadd.f32 %v242_v46, %v6445_v34  ;;  %v6495_v5 = vpop.f32.mrf.mxu1  ;;  %1341 = vmatpush2.msra.mxu0 %v12143_v22  ;;  %1418 = vmatpush2.msra.mxu1 %v12144_v31  ;;  %12230 = vst [vmem:[#allocation85_spill] sm:$0xff] %v6986_v3  ;;  %v7010_v20 = vld [vmem:[%s11476_s2 + $0x80] sm:$0xff] }
  0xdf   :  { %12142 = vst [vmem:[#allocation4_spill] sm:$0xff] %v6495_v5  ;;  %1342 = vmatprep.subr.mxu0 %v12145_v32  ;;  %1419 = vmatprep.subr.mxu1 %v6234_v42  ;;  %v6980_v5 = vld [vmem:[%s11476_s2 + $0x120] sm:$0xff]  ;;  %12234 = vst [vmem:[#allocation89_spill] sm:$0xff] %v7010_v20 }
  0xe0   :  { %12141 = vst [vmem:[#allocation42_spill] sm:$0xff] %v6493_v28  ;;  %v246_v33 = vpop.f32.mrf.mxu0  ;;  %v6501_v38 = vpop.f32.mrf.mxu1  ;;  %1343 = vmatpush2.msra.mxu0 %v12147_v39  ;;  %1420 = vmatpush2.msra.mxu1 %v6244_v63  ;;  %12229 = vst [vmem:[#allocation84_spill] sm:$0xff] %v6980_v5  ;;  %v7004_v28 = vld [vmem:[%s11476_s2 + $0xf0] sm:$0xff] }
  0xe1   :  { %12146 = vst [vmem:[#allocation5_spill] sm:$0xff] %v6501_v38  ;;  %v6506_v41 = vadd.f32 %v246_v33, %v6436_v29  ;;  %1344 = vmatprep.subr.mxu0 %v12149_v43  ;;  %1421 = vmatprep.subr.mxu1 %v6254_v56  ;;  %v6974_v38 = vld [vmem:[%s11476_s2 + $0xb8] sm:$0xff]  ;;  %12233 = vst [vmem:[#allocation88_spill] sm:$0xff] %v7004_v28 }
  0xe2   :  { %v248_v44 = vpop.f32.mrf.mxu0  ;;  %v6510_v47 = vpop.f32.mrf.mxu1  ;;  %1345 = vmatpush2.msra.mxu0 %v12151_v48  ;;  %1422 = vmatpush2.msra.mxu1 %v6263_v60  ;;  %12228 = vst [vmem:[#allocation83_spill] sm:$0xff] %v6974_v38 }
  0xe3   :  { %12148 = vst [vmem:[#allocation43_spill] sm:$0xff] %v6506_v41  ;;  %12150 = vst [vmem:[#allocation6_spill] sm:$0xff] %v6510_v47  ;;  %v6515_v42 = vadd.f32 %v248_v44, %v6445_v34  ;;  %1436 = vmatprep.subr.mxu0 %v12153_v49  ;;  %1616 = vmatprep.subr.mxu1 %v6280_v27  ;;  %v6968_v47 = vld [vmem:[%s11476_s2 + $0x128] sm:$0xff] }
  0xe4   :  { %v252_v63 = vpop.f32.mrf.mxu0  ;;  %12227 = vst [vmem:[#allocation82_spill] sm:$0xff] %v6968_v47  ;;  %v6998_v41 = vld [vmem:[%s11476_s2 + $0x88] sm:$0xff] }
  0xe5   :  { %12152 = vst [vmem:[#allocation44_spill] sm:$0xff] %v6515_v42  ;;  %v6520_v51 = vadd.f32 %v252_v63, %v6436_v29  ;;  %v6522_v55 = vpop.f32.mrf.mxu1  ;;  %v6992_v42 = vld [vmem:[%s11476_s2 + $0xf8] sm:$0xff]  ;;  %12232 = vst [vmem:[#allocation87_spill] sm:$0xff] %v6998_v41 }
  0xe6   :  { %12155 = vst [vmem:[#allocation45_spill] sm:$0xff] %v6522_v55  ;;  %v254_v56 = vpop.f32.mrf.mxu0  ;;  %12231 = vst [vmem:[#allocation86_spill] sm:$0xff] %v6992_v42 }
  0xe7   :  { %12154 = vst [vmem:[#allocation7_spill] sm:$0xff] %v6520_v51  ;;  %v6525_v61 = vadd.f32 %v254_v56, %v6445_v34  ;;  %v6527_v1 = vpop.f32.mrf.mxu1  ;;  %v6938_v51 = vld [vmem:[%s11476_s2 + $0x110] sm:$0xff] }
  0xe8   :  { %12157 = vst [vmem:[#allocation9_spill] sm:$0xff] %v6527_v1  ;;  %v258_v60 = vpop.f32.mrf.mxu0  ;;  %12222 = vst [vmem:[#allocation77_spill] sm:$0xff] %v6938_v51 }
  0xe9   :  { %12156 = vst [vmem:[#allocation8_spill] sm:$0xff] %v6525_v61  ;;  %v6530_v2 = vadd.f32 %v258_v60, %v6436_v29  ;;  %v6532_v12 = vpop.f32.mrf.mxu1 }
  0xea   :  { %12159 = vst [vmem:[#allocation10_spill] sm:$0xff] %v6532_v12  ;;  %v260_v16 = vpop.f32.mrf.mxu0 }
  0xeb   :  { %12158 = vst [vmem:[#allocation46_spill] sm:$0xff] %v6530_v2  ;;  %v6535_v27 = vadd.f32 %v260_v16, %v6445_v34  ;;  %v6537_v17 = vpop.f32.mrf.mxu1 }
  0xec   :  { %12161 = vst [vmem:[#allocation11_spill] sm:$0xff] %v6537_v17  ;;  %v264_v50 = vpop.f32.mrf.mxu0  ;;  %v219_v17 = vadd.f32 %v6402_v18, %v6445_v34 }
  0xed   :  { %12160 = vst [vmem:[#allocation47_spill] sm:$0xff] %v6535_v27  ;;  %v6540_v21 = vadd.f32 %v264_v50, %v6436_v29  ;;  %v6545_v46 = vpop.f32.mrf.mxu1 }
  0xee   :  { %v266_v30 = vpop.f32.mrf.mxu0  ;;  %12164 = vst [vmem:[#allocation13_spill] sm:$0xff] %v6545_v46 }
  0xef   :  { %12162 = vst [vmem:[#allocation48_spill] sm:$0xff] %v6540_v21  ;;  %v6543_v40 = vadd.f32 %v266_v30, %v6445_v34  ;;  %v6550_v31 = vpop.f32.mrf.mxu1 }
  0xf0   :  { %12166 = vst [vmem:[#allocation14_spill] sm:$0xff] %v6550_v31 }
  0xf1   :  { %12163 = vst [vmem:[#allocation12_spill] sm:$0xff] %v6543_v40  ;;  %v270_v52 = vpop.f32.mrf.mxu0  ;;  %v6558_v44 = vpop.f32.mrf.mxu1 }
  0xf2   :  { %v6548_v59 = vadd.f32 %v270_v52, %v6436_v29  ;;  %12169 = vst [vmem:[#allocation51_spill] sm:$0xff] %v6558_v44 }
  0xf3   :  { %v272_v22 = vpop.f32.mrf.mxu0  ;;  %v6566_v60 = vpop.f32.mrf.mxu1 }
  0xf4   :  { %12165 = vst [vmem:[#allocation49_spill] sm:$0xff] %v6548_v59  ;;  %v6553_v32 = vadd.f32 %v272_v22, %v6445_v34  ;;  %12172 = vst [vmem:[#allocation52_spill] sm:$0xff] %v6566_v60 }
  0xf5   :  { %v276_v33 = vpop.f32.mrf.mxu0 }
  0xf6   :  { %12167 = vst [vmem:[#allocation50_spill] sm:$0xff] %v6553_v32  ;;  %v6556_v39 = vadd.f32 %v276_v33, %v6436_v29  ;;  %v6574_v22 = vpop.f32.mrf.mxu1 }
  0xf7   :  { %v278_v43 = vpop.f32.mrf.mxu0  ;;  %12175 = vst [vmem:[#allocation19_spill] sm:$0xff] %v6574_v22 }
  0xf8   :  { %12168 = vst [vmem:[#allocation15_spill] sm:$0xff] %v6556_v39  ;;  %v6561_v48 = vadd.f32 %v278_v43, %v6445_v34  ;;  %v6582_v4 = vpop.f32.mrf.mxu1 }
  0xf9   :  { %v282_v49 = vpop.f32.mrf.mxu0  ;;  %12178 = vst [vmem:[#allocation21_spill] sm:$0xff] %v6582_v4 }
  0xfa   :  { %12170 = vst [vmem:[#allocation16_spill] sm:$0xff] %v6561_v48  ;;  %v6564_v63 = vadd.f32 %v282_v49, %v6436_v29 }
  0xfb   :  { %v284_v56 = vpop.f32.mrf.mxu0 }
  0xfc   :  { %12171 = vst [vmem:[#allocation17_spill] sm:$0xff] %v6564_v63  ;;  %v6569_v16 = vadd.f32 %v284_v56, %v6445_v34 }
  0xfd   :  { %v288_v50 = vpop.f32.mrf.mxu0 }
  0xfe   :  { %12173 = vst [vmem:[#allocation18_spill] sm:$0xff] %v6569_v16  ;;  %v6572_v30 = vadd.f32 %v288_v50, %v6436_v29 }
  0xff   :  { %v290_v52 = vpop.f32.mrf.mxu0 }
 0x100   :  { %12174 = vst [vmem:[#allocation53_spill] sm:$0xff] %v6572_v30  ;;  %v6577_v33 = vadd.f32 %v290_v52, %v6445_v34  ;;  %v6590_v30 = vpop.f32.mrf.mxu1 }
 0x101   :  { %12181 = vst [vmem:[#allocation56_spill] sm:$0xff] %v6590_v30 }
 0x102   :  { %12176 = vst [vmem:[#allocation54_spill] sm:$0xff] %v6577_v33  ;;  %v294_v43 = vpop.f32.mrf.mxu0 }
 0x103   :  { %v6580_v49 = vadd.f32 %v294_v43, %v6436_v29 }
 0x104   :  { %v296_v24 = vpop.f32.mrf.mxu0 }
 0x105   :  { %12177 = vst [vmem:[#allocation20_spill] sm:$0xff] %v6580_v49  ;;  %v6585_v56 = vadd.f32 %v296_v24, %v6445_v34  ;;  %v6598_v49 = vpop.f32.mrf.mxu1 }
 0x106   :  { %v300_v16 = vpop.f32.mrf.mxu0  ;;  %12184 = vst [vmem:[#allocation24_spill] sm:$0xff] %v6598_v49 }
 0x107   :  { %12179 = vst [vmem:[#allocation55_spill] sm:$0xff] %v6585_v56  ;;  %v6588_v50 = vadd.f32 %v300_v16, %v6436_v29  ;;  %v6605_v16 = vpop.f32.mrf.mxu1 }
 0x108   :  { %v302_v22 = vpop.f32.mrf.mxu0  ;;  %12186 = vst [vmem:[#allocation58_spill] sm:$0xff] %v6605_v16 }
 0x109   :  { %12180 = vst [vmem:[#allocation22_spill] sm:$0xff] %v6588_v50  ;;  %v6593_v52 = vadd.f32 %v302_v22, %v6445_v34  ;;  %v6609_v30 = vpop.f32.mrf.mxu1 }
 0x10a   :  { %v306_v33 = vpop.f32.mrf.mxu0  ;;  %12187 = vst [vmem:[#allocation26_spill] sm:$0xff] %v6609_v30 }
 0x10b   :  { %12182 = vst [vmem:[#allocation23_spill] sm:$0xff] %v6593_v52  ;;  %v6596_v43 = vadd.f32 %v306_v33, %v6436_v29  ;;  %v6615_v33 = vpop.f32.mrf.mxu1 }
 0x10c   :  { %v308_v4 = vpop.f32.mrf.mxu0  ;;  %12188 = vst [vmem:[#allocation59_spill] sm:$0xff] %v6615_v33 }
 0x10d   :  { %12183 = vst [vmem:[#allocation57_spill] sm:$0xff] %v6596_v43  ;;  %v6601_v24 = vadd.f32 %v308_v4, %v6445_v34  ;;  %v6621_v4 = vpop.f32.mrf.mxu1 }
 0x10e   :  { %v6603_v56 = vpop.f32.mrf.mxu0  ;;  %12189 = vst [vmem:[#allocation27_spill] sm:$0xff] %v6621_v4 }
 0x10f   :  { %12185 = vst [vmem:[#allocation25_spill] sm:$0xff] %v6601_v24  ;;  %v6625_v63 = vpop.f32.mrf.mxu1 }
 0x110   :  { %v6607_v50 = vpop.f32.mrf.mxu0  ;;  %12190 = vst [vmem:[#allocation60_spill] sm:$0xff] %v6625_v63 }
 0x111   :  { %v6631_v30 = vpop.f32.mrf.mxu1 }
 0x112   :  { %12192 = vst [vmem:[#allocation29_spill] sm:$0xff] %v6631_v30  ;;  %v217_v30 = vadd.f32 %v6394_v7, %v6436_v29 }
 0x113   :  { %v6635_v60 = vpop.f32.mrf.mxu1 }
 0x114   :  { %v6611_v22 = vpop.f32.mrf.mxu0  ;;  %12194 = vst [vmem:[#allocation30_spill] sm:$0xff] %v6635_v60 }
 0x115   :  { %v6641_v31 = vpop.f32.mrf.mxu1 }
 0x116   :  { %v6613_v52 = vpop.f32.mrf.mxu0  ;;  %12197 = vst [vmem:[#allocation63_spill] sm:$0xff] %v6641_v31 }
 0x117   :  { %v1014_v63 = vpop.f32.mrf.mxu1 }
 0x118   :  { %v1179_v31 = vadd.f32 %v1014_v63, %v217_v30 }
 0x119   :  { %v6617_v43 = vpop.f32.mrf.mxu0  ;;  %v1016_v59 = vpop.f32.mrf.mxu1 }
 0x11a   :  { %v3881_v7 = vmul.f32 -1.442695, %v1179_v31 }
 0x11b   :  { %v6619_v49 = vpop.f32.mrf.mxu0  ;;  %v1020_v21 = vpop.f32.mrf.mxu1 }
 0x11c   :  { %4017 = vpow2.f32 %v3881_v7  ;;  %v81_v7 = vsub.s32 2, %v6392_v6 }
 0x11e   :  { %v6623_v24 = vpop.f32.mrf.mxu0 }
 0x120   :  { %v6627_v16 = vpop.f32.mrf.mxu0 }
 0x123   :  { %v6629_v48 = vpop.f32.mrf.mxu0 }
 0x124   :  { %12191 = vst [vmem:[#allocation28_spill] sm:$0xff] %v6629_v48  ;;  %v6962_v48 = vld [vmem:[%s11476_s2 + $0xe0] sm:$0xff] }
 0x125   :  { %v6633_v39 = vpop.f32.mrf.mxu0  ;;  %12226 = vst [vmem:[#allocation81_spill] sm:$0xff] %v6962_v48 }
 0x126   :  { %12193 = vst [vmem:[#allocation61_spill] sm:$0xff] %v6633_v39  ;;  %v6956_v39 = vld [vmem:[%s11476_s2 + $0x150] sm:$0xff] }
 0x127   :  { %12225 = vst [vmem:[#allocation80_spill] sm:$0xff] %v6956_v39 }
 0x128   :  { %v6637_v33 = vpop.f32.mrf.mxu0 }
 0x129   :  { %12195 = vst [vmem:[#allocation62_spill] sm:$0xff] %v6637_v33  ;;  %v6950_v33 = vld [vmem:[%s11476_s2 + $0xe8] sm:$0xff] }
 0x12a   :  { %v6639_v44 = vpop.f32.mrf.mxu0  ;;  %12224 = vst [vmem:[#allocation79_spill] sm:$0xff] %v6950_v33 }
 0x12b   :  { %12196 = vst [vmem:[#allocation31_spill] sm:$0xff] %v6639_v44  ;;  %v6944_v44 = vld [vmem:[%s11476_s2 + $0x158] sm:$0xff] }
 0x12c   :  { %12223 = vst [vmem:[#allocation78_spill] sm:$0xff] %v6944_v44 }
 0x12d   :  { %v6643_v4 = vpop.f32.mrf.mxu0 }
 0x12e   :  { %12198 = vst [vmem:[#allocation32_spill] sm:$0xff] %v6643_v4  ;;  %v1180_v4 = vadd.f32 %v1016_v59, %v219_v17 }
 0x12f   :  { %v6645_v46 = vpop.f32.mrf.mxu0 }
 0x130   :  { %12199 = vst [vmem:[#allocation33_spill] sm:$0xff] %v6645_v46  ;;  %v223_v46 = vadd.f32 %v6418_v35, %v6436_v29  ;;  %v3882_v27 = vmul.f32 -1.442695, %v1180_v4 }
 0x132   :  { %v6647_v32 = vpop.f32.mrf.mxu0  ;;  %v1181_v55 = vadd.f32 %v1020_v21, %v223_v46  ;;  %4019 = vpow2.f32 %v3882_v27  ;;  %v4018_v21 = vpop.eup %4017 }
 0x133   :  { %12200 = vst [vmem:[#allocation64_spill] sm:$0xff] %v6647_v32  ;;  %v1022_v32 = vpop.f32.mrf.mxu1  ;;  %v1195_v31 = vadd.f32 1.0, %v4018_v21 }
 0x134   :  { %v6649_v40 = vpop.f32.mrf.mxu0  ;;  %v3883_v63 = vmul.f32 -1.442695, %v1181_v55 }
 0x135   :  { %12201 = vst [vmem:[#allocation34_spill] sm:$0xff] %v6649_v40  ;;  %v225_v40 = vadd.f32 %v6427_v57, %v6445_v34 }
 0x136   :  { %4021 = vpow2.f32 %v3883_v63 }
 0x137   :  { %v6653_v60 = vpop.f32.mrf.mxu0  ;;  %v1182_v2 = vadd.f32 %v1022_v32, %v225_v40 }
 0x138   :  { %12202 = vst [vmem:[#allocation65_spill] sm:$0xff] %v6653_v60 }
 0x139   :  { %v6657_v12 = vpop.f32.mrf.mxu0  ;;  %v3884_v17 = vmul.f32 -1.442695, %v1182_v2 }
 0x13a   :  { %12203 = vst [vmem:[#allocation35_spill] sm:$0xff] %v6657_v12 }
 0x13b   :  { %4023 = vpow2.f32 %v3884_v17 }
 0x13c   :  { %v6661_v1 = vpop.f32.mrf.mxu0  ;;  %4025 = vrcp.f32 %v1195_v31  ;;  %v6696_v31 = vrot.slane %v6416_v13, %v81_v7  ;;  %v12219_v7 = vsub.s32 1, %v6392_v6 }
 0x13d   :  { %12204 = vst [vmem:[#allocation66_spill] sm:$0xff] %v6661_v1 }
 0x13e   :  { %v6665_v60 = vpop.f32.mrf.mxu0 }
 0x13f   :  { %12205 = vst [vmem:[#allocation36_spill] sm:$0xff] %v6665_v60  ;;  %v4020_v40 = vpop.eup %4019 }
 0x140   :  { %v1196_v27 = vadd.f32 1.0, %v4020_v40  ;;  %v729_v40 = vld [vmem:[%s11478_s4] sm:$0x3] }
 0x141   :  { %v6667_v18 = vpop.f32.mrf.mxu0 }
 0x142   :  { %12206 = vst [vmem:[#allocation37_spill] sm:$0xff] %v6667_v18  ;;  %4027 = vrcp.f32 %v1196_v27  ;;  %v384_v18 = vadd.f32 %v6420_v8, %v6696_v31 }
 0x143   :  { %v6669_v59 = vpop.f32.mrf.mxu0  ;;  %v4022_v2 = vpop.eup %4021 }
 0x144   :  { %12207 = vst [vmem:[#allocation38_spill] sm:$0xff] %v6669_v59  ;;  %v1197_v4 = vadd.f32 1.0, %v4022_v2  ;;  %v93_v2 = vsub.s32 5, %v6392_v6 }
 0x146   :  { %v6671_v35 = vpop.f32.mrf.mxu0  ;;  %4029 = vrcp.f32 %v1197_v4 }
 0x147   :  { %12208 = vst [vmem:[#allocation39_spill] sm:$0xff] %v6671_v35 }
 0x148   :  { %v6673_v29 = vpop.f32.mrf.mxu0  ;;  %v4024_v32 = vpop.eup %4023 }
 0x149   :  { %12209 = vst [vmem:[#allocation40_spill] sm:$0xff] %v6673_v29  ;;  %v1198_v63 = vadd.f32 1.0, %v4024_v32 }
 0x14b   :  { %v6675_v57 = vpop.f32.mrf.mxu0  ;;  %4031 = vrcp.f32 %v1198_v63  ;;  %v6715_v63 = vrot.slane %v729_v40, %v12219_v7 }
 0x14c   :  { %12210 = vst [vmem:[#allocation67_spill] sm:$0xff] %v6675_v57 }
 0x14d   :  { %v6677_v34 = vpop.f32.mrf.mxu0 }
 0x14e   :  { %12211 = vst [vmem:[#allocation68_spill] sm:$0xff] %v6677_v34  ;;  %v85_v34 = vsub.s32 3, %v6392_v6 }
 0x150   :  { %v6679_v46 = vpop.f32.mrf.mxu0  ;;  %v6702_v32 = vrot.slane %v6416_v13, %v85_v34 }
 0x151   :  { %12212 = vst [vmem:[#allocation69_spill] sm:$0xff] %v6679_v46  ;;  %v89_v46 = vsub.s32 4, %v6392_v6 }
 0x152   :  { %v6681_v55 = vpop.f32.mrf.mxu0  ;;  %v380_v57 = vadd.f32 %v6404_v19, %v6702_v32  ;;  %v386_v19 = vadd.f32 %v6429_v62, %v6702_v32 }
 0x153   :  { %12213 = vst [vmem:[#allocation70_spill] sm:$0xff] %v6681_v55  ;;  %v6718_v55 = vrot.slane %v6416_v13, %v93_v2 }
 0x155   :  { %v6683_v30 = vpop.f32.mrf.mxu0 }
 0x156   :  { %12214 = vst [vmem:[#allocation71_spill] sm:$0xff] %v6683_v30  ;;  %v378_v30 = vadd.f32 %v6396_v10, %v6696_v31 }
 0x157   :  { %v6686_v17 = vpop.f32.mrf.mxu0 }
 0x158   :  { %12215 = vst [vmem:[#allocation72_spill] sm:$0xff] %v6686_v17  ;;  %v12218_v17 = vsub.s32 0, %v6392_v6 }
 0x15a   :  { %v6690_v21 = vpop.f32.mrf.mxu0  ;;  %v6706_v4 = vrot.slane %v729_v40, %v12218_v17 }
 0x15b   :  { %12216 = vst [vmem:[#allocation73_spill] sm:$0xff] %v6690_v21  ;;  %v6709_v21 = vrot.slane %v6416_v13, %v89_v46  ;;  %v4026_v46 = vpop.eup %4025 }
 0x15c   :  { %v6699_v27 = vpop.f32.mrf.mxu0  ;;  %v4028_v2 = vpop.eup %4027 }
 0x15d   :  { %12217 = vst [vmem:[#allocation74_spill] sm:$0xff] %v6699_v27  ;;  %v539_v35 = vadd.f32 %v6603_v56, %v6709_v21 }
 0x160   :  { %v1091_v27 = vpop.f32.mrf.mxu0  ;;  %v1168_v34 = vpop.f32.mrf.mxu1 }
 0x161   :  { %v1207_v17 = vadd.f32 %v1091_v27, %v378_v30  ;;  %v1235_v29 = vadd.f32 %v1168_v34, %v6706_v4  ;;  %v541_v30 = vadd.f32 %v6607_v50, %v6718_v55  ;;  %v545_v50 = vadd.f32 %v6611_v22, %v6709_v21 }
 0x162   :  { %v1093_v10 = vpop.f32.mrf.mxu0  ;;  %v1170_v59 = vpop.f32.mrf.mxu1 }
 0x163   :  { %v3885_v6 = vmul.f32 -1.442695, %v1207_v17  ;;  %v1239_v40 = vmul.f32 %v4026_v46, %v1235_v29  ;;  %v1208_v7 = vadd.f32 %v1093_v10, %v380_v57  ;;  %v1236_v13 = vadd.f32 %v1170_v59, %v6715_v63  ;;  %v4030_v10 = vpop.eup %4029 }
 0x164   :  { %v1097_v27 = vpop.f32.mrf.mxu0  ;;  %v1174_v34 = vpop.f32.mrf.mxu1 }
 0x165   :  { %4033 = vpow2.f32 %v3885_v6  ;;  %v1243_v56 = vadd.f32 %v1239_v40, %v539_v35  ;;  %v3886_v60 = vmul.f32 -1.442695, %v1208_v7  ;;  %v1240_v17 = vmul.f32 %v4028_v2, %v1236_v13  ;;  %v4032_v62 = vpop.eup %4031 }
 0x166   :  { %v1209_v29 = vadd.f32 %v1097_v27, %v384_v18  ;;  %v1237_v57 = vadd.f32 %v1174_v34, %v6706_v4  ;;  %v1099_v59 = vpop.f32.mrf.mxu0  ;;  %v1176_v46 = vpop.f32.mrf.mxu1  ;;  %v547_v35 = vadd.f32 %v6613_v52, %v6718_v55 }
 0x167   :  { %v1244_v1 = vadd.f32 %v1240_v17, %v541_v30  ;;  %v1210_v8 = vadd.f32 %v1099_v59, %v386_v19  ;;  %v1238_v12 = vadd.f32 %v1176_v46, %v6715_v63  ;;  %4035 = vpow2.f32 %v3886_v60 }
 0x168   :  { %v3887_v61 = vmul.f32 -1.442695, %v1209_v29  ;;  %v1241_v6 = vmul.f32 %v4030_v10, %v1237_v57 }
 0x169   :  { %v3888_v18 = vmul.f32 -1.442695, %v1210_v8  ;;  %v1242_v40 = vmul.f32 %v4032_v62, %v1238_v12 }
 0x16a   :  { %4037 = vpow2.f32 %v3887_v61  ;;  %v1245_v7 = vadd.f32 %v1241_v6, %v545_v50 }
 0x16b   :  { %4039 = vpow2.f32 %v3888_v18  ;;  %v1246_v13 = vadd.f32 %v1242_v40, %v547_v35 }
 0x172   :  { %v4034_v2 = vpop.eup %4033 }
 0x173   :  { %v1223_v19 = vadd.f32 1.0, %v4034_v2 }
 0x174   :  { %v4036_v30 = vpop.eup %4035 }
 0x175   :  { %4041 = vrcp.f32 %v1223_v19  ;;  %v1224_v27 = vadd.f32 1.0, %v4036_v30 }
 0x176   :  { %4043 = vtanh.f32 %v1243_v56 }
 0x177   :  { %v4038_v34 = vpop.eup %4037  ;;  %4045 = vrcp.f32 %v1224_v27 }
 0x178   :  { %v4040_v22 = vpop.eup %4039  ;;  %v1225_v60 = vadd.f32 1.0, %v4038_v34  ;;  %4047 = vtanh.f32 %v1244_v1 }
 0x179   :  { %v1226_v17 = vadd.f32 1.0, %v4040_v22  ;;  %v6753_v22 = vld [vmem:[%s11476_s2 + $0x2f0] sm:$0xff] }
 0x17a   :  { %4049 = vrcp.f32 %v1225_v60  ;;  %v6760_v60 = vld [vmem:[%s11476_s2 + $0x2c8] sm:$0xff] }
 0x17b   :  { %4051 = vrcp.f32 %v1226_v17  ;;  %v6767_v17 = vld [vmem:[%s11476_s2 + $0x2c0] sm:$0xff] }
 0x17c   :  { %4053 = vtanh.f32 %v1245_v7 }
 0x17d   :  { %4055 = vtanh.f32 %v1246_v13 }
 0x182   :  { %v4042_v61 = vpop.eup %4041 }
 0x183   :  { %v1251_v12 = vsub.f32 1.0, %v4042_v61  ;;  %v4044_v52 = vpop.eup %4043  ;;  %v1259_v59 = vmul.f32 0.0, %v4042_v61  ;;  %v6782_v61 = vld [vmem:[%s11476_s2 + $0x290] sm:$0xff] }
 0x184   :  { %v4046_v29 = vpop.eup %4045 }
 0x185   :  { %v1255_v57 = vmul.f32 %v4044_v52, %v1251_v12  ;;  %v4048_v46 = vpop.eup %4047  ;;  %v1252_v10 = vsub.f32 1.0, %v4046_v29  ;;  %v1260_v6 = vmul.f32 0.0, %v4046_v29  ;;  %v6788_v12 = vld [vmem:[%s11476_s2 + $0x268] sm:$0xff]  ;;  %v6795_v52 = vld [vmem:[%s11476_s2 + $0x260] sm:$0xff]  ;;  %v6802_v29 = vld [vmem:[%s11476_s2 + $0x238] sm:$0xff] }
 0x187   :  { %v4050_v8 = vpop.eup %4049  ;;  %v6738_v62 = vadd.f32 %v1259_v59, %v1255_v57  ;;  %v1256_v50 = vmul.f32 %v4048_v46, %v1252_v10  ;;  %v6809_v57 = vld [vmem:[%s11476_s2 + $0x230] sm:$0xff]  ;;  %v6854_v46 = vld [vmem:[%s11476_s2 + $0x1a8] sm:$0xff] }
 0x188   :  { %v4052_v56 = vpop.eup %4051  ;;  %v1253_v1 = vsub.f32 1.0, %v4050_v8  ;;  %v1261_v2 = vmul.f32 0.0, %v4050_v8  ;;  %v6842_v59 = vld [vmem:[%s11476_s2 + $0x1d0] sm:$0xff]  ;;  %v6866_v8 = vld [vmem:[%s11476_s2 + $0x1a0] sm:$0xff] }
 0x189   :  { %v4054_v35 = vpop.eup %4053  ;;  %v1254_v18 = vsub.f32 1.0, %v4052_v56  ;;  %v6740_v7 = vadd.f32 %v1260_v6, %v1256_v50  ;;  %v1262_v30 = vmul.f32 0.0, %v4052_v56  ;;  %v6860_v10 = vld [vmem:[%s11476_s2 + $0x210] sm:$0xff]  ;;  %v6872_v56 = vld [vmem:[%s11476_s2 + $0x1e8] sm:$0xff]  ;;  %v6878_v50 = vld [vmem:[%s11476_s2 + $0x178] sm:$0xff] }
 0x18a   :  { %v4056_v40 = vpop.eup %4055  ;;  %v1257_v13 = vmul.f32 %v4054_v35, %v1253_v1  ;;  %v6884_v6 = vld [vmem:[%s11476_s2 + $0x1e0] sm:$0xff]  ;;  %v6890_v1 = vld [vmem:[%s11476_s2 + $0x170] sm:$0xff]  ;;  %v6896_v35 = vld [vmem:[%s11476_s2 + $0x1b8] sm:$0xff] }
 0x18b   :  { %v1258_v19 = vmul.f32 %v4056_v40, %v1254_v18  ;;  %1346 = vmatprep.mubr.f32.mxu0 %v6740_v7  ;;  %1423 = vmatprep.mubr.f32.mxu1 %v6740_v7  ;;  %v6902_v18 = vld [vmem:[%s11476_s2 + $0x148] sm:$0xff]  ;;  %v6908_v40 = vld [vmem:[%s11476_s2 + $0x1b0] sm:$0xff] }
 0x18c   :  { %v6744_v27 = vadd.f32 %v1261_v2, %v1257_v13  ;;  %1347 = vmatmul.mubr.f32.vlgmr.msra.gmra.mxu0 %v6738_v62  ;;  %1424 = vmatmul.mubr.f32.vlgmr.msra.gmra.mxu1 %v6738_v62  ;;  %v6914_v13 = vld [vmem:[%s11476_s2 + $0x140] sm:$0xff]  ;;  %v6920_v2 = vld [vmem:[%s11476_s2 + $0x188] sm:$0xff] }
 0x18d   :  { %v6748_v34 = vadd.f32 %v1262_v30, %v1258_v19  ;;  %1437 = vmatpush1.msra.mxu0 %v6753_v22  ;;  %1617 = vmatpush1.msra.mxu1 %v6287_v58  ;;  %v6774_v58 = vld [vmem:[%s11476_s2 + $0x298] sm:$0xff]  ;;  %12220 = vst [vmem:[#allocation75_spill] sm:$0xff] %v6914_v13  ;;  %v6932_v30 = vld [vmem:[%s11476_s2 + $0x180] sm:$0xff] }
 0x18e   :  { %1438 = vmatprep.subr.mxu0 %v6760_v60  ;;  %1618 = vmatprep.subr.mxu1 %v6296_v9  ;;  %v6816_v9 = vld [vmem:[%s11476_s2 + $0x208] sm:$0xff]  ;;  %v6926_v19 = vld [vmem:[%s11476_s2 + $0x118] sm:$0xff] }
 0x18f   :  { %1352 = vmatprep.mubr.f32.mxu0 %v6748_v34  ;;  %1439 = vmatpush1.msra.mxu0 %v6767_v17  ;;  %12221 = vst [vmem:[#allocation76_spill] sm:$0xff] %v6926_v19 }
 0x190   :  { %1429 = vmatprep.mubr.f32.mxu1 %v6748_v34  ;;  %1440 = vmatprep.subr.mxu0 %v6774_v58 }
 0x191   :  { %1353 = vmatmul.mubr.f32.gmra.mxu0 %v6744_v27  ;;  %1430 = vmatmul.mubr.f32.gmra.mxu1 %v6744_v27 }
 0x192   :  { %1441 = vmatpush1.msra.mxu0 %v6782_v61  ;;  %1500 = vmatprep.mubr.f32.mxu0 %v6740_v7 }
 0x193   :  { %1442 = vmatprep.subr.mxu0 %v6788_v12  ;;  %1619 = vmatpush1.msra.mxu1 %v6303_v25  ;;  %v6823_v25 = vld [vmem:[%s11476_s2 + $0x200] sm:$0xff] }
 0x194   :  { %1443 = vmatpush1.msra.mxu0 %v6795_v52  ;;  %1620 = vmatprep.subr.mxu1 %v6310_v23  ;;  %v6830_v23 = vld [vmem:[%s11476_s2 + $0x1d8] sm:$0xff] }
 0x195   :  { %1444 = vmatprep.subr.mxu0 %v6802_v29  ;;  %1621 = vmatpush1.msra.mxu1 %v6317_v26  ;;  %v6836_v26 = vld [vmem:[%s11476_s2 + $0x240] sm:$0xff] }
 0x196   :  { %1445 = vmatpush1.msra.mxu0 %v6809_v57  ;;  %1622 = vmatprep.subr.mxu1 %v6324_v0  ;;  %v6848_v0 = vld [vmem:[%s11476_s2 + $0x218] sm:$0xff] }
 0x197   :  { %1446 = vmatprep.subr.mxu0 %v6816_v9  ;;  %1623 = vmatpush1.msra.mxu1 %v6836_v26 }
 0x198   :  { %1447 = vmatpush1.msra.mxu0 %v6823_v25  ;;  %1624 = vmatprep.subr.mxu1 %v6848_v0 }
 0x199   :  { %1448 = vmatprep.subr.mxu0 %v6830_v23  ;;  %1625 = vmatpush1.msra.mxu1 %v6860_v10 }
 0x19a   :  { %1449 = vmatpush1.msra.mxu0 %v6842_v59  ;;  %1626 = vmatprep.subr.mxu1 %v6872_v56 }
 0x19b   :  { %1450 = vmatprep.subr.mxu0 %v6854_v46  ;;  %1627 = vmatpush1.msra.mxu1 %v6884_v6 }
 0x19c   :  { %1451 = vmatpush1.msra.mxu0 %v6866_v8  ;;  %1628 = vmatprep.subr.mxu1 %v6896_v35 }
 0x19d   :  { %1452 = vmatprep.subr.mxu0 %v6878_v50  ;;  %1629 = vmatpush1.msra.mxu1 %v6908_v40 }
 0x19e   :  { %1453 = vmatpush1.msra.mxu0 %v6890_v1  ;;  %1630 = vmatprep.subr.mxu1 %v6920_v2 }
 0x19f   :  { %1454 = vmatprep.subr.mxu0 %v6902_v18  ;;  %1631 = vmatpush1.msra.mxu1 %v6932_v30 }
 0x1a0   :  { %1455 = vmatpush1.msra.mxu0 %v6914_v13  ;;  %1632 = vmatprep.subr.mxu1 %v6944_v44  ;;  %v390_v13 = vadd.f32 %v6450_v37, %v6696_v31 }
 0x1a1   :  { %1456 = vmatprep.subr.mxu0 %v6926_v19  ;;  %1633 = vmatpush1.msra.mxu1 %v6956_v39 }
 0x1a2   :  { %1457 = vmatpush1.msra.mxu0 %v6938_v51  ;;  %1634 = vmatprep.subr.mxu1 %v6968_v47 }
 0x1a3   :  { %1458 = vmatprep.subr.mxu0 %v6950_v33  ;;  %1635 = vmatpush1.msra.mxu1 %v6980_v5 }
 0x1a4   :  { %1459 = vmatpush1.msra.mxu0 %v6962_v48  ;;  %1636 = vmatprep.subr.mxu1 %v6992_v42 }
 0x1a5   :  { %1460 = vmatprep.subr.mxu0 %v6974_v38  ;;  %1637 = vmatpush1.msra.mxu1 %v7004_v28  ;;  %v7028_v28 = vld [vmem:[%s11476_s2 + $0xc0] sm:$0xff] }
 0x1a6   :  { %1461 = vmatpush1.msra.mxu0 %v6986_v3  ;;  %v7016_v3 = vld [vmem:[%s11476_s2 + $0xc8] sm:$0xff]  ;;  %12237 = vst [vmem:[#allocation92_spill] sm:$0xff] %v7028_v28 }
 0x1a7   :  { %1462 = vmatprep.subr.mxu0 %v6998_v41  ;;  %12235 = vst [vmem:[#allocation90_spill] sm:$0xff] %v7016_v3  ;;  %1638 = vmatprep.subr.mxu1 %v7016_v3  ;;  %v7022_v41 = vld [vmem:[%s11476_s2 + $0x58] sm:$0xff] }
 0x1a8   :  { %1463 = vmatpush1.msra.mxu0 %v7010_v20  ;;  %12236 = vst [vmem:[#allocation91_spill] sm:$0xff] %v7022_v41  ;;  %1639 = vmatpush1.msra.mxu1 %v7028_v28  ;;  %v7034_v20 = vld [vmem:[%s11476_s2 + $0x50] sm:$0xff]  ;;  %v7040_v3 = vld [vmem:[%s11476_s2 + $0x98] sm:$0xff] }
 0x1a9   :  { %1464 = vmatprep.subr.mxu0 %v7022_v41  ;;  %12238 = vst [vmem:[#allocation93_spill] sm:$0xff] %v7034_v20  ;;  %12239 = vst [vmem:[#allocation94_spill] sm:$0xff] %v7040_v3  ;;  %1640 = vmatprep.subr.mxu1 %v7040_v3  ;;  %v7046_v41 = vld [vmem:[%s11476_s2 + $0x28] sm:$0xff]  ;;  %v7052_v28 = vld [vmem:[%s11476_s2 + $0x90] sm:$0xff] }
 0x1aa   :  { %1465 = vmatpush1.msra.mxu0 %v7034_v20  ;;  %12240 = vst [vmem:[#allocation95_spill] sm:$0xff] %v7046_v41  ;;  %12241 = vst [vmem:[#allocation96_spill] sm:$0xff] %v7052_v28  ;;  %1641 = vmatpush1.msra.mxu1 %v7052_v28  ;;  %v7058_v20 = vld [vmem:[%s11476_s2 + $0x20] sm:$0xff]  ;;  %v7064_v3 = vld [vmem:[%s11476_s2 + $0x68] sm:$0xff] }
 0x1ab   :  { %1466 = vmatprep.subr.mxu0 %v7046_v41  ;;  %12242 = vst [vmem:[#allocation97_spill] sm:$0xff] %v7058_v20  ;;  %12243 = vst [vmem:[#allocation98_spill] sm:$0xff] %v7064_v3  ;;  %1642 = vmatprep.subr.mxu1 %v7064_v3  ;;  %v7070_v41 = vld [vmem:[%s11476_s2 + $0x5f8] sm:$0xff]  ;;  %v7076_v28 = vld [vmem:[%s11476_s2 + $0x60] sm:$0xff] }
 0x1ac   :  { %1467 = vmatpush1.msra.mxu0 %v7058_v20  ;;  %12244 = vst [vmem:[#allocation99_spill] sm:$0xff] %v7070_v41  ;;  %12245 = vst [vmem:[#allocation100_spill] sm:$0xff] %v7076_v28  ;;  %1643 = vmatpush1.msra.mxu1 %v7076_v28  ;;  %v7082_v20 = vld [vmem:[%s11476_s2 + $0x5f0] sm:$0xff]  ;;  %v7088_v3 = vld [vmem:[%s11476_s2 + $0x38] sm:$0xff] }
 0x1ad   :  { %1468 = vmatprep.subr.mxu0 %v7070_v41  ;;  %12246 = vst [vmem:[#allocation101_spill] sm:$0xff] %v7082_v20  ;;  %12247 = vst [vmem:[#allocation102_spill] sm:$0xff] %v7088_v3  ;;  %1644 = vmatprep.subr.mxu1 %v7088_v3  ;;  %v7094_v41 = vld [vmem:[%s11476_s2 + $0x5c8] sm:$0xff]  ;;  %v7100_v28 = vld [vmem:[%s11476_s2 + $0x30] sm:$0xff] }
 0x1ae   :  { %1469 = vmatpush2.msra.mxu0 %v7082_v20  ;;  %12248 = vst [vmem:[#allocation103_spill] sm:$0xff] %v7094_v41  ;;  %12249 = vst [vmem:[#allocation104_spill] sm:$0xff] %v7100_v28  ;;  %1645 = vmatpush1.msra.mxu1 %v7100_v28  ;;  %v7106_v20 = vld [vmem:[%s11476_s2 + $0x5c0] sm:$0xff]  ;;  %v7112_v3 = vld [vmem:[%s11476_s2 + $0x8] sm:$0xff] }
 0x1af   :  { %1470 = vmatprep.subr.mxu0 %v7094_v41  ;;  %12250 = vst [vmem:[#allocation105_spill] sm:$0xff] %v7106_v20  ;;  %12251 = vst [vmem:[#allocation106_spill] sm:$0xff] %v7112_v3  ;;  %1646 = vmatprep.subr.mxu1 %v7112_v3  ;;  %v7118_v41 = vld [vmem:[%s11476_s2 + $0x598] sm:$0xff]  ;;  %v7124_v28 = vld [vmem:[%s11476_s2] sm:$0xff] }
 0x1b0   :  { %1471 = vmatpush2.msra.mxu0 %v7106_v20  ;;  %12252 = vst [vmem:[#allocation107_spill] sm:$0xff] %v7118_v41  ;;  %12253 = vst [vmem:[#allocation108_spill] sm:$0xff] %v7124_v28  ;;  %1647 = vmatpush1.msra.mxu1 %v7124_v28  ;;  %v7130_v20 = vld [vmem:[%s11476_s2 + $0x590] sm:$0xff]  ;;  %v7136_v3 = vld [vmem:[%s11476_s2 + $0x5d8] sm:$0xff] }
 0x1b1   :  { %1472 = vmatprep.subr.mxu0 %v7118_v41  ;;  %12254 = vst [vmem:[#allocation109_spill] sm:$0xff] %v7130_v20  ;;  %12255 = vst [vmem:[#allocation110_spill] sm:$0xff] %v7136_v3  ;;  %1648 = vmatprep.subr.mxu1 %v7136_v3  ;;  %v7142_v41 = vld [vmem:[%s11476_s2 + $0x568] sm:$0xff]  ;;  %v7148_v28 = vld [vmem:[%s11476_s2 + $0x5d0] sm:$0xff] }
 0x1b2   :  { %1473 = vmatpush2.msra.mxu0 %v7130_v20  ;;  %12256 = vst [vmem:[#allocation111_spill] sm:$0xff] %v7142_v41  ;;  %12257 = vst [vmem:[#allocation112_spill] sm:$0xff] %v7148_v28  ;;  %1649 = vmatpush2.msra.mxu1 %v7148_v28  ;;  %v7154_v20 = vld [vmem:[%s11476_s2 + $0x560] sm:$0xff]  ;;  %v7160_v3 = vld [vmem:[%s11476_s2 + $0x5a8] sm:$0xff] }
 0x1b3   :  { %1474 = vmatprep.subr.mxu0 %v7142_v41  ;;  %12258 = vst [vmem:[#allocation113_spill] sm:$0xff] %v7154_v20  ;;  %12259 = vst [vmem:[#allocation114_spill] sm:$0xff] %v7160_v3  ;;  %1650 = vmatprep.subr.mxu1 %v7160_v3  ;;  %v7166_v41 = vld [vmem:[%s11476_s2 + $0x538] sm:$0xff]  ;;  %v7172_v28 = vld [vmem:[%s11476_s2 + $0x5a0] sm:$0xff] }
 0x1b4   :  { %1475 = vmatpush2.msra.mxu0 %v7154_v20  ;;  %12260 = vst [vmem:[#allocation115_spill] sm:$0xff] %v7166_v41  ;;  %12261 = vst [vmem:[#allocation116_spill] sm:$0xff] %v7172_v28  ;;  %1651 = vmatpush2.msra.mxu1 %v7172_v28  ;;  %v7178_v20 = vld [vmem:[%s11476_s2 + $0x530] sm:$0xff]  ;;  %v7184_v3 = vld [vmem:[%s11476_s2 + $0x578] sm:$0xff] }
 0x1b5   :  { %1476 = vmatprep.subr.mxu0 %v7166_v41  ;;  %12262 = vst [vmem:[#allocation117_spill] sm:$0xff] %v7178_v20  ;;  %12263 = vst [vmem:[#allocation118_spill] sm:$0xff] %v7184_v3  ;;  %1652 = vmatprep.subr.mxu1 %v7184_v3  ;;  %v7190_v41 = vld [vmem:[%s11476_s2 + $0x508] sm:$0xff]  ;;  %v7196_v28 = vld [vmem:[%s11476_s2 + $0x570] sm:$0xff] }
 0x1b6   :  { %1477 = vmatpush2.msra.mxu0 %v7178_v20  ;;  %12264 = vst [vmem:[#allocation119_spill] sm:$0xff] %v7190_v41  ;;  %12265 = vst [vmem:[#allocation120_spill] sm:$0xff] %v7196_v28  ;;  %1653 = vmatpush2.msra.mxu1 %v7196_v28  ;;  %v7202_v20 = vld [vmem:[%s11476_s2 + $0x500] sm:$0xff]  ;;  %v7208_v3 = vld [vmem:[%s11476_s2 + $0x548] sm:$0xff] }
 0x1b7   :  { %1478 = vmatprep.subr.mxu0 %v7190_v41  ;;  %12266 = vst [vmem:[#allocation121_spill] sm:$0xff] %v7202_v20  ;;  %12267 = vst [vmem:[#allocation122_spill] sm:$0xff] %v7208_v3  ;;  %1654 = vmatprep.subr.mxu1 %v7208_v3  ;;  %v7214_v41 = vld [vmem:[%s11476_s2 + $0x4d8] sm:$0xff]  ;;  %v7220_v28 = vld [vmem:[%s11476_s2 + $0x540] sm:$0xff] }
 0x1b8   :  { %1479 = vmatpush2.msra.mxu0 %v7202_v20  ;;  %12268 = vst [vmem:[#allocation123_spill] sm:$0xff] %v7214_v41  ;;  %12269 = vst [vmem:[#allocation124_spill] sm:$0xff] %v7220_v28  ;;  %1655 = vmatpush2.msra.mxu1 %v7220_v28  ;;  %v7226_v20 = vld [vmem:[%s11476_s2 + $0x4d0] sm:$0xff]  ;;  %v7232_v3 = vld [vmem:[%s11476_s2 + $0x518] sm:$0xff] }
 0x1b9   :  { %1480 = vmatprep.subr.mxu0 %v7214_v41  ;;  %12270 = vst [vmem:[#allocation125_spill] sm:$0xff] %v7226_v20  ;;  %12271 = vst [vmem:[#allocation126_spill] sm:$0xff] %v7232_v3  ;;  %1656 = vmatprep.subr.mxu1 %v7232_v3  ;;  %v7238_v41 = vld [vmem:[%s11476_s2 + $0x4a8] sm:$0xff]  ;;  %v7244_v28 = vld [vmem:[%s11476_s2 + $0x510] sm:$0xff] }
 0x1ba   :  { %1481 = vmatpush2.msra.mxu0 %v7226_v20  ;;  %12272 = vst [vmem:[#allocation127_spill] sm:$0xff] %v7238_v41  ;;  %12273 = vst [vmem:[#allocation128_spill] sm:$0xff] %v7244_v28  ;;  %1657 = vmatpush2.msra.mxu1 %v7244_v28  ;;  %v7250_v20 = vld [vmem:[%s11476_s2 + $0x4a0] sm:$0xff]  ;;  %v7256_v3 = vld [vmem:[%s11476_s2 + $0x4e8] sm:$0xff] }
 0x1bb   :  { %1482 = vmatprep.subr.mxu0 %v7238_v41  ;;  %12274 = vst [vmem:[#allocation129_spill] sm:$0xff] %v7250_v20  ;;  %12275 = vst [vmem:[#allocation130_spill] sm:$0xff] %v7256_v3  ;;  %1658 = vmatprep.subr.mxu1 %v7256_v3  ;;  %v7262_v41 = vld [vmem:[%s11476_s2 + $0x478] sm:$0xff]  ;;  %v7268_v28 = vld [vmem:[%s11476_s2 + $0x4e0] sm:$0xff] }
 0x1bc   :  { %1483 = vmatpush2.msra.mxu0 %v7250_v20  ;;  %12276 = vst [vmem:[#allocation131_spill] sm:$0xff] %v7262_v41  ;;  %12277 = vst [vmem:[#allocation132_spill] sm:$0xff] %v7268_v28  ;;  %1659 = vmatpush2.msra.mxu1 %v7268_v28  ;;  %v7274_v20 = vld [vmem:[%s11476_s2 + $0x470] sm:$0xff]  ;;  %v7280_v3 = vld [vmem:[%s11476_s2 + $0x4b8] sm:$0xff] }
 0x1bd   :  { %1484 = vmatprep.subr.mxu0 %v7262_v41  ;;  %12278 = vst [vmem:[#allocation133_spill] sm:$0xff] %v7274_v20  ;;  %12279 = vst [vmem:[#allocation134_spill] sm:$0xff] %v7280_v3  ;;  %1660 = vmatprep.subr.mxu1 %v7280_v3  ;;  %v7286_v41 = vld [vmem:[%s11476_s2 + $0x448] sm:$0xff]  ;;  %v7292_v28 = vld [vmem:[%s11476_s2 + $0x4b0] sm:$0xff] }
 0x1be   :  { %1485 = vmatpush2.msra.mxu0 %v7274_v20  ;;  %12280 = vst [vmem:[#allocation135_spill] sm:$0xff] %v7286_v41  ;;  %12281 = vst [vmem:[#allocation136_spill] sm:$0xff] %v7292_v28  ;;  %1661 = vmatpush2.msra.mxu1 %v7292_v28  ;;  %v7298_v20 = vld [vmem:[%s11476_s2 + $0x440] sm:$0xff]  ;;  %v7304_v3 = vld [vmem:[%s11476_s2 + $0x488] sm:$0xff] }
 0x1bf   :  { %1486 = vmatprep.subr.mxu0 %v7286_v41  ;;  %12282 = vst [vmem:[#allocation137_spill] sm:$0xff] %v7298_v20  ;;  %12283 = vst [vmem:[#allocation138_spill] sm:$0xff] %v7304_v3  ;;  %1662 = vmatprep.subr.mxu1 %v7304_v3  ;;  %v7310_v41 = vld [vmem:[%s11476_s2 + $0x418] sm:$0xff]  ;;  %v7316_v28 = vld [vmem:[%s11476_s2 + $0x480] sm:$0xff] }
 0x1c0   :  { %1487 = vmatpush2.msra.mxu0 %v7298_v20  ;;  %12284 = vst [vmem:[#allocation139_spill] sm:$0xff] %v7310_v41  ;;  %12285 = vst [vmem:[#allocation140_spill] sm:$0xff] %v7316_v28  ;;  %1663 = vmatpush2.msra.mxu1 %v7316_v28  ;;  %v7322_v20 = vld [vmem:[%s11476_s2 + $0x410] sm:$0xff]  ;;  %v7328_v3 = vld [vmem:[%s11476_s2 + $0x458] sm:$0xff] }
 0x1c1   :  { %1488 = vmatprep.subr.mxu0 %v7310_v41  ;;  %12286 = vst [vmem:[#allocation141_spill] sm:$0xff] %v7322_v20  ;;  %12287 = vst [vmem:[#allocation142_spill] sm:$0xff] %v7328_v3  ;;  %1664 = vmatprep.subr.mxu1 %v7328_v3  ;;  %v7334_v41 = vld [vmem:[%s11476_s2 + $0x3e8] sm:$0xff]  ;;  %v7340_v28 = vld [vmem:[%s11476_s2 + $0x450] sm:$0xff] }
 0x1c2   :  { %1489 = vmatpush2.msra.mxu0 %v7322_v20  ;;  %12288 = vst [vmem:[#allocation143_spill] sm:$0xff] %v7334_v41  ;;  %12289 = vst [vmem:[#allocation144_spill] sm:$0xff] %v7340_v28  ;;  %1665 = vmatpush2.msra.mxu1 %v7340_v28  ;;  %v7346_v20 = vld [vmem:[%s11476_s2 + $0x3e0] sm:$0xff]  ;;  %v7352_v3 = vld [vmem:[%s11476_s2 + $0x428] sm:$0xff] }
 0x1c3   :  { %1490 = vmatprep.subr.mxu0 %v7334_v41  ;;  %12290 = vst [vmem:[#allocation145_spill] sm:$0xff] %v7346_v20  ;;  %12291 = vst [vmem:[#allocation146_spill] sm:$0xff] %v7352_v3  ;;  %1666 = vmatprep.subr.mxu1 %v7352_v3  ;;  %v7358_v41 = vld [vmem:[%s11476_s2 + $0x3b8] sm:$0xff]  ;;  %v7364_v28 = vld [vmem:[%s11476_s2 + $0x420] sm:$0xff] }
 0x1c4   :  { %1491 = vmatpush2.msra.mxu0 %v7346_v20  ;;  %12292 = vst [vmem:[#allocation147_spill] sm:$0xff] %v7358_v41  ;;  %12293 = vst [vmem:[#allocation148_spill] sm:$0xff] %v7364_v28  ;;  %1667 = vmatpush2.msra.mxu1 %v7364_v28  ;;  %v7370_v20 = vld [vmem:[%s11476_s2 + $0x3b0] sm:$0xff]  ;;  %v7376_v3 = vld [vmem:[%s11476_s2 + $0x3f8] sm:$0xff] }
 0x1c5   :  { %1492 = vmatprep.subr.mxu0 %v7358_v41  ;;  %12294 = vst [vmem:[#allocation149_spill] sm:$0xff] %v7370_v20  ;;  %12295 = vst [vmem:[#allocation150_spill] sm:$0xff] %v7376_v3  ;;  %1668 = vmatprep.subr.mxu1 %v7376_v3  ;;  %v7382_v41 = vld [vmem:[%s11476_s2 + $0x388] sm:$0xff]  ;;  %v7388_v28 = vld [vmem:[%s11476_s2 + $0x3f0] sm:$0xff] }
 0x1c6   :  { %1493 = vmatpush2.msra.mxu0 %v7370_v20  ;;  %12296 = vst [vmem:[#allocation151_spill] sm:$0xff] %v7382_v41  ;;  %12297 = vst [vmem:[#allocation152_spill] sm:$0xff] %v7388_v28  ;;  %1669 = vmatpush2.msra.mxu1 %v7388_v28  ;;  %v7394_v20 = vld [vmem:[%s11476_s2 + $0x380] sm:$0xff]  ;;  %v7400_v3 = vld [vmem:[%s11476_s2 + $0x3c8] sm:$0xff] }
 0x1c7   :  { %1494 = vmatprep.subr.mxu0 %v7382_v41  ;;  %12298 = vst [vmem:[#allocation153_spill] sm:$0xff] %v7394_v20  ;;  %12299 = vst [vmem:[#allocation154_spill] sm:$0xff] %v7400_v3  ;;  %1670 = vmatprep.subr.mxu1 %v7400_v3  ;;  %v7406_v41 = vld [vmem:[%s11476_s2 + $0x358] sm:$0xff]  ;;  %v7412_v28 = vld [vmem:[%s11476_s2 + $0x3c0] sm:$0xff] }
 0x1c8   :  { %1495 = vmatpush2.msra.mxu0 %v7394_v20  ;;  %12300 = vst [vmem:[#allocation155_spill] sm:$0xff] %v7406_v41  ;;  %12301 = vst [vmem:[#allocation156_spill] sm:$0xff] %v7412_v28  ;;  %1671 = vmatpush2.msra.mxu1 %v7412_v28  ;;  %v7418_v20 = vld [vmem:[%s11476_s2 + $0x350] sm:$0xff]  ;;  %v7424_v3 = vld [vmem:[%s11476_s2 + $0x398] sm:$0xff] }
 0x1c9   :  { %1496 = vmatprep.subr.mxu0 %v7406_v41  ;;  %12302 = vst [vmem:[#allocation157_spill] sm:$0xff] %v7418_v20  ;;  %12303 = vst [vmem:[#allocation158_spill] sm:$0xff] %v7424_v3  ;;  %1672 = vmatprep.subr.mxu1 %v7424_v3  ;;  %v7430_v41 = vld [vmem:[%s11476_s2 + $0x328] sm:$0xff]  ;;  %v7436_v28 = vld [vmem:[%s11476_s2 + $0x390] sm:$0xff] }
 0x1ca   :  { %1497 = vmatpush2.msra.mxu0 %v7418_v20  ;;  %12304 = vst [vmem:[#allocation159_spill] sm:$0xff] %v7430_v41  ;;  %12305 = vst [vmem:[#allocation160_spill] sm:$0xff] %v7436_v28  ;;  %1673 = vmatpush2.msra.mxu1 %v7436_v28  ;;  %v7442_v20 = vld [vmem:[%s11476_s2 + $0x320] sm:$0xff]  ;;  %v7448_v3 = vld [vmem:[%s11476_s2 + $0x368] sm:$0xff] }
 0x1cb   :  { %1498 = vmatprep.subr.mxu0 %v7430_v41  ;;  %12306 = vst [vmem:[#allocation161_spill] sm:$0xff] %v7442_v20  ;;  %12307 = vst [vmem:[#allocation162_spill] sm:$0xff] %v7448_v3  ;;  %1674 = vmatprep.subr.mxu1 %v7448_v3  ;;  %v7455_v41 = vld [vmem:[%s11476_s2 + $0x2e8] sm:$0xff]  ;;  %v7468_v3 = vld [vmem:[%s11476_s2 + $0x2b8] sm:$0xff] }
 0x1cc   :  { %1499 = vmatpush2.msra.mxu0 %v7442_v20  ;;  %12308 = vst [vmem:[#allocation163_spill] sm:$0xff] %v7455_v41  ;;  %v7462_v20 = vld [vmem:[%s11476_s2 + $0x2e0] sm:$0xff]  ;;  %12310 = vst [vmem:[#allocation165_spill] sm:$0xff] %v7468_v3  ;;  %v7480_v28 = vld [vmem:[%s11476_s2 + $0x2b0] sm:$0xff] }
 0x1cd   :  { %1501 = vmatmul.mubr.f32.vlgmr.msra.gmra.mxu0 %v6738_v62  ;;  %1693 = vmatprep.subr.mxu0 %v7455_v41  ;;  %12309 = vst [vmem:[#allocation164_spill] sm:$0xff] %v7462_v20  ;;  %v7474_v41 = vld [vmem:[%s11476_s2 + $0x360] sm:$0xff]  ;;  %12312 = vst [vmem:[#allocation167_spill] sm:$0xff] %v7480_v28 }
 0x1ce   :  { %1506 = vmatprep.mubr.f32.mxu0 %v6748_v34  ;;  %1694 = vmatpush1.msra.mxu0 %v7462_v20  ;;  %12311 = vst [vmem:[#allocation166_spill] sm:$0xff] %v7474_v41  ;;  %v7486_v20 = vld [vmem:[%s11476_s2 + $0x338] sm:$0xff] }
 0x1cf   :  { %1695 = vmatprep.subr.mxu0 %v7468_v3  ;;  %1675 = vmatpush2.msra.mxu1 %v7474_v41  ;;  %12313 = vst [vmem:[#allocation168_spill] sm:$0xff] %v7486_v20  ;;  %v7493_v3 = vld [vmem:[%s11476_s2 + $0x288] sm:$0xff]  ;;  %v7511_v41 = vld [vmem:[%s11476_s2 + $0x258] sm:$0xff] }
 0x1d0   :  { %1696 = vmatpush1.msra.mxu0 %v7480_v28  ;;  %1676 = vmatprep.subr.mxu1 %v7486_v20  ;;  %12314 = vst [vmem:[#allocation169_spill] sm:$0xff] %v7493_v3  ;;  %v7499_v28 = vld [vmem:[%s11476_s2 + $0x280] sm:$0xff]  ;;  %v7505_v20 = vld [vmem:[%s11476_s2 + $0x330] sm:$0xff]  ;;  %12317 = vst [vmem:[#allocation172_spill] sm:$0xff] %v7511_v41 }
 0x1d1   :  { %1507 = vmatmul.mubr.f32.gmra.mxu0 %v6744_v27  ;;  %1697 = vmatprep.subr.mxu0 %v7493_v3  ;;  %12315 = vst [vmem:[#allocation170_spill] sm:$0xff] %v7499_v28  ;;  %12316 = vst [vmem:[#allocation171_spill] sm:$0xff] %v7505_v20  ;;  %v7517_v3 = vld [vmem:[%s11476_s2 + $0x308] sm:$0xff] }
 0x1d2   :  { %1698 = vmatpush1.msra.mxu0 %v7499_v28  ;;  %1677 = vmatpush2.msra.mxu1 %v7505_v20  ;;  %12318 = vst [vmem:[#allocation173_spill] sm:$0xff] %v7517_v3  ;;  %v7523_v28 = vld [vmem:[%s11476_s2 + $0x250] sm:$0xff]  ;;  %v7529_v20 = vld [vmem:[%s11476_s2 + $0x300] sm:$0xff] }
 0x1d3   :  { %1699 = vmatprep.subr.mxu0 %v7511_v41  ;;  %1678 = vmatprep.subr.mxu1 %v7517_v3  ;;  %12319 = vst [vmem:[#allocation174_spill] sm:$0xff] %v7523_v28  ;;  %12320 = vst [vmem:[#allocation175_spill] sm:$0xff] %v7529_v20  ;;  %v7535_v41 = vld [vmem:[%s11476_s2 + $0x228] sm:$0xff]  ;;  %v7541_v3 = vld [vmem:[%s11476_s2 + $0x2f8] sm:$0xff] }
 0x1d4   :  { %1700 = vmatpush1.msra.mxu0 %v7523_v28  ;;  %1679 = vmatpush2.msra.mxu1 %v7529_v20  ;;  %12321 = vst [vmem:[#allocation176_spill] sm:$0xff] %v7535_v41  ;;  %12322 = vst [vmem:[#allocation177_spill] sm:$0xff] %v7541_v3  ;;  %v7547_v28 = vld [vmem:[%s11476_s2 + $0x220] sm:$0xff]  ;;  %v7553_v20 = vld [vmem:[%s11476_s2 + $0x1f8] sm:$0xff] }
 0x1d5   :  { %1701 = vmatprep.subr.mxu0 %v7535_v41  ;;  %1770 = vmatprep.subr.mxu1 %v7541_v3  ;;  %12323 = vst [vmem:[#allocation178_spill] sm:$0xff] %v7547_v28  ;;  %12324 = vst [vmem:[#allocation179_spill] sm:$0xff] %v7553_v20  ;;  %v7559_v41 = vld [vmem:[%s11476_s2 + $0x1f0] sm:$0xff]  ;;  %v7565_v3 = vld [vmem:[%s11476_s2 + $0x1c8] sm:$0xff] }
 0x1d6   :  { %1702 = vmatpush1.msra.mxu0 %v7547_v28  ;;  %12325 = vst [vmem:[#allocation180_spill] sm:$0xff] %v7559_v41  ;;  %12326 = vst [vmem:[#allocation181_spill] sm:$0xff] %v7565_v3  ;;  %v7571_v28 = vld [vmem:[%s11476_s2 + $0x1c0] sm:$0xff] }
 0x1d7   :  { %1703 = vmatprep.subr.mxu0 %v7553_v20  ;;  %12327 = vst [vmem:[#allocation182_spill] sm:$0xff] %v7571_v28  ;;  %v7577_v20 = vld [vmem:[%s11476_s2 + $0x198] sm:$0xff] }
 0x1d8   :  { %1704 = vmatpush1.msra.mxu0 %v7559_v41  ;;  %12328 = vst [vmem:[#allocation183_spill] sm:$0xff] %v7577_v20  ;;  %v7583_v41 = vld [vmem:[%s11476_s2 + $0x190] sm:$0xff] }
 0x1d9   :  { %1705 = vmatprep.subr.mxu0 %v7565_v3  ;;  %12329 = vst [vmem:[#allocation184_spill] sm:$0xff] %v7583_v41  ;;  %v7589_v3 = vld [vmem:[%s11476_s2 + $0x168] sm:$0xff] }
 0x1da   :  { %1706 = vmatpush1.msra.mxu0 %v7571_v28  ;;  %12330 = vst [vmem:[#allocation185_spill] sm:$0xff] %v7589_v3  ;;  %v7595_v28 = vld [vmem:[%s11476_s2 + $0x160] sm:$0xff] }
 0x1db   :  { %1707 = vmatprep.subr.mxu0 %v7577_v20  ;;  %12331 = vst [vmem:[#allocation186_spill] sm:$0xff] %v7595_v28  ;;  %v7601_v20 = vld [vmem:[%s11476_s2 + $0x138] sm:$0xff] }
 0x1dc   :  { %1708 = vmatpush1.msra.mxu0 %v7583_v41  ;;  %12332 = vst [vmem:[#allocation187_spill] sm:$0xff] %v7601_v20  ;;  %v7607_v41 = vld [vmem:[%s11476_s2 + $0x130] sm:$0xff] }
 0x1dd   :  { %1709 = vmatprep.subr.mxu0 %v7589_v3  ;;  %12333 = vst [vmem:[#allocation188_spill] sm:$0xff] %v7607_v41  ;;  %v7613_v3 = vld [vmem:[%s11476_s2 + $0x108] sm:$0xff] }
 0x1de   :  { %1710 = vmatpush1.msra.mxu0 %v7595_v28  ;;  %12334 = vst [vmem:[#allocation189_spill] sm:$0xff] %v7613_v3  ;;  %v7619_v28 = vld [vmem:[%s11476_s2 + $0x100] sm:$0xff] }
 0x1df   :  { %1711 = vmatprep.subr.mxu0 %v7601_v20  ;;  %12335 = vst [vmem:[#allocation190_spill] sm:$0xff] %v7619_v28  ;;  %v7625_v20 = vld [vmem:[%s11476_s2 + $0xd8] sm:$0xff] }
 0x1e0   :  { %1712 = vmatpush1.msra.mxu0 %v7607_v41  ;;  %12336 = vst [vmem:[#allocation191_spill] sm:$0xff] %v7625_v20  ;;  %v7631_v41 = vld [vmem:[%s11476_s2 + $0xd0] sm:$0xff] }
 0x1e1   :  { %1713 = vmatprep.subr.mxu0 %v7613_v3  ;;  %12337 = vst [vmem:[#allocation192_spill] sm:$0xff] %v7631_v41  ;;  %v7637_v3 = vld [vmem:[%s11476_s2 + $0xa8] sm:$0xff] }
 0x1e2   :  { %1714 = vmatpush1.msra.mxu0 %v7619_v28  ;;  %12338 = vst [vmem:[#allocation193_spill] sm:$0xff] %v7637_v3  ;;  %v7643_v28 = vld [vmem:[%s11476_s2 + $0xa0] sm:$0xff] }
 0x1e3   :  { %1715 = vmatprep.subr.mxu0 %v7625_v20  ;;  %12339 = vst [vmem:[#allocation194_spill] sm:$0xff] %v7643_v28  ;;  %v7649_v20 = vld [vmem:[%s11476_s2 + $0x78] sm:$0xff] }
 0x1e4   :  { %1716 = vmatpush1.msra.mxu0 %v7631_v41  ;;  %12340 = vst [vmem:[#allocation195_spill] sm:$0xff] %v7649_v20  ;;  %v7655_v41 = vld [vmem:[%s11476_s2 + $0x70] sm:$0xff] }
 0x1e5   :  { %1717 = vmatprep.subr.mxu0 %v7637_v3  ;;  %12341 = vst [vmem:[#allocation196_spill] sm:$0xff] %v7655_v41  ;;  %v7661_v3 = vld [vmem:[%s11476_s2 + $0x48] sm:$0xff] }
 0x1e6   :  { %1718 = vmatpush1.msra.mxu0 %v7643_v28  ;;  %12342 = vst [vmem:[#allocation197_spill] sm:$0xff] %v7661_v3  ;;  %v7667_v28 = vld [vmem:[%s11476_s2 + $0x40] sm:$0xff] }
 0x1e7   :  { %1719 = vmatprep.subr.mxu0 %v7649_v20  ;;  %12343 = vst [vmem:[#allocation198_spill] sm:$0xff] %v7667_v28  ;;  %v7673_v20 = vld [vmem:[%s11476_s2 + $0x18] sm:$0xff] }
 0x1e8   :  { %1720 = vmatpush1.msra.mxu0 %v7655_v41  ;;  %12344 = vst [vmem:[#allocation199_spill] sm:$0xff] %v7673_v20  ;;  %v7679_v41 = vld [vmem:[%s11476_s2 + $0x10] sm:$0xff] }
 0x1e9   :  { %1721 = vmatprep.subr.mxu0 %v7661_v3  ;;  %12345 = vst [vmem:[#allocation200_spill] sm:$0xff] %v7679_v41  ;;  %v7685_v3 = vld [vmem:[%s11476_s2 + $0x5e8] sm:$0xff] }
 0x1ea   :  { %1722 = vmatpush1.msra.mxu0 %v7667_v28  ;;  %12346 = vst [vmem:[#allocation201_spill] sm:$0xff] %v7685_v3  ;;  %v7691_v28 = vld [vmem:[%s11476_s2 + $0x5e0] sm:$0xff] }
 0x1eb   :  { %1723 = vmatprep.subr.mxu0 %v7673_v20  ;;  %12347 = vst [vmem:[#allocation202_spill] sm:$0xff] %v7691_v28  ;;  %v7697_v20 = vld [vmem:[%s11476_s2 + $0x5b8] sm:$0xff] }
 0x1ec   :  { %1724 = vmatpush1.msra.mxu0 %v7679_v41  ;;  %12348 = vst [vmem:[#allocation203_spill] sm:$0xff] %v7697_v20  ;;  %v7703_v41 = vld [vmem:[%s11476_s2 + $0x5b0] sm:$0xff] }
 0x1ed   :  { %1725 = vmatprep.subr.mxu0 %v7685_v3  ;;  %12349 = vst [vmem:[#allocation204_spill] sm:$0xff] %v7703_v41  ;;  %v7709_v3 = vld [vmem:[%s11476_s2 + $0x588] sm:$0xff] }
 0x1ee   :  { %1726 = vmatpush2.msra.mxu0 %v7691_v28  ;;  %12350 = vst [vmem:[#allocation205_spill] sm:$0xff] %v7709_v3  ;;  %v7715_v28 = vld [vmem:[%s11476_s2 + $0x580] sm:$0xff] }
 0x1ef   :  { %1727 = vmatprep.subr.mxu0 %v7697_v20  ;;  %12351 = vst [vmem:[#allocation206_spill] sm:$0xff] %v7715_v28  ;;  %v7721_v20 = vld [vmem:[%s11476_s2 + $0x558] sm:$0xff] }
 0x1f0   :  { %1728 = vmatpush2.msra.mxu0 %v7703_v41  ;;  %12352 = vst [vmem:[#allocation207_spill] sm:$0xff] %v7721_v20  ;;  %v7727_v41 = vld [vmem:[%s11476_s2 + $0x550] sm:$0xff] }
 0x1f1   :  { %1729 = vmatprep.subr.mxu0 %v7709_v3  ;;  %12353 = vst [vmem:[#allocation208_spill] sm:$0xff] %v7727_v41  ;;  %v7733_v3 = vld [vmem:[%s11476_s2 + $0x528] sm:$0xff] }
 0x1f2   :  { %1730 = vmatpush2.msra.mxu0 %v7715_v28  ;;  %12354 = vst [vmem:[#allocation209_spill] sm:$0xff] %v7733_v3  ;;  %v7739_v28 = vld [vmem:[%s11476_s2 + $0x520] sm:$0xff] }
 0x1f3   :  { %1731 = vmatprep.subr.mxu0 %v7721_v20  ;;  %12355 = vst [vmem:[#allocation210_spill] sm:$0xff] %v7739_v28  ;;  %v7745_v20 = vld [vmem:[%s11476_s2 + $0x4f8] sm:$0xff] }
 0x1f4   :  { %1732 = vmatpush2.msra.mxu0 %v7727_v41  ;;  %12356 = vst [vmem:[#allocation211_spill] sm:$0xff] %v7745_v20  ;;  %v7751_v41 = vld [vmem:[%s11476_s2 + $0x4f0] sm:$0xff] }
 0x1f5   :  { %1733 = vmatprep.subr.mxu0 %v7733_v3  ;;  %12357 = vst [vmem:[#allocation212_spill] sm:$0xff] %v7751_v41  ;;  %v7757_v3 = vld [vmem:[%s11476_s2 + $0x4c8] sm:$0xff] }
 0x1f6   :  { %1734 = vmatpush2.msra.mxu0 %v7739_v28  ;;  %12358 = vst [vmem:[#allocation213_spill] sm:$0xff] %v7757_v3  ;;  %v7763_v28 = vld [vmem:[%s11476_s2 + $0x4c0] sm:$0xff] }
 0x1f7   :  { %1735 = vmatprep.subr.mxu0 %v7745_v20  ;;  %12359 = vst [vmem:[#allocation214_spill] sm:$0xff] %v7763_v28  ;;  %v7769_v20 = vld [vmem:[%s11476_s2 + $0x498] sm:$0xff] }
 0x1f8   :  { %1736 = vmatpush2.msra.mxu0 %v7751_v41  ;;  %12360 = vst [vmem:[#allocation215_spill] sm:$0xff] %v7769_v20  ;;  %v7775_v41 = vld [vmem:[%s11476_s2 + $0x490] sm:$0xff] }
 0x1f9   :  { %1737 = vmatprep.subr.mxu0 %v7757_v3  ;;  %12361 = vst [vmem:[#allocation216_spill] sm:$0xff] %v7775_v41  ;;  %v7781_v3 = vld [vmem:[%s11476_s2 + $0x468] sm:$0xff] }
 0x1fa   :  { %1738 = vmatpush2.msra.mxu0 %v7763_v28  ;;  %12362 = vst [vmem:[#allocation217_spill] sm:$0xff] %v7781_v3  ;;  %v7787_v28 = vld [vmem:[%s11476_s2 + $0x460] sm:$0xff] }
 0x1fb   :  { %1739 = vmatprep.subr.mxu0 %v7769_v20  ;;  %12363 = vst [vmem:[#allocation218_spill] sm:$0xff] %v7787_v28  ;;  %v7793_v20 = vld [vmem:[%s11476_s2 + $0x438] sm:$0xff] }
 0x1fc   :  { %1740 = vmatpush2.msra.mxu0 %v7775_v41  ;;  %12364 = vst [vmem:[#allocation219_spill] sm:$0xff] %v7793_v20  ;;  %v7799_v41 = vld [vmem:[%s11476_s2 + $0x430] sm:$0xff] }
 0x1fd   :  { %1741 = vmatprep.subr.mxu0 %v7781_v3  ;;  %12365 = vst [vmem:[#allocation220_spill] sm:$0xff] %v7799_v41  ;;  %v7805_v3 = vld [vmem:[%s11476_s2 + $0x408] sm:$0xff] }
 0x1fe   :  { %1742 = vmatpush2.msra.mxu0 %v7787_v28  ;;  %12366 = vst [vmem:[#allocation221_spill] sm:$0xff] %v7805_v3  ;;  %v7811_v28 = vld [vmem:[%s11476_s2 + $0x400] sm:$0xff] }
 0x1ff   :  { %1743 = vmatprep.subr.mxu0 %v7793_v20  ;;  %12367 = vst [vmem:[#allocation222_spill] sm:$0xff] %v7811_v28  ;;  %v7817_v20 = vld [vmem:[%s11476_s2 + $0x3d8] sm:$0xff] }
 0x200   :  { %1744 = vmatpush2.msra.mxu0 %v7799_v41  ;;  %12368 = vst [vmem:[#allocation223_spill] sm:$0xff] %v7817_v20  ;;  %v7823_v41 = vld [vmem:[%s11476_s2 + $0x3d0] sm:$0xff] }
 0x201   :  { %1745 = vmatprep.subr.mxu0 %v7805_v3  ;;  %12369 = vst [vmem:[#allocation224_spill] sm:$0xff] %v7823_v41  ;;  %v7829_v3 = vld [vmem:[%s11476_s2 + $0x3a8] sm:$0xff] }
 0x202   :  { %1746 = vmatpush2.msra.mxu0 %v7811_v28  ;;  %12370 = vst [vmem:[#allocation225_spill] sm:$0xff] %v7829_v3  ;;  %v7835_v28 = vld [vmem:[%s11476_s2 + $0x3a0] sm:$0xff] }
 0x203   :  { %1747 = vmatprep.subr.mxu0 %v7817_v20  ;;  %12371 = vst [vmem:[#allocation226_spill] sm:$0xff] %v7835_v28  ;;  %v7841_v20 = vld [vmem:[%s11476_s2 + $0x378] sm:$0xff] }
 0x204   :  { %1748 = vmatpush2.msra.mxu0 %v7823_v41  ;;  %12372 = vst [vmem:[#allocation227_spill] sm:$0xff] %v7841_v20  ;;  %v7847_v41 = vld [vmem:[%s11476_s2 + $0x370] sm:$0xff] }
 0x205   :  { %1749 = vmatprep.subr.mxu0 %v7829_v3  ;;  %12373 = vst [vmem:[#allocation228_spill] sm:$0xff] %v7847_v41  ;;  %v7853_v3 = vld [vmem:[%s11476_s2 + $0x348] sm:$0xff] }
 0x206   :  { %1750 = vmatpush2.msra.mxu0 %v7835_v28  ;;  %12374 = vst [vmem:[#allocation229_spill] sm:$0xff] %v7853_v3  ;;  %v7859_v28 = vld [vmem:[%s11476_s2 + $0x340] sm:$0xff] }
 0x207   :  { %1751 = vmatprep.subr.mxu0 %v7841_v20  ;;  %12375 = vst [vmem:[#allocation230_spill] sm:$0xff] %v7859_v28  ;;  %v7865_v20 = vld [vmem:[%s11476_s2 + $0x318] sm:$0xff] }
 0x208   :  { %1752 = vmatpush2.msra.mxu0 %v7847_v41  ;;  %12376 = vst [vmem:[#allocation231_spill] sm:$0xff] %v7865_v20  ;;  %v7871_v41 = vld [vmem:[%s11476_s2 + $0x310] sm:$0xff] }
 0x209   :  { %1753 = vmatprep.subr.mxu0 %v7853_v3  ;;  %12377 = vst [vmem:[#allocation232_spill] sm:$0xff] %v7871_v41  ;;  %v7877_v3 = vld [vmem:[%s11476_s2 + $0x2d8] sm:$0xff] }
 0x20a   :  { %1754 = vmatpush2.msra.mxu0 %v7859_v28  ;;  %12378 = vst [vmem:[#allocation233_spill] sm:$0xff] %v7877_v3 }
 0x20b   :  { %1755 = vmatprep.subr.mxu0 %v7865_v20 }
 0x20c   :  { %1756 = vmatpush2.msra.mxu0 %v7871_v41 }
 0x20d   :  { %1950 = vmatprep.subr.mxu0 %v7877_v3 }
 0x24c   :  { %v1348_v28 = vpop.f32.mrf.mxu0  ;;  %v1425_v47 = vpop.f32.mrf.mxu1 }
 0x24d   :  { %v1513_v48 = vadd.f32 %v1348_v28, %v6448_v36  ;;  %v1541_v28 = vadd.f32 %v1425_v47, %v390_v13 }
 0x24e   :  { %v1350_v38 = vpop.f32.mrf.mxu0  ;;  %v1427_v19 = vpop.f32.mrf.mxu1 }
 0x24f   :  { %v1514_v20 = vadd.f32 %v1350_v38, %v6457_v11  ;;  %v3889_v33 = vmul.f32 -1.442695, %v1513_v48  ;;  %v392_v11 = vadd.f32 %v6459_v45, %v6702_v32 }
 0x251   :  { %v1354_v42 = vpop.f32.mrf.mxu0  ;;  %v3890_v41 = vmul.f32 -1.442695, %v1514_v20  ;;  %4057 = vpow2.f32 %v3889_v33  ;;  %v1431_v36 = vpop.f32.mrf.mxu1  ;;  %v1542_v20 = vadd.f32 %v1427_v19, %v392_v11 }
 0x252   :  { %v1515_v51 = vadd.f32 %v1354_v42, %v6466_v53  ;;  %v396_v53 = vadd.f32 %v6468_v54, %v6696_v31 }
 0x253   :  { %v1356_v5 = vpop.f32.mrf.mxu0  ;;  %4059 = vpow2.f32 %v3890_v41  ;;  %v3893_v41 = vmul.f32 -1.442695, %v1541_v28 }
 0x254   :  { %v1516_v39 = vadd.f32 %v1356_v5, %v6475_v14  ;;  %v3891_v44 = vmul.f32 -1.442695, %v1515_v51  ;;  %v1433_v14 = vpop.f32.mrf.mxu1  ;;  %v398_v5 = vadd.f32 %v6477_v15, %v6702_v32  ;;  %v1543_v38 = vadd.f32 %v1431_v36, %v396_v53 }
 0x255   :  { %v3894_v51 = vmul.f32 -1.442695, %v1542_v20 }
 0x256   :  { %v3892_v3 = vmul.f32 -1.442695, %v1516_v39  ;;  %4061 = vpow2.f32 %v3891_v44  ;;  %v1544_v42 = vadd.f32 %v1433_v14, %v398_v5  ;;  %v3895_v39 = vmul.f32 -1.442695, %v1543_v38 }
 0x258   :  { %4063 = vpow2.f32 %v3892_v3  ;;  %v3896_v48 = vmul.f32 -1.442695, %v1544_v42  ;;  %v551_v42 = vadd.f32 %v6617_v43, %v6709_v21 }
 0x259   :  { %4065 = vpow2.f32 %v3893_v41 }
 0x25a   :  { %4067 = vpow2.f32 %v3894_v51 }
 0x25b   :  { %4069 = vpow2.f32 %v3895_v39 }
 0x25c   :  { %4071 = vpow2.f32 %v3896_v48 }
 0x25e   :  { %v4058_v37 = vpop.eup %4057 }
 0x25f   :  { %v1529_v45 = vadd.f32 1.0, %v4058_v37 }
 0x260   :  { %v4060_v44 = vpop.eup %4059 }
 0x261   :  { %v1530_v47 = vadd.f32 1.0, %v4060_v44  ;;  %4073 = vrcp.f32 %v1529_v45  ;;  %v553_v44 = vadd.f32 %v6619_v49, %v6718_v55  ;;  %v559_v49 = vadd.f32 %v6627_v16, %v6718_v55 }
 0x263   :  { %v4062_v3 = vpop.eup %4061  ;;  %4075 = vrcp.f32 %v1530_v47 }
 0x264   :  { %v1531_v33 = vadd.f32 1.0, %v4062_v3 }
 0x265   :  { %v4064_v54 = vpop.eup %4063 }
 0x266   :  { %v1532_v15 = vadd.f32 1.0, %v4064_v54  ;;  %4077 = vrcp.f32 %v1531_v33  ;;  %v4066_v13 = vpop.eup %4065 }
 0x267   :  { %v4068_v19 = vpop.eup %4067  ;;  %v1557_v11 = vadd.f32 1.0, %v4066_v13 }
 0x268   :  { %4079 = vrcp.f32 %v1532_v15  ;;  %v4070_v36 = vpop.eup %4069  ;;  %v1558_v20 = vadd.f32 1.0, %v4068_v19  ;;  %v557_v15 = vadd.f32 %v6623_v24, %v6709_v21 }
 0x269   :  { %v4072_v53 = vpop.eup %4071  ;;  %v1559_v38 = vadd.f32 1.0, %v4070_v36  ;;  %4081 = vrcp.f32 %v1557_v11 }
 0x26a   :  { %v1560_v48 = vadd.f32 1.0, %v4072_v53  ;;  %4083 = vrcp.f32 %v1558_v20 }
 0x26b   :  { %4085 = vrcp.f32 %v1559_v38 }
 0x26e   :  { %v4074_v5 = vpop.eup %4073 }
 0x270   :  { %v4076_v39 = vpop.eup %4075 }
 0x273   :  { %v4078_v33 = vpop.eup %4077 }
 0x275   :  { %v4080_v11 = vpop.eup %4079 }
 0x28d   :  { %v1502_v28 = vpop.f32.mrf.mxu0 }
 0x28e   :  { %v1569_v14 = vadd.f32 %v1502_v28, %v6706_v4 }
 0x28f   :  { %v1504_v41 = vpop.f32.mrf.mxu0 }
 0x290   :  { %v1573_v51 = vmul.f32 %v4074_v5, %v1569_v14  ;;  %v1570_v37 = vadd.f32 %v1504_v41, %v6715_v63  ;;  %v4082_v14 = vpop.eup %4081 }
 0x291   :  { %v1508_v45 = vpop.f32.mrf.mxu0  ;;  %v4084_v24 = vpop.eup %4083  ;;  %v1585_v38 = vsub.f32 1.0, %v4082_v14 }
 0x292   :  { %v1577_v3 = vadd.f32 %v1573_v51, %v551_v42  ;;  %v1574_v47 = vmul.f32 %v4076_v39, %v1570_v37  ;;  %v1571_v54 = vadd.f32 %v1508_v45, %v6706_v4  ;;  %v4086_v5 = vpop.eup %4085  ;;  %v1586_v51 = vsub.f32 1.0, %v4084_v24 }
 0x293   :  { %v1510_v43 = vpop.f32.mrf.mxu0  ;;  %v1593_v39 = vmul.f32 %v4082_v14, %v6738_v62  ;;  %v1594_v16 = vmul.f32 %v4084_v24, %v6740_v7  ;;  %v12407_v14 = vld [vmem:[#allocation101_spill] sm:$0xff]  ;;  %v12408_v24 = vld [vmem:[#allocation106_spill] sm:$0xff] }
 0x294   :  { %4087 = vtanh.f32 %v1577_v3  ;;  %v1578_v13 = vadd.f32 %v1574_v47, %v553_v44  ;;  %v1575_v19 = vmul.f32 %v4078_v33, %v1571_v54  ;;  %v1572_v36 = vadd.f32 %v1510_v43, %v6715_v63 }
 0x295   :  { %4089 = vrcp.f32 %v1560_v48  ;;  %v1587_v3 = vsub.f32 1.0, %v4086_v5  ;;  %v1595_v43 = vmul.f32 %v4086_v5, %v6744_v27  ;;  %v7924_v27 = vld [vmem:[%s11476_s2 + $0x2d0] sm:$0xff]  ;;  %v12409_v5 = vld [vmem:[#allocation103_spill] sm:$0xff] }
 0x296   :  { %4091 = vtanh.f32 %v1578_v13  ;;  %v1579_v28 = vadd.f32 %v1575_v19, %v557_v15  ;;  %v1576_v53 = vmul.f32 %v4080_v11, %v1572_v36  ;;  %v12402_v11 = vld [vmem:[#allocation100_spill] sm:$0xff] }
 0x298   :  { %4093 = vtanh.f32 %v1579_v28  ;;  %v1580_v20 = vadd.f32 %v1576_v53, %v559_v49  ;;  %v12403_v49 = vld [vmem:[#allocation97_spill] sm:$0xff]  ;;  %v12404_v28 = vld [vmem:[#allocation102_spill] sm:$0xff]  ;;  %v12405_v53 = vld [vmem:[#allocation99_spill] sm:$0xff] }
 0x29a   :  { %4095 = vtanh.f32 %v1580_v20  ;;  %v12406_v20 = vld [vmem:[#allocation104_spill] sm:$0xff] }
 0x2a1   :  { %v4088_v41 = vpop.eup %4087 }
 0x2a2   :  { %v4090_v42 = vpop.eup %4089  ;;  %v1589_v37 = vmul.f32 %v4088_v41, %v1585_v38  ;;  %v12410_v38 = vld [vmem:[#allocation108_spill] sm:$0xff]  ;;  %v12411_v41 = vld [vmem:[#allocation105_spill] sm:$0xff] }
 0x2a3   :  { %v4092_v44 = vpop.eup %4091  ;;  %v1588_v33 = vsub.f32 1.0, %v4090_v42  ;;  %v1596_v19 = vmul.f32 %v4090_v42, %v6748_v34  ;;  %v7931_v34 = vld [vmem:[%s11476_s2 + $0x2a8] sm:$0xff]  ;;  %v12412_v42 = vld [vmem:[#allocation110_spill] sm:$0xff] }
 0x2a4   :  { %v1590_v48 = vmul.f32 %v4092_v44, %v1586_v51  ;;  %v7906_v45 = vadd.f32 %v1593_v39, %v1589_v37  ;;  %v12413_v51 = vld [vmem:[#allocation107_spill] sm:$0xff]  ;;  %v12414_v37 = vld [vmem:[#allocation112_spill] sm:$0xff]  ;;  %v12415_v39 = vld [vmem:[#allocation109_spill] sm:$0xff] }
 0x2a5   :  { %v4094_v47 = vpop.eup %4093  ;;  %v12416_v44 = vld [vmem:[#allocation114_spill] sm:$0xff] }
 0x2a6   :  { %v7908_v54 = vadd.f32 %v1594_v16, %v1590_v48  ;;  %v1591_v15 = vmul.f32 %v4094_v47, %v1587_v3  ;;  %v12417_v48 = vld [vmem:[#allocation111_spill] sm:$0xff]  ;;  %v12418_v16 = vld [vmem:[#allocation116_spill] sm:$0xff]  ;;  %v12419_v3 = vld [vmem:[#allocation113_spill] sm:$0xff] }
 0x2a7   :  { %v4096_v13 = vpop.eup %4095  ;;  %v12420_v47 = vld [vmem:[#allocation118_spill] sm:$0xff] }
 0x2a8   :  { %1680 = vmatprep.mubr.f32.mxu1 %v7908_v54  ;;  %1757 = vmatprep.mubr.f32.mxu0 %v7908_v54  ;;  %v1592_v62 = vmul.f32 %v4096_v13, %v1588_v33  ;;  %v7914_v36 = vadd.f32 %v1595_v43, %v1591_v15  ;;  %v12421_v33 = vld [vmem:[#allocation115_spill] sm:$0xff]  ;;  %v12422_v15 = vld [vmem:[#allocation120_spill] sm:$0xff]  ;;  %v12423_v43 = vld [vmem:[#allocation117_spill] sm:$0xff] }
 0x2a9   :  { %1681 = vmatmul.mubr.f32.vlgmr.msra.gmra.mxu1 %v7906_v45  ;;  %1758 = vmatmul.mubr.f32.vlgmr.msra.gmra.mxu0 %v7906_v45  ;;  %v12424_v13 = vld [vmem:[#allocation122_spill] sm:$0xff] }
 0x2aa   :  { %1771 = vmatpush1.msra.mxu1 %v6753_v22  ;;  %v7919_v7 = vadd.f32 %v1596_v19, %v1592_v62  ;;  %1951 = vmatpush1.msra.mxu0 %v7924_v27  ;;  %v7946_v22 = vld [vmem:[%s11476_s2 + $0x2a0] sm:$0xff]  ;;  %v12426_v19 = vld [vmem:[#allocation124_spill] sm:$0xff] }
 0x2ab   :  { %1772 = vmatprep.subr.mxu1 %v6760_v60  ;;  %1952 = vmatprep.subr.mxu0 %v7931_v34  ;;  %v7953_v60 = vld [vmem:[%s11476_s2 + $0x278] sm:$0xff]  ;;  %v12425_v62 = vld [vmem:[#allocation119_spill] sm:$0xff] }
 0x2ac   :  { %1773 = vmatpush1.msra.mxu1 %v6767_v17  ;;  %1686 = vmatprep.mubr.f32.mxu1 %v7919_v7  ;;  %v7960_v17 = vld [vmem:[%s11476_s2 + $0x270] sm:$0xff] }
 0x2ad   :  { %1763 = vmatprep.mubr.f32.mxu0 %v7919_v7  ;;  %1774 = vmatprep.subr.mxu1 %v6774_v58  ;;  %v7967_v58 = vld [vmem:[%s11476_s2 + $0x248] sm:$0xff] }
 0x2ae   :  { %1687 = vmatmul.mubr.f32.gmra.mxu1 %v7914_v36  ;;  %1764 = vmatmul.mubr.f32.gmra.mxu0 %v7914_v36 }
 0x2af   :  { %1775 = vmatpush1.msra.mxu1 %v6782_v61  ;;  %1834 = vmatprep.mubr.f32.mxu1 %v7908_v54  ;;  %v12379_v61 = vld [vmem:[#allocation75_spill] sm:$0xff] }
 0x2b0   :  { %1776 = vmatprep.subr.mxu1 %v6788_v12  ;;  %1953 = vmatpush1.msra.mxu0 %v7946_v22  ;;  %v12380_v12 = vld [vmem:[#allocation78_spill] sm:$0xff] }
 0x2b1   :  { %1777 = vmatpush1.msra.mxu1 %v6795_v52  ;;  %1954 = vmatprep.subr.mxu0 %v7953_v60  ;;  %v12381_v52 = vld [vmem:[#allocation76_spill] sm:$0xff] }
 0x2b2   :  { %1778 = vmatprep.subr.mxu1 %v6802_v29  ;;  %1955 = vmatpush1.msra.mxu0 %v7960_v17  ;;  %v12382_v29 = vld [vmem:[#allocation80_spill] sm:$0xff] }
 0x2b3   :  { %1779 = vmatpush1.msra.mxu1 %v6809_v57  ;;  %1956 = vmatprep.subr.mxu0 %v7967_v58  ;;  %v12383_v57 = vld [vmem:[#allocation77_spill] sm:$0xff] }
 0x2b4   :  { %1780 = vmatprep.subr.mxu1 %v6816_v9  ;;  %1957 = vmatpush1.msra.mxu0 %v6836_v26  ;;  %v12384_v9 = vld [vmem:[#allocation82_spill] sm:$0xff]  ;;  %v12387_v26 = vld [vmem:[#allocation81_spill] sm:$0xff] }
 0x2b5   :  { %1781 = vmatpush1.msra.mxu1 %v6823_v25  ;;  %1958 = vmatprep.subr.mxu0 %v6848_v0  ;;  %v12385_v25 = vld [vmem:[#allocation79_spill] sm:$0xff] }
 0x2b6   :  { %1782 = vmatprep.subr.mxu1 %v6830_v23  ;;  %1959 = vmatpush1.msra.mxu0 %v6860_v10  ;;  %v12386_v23 = vld [vmem:[#allocation84_spill] sm:$0xff]  ;;  %v12389_v0 = vld [vmem:[#allocation83_spill] sm:$0xff]  ;;  %v12391_v10 = vld [vmem:[#allocation85_spill] sm:$0xff] }
 0x2b7   :  { %1783 = vmatpush1.msra.mxu1 %v6842_v59  ;;  %1960 = vmatprep.subr.mxu0 %v6872_v56  ;;  %v12388_v59 = vld [vmem:[#allocation86_spill] sm:$0xff]  ;;  %v12393_v56 = vld [vmem:[#allocation87_spill] sm:$0xff] }
 0x2b8   :  { %1784 = vmatprep.subr.mxu1 %v6854_v46  ;;  %1961 = vmatpush1.msra.mxu0 %v6884_v6  ;;  %v12390_v46 = vld [vmem:[#allocation88_spill] sm:$0xff]  ;;  %v12395_v6 = vld [vmem:[#allocation89_spill] sm:$0xff] }
 0x2b9   :  { %1785 = vmatpush1.msra.mxu1 %v6866_v8  ;;  %1962 = vmatprep.subr.mxu0 %v6896_v35  ;;  %v12392_v8 = vld [vmem:[#allocation90_spill] sm:$0xff]  ;;  %v12397_v35 = vld [vmem:[#allocation91_spill] sm:$0xff] }
 0x2ba   :  { %1786 = vmatprep.subr.mxu1 %v6878_v50  ;;  %1963 = vmatpush1.msra.mxu0 %v6908_v40  ;;  %v12394_v50 = vld [vmem:[#allocation92_spill] sm:$0xff]  ;;  %v12399_v40 = vld [vmem:[#allocation93_spill] sm:$0xff] }
 0x2bb   :  { %1787 = vmatpush1.msra.mxu1 %v6890_v1  ;;  %1964 = vmatprep.subr.mxu0 %v6920_v2  ;;  %v12396_v1 = vld [vmem:[#allocation94_spill] sm:$0xff] }
 0x2bc   :  { %1788 = vmatprep.subr.mxu1 %v6902_v18  ;;  %1965 = vmatpush1.msra.mxu0 %v6932_v30  ;;  %v12398_v18 = vld [vmem:[#allocation96_spill] sm:$0xff]  ;;  %v12400_v2 = vld [vmem:[#allocation98_spill] sm:$0xff]  ;;  %v12401_v30 = vld [vmem:[#allocation95_spill] sm:$0xff] }
 0x2bd   :  { %1789 = vmatpush1.msra.mxu1 %v12379_v61  ;;  %1966 = vmatprep.subr.mxu0 %v12380_v12  ;;  %v12427_v61 = vld [vmem:[#allocation121_spill] sm:$0xff]  ;;  %v12428_v12 = vld [vmem:[#allocation126_spill] sm:$0xff] }
 0x2be   :  { %1790 = vmatprep.subr.mxu1 %v12381_v52  ;;  %1967 = vmatpush1.msra.mxu0 %v12382_v29  ;;  %v12429_v52 = vld [vmem:[#allocation123_spill] sm:$0xff]  ;;  %v12430_v29 = vld [vmem:[#allocation128_spill] sm:$0xff] }
 0x2bf   :  { %1791 = vmatpush1.msra.mxu1 %v12383_v57  ;;  %1968 = vmatprep.subr.mxu0 %v12384_v9  ;;  %v12431_v57 = vld [vmem:[#allocation125_spill] sm:$0xff]  ;;  %v12432_v9 = vld [vmem:[#allocation130_spill] sm:$0xff] }
 0x2c0   :  { %1792 = vmatprep.subr.mxu1 %v12385_v25  ;;  %1969 = vmatpush1.msra.mxu0 %v12386_v23  ;;  %v12433_v25 = vld [vmem:[#allocation127_spill] sm:$0xff]  ;;  %v12434_v23 = vld [vmem:[#allocation132_spill] sm:$0xff] }
 0x2c1   :  { %1793 = vmatpush1.msra.mxu1 %v12387_v26  ;;  %1970 = vmatprep.subr.mxu0 %v12388_v59  ;;  %v12435_v26 = vld [vmem:[#allocation129_spill] sm:$0xff]  ;;  %v12436_v59 = vld [vmem:[#allocation134_spill] sm:$0xff] }
 0x2c2   :  { %1794 = vmatprep.subr.mxu1 %v12389_v0  ;;  %1971 = vmatpush1.msra.mxu0 %v12390_v46  ;;  %v12437_v0 = vld [vmem:[#allocation131_spill] sm:$0xff]  ;;  %v12438_v46 = vld [vmem:[#allocation136_spill] sm:$0xff] }
 0x2c3   :  { %1795 = vmatpush1.msra.mxu1 %v12391_v10  ;;  %1972 = vmatprep.subr.mxu0 %v12392_v8  ;;  %v12439_v10 = vld [vmem:[#allocation133_spill] sm:$0xff]  ;;  %v12440_v8 = vld [vmem:[#allocation138_spill] sm:$0xff] }
 0x2c4   :  { %1796 = vmatprep.subr.mxu1 %v12393_v56  ;;  %1973 = vmatpush1.msra.mxu0 %v12394_v50  ;;  %v12441_v56 = vld [vmem:[#allocation135_spill] sm:$0xff]  ;;  %v12442_v50 = vld [vmem:[#allocation140_spill] sm:$0xff] }
 0x2c5   :  { %1797 = vmatpush1.msra.mxu1 %v12395_v6  ;;  %1974 = vmatprep.subr.mxu0 %v12396_v1  ;;  %v12443_v6 = vld [vmem:[#allocation137_spill] sm:$0xff]  ;;  %v12444_v1 = vld [vmem:[#allocation142_spill] sm:$0xff] }
 0x2c6   :  { %1798 = vmatprep.subr.mxu1 %v12397_v35  ;;  %1975 = vmatpush1.msra.mxu0 %v12398_v18  ;;  %v12445_v35 = vld [vmem:[#allocation139_spill] sm:$0xff]  ;;  %v12446_v18 = vld [vmem:[#allocation144_spill] sm:$0xff] }
 0x2c7   :  { %1799 = vmatpush1.msra.mxu1 %v12399_v40  ;;  %1976 = vmatprep.subr.mxu0 %v12400_v2  ;;  %v12447_v40 = vld [vmem:[#allocation141_spill] sm:$0xff]  ;;  %v12448_v2 = vld [vmem:[#allocation146_spill] sm:$0xff] }
 0x2c8   :  { %1800 = vmatprep.subr.mxu1 %v12401_v30  ;;  %1977 = vmatpush1.msra.mxu0 %v12402_v11  ;;  %v12449_v30 = vld [vmem:[#allocation143_spill] sm:$0xff]  ;;  %v12450_v11 = vld [vmem:[#allocation148_spill] sm:$0xff] }
 0x2c9   :  { %1801 = vmatpush1.msra.mxu1 %v12403_v49  ;;  %1978 = vmatprep.subr.mxu0 %v12404_v28  ;;  %v12451_v49 = vld [vmem:[#allocation145_spill] sm:$0xff]  ;;  %v12452_v28 = vld [vmem:[#allocation150_spill] sm:$0xff] }
 0x2ca   :  { %1802 = vmatprep.subr.mxu1 %v12405_v53  ;;  %1979 = vmatpush1.msra.mxu0 %v12406_v20  ;;  %v12453_v53 = vld [vmem:[#allocation147_spill] sm:$0xff]  ;;  %v12454_v20 = vld [vmem:[#allocation152_spill] sm:$0xff] }
 0x2cb   :  { %1803 = vmatpush2.msra.mxu1 %v12407_v14  ;;  %1980 = vmatprep.subr.mxu0 %v12408_v24  ;;  %v12455_v14 = vld [vmem:[#allocation149_spill] sm:$0xff]  ;;  %v12456_v24 = vld [vmem:[#allocation154_spill] sm:$0xff] }
 0x2cc   :  { %1804 = vmatprep.subr.mxu1 %v12409_v5  ;;  %1981 = vmatpush1.msra.mxu0 %v12410_v38  ;;  %v12457_v5 = vld [vmem:[#allocation151_spill] sm:$0xff]  ;;  %v12458_v38 = vld [vmem:[#allocation156_spill] sm:$0xff] }
 0x2cd   :  { %1805 = vmatpush2.msra.mxu1 %v12411_v41  ;;  %1982 = vmatprep.subr.mxu0 %v12412_v42  ;;  %v12459_v41 = vld [vmem:[#allocation153_spill] sm:$0xff]  ;;  %v12460_v42 = vld [vmem:[#allocation158_spill] sm:$0xff] }
 0x2ce   :  { %1806 = vmatprep.subr.mxu1 %v12413_v51  ;;  %1983 = vmatpush2.msra.mxu0 %v12414_v37  ;;  %v12461_v51 = vld [vmem:[#allocation155_spill] sm:$0xff]  ;;  %v12462_v37 = vld [vmem:[#allocation160_spill] sm:$0xff] }
 0x2cf   :  { %1807 = vmatpush2.msra.mxu1 %v12415_v39  ;;  %1984 = vmatprep.subr.mxu0 %v12416_v44  ;;  %v12463_v39 = vld [vmem:[#allocation157_spill] sm:$0xff]  ;;  %v12464_v44 = vld [vmem:[#allocation162_spill] sm:$0xff] }
 0x2d0   :  { %1808 = vmatprep.subr.mxu1 %v12417_v48  ;;  %1985 = vmatpush2.msra.mxu0 %v12418_v16  ;;  %v12465_v48 = vld [vmem:[#allocation159_spill] sm:$0xff]  ;;  %v12466_v16 = vld [vmem:[#allocation166_spill] sm:$0xff] }
 0x2d1   :  { %1809 = vmatpush2.msra.mxu1 %v12419_v3  ;;  %1986 = vmatprep.subr.mxu0 %v12420_v47  ;;  %v12467_v3 = vld [vmem:[#allocation161_spill] sm:$0xff]  ;;  %v12468_v47 = vld [vmem:[#allocation168_spill] sm:$0xff] }
 0x2d2   :  { %1810 = vmatprep.subr.mxu1 %v12421_v33  ;;  %1987 = vmatpush2.msra.mxu0 %v12422_v15  ;;  %v12469_v33 = vld [vmem:[#allocation163_spill] sm:$0xff]  ;;  %v12470_v15 = vld [vmem:[#allocation164_spill] sm:$0xff] }
 0x2d3   :  { %1811 = vmatpush2.msra.mxu1 %v12423_v43  ;;  %1988 = vmatprep.subr.mxu0 %v12424_v13  ;;  %v12471_v43 = vld [vmem:[#allocation165_spill] sm:$0xff]  ;;  %v12472_v13 = vld [vmem:[#allocation171_spill] sm:$0xff] }
 0x2d4   :  { %1812 = vmatprep.subr.mxu1 %v12425_v62  ;;  %1989 = vmatpush2.msra.mxu0 %v12426_v19  ;;  %v12473_v62 = vld [vmem:[#allocation167_spill] sm:$0xff]  ;;  %v12474_v19 = vld [vmem:[#allocation173_spill] sm:$0xff] }
 0x2d5   :  { %1813 = vmatpush2.msra.mxu1 %v12427_v61  ;;  %1990 = vmatprep.subr.mxu0 %v12428_v12  ;;  %v12475_v61 = vld [vmem:[#allocation169_spill] sm:$0xff]  ;;  %v12476_v12 = vld [vmem:[#allocation170_spill] sm:$0xff] }
 0x2d6   :  { %1814 = vmatprep.subr.mxu1 %v12429_v52  ;;  %1991 = vmatpush2.msra.mxu0 %v12430_v29  ;;  %v12477_v52 = vld [vmem:[#allocation175_spill] sm:$0xff]  ;;  %v12478_v29 = vld [vmem:[#allocation172_spill] sm:$0xff] }
 0x2d7   :  { %1815 = vmatpush2.msra.mxu1 %v12431_v57  ;;  %1992 = vmatprep.subr.mxu0 %v12432_v9  ;;  %v12479_v57 = vld [vmem:[#allocation177_spill] sm:$0xff]  ;;  %v12480_v9 = vld [vmem:[#allocation174_spill] sm:$0xff] }
 0x2d8   :  { %1816 = vmatprep.subr.mxu1 %v12433_v25  ;;  %1993 = vmatpush2.msra.mxu0 %v12434_v23  ;;  %v12481_v25 = vld [vmem:[#allocation176_spill] sm:$0xff]  ;;  %v12482_v23 = vld [vmem:[#allocation178_spill] sm:$0xff] }
 0x2d9   :  { %1817 = vmatpush2.msra.mxu1 %v12435_v26  ;;  %1994 = vmatprep.subr.mxu0 %v12436_v59  ;;  %v12483_v26 = vld [vmem:[#allocation179_spill] sm:$0xff]  ;;  %v12484_v59 = vld [vmem:[#allocation180_spill] sm:$0xff] }
 0x2da   :  { %1818 = vmatprep.subr.mxu1 %v12437_v0  ;;  %1995 = vmatpush2.msra.mxu0 %v12438_v46  ;;  %v12485_v0 = vld [vmem:[#allocation181_spill] sm:$0xff]  ;;  %v12486_v46 = vld [vmem:[#allocation182_spill] sm:$0xff] }
 0x2db   :  { %1819 = vmatpush2.msra.mxu1 %v12439_v10  ;;  %1996 = vmatprep.subr.mxu0 %v12440_v8  ;;  %v12487_v10 = vld [vmem:[#allocation183_spill] sm:$0xff]  ;;  %v12488_v8 = vld [vmem:[#allocation184_spill] sm:$0xff] }
 0x2dc   :  { %1820 = vmatprep.subr.mxu1 %v12441_v56  ;;  %1997 = vmatpush2.msra.mxu0 %v12442_v50  ;;  %v12489_v56 = vld [vmem:[#allocation185_spill] sm:$0xff]  ;;  %v12490_v50 = vld [vmem:[#allocation186_spill] sm:$0xff] }
 0x2dd   :  { %1821 = vmatpush2.msra.mxu1 %v12443_v6  ;;  %1998 = vmatprep.subr.mxu0 %v12444_v1  ;;  %v12491_v6 = vld [vmem:[#allocation187_spill] sm:$0xff]  ;;  %v12492_v1 = vld [vmem:[#allocation188_spill] sm:$0xff] }
 0x2de   :  { %1822 = vmatprep.subr.mxu1 %v12445_v35  ;;  %1999 = vmatpush2.msra.mxu0 %v12446_v18  ;;  %v12493_v35 = vld [vmem:[#allocation189_spill] sm:$0xff]  ;;  %v12494_v18 = vld [vmem:[#allocation190_spill] sm:$0xff] }
 0x2df   :  { %1823 = vmatpush2.msra.mxu1 %v12447_v40  ;;  %2000 = vmatprep.subr.mxu0 %v12448_v2  ;;  %v12495_v40 = vld [vmem:[#allocation191_spill] sm:$0xff]  ;;  %v12496_v2 = vld [vmem:[#allocation192_spill] sm:$0xff] }
 0x2e0   :  { %1824 = vmatprep.subr.mxu1 %v12449_v30  ;;  %2001 = vmatpush2.msra.mxu0 %v12450_v11  ;;  %v12497_v30 = vld [vmem:[#allocation193_spill] sm:$0xff]  ;;  %v12498_v11 = vld [vmem:[#allocation194_spill] sm:$0xff] }
 0x2e1   :  { %1825 = vmatpush2.msra.mxu1 %v12451_v49  ;;  %2002 = vmatprep.subr.mxu0 %v12452_v28  ;;  %v12499_v49 = vld [vmem:[#allocation195_spill] sm:$0xff]  ;;  %v12500_v28 = vld [vmem:[#allocation196_spill] sm:$0xff] }
 0x2e2   :  { %1826 = vmatprep.subr.mxu1 %v12453_v53  ;;  %2003 = vmatpush2.msra.mxu0 %v12454_v20  ;;  %v12501_v53 = vld [vmem:[#allocation197_spill] sm:$0xff]  ;;  %v12502_v20 = vld [vmem:[#allocation198_spill] sm:$0xff] }
 0x2e3   :  { %1827 = vmatpush2.msra.mxu1 %v12455_v14  ;;  %2004 = vmatprep.subr.mxu0 %v12456_v24  ;;  %v12503_v14 = vld [vmem:[#allocation199_spill] sm:$0xff]  ;;  %v12504_v24 = vld [vmem:[#allocation200_spill] sm:$0xff] }
 0x2e4   :  { %1828 = vmatprep.subr.mxu1 %v12457_v5  ;;  %2005 = vmatpush2.msra.mxu0 %v12458_v38  ;;  %v12505_v5 = vld [vmem:[#allocation201_spill] sm:$0xff]  ;;  %v12506_v38 = vld [vmem:[#allocation202_spill] sm:$0xff] }
 0x2e5   :  { %1829 = vmatpush2.msra.mxu1 %v12459_v41  ;;  %2006 = vmatprep.subr.mxu0 %v12460_v42  ;;  %v12507_v41 = vld [vmem:[#allocation203_spill] sm:$0xff]  ;;  %v12508_v42 = vld [vmem:[#allocation204_spill] sm:$0xff] }
 0x2e6   :  { %1830 = vmatprep.subr.mxu1 %v12461_v51  ;;  %2007 = vmatpush2.msra.mxu0 %v12462_v37  ;;  %v12509_v51 = vld [vmem:[#allocation205_spill] sm:$0xff]  ;;  %v12510_v37 = vld [vmem:[#allocation206_spill] sm:$0xff] }
 0x2e7   :  { %1831 = vmatpush2.msra.mxu1 %v12463_v39  ;;  %2008 = vmatprep.subr.mxu0 %v12464_v44  ;;  %v12511_v39 = vld [vmem:[#allocation207_spill] sm:$0xff]  ;;  %v12512_v44 = vld [vmem:[#allocation208_spill] sm:$0xff] }
 0x2e8   :  { %1832 = vmatprep.subr.mxu1 %v12465_v48  ;;  %2009 = vmatpush2.msra.mxu0 %v12466_v16  ;;  %v12513_v48 = vld [vmem:[#allocation209_spill] sm:$0xff]  ;;  %v12514_v16 = vld [vmem:[#allocation210_spill] sm:$0xff] }
 0x2e9   :  { %1833 = vmatpush2.msra.mxu1 %v12467_v3  ;;  %2010 = vmatprep.subr.mxu0 %v12468_v47  ;;  %v12515_v3 = vld [vmem:[#allocation211_spill] sm:$0xff]  ;;  %v12516_v47 = vld [vmem:[#allocation212_spill] sm:$0xff] }
 0x2ea   :  { %1835 = vmatmul.mubr.f32.vlgmr.msra.gmra.mxu1 %v7906_v45  ;;  %2027 = vmatprep.subr.mxu1 %v12469_v33  ;;  %v12517_v33 = vld [vmem:[#allocation213_spill] sm:$0xff] }
 0x2eb   :  { %1840 = vmatprep.mubr.f32.mxu1 %v7919_v7  ;;  %2028 = vmatpush1.msra.mxu1 %v12470_v15  ;;  %v12518_v15 = vld [vmem:[#allocation214_spill] sm:$0xff] }
 0x2ec   :  { %2029 = vmatprep.subr.mxu1 %v12471_v43  ;;  %2011 = vmatpush2.msra.mxu0 %v12472_v13  ;;  %v12519_v43 = vld [vmem:[#allocation215_spill] sm:$0xff]  ;;  %v12520_v13 = vld [vmem:[#allocation216_spill] sm:$0xff] }
 0x2ed   :  { %2030 = vmatpush1.msra.mxu1 %v12473_v62  ;;  %2012 = vmatprep.subr.mxu0 %v12474_v19  ;;  %v12521_v62 = vld [vmem:[#allocation217_spill] sm:$0xff]  ;;  %v12522_v19 = vld [vmem:[#allocation218_spill] sm:$0xff] }
 0x2ee   :  { %1841 = vmatmul.mubr.f32.gmra.mxu1 %v7914_v36  ;;  %2031 = vmatprep.subr.mxu1 %v12475_v61  ;;  %v12523_v61 = vld [vmem:[#allocation219_spill] sm:$0xff] }
 0x2ef   :  { %2032 = vmatpush1.msra.mxu1 %v12476_v12  ;;  %2013 = vmatpush2.msra.mxu0 %v12477_v52  ;;  %v12524_v12 = vld [vmem:[#allocation220_spill] sm:$0xff]  ;;  %v12525_v52 = vld [vmem:[#allocation221_spill] sm:$0xff] }
 0x2f0   :  { %2033 = vmatprep.subr.mxu1 %v12478_v29  ;;  %2104 = vmatprep.subr.mxu0 %v12479_v57  ;;  %v12526_v29 = vld [vmem:[#allocation222_spill] sm:$0xff]  ;;  %v12527_v57 = vld [vmem:[#allocation223_spill] sm:$0xff] }
 0x2f1   :  { %2034 = vmatpush1.msra.mxu1 %v12480_v9  ;;  %v12528_v9 = vld [vmem:[#allocation224_spill] sm:$0xff] }
 0x2f2   :  { %2035 = vmatprep.subr.mxu1 %v12481_v25  ;;  %v12529_v25 = vld [vmem:[#allocation225_spill] sm:$0xff] }
 0x2f3   :  { %2036 = vmatpush1.msra.mxu1 %v12482_v23  ;;  %v12530_v23 = vld [vmem:[#allocation226_spill] sm:$0xff] }
 0x2f4   :  { %2037 = vmatprep.subr.mxu1 %v12483_v26  ;;  %v12531_v26 = vld [vmem:[#allocation227_spill] sm:$0xff] }
 0x2f5   :  { %2038 = vmatpush1.msra.mxu1 %v12484_v59  ;;  %v12532_v59 = vld [vmem:[#allocation228_spill] sm:$0xff] }
 0x2f6   :  { %2039 = vmatprep.subr.mxu1 %v12485_v0  ;;  %v12533_v0 = vld [vmem:[#allocation229_spill] sm:$0xff] }
 0x2f7   :  { %2040 = vmatpush1.msra.mxu1 %v12486_v46  ;;  %v12534_v46 = vld [vmem:[#allocation230_spill] sm:$0xff] }
 0x2f8   :  { %2041 = vmatprep.subr.mxu1 %v12487_v10  ;;  %v12535_v10 = vld [vmem:[#allocation231_spill] sm:$0xff] }
 0x2f9   :  { %2042 = vmatpush1.msra.mxu1 %v12488_v8  ;;  %v12536_v8 = vld [vmem:[#allocation232_spill] sm:$0xff] }
 0x2fa   :  { %2043 = vmatprep.subr.mxu1 %v12489_v56  ;;  %v12537_v56 = vld [vmem:[#allocation233_spill] sm:$0xff] }
 0x2fb   :  { %2044 = vmatpush1.msra.mxu1 %v12490_v50 }
 0x2fc   :  { %2045 = vmatprep.subr.mxu1 %v12491_v6 }
 0x2fd   :  { %2046 = vmatpush1.msra.mxu1 %v12492_v1 }
 0x2fe   :  { %2047 = vmatprep.subr.mxu1 %v12493_v35  ;;  %v12538_v35 = vld [vmem:[#allocation41_spill] sm:$0xff] }
 0x2ff   :  { %2048 = vmatpush1.msra.mxu1 %v12494_v18 }
 0x300   :  { %2049 = vmatprep.subr.mxu1 %v12495_v40  ;;  %v12539_v40 = vld [vmem:[#allocation42_spill] sm:$0xff] }
 0x301   :  { %2050 = vmatpush1.msra.mxu1 %v12496_v2 }
 0x302   :  { %2051 = vmatprep.subr.mxu1 %v12497_v30 }
 0x303   :  { %2052 = vmatpush1.msra.mxu1 %v12498_v11 }
 0x304   :  { %2053 = vmatprep.subr.mxu1 %v12499_v49 }
 0x305   :  { %2054 = vmatpush1.msra.mxu1 %v12500_v28  ;;  %v12540_v28 = vld [vmem:[#allocation43_spill] sm:$0xff] }
 0x306   :  { %2055 = vmatprep.subr.mxu1 %v12501_v53 }
 0x307   :  { %2056 = vmatpush1.msra.mxu1 %v12502_v20 }
 0x308   :  { %2057 = vmatprep.subr.mxu1 %v12503_v14  ;;  %v12541_v14 = vld [vmem:[#allocation44_spill] sm:$0xff] }
 0x309   :  { %2058 = vmatpush1.msra.mxu1 %v12504_v24 }
 0x30a   :  { %2059 = vmatprep.subr.mxu1 %v12505_v5 }
 0x30b   :  { %2060 = vmatpush2.msra.mxu1 %v12506_v38 }
 0x30c   :  { %2061 = vmatprep.subr.mxu1 %v12507_v41 }
 0x30d   :  { %2062 = vmatpush2.msra.mxu1 %v12508_v42  ;;  %v12542_v42 = vld [vmem:[#allocation3_spill] sm:$0xff] }
 0x30e   :  { %2063 = vmatprep.subr.mxu1 %v12509_v51  ;;  %v402_v51 = vadd.f32 %v12542_v42, %v6696_v31 }
 0x30f   :  { %2064 = vmatpush2.msra.mxu1 %v12510_v37 }
 0x310   :  { %2065 = vmatprep.subr.mxu1 %v12511_v39  ;;  %v12543_v39 = vld [vmem:[#allocation4_spill] sm:$0xff] }
 0x311   :  { %2066 = vmatpush2.msra.mxu1 %v12512_v44  ;;  %v404_v44 = vadd.f32 %v12543_v39, %v6702_v32 }
 0x312   :  { %2067 = vmatprep.subr.mxu1 %v12513_v48 }
 0x313   :  { %2068 = vmatpush2.msra.mxu1 %v12514_v16  ;;  %v12544_v16 = vld [vmem:[#allocation5_spill] sm:$0xff] }
 0x314   :  { %2069 = vmatprep.subr.mxu1 %v12515_v3  ;;  %v408_v3 = vadd.f32 %v12544_v16, %v6696_v31 }
 0x315   :  { %2070 = vmatpush2.msra.mxu1 %v12516_v47 }
 0x316   :  { %2071 = vmatprep.subr.mxu1 %v12517_v33 }
 0x317   :  { %2072 = vmatpush2.msra.mxu1 %v12518_v15  ;;  %v12545_v15 = vld [vmem:[#allocation6_spill] sm:$0xff] }
 0x318   :  { %2073 = vmatprep.subr.mxu1 %v12519_v43  ;;  %v410_v43 = vadd.f32 %v12545_v15, %v6702_v32 }
 0x319   :  { %2074 = vmatpush2.msra.mxu1 %v12520_v13 }
 0x31a   :  { %2075 = vmatprep.subr.mxu1 %v12521_v62 }
 0x31b   :  { %2076 = vmatpush2.msra.mxu1 %v12522_v19 }
 0x31c   :  { %2077 = vmatprep.subr.mxu1 %v12523_v61 }
 0x31d   :  { %2078 = vmatpush2.msra.mxu1 %v12524_v12 }
 0x31e   :  { %2079 = vmatprep.subr.mxu1 %v12525_v52 }
 0x31f   :  { %2080 = vmatpush2.msra.mxu1 %v12526_v29 }
 0x320   :  { %2081 = vmatprep.subr.mxu1 %v12527_v57 }
 0x321   :  { %2082 = vmatpush2.msra.mxu1 %v12528_v9 }
 0x322   :  { %2083 = vmatprep.subr.mxu1 %v12529_v25 }
 0x323   :  { %2084 = vmatpush2.msra.mxu1 %v12530_v23 }
 0x324   :  { %2085 = vmatprep.subr.mxu1 %v12531_v26 }
 0x325   :  { %2086 = vmatpush2.msra.mxu1 %v12532_v59 }
 0x326   :  { %2087 = vmatprep.subr.mxu1 %v12533_v0 }
 0x327   :  { %2088 = vmatpush2.msra.mxu1 %v12534_v46 }
 0x328   :  { %2089 = vmatprep.subr.mxu1 %v12535_v10 }
 0x329   :  { %2090 = vmatpush2.msra.mxu1 %v12536_v8 }
 0x32a   :  { %2284 = vmatprep.subr.mxu1 %v12537_v56 }
 0x369   :  { %v1682_v50 = vpop.f32.mrf.mxu1  ;;  %v1759_v49 = vpop.f32.mrf.mxu0 }
 0x36a   :  { %v1847_v18 = vadd.f32 %v1682_v50, %v12538_v35  ;;  %v1875_v48 = vadd.f32 %v1759_v49, %v402_v51 }
 0x36b   :  { %v1684_v6 = vpop.f32.mrf.mxu1  ;;  %v1761_v5 = vpop.f32.mrf.mxu0 }
 0x36c   :  { %v1848_v2 = vadd.f32 %v1684_v6, %v12539_v40  ;;  %v3897_v11 = vmul.f32 -1.442695, %v1847_v18  ;;  %v1876_v47 = vadd.f32 %v1761_v5, %v404_v44  ;;  %v3901_v62 = vmul.f32 -1.442695, %v1875_v48 }
 0x36e   :  { %v1688_v1 = vpop.f32.mrf.mxu1  ;;  %v3898_v20 = vmul.f32 -1.442695, %v1848_v2  ;;  %4097 = vpow2.f32 %v3897_v11  ;;  %v1765_v37 = vpop.f32.mrf.mxu0  ;;  %v3902_v61 = vmul.f32 -1.442695, %v1876_v47 }
 0x36f   :  { %v1849_v53 = vadd.f32 %v1688_v1, %v12540_v28  ;;  %v1877_v13 = vadd.f32 %v1765_v37, %v408_v3  ;;  %v12548_v37 = vld [vmem:[#allocation62_spill] sm:$0xff] }
 0x370   :  { %v1690_v30 = vpop.f32.mrf.mxu1  ;;  %4099 = vpow2.f32 %v3898_v20  ;;  %v1767_v33 = vpop.f32.mrf.mxu0  ;;  %v12547_v20 = vld [vmem:[#allocation61_spill] sm:$0xff]  ;;  %v569_v39 = vadd.f32 %v12548_v37, %v6709_v21 }
 0x371   :  { %v1850_v24 = vadd.f32 %v1690_v30, %v12541_v14  ;;  %v3899_v38 = vmul.f32 -1.442695, %v1849_v53  ;;  %v1878_v19 = vadd.f32 %v1767_v33, %v410_v43  ;;  %v3903_v52 = vmul.f32 -1.442695, %v1877_v13  ;;  %v12546_v30 = vld [vmem:[#allocation28_spill] sm:$0xff]  ;;  %v12549_v33 = vld [vmem:[#allocation31_spill] sm:$0xff] }
 0x372   :  { %v563_v11 = vadd.f32 %v12546_v30, %v6709_v21  ;;  %v565_v14 = vadd.f32 %v12547_v20, %v6718_v55  ;;  %v571_v15 = vadd.f32 %v12549_v33, %v6718_v55  ;;  %v8230_v30 = vld [vmem:[%s11476_s2 + $0x268] sm:$0xff]  ;;  %v8288_v20 = vld [vmem:[%s11476_s2 + $0x210] sm:$0xff]  ;;  %v8378_v33 = vld [vmem:[%s11476_s2 + $0x118] sm:$0xff] }
 0x373   :  { %v3900_v41 = vmul.f32 -1.442695, %v1850_v24  ;;  %4101 = vpow2.f32 %v3899_v38  ;;  %v3904_v57 = vmul.f32 -1.442695, %v1878_v19  ;;  %v8336_v37 = vld [vmem:[%s11476_s2 + $0x1b0] sm:$0xff] }
 0x375   :  { %4103 = vpow2.f32 %v3900_v41 }
 0x376   :  { %4105 = vpow2.f32 %v3901_v62 }
 0x377   :  { %4107 = vpow2.f32 %v3902_v61 }
 0x378   :  { %4109 = vpow2.f32 %v3903_v52 }
 0x379   :  { %4111 = vpow2.f32 %v3904_v57 }
 0x37b   :  { %v4098_v12 = vpop.eup %4097 }
 0x37c   :  { %v1863_v9 = vadd.f32 1.0, %v4098_v12 }
 0x37d   :  { %v4100_v29 = vpop.eup %4099 }
 0x37e   :  { %v1864_v23 = vadd.f32 1.0, %v4100_v29  ;;  %4113 = vrcp.f32 %v1863_v9 }
 0x380   :  { %v4102_v25 = vpop.eup %4101  ;;  %4115 = vrcp.f32 %v1864_v23 }
 0x381   :  { %v1865_v59 = vadd.f32 1.0, %v4102_v25 }
 0x382   :  { %v4104_v26 = vpop.eup %4103 }
 0x383   :  { %v1866_v0 = vadd.f32 1.0, %v4104_v26  ;;  %4117 = vrcp.f32 %v1865_v59  ;;  %v4106_v46 = vpop.eup %4105 }
 0x384   :  { %v4108_v10 = vpop.eup %4107  ;;  %v1891_v56 = vadd.f32 1.0, %v4106_v46 }
 0x385   :  { %4119 = vrcp.f32 %v1866_v0  ;;  %v4110_v8 = vpop.eup %4109  ;;  %v1892_v1 = vadd.f32 1.0, %v4108_v10 }
 0x386   :  { %v4112_v6 = vpop.eup %4111  ;;  %v1893_v40 = vadd.f32 1.0, %v4110_v8  ;;  %4121 = vrcp.f32 %v1891_v56 }
 0x387   :  { %v1894_v24 = vadd.f32 1.0, %v4112_v6  ;;  %4123 = vrcp.f32 %v1892_v1 }
 0x388   :  { %4125 = vrcp.f32 %v1893_v40 }
 0x38b   :  { %v4114_v18 = vpop.eup %4113 }
 0x38d   :  { %v4116_v53 = vpop.eup %4115 }
 0x390   :  { %v4118_v51 = vpop.eup %4117 }
 0x392   :  { %v4120_v47 = vpop.eup %4119 }
 0x393   :  { %v4122_v19 = vpop.eup %4121 }
 0x394   :  { %v4124_v61 = vpop.eup %4123  ;;  %v1919_v52 = vsub.f32 1.0, %v4122_v19  ;;  %v1927_v23 = vmul.f32 %v4122_v19, %v7906_v45  ;;  %v8408_v19 = vld [vmem:[%s11476_s2 + $0x120] sm:$0xff] }
 0x395   :  { %v4126_v12 = vpop.eup %4125  ;;  %v1920_v9 = vsub.f32 1.0, %v4124_v61  ;;  %v1928_v0 = vmul.f32 %v4124_v61, %v7908_v54  ;;  %v8191_v54 = vld [vmem:[%s11476_s2 + $0x2f0] sm:$0xff]  ;;  %12552 = vst [vmem:[#allocation76_spill] sm:$0xff] %v8408_v19  ;;  %v8414_v61 = vld [vmem:[%s11476_s2 + $0xe0] sm:$0xff] }
 0x396   :  { %v1921_v10 = vsub.f32 1.0, %v4126_v12  ;;  %v1929_v1 = vmul.f32 %v4126_v12, %v7914_v36  ;;  %12553 = vst [vmem:[#allocation80_spill] sm:$0xff] %v8414_v61  ;;  %v8420_v12 = vld [vmem:[%s11476_s2 + $0xf8] sm:$0xff] }
 0x397   :  { %12554 = vst [vmem:[#allocation77_spill] sm:$0xff] %v8420_v12 }
 0x3aa   :  { %v1836_v50 = vpop.f32.mrf.mxu1 }
 0x3ab   :  { %v1903_v35 = vadd.f32 %v1836_v50, %v6706_v4 }
 0x3ac   :  { %v1838_v2 = vpop.f32.mrf.mxu1 }
 0x3ad   :  { %v1907_v49 = vmul.f32 %v4114_v18, %v1903_v35  ;;  %v1904_v28 = vadd.f32 %v1838_v2, %v6715_v63  ;;  %v8207_v2 = vld [vmem:[%s11476_s2 + $0x2c0] sm:$0xff] }
 0x3ae   :  { %v1842_v5 = vpop.f32.mrf.mxu1 }
 0x3af   :  { %v1911_v38 = vadd.f32 %v1907_v49, %v563_v11  ;;  %v1908_v41 = vmul.f32 %v4116_v53, %v1904_v28  ;;  %v1905_v42 = vadd.f32 %v1842_v5, %v6706_v4  ;;  %v8237_v11 = vld [vmem:[%s11476_s2 + $0x260] sm:$0xff]  ;;  %v8244_v49 = vld [vmem:[%s11476_s2 + $0x238] sm:$0xff]  ;;  %v8306_v5 = vld [vmem:[%s11476_s2 + $0x1a8] sm:$0xff] }
 0x3b0   :  { %v1844_v44 = vpop.f32.mrf.mxu1  ;;  %v8270_v28 = vld [vmem:[%s11476_s2 + $0x200] sm:$0xff]  ;;  %v8282_v53 = vld [vmem:[%s11476_s2 + $0x1d8] sm:$0xff] }
 0x3b1   :  { %4127 = vtanh.f32 %v1911_v38  ;;  %v1912_v48 = vadd.f32 %v1908_v41, %v565_v14  ;;  %v1909_v16 = vmul.f32 %v4118_v51, %v1905_v42  ;;  %v1906_v3 = vadd.f32 %v1844_v44, %v6715_v63  ;;  %v8294_v14 = vld [vmem:[%s11476_s2 + $0x1d0] sm:$0xff]  ;;  %v8312_v38 = vld [vmem:[%s11476_s2 + $0x1e0] sm:$0xff]  ;;  %v8324_v42 = vld [vmem:[%s11476_s2 + $0x1b8] sm:$0xff] }
 0x3b2   :  { %4129 = vrcp.f32 %v1894_v24  ;;  %v8300_v24 = vld [vmem:[%s11476_s2 + $0x1e8] sm:$0xff]  ;;  %v8318_v41 = vld [vmem:[%s11476_s2 + $0x1a0] sm:$0xff]  ;;  %v8330_v51 = vld [vmem:[%s11476_s2 + $0x178] sm:$0xff] }
 0x3b3   :  { %4131 = vtanh.f32 %v1912_v48  ;;  %v1913_v43 = vadd.f32 %v1909_v16, %v569_v39  ;;  %v1910_v13 = vmul.f32 %v4120_v47, %v1906_v3  ;;  %v8342_v39 = vld [vmem:[%s11476_s2 + $0x170] sm:$0xff]  ;;  %v8348_v44 = vld [vmem:[%s11476_s2 + $0x188] sm:$0xff]  ;;  %v8360_v16 = vld [vmem:[%s11476_s2 + $0x180] sm:$0xff] }
 0x3b4   :  { %v8354_v48 = vld [vmem:[%s11476_s2 + $0x148] sm:$0xff]  ;;  %v8366_v3 = vld [vmem:[%s11476_s2 + $0x140] sm:$0xff]  ;;  %v8372_v47 = vld [vmem:[%s11476_s2 + $0x158] sm:$0xff] }
 0x3b5   :  { %4133 = vtanh.f32 %v1913_v43  ;;  %v1914_v62 = vadd.f32 %v1910_v13, %v571_v15  ;;  %v8384_v15 = vld [vmem:[%s11476_s2 + $0x150] sm:$0xff]  ;;  %v8396_v13 = vld [vmem:[%s11476_s2 + $0x128] sm:$0xff] }
 0x3b6   :  { %v8390_v43 = vld [vmem:[%s11476_s2 + $0x110] sm:$0xff]  ;;  %12550 = vst [vmem:[#allocation75_spill] sm:$0xff] %v8396_v13 }
 0x3b7   :  { %4135 = vtanh.f32 %v1914_v62  ;;  %v8402_v62 = vld [vmem:[%s11476_s2 + $0xe8] sm:$0xff] }
 0x3b8   :  { %12551 = vst [vmem:[#allocation78_spill] sm:$0xff] %v8402_v62 }
 0x3be   :  { %v4128_v29 = vpop.eup %4127 }
 0x3bf   :  { %v4130_v57 = vpop.eup %4129  ;;  %v1923_v25 = vmul.f32 %v4128_v29, %v1919_v52  ;;  %v8426_v52 = vld [vmem:[%s11476_s2 + $0xb8] sm:$0xff]  ;;  %v8432_v29 = vld [vmem:[%s11476_s2 + $0xf0] sm:$0xff] }
 0x3c0   :  { %v4132_v26 = vpop.eup %4131  ;;  %v1922_v50 = vsub.f32 1.0, %v4130_v57  ;;  %v1930_v18 = vmul.f32 %v4130_v57, %v7919_v7  ;;  %v8200_v7 = vld [vmem:[%s11476_s2 + $0x2c8] sm:$0xff]  ;;  %12555 = vst [vmem:[#allocation82_spill] sm:$0xff] %v8426_v52  ;;  %12556 = vst [vmem:[#allocation79_spill] sm:$0xff] %v8432_v29  ;;  %v8438_v57 = vld [vmem:[%s11476_s2 + $0xb0] sm:$0xff] }
 0x3c1   :  { %v1924_v59 = vmul.f32 %v4132_v26, %v1920_v9  ;;  %v8176_v46 = vadd.f32 %v1927_v23, %v1923_v25  ;;  %12557 = vst [vmem:[#allocation84_spill] sm:$0xff] %v8438_v57  ;;  %v8444_v9 = vld [vmem:[%s11476_s2 + $0xc8] sm:$0xff]  ;;  %v8456_v23 = vld [vmem:[%s11476_s2 + $0xc0] sm:$0xff] }
 0x3c2   :  { %v4134_v8 = vpop.eup %4133  ;;  %12558 = vst [vmem:[#allocation81_spill] sm:$0xff] %v8444_v9  ;;  %v8450_v25 = vld [vmem:[%s11476_s2 + $0x88] sm:$0xff]  ;;  %12560 = vst [vmem:[#allocation83_spill] sm:$0xff] %v8456_v23  ;;  %v8462_v26 = vld [vmem:[%s11476_s2 + $0x80] sm:$0xff] }
 0x3c3   :  { %v8178_v56 = vadd.f32 %v1928_v0, %v1924_v59  ;;  %v1925_v6 = vmul.f32 %v4134_v8, %v1921_v10  ;;  %12559 = vst [vmem:[#allocation86_spill] sm:$0xff] %v8450_v25  ;;  %12561 = vst [vmem:[#allocation88_spill] sm:$0xff] %v8462_v26  ;;  %v8468_v59 = vld [vmem:[%s11476_s2 + $0x98] sm:$0xff]  ;;  %v8480_v10 = vld [vmem:[%s11476_s2 + $0x90] sm:$0xff] }
 0x3c4   :  { %v4136_v35 = vpop.eup %4135  ;;  %12562 = vst [vmem:[#allocation85_spill] sm:$0xff] %v8468_v59  ;;  %v8474_v0 = vld [vmem:[%s11476_s2 + $0x58] sm:$0xff]  ;;  %12564 = vst [vmem:[#allocation87_spill] sm:$0xff] %v8480_v10  ;;  %v8486_v8 = vld [vmem:[%s11476_s2 + $0x50] sm:$0xff] }
 0x3c5   :  { %2014 = vmatprep.mubr.f32.mxu0 %v8178_v56  ;;  %2091 = vmatprep.mubr.f32.mxu1 %v8178_v56  ;;  %v1926_v45 = vmul.f32 %v4136_v35, %v1922_v50  ;;  %v8184_v40 = vadd.f32 %v1929_v1, %v1925_v6  ;;  %12563 = vst [vmem:[#allocation90_spill] sm:$0xff] %v8474_v0  ;;  %12565 = vst [vmem:[#allocation92_spill] sm:$0xff] %v8486_v8  ;;  %v8492_v50 = vld [vmem:[%s11476_s2 + $0x68] sm:$0xff]  ;;  %v8504_v1 = vld [vmem:[%s11476_s2 + $0x60] sm:$0xff] }
 0x3c6   :  { %2015 = vmatmul.mubr.f32.vlgmr.msra.gmra.mxu0 %v8176_v46  ;;  %2092 = vmatmul.mubr.f32.vlgmr.msra.gmra.mxu1 %v8176_v46  ;;  %12566 = vst [vmem:[#allocation89_spill] sm:$0xff] %v8492_v50  ;;  %v8498_v6 = vld [vmem:[%s11476_s2 + $0x28] sm:$0xff]  ;;  %12568 = vst [vmem:[#allocation91_spill] sm:$0xff] %v8504_v1  ;;  %v8510_v35 = vld [vmem:[%s11476_s2 + $0x20] sm:$0xff] }
 0x3c7   :  { %2105 = vmatpush1.msra.mxu0 %v8191_v54  ;;  %v8194_v36 = vadd.f32 %v1930_v18, %v1926_v45  ;;  %2285 = vmatpush1.msra.mxu1 %v7924_v27  ;;  %v8215_v27 = vld [vmem:[%s11476_s2 + $0x298] sm:$0xff]  ;;  %12567 = vst [vmem:[#allocation94_spill] sm:$0xff] %v8498_v6  ;;  %12569 = vst [vmem:[#allocation96_spill] sm:$0xff] %v8510_v35 }
 0x3c8   :  { %2106 = vmatprep.subr.mxu0 %v8200_v7  ;;  %2286 = vmatprep.subr.mxu1 %v7931_v34  ;;  %v8223_v34 = vld [vmem:[%s11476_s2 + $0x290] sm:$0xff]  ;;  %v8516_v45 = vld [vmem:[%s11476_s2 + $0x38] sm:$0xff] }
 0x3c9   :  { %2107 = vmatpush1.msra.mxu0 %v8207_v2  ;;  %2020 = vmatprep.mubr.f32.mxu0 %v8194_v36  ;;  %12570 = vst [vmem:[#allocation93_spill] sm:$0xff] %v8516_v45  ;;  %v8522_v18 = vld [vmem:[%s11476_s2 + $0x5f8] sm:$0xff] }
 0x3ca   :  { %2097 = vmatprep.mubr.f32.mxu1 %v8194_v36  ;;  %2108 = vmatprep.subr.mxu0 %v8215_v27  ;;  %12571 = vst [vmem:[#allocation98_spill] sm:$0xff] %v8522_v18 }
 0x3cb   :  { %2021 = vmatmul.mubr.f32.gmra.mxu0 %v8184_v40  ;;  %2098 = vmatmul.mubr.f32.gmra.mxu1 %v8184_v40 }
 0x3cc   :  { %2109 = vmatpush1.msra.mxu0 %v8223_v34  ;;  %2168 = vmatprep.mubr.f32.mxu0 %v8178_v56 }
 0x3cd   :  { %2110 = vmatprep.subr.mxu0 %v8230_v30  ;;  %2287 = vmatpush1.msra.mxu1 %v7946_v22  ;;  %v8251_v22 = vld [vmem:[%s11476_s2 + $0x230] sm:$0xff] }
 0x3ce   :  { %2111 = vmatpush1.msra.mxu0 %v8237_v11  ;;  %2288 = vmatprep.subr.mxu1 %v7953_v60  ;;  %v8258_v60 = vld [vmem:[%s11476_s2 + $0x208] sm:$0xff] }
 0x3cf   :  { %2112 = vmatprep.subr.mxu0 %v8244_v49  ;;  %2289 = vmatpush1.msra.mxu1 %v7960_v17  ;;  %v8264_v17 = vld [vmem:[%s11476_s2 + $0x240] sm:$0xff] }
 0x3d0   :  { %2113 = vmatpush1.msra.mxu0 %v8251_v22  ;;  %2290 = vmatprep.subr.mxu1 %v7967_v58  ;;  %v8276_v58 = vld [vmem:[%s11476_s2 + $0x218] sm:$0xff] }
 0x3d1   :  { %2114 = vmatprep.subr.mxu0 %v8258_v60  ;;  %2291 = vmatpush1.msra.mxu1 %v8264_v17 }
 0x3d2   :  { %2115 = vmatpush1.msra.mxu0 %v8270_v28  ;;  %2292 = vmatprep.subr.mxu1 %v8276_v58 }
 0x3d3   :  { %2116 = vmatprep.subr.mxu0 %v8282_v53  ;;  %2293 = vmatpush1.msra.mxu1 %v8288_v20 }
 0x3d4   :  { %2117 = vmatpush1.msra.mxu0 %v8294_v14  ;;  %2294 = vmatprep.subr.mxu1 %v8300_v24 }
 0x3d5   :  { %2118 = vmatprep.subr.mxu0 %v8306_v5  ;;  %2295 = vmatpush1.msra.mxu1 %v8312_v38 }
 0x3d6   :  { %2119 = vmatpush1.msra.mxu0 %v8318_v41  ;;  %2296 = vmatprep.subr.mxu1 %v8324_v42 }
 0x3d7   :  { %2120 = vmatprep.subr.mxu0 %v8330_v51  ;;  %2297 = vmatpush1.msra.mxu1 %v8336_v37 }
 0x3d8   :  { %2121 = vmatpush1.msra.mxu0 %v8342_v39  ;;  %2298 = vmatprep.subr.mxu1 %v8348_v44 }
 0x3d9   :  { %2122 = vmatprep.subr.mxu0 %v8354_v48  ;;  %2299 = vmatpush1.msra.mxu1 %v8360_v16 }
 0x3da   :  { %2123 = vmatpush1.msra.mxu0 %v8366_v3  ;;  %2300 = vmatprep.subr.mxu1 %v8372_v47 }
 0x3db   :  { %2124 = vmatprep.subr.mxu0 %v8378_v33  ;;  %2301 = vmatpush1.msra.mxu1 %v8384_v15 }
 0x3dc   :  { %2125 = vmatpush1.msra.mxu0 %v8390_v43  ;;  %2302 = vmatprep.subr.mxu1 %v8396_v13 }
 0x3dd   :  { %2126 = vmatprep.subr.mxu0 %v8402_v62  ;;  %2303 = vmatpush1.msra.mxu1 %v8408_v19 }
 0x3de   :  { %2127 = vmatpush1.msra.mxu0 %v8414_v61  ;;  %2304 = vmatprep.subr.mxu1 %v8420_v12  ;;  %v12708_v61 = vld [vmem:[#allocation45_spill] sm:$0xff] }
 0x3df   :  { %2128 = vmatprep.subr.mxu0 %v8426_v52  ;;  %2305 = vmatpush1.msra.mxu1 %v8432_v29  ;;  %v414_v19 = vadd.f32 %v12708_v61, %v6696_v31 }
 0x3e0   :  { %2129 = vmatpush1.msra.mxu0 %v8438_v57  ;;  %2306 = vmatprep.subr.mxu1 %v8444_v9  ;;  %v12707_v57 = vld [vmem:[#allocation47_spill] sm:$0xff] }
 0x3e1   :  { %2130 = vmatprep.subr.mxu0 %v8450_v25  ;;  %2307 = vmatpush1.msra.mxu1 %v8456_v23  ;;  %v12706_v25 = vld [vmem:[#allocation46_spill] sm:$0xff] }
 0x3e2   :  { %2131 = vmatpush1.msra.mxu0 %v8462_v26  ;;  %2308 = vmatprep.subr.mxu1 %v8468_v59 }
 0x3e3   :  { %2132 = vmatprep.subr.mxu0 %v8474_v0  ;;  %2309 = vmatpush1.msra.mxu1 %v8480_v10 }
 0x3e4   :  { %2133 = vmatpush1.msra.mxu0 %v8486_v8  ;;  %2310 = vmatprep.subr.mxu1 %v8492_v50  ;;  %v12704_v8 = vld [vmem:[#allocation7_spill] sm:$0xff] }
 0x3e5   :  { %2134 = vmatprep.subr.mxu0 %v8498_v6  ;;  %2311 = vmatpush1.msra.mxu1 %v8504_v1  ;;  %v8528_v1 = vld [vmem:[%s11476_s2 + $0x30] sm:$0xff] }
 0x3e6   :  { %2135 = vmatpush1.msra.mxu0 %v8510_v35  ;;  %2312 = vmatprep.subr.mxu1 %v8516_v45  ;;  %12572 = vst [vmem:[#allocation95_spill] sm:$0xff] %v8528_v1  ;;  %v8534_v35 = vld [vmem:[%s11476_s2 + $0x5f0] sm:$0xff]  ;;  %v8540_v45 = vld [vmem:[%s11476_s2 + $0x8] sm:$0xff] }
 0x3e7   :  { %2136 = vmatprep.subr.mxu0 %v8522_v18  ;;  %2313 = vmatpush1.msra.mxu1 %v8528_v1  ;;  %12573 = vst [vmem:[#allocation100_spill] sm:$0xff] %v8534_v35  ;;  %12574 = vst [vmem:[#allocation97_spill] sm:$0xff] %v8540_v45  ;;  %v8546_v18 = vld [vmem:[%s11476_s2 + $0x5c8] sm:$0xff]  ;;  %v8552_v1 = vld [vmem:[%s11476_s2] sm:$0xff] }
 0x3e8   :  { %2137 = vmatpush2.msra.mxu0 %v8534_v35  ;;  %2314 = vmatprep.subr.mxu1 %v8540_v45  ;;  %12575 = vst [vmem:[#allocation102_spill] sm:$0xff] %v8546_v18  ;;  %12576 = vst [vmem:[#allocation99_spill] sm:$0xff] %v8552_v1  ;;  %v8558_v35 = vld [vmem:[%s11476_s2 + $0x5c0] sm:$0xff]  ;;  %v8564_v45 = vld [vmem:[%s11476_s2 + $0x5d8] sm:$0xff] }
 0x3e9   :  { %2138 = vmatprep.subr.mxu0 %v8546_v18  ;;  %2315 = vmatpush1.msra.mxu1 %v8552_v1  ;;  %12577 = vst [vmem:[#allocation104_spill] sm:$0xff] %v8558_v35  ;;  %12578 = vst [vmem:[#allocation101_spill] sm:$0xff] %v8564_v45  ;;  %v8570_v18 = vld [vmem:[%s11476_s2 + $0x598] sm:$0xff]  ;;  %v8576_v1 = vld [vmem:[%s11476_s2 + $0x5d0] sm:$0xff] }
 0x3ea   :  { %2139 = vmatpush2.msra.mxu0 %v8558_v35  ;;  %2316 = vmatprep.subr.mxu1 %v8564_v45  ;;  %12579 = vst [vmem:[#allocation106_spill] sm:$0xff] %v8570_v18  ;;  %12580 = vst [vmem:[#allocation103_spill] sm:$0xff] %v8576_v1  ;;  %v8582_v35 = vld [vmem:[%s11476_s2 + $0x590] sm:$0xff]  ;;  %v8588_v45 = vld [vmem:[%s11476_s2 + $0x5a8] sm:$0xff] }
 0x3eb   :  { %2140 = vmatprep.subr.mxu0 %v8570_v18  ;;  %2317 = vmatpush2.msra.mxu1 %v8576_v1  ;;  %12581 = vst [vmem:[#allocation108_spill] sm:$0xff] %v8582_v35  ;;  %12582 = vst [vmem:[#allocation105_spill] sm:$0xff] %v8588_v45  ;;  %v8594_v18 = vld [vmem:[%s11476_s2 + $0x568] sm:$0xff]  ;;  %v8600_v1 = vld [vmem:[%s11476_s2 + $0x5a0] sm:$0xff] }
 0x3ec   :  { %2141 = vmatpush2.msra.mxu0 %v8582_v35  ;;  %2318 = vmatprep.subr.mxu1 %v8588_v45  ;;  %12583 = vst [vmem:[#allocation110_spill] sm:$0xff] %v8594_v18  ;;  %12584 = vst [vmem:[#allocation107_spill] sm:$0xff] %v8600_v1  ;;  %v8606_v35 = vld [vmem:[%s11476_s2 + $0x560] sm:$0xff]  ;;  %v8612_v45 = vld [vmem:[%s11476_s2 + $0x578] sm:$0xff] }
 0x3ed   :  { %2142 = vmatprep.subr.mxu0 %v8594_v18  ;;  %2319 = vmatpush2.msra.mxu1 %v8600_v1  ;;  %12585 = vst [vmem:[#allocation112_spill] sm:$0xff] %v8606_v35  ;;  %12586 = vst [vmem:[#allocation109_spill] sm:$0xff] %v8612_v45  ;;  %v8618_v18 = vld [vmem:[%s11476_s2 + $0x538] sm:$0xff]  ;;  %v8624_v1 = vld [vmem:[%s11476_s2 + $0x570] sm:$0xff] }
 0x3ee   :  { %2143 = vmatpush2.msra.mxu0 %v8606_v35  ;;  %2320 = vmatprep.subr.mxu1 %v8612_v45  ;;  %12587 = vst [vmem:[#allocation114_spill] sm:$0xff] %v8618_v18  ;;  %12588 = vst [vmem:[#allocation111_spill] sm:$0xff] %v8624_v1  ;;  %v8630_v35 = vld [vmem:[%s11476_s2 + $0x530] sm:$0xff]  ;;  %v8636_v45 = vld [vmem:[%s11476_s2 + $0x548] sm:$0xff] }
 0x3ef   :  { %2144 = vmatprep.subr.mxu0 %v8618_v18  ;;  %2321 = vmatpush2.msra.mxu1 %v8624_v1  ;;  %12589 = vst [vmem:[#allocation116_spill] sm:$0xff] %v8630_v35  ;;  %12590 = vst [vmem:[#allocation113_spill] sm:$0xff] %v8636_v45  ;;  %v8642_v18 = vld [vmem:[%s11476_s2 + $0x508] sm:$0xff]  ;;  %v8648_v1 = vld [vmem:[%s11476_s2 + $0x540] sm:$0xff] }
 0x3f0   :  { %2145 = vmatpush2.msra.mxu0 %v8630_v35  ;;  %2322 = vmatprep.subr.mxu1 %v8636_v45  ;;  %12591 = vst [vmem:[#allocation118_spill] sm:$0xff] %v8642_v18  ;;  %12592 = vst [vmem:[#allocation115_spill] sm:$0xff] %v8648_v1  ;;  %v8654_v35 = vld [vmem:[%s11476_s2 + $0x500] sm:$0xff]  ;;  %v8660_v45 = vld [vmem:[%s11476_s2 + $0x518] sm:$0xff] }
 0x3f1   :  { %2146 = vmatprep.subr.mxu0 %v8642_v18  ;;  %2323 = vmatpush2.msra.mxu1 %v8648_v1  ;;  %12593 = vst [vmem:[#allocation120_spill] sm:$0xff] %v8654_v35  ;;  %12594 = vst [vmem:[#allocation117_spill] sm:$0xff] %v8660_v45  ;;  %v8666_v18 = vld [vmem:[%s11476_s2 + $0x4d8] sm:$0xff]  ;;  %v8672_v1 = vld [vmem:[%s11476_s2 + $0x510] sm:$0xff] }
 0x3f2   :  { %2147 = vmatpush2.msra.mxu0 %v8654_v35  ;;  %2324 = vmatprep.subr.mxu1 %v8660_v45  ;;  %12595 = vst [vmem:[#allocation122_spill] sm:$0xff] %v8666_v18  ;;  %12596 = vst [vmem:[#allocation119_spill] sm:$0xff] %v8672_v1  ;;  %v8678_v35 = vld [vmem:[%s11476_s2 + $0x4d0] sm:$0xff]  ;;  %v8684_v45 = vld [vmem:[%s11476_s2 + $0x4e8] sm:$0xff] }
 0x3f3   :  { %2148 = vmatprep.subr.mxu0 %v8666_v18  ;;  %2325 = vmatpush2.msra.mxu1 %v8672_v1  ;;  %12597 = vst [vmem:[#allocation124_spill] sm:$0xff] %v8678_v35  ;;  %12598 = vst [vmem:[#allocation121_spill] sm:$0xff] %v8684_v45  ;;  %v8690_v18 = vld [vmem:[%s11476_s2 + $0x4a8] sm:$0xff]  ;;  %v8696_v1 = vld [vmem:[%s11476_s2 + $0x4e0] sm:$0xff] }
 0x3f4   :  { %2149 = vmatpush2.msra.mxu0 %v8678_v35  ;;  %2326 = vmatprep.subr.mxu1 %v8684_v45  ;;  %12599 = vst [vmem:[#allocation126_spill] sm:$0xff] %v8690_v18  ;;  %12600 = vst [vmem:[#allocation123_spill] sm:$0xff] %v8696_v1  ;;  %v8702_v35 = vld [vmem:[%s11476_s2 + $0x4a0] sm:$0xff]  ;;  %v8708_v45 = vld [vmem:[%s11476_s2 + $0x4b8] sm:$0xff] }
 0x3f5   :  { %2150 = vmatprep.subr.mxu0 %v8690_v18  ;;  %2327 = vmatpush2.msra.mxu1 %v8696_v1  ;;  %12601 = vst [vmem:[#allocation128_spill] sm:$0xff] %v8702_v35  ;;  %12602 = vst [vmem:[#allocation125_spill] sm:$0xff] %v8708_v45  ;;  %v8714_v18 = vld [vmem:[%s11476_s2 + $0x478] sm:$0xff]  ;;  %v8720_v1 = vld [vmem:[%s11476_s2 + $0x4b0] sm:$0xff] }
 0x3f6   :  { %2151 = vmatpush2.msra.mxu0 %v8702_v35  ;;  %2328 = vmatprep.subr.mxu1 %v8708_v45  ;;  %12603 = vst [vmem:[#allocation130_spill] sm:$0xff] %v8714_v18  ;;  %12604 = vst [vmem:[#allocation127_spill] sm:$0xff] %v8720_v1  ;;  %v8726_v35 = vld [vmem:[%s11476_s2 + $0x470] sm:$0xff]  ;;  %v8732_v45 = vld [vmem:[%s11476_s2 + $0x488] sm:$0xff] }
 0x3f7   :  { %2152 = vmatprep.subr.mxu0 %v8714_v18  ;;  %2329 = vmatpush2.msra.mxu1 %v8720_v1  ;;  %12605 = vst [vmem:[#allocation132_spill] sm:$0xff] %v8726_v35  ;;  %12606 = vst [vmem:[#allocation129_spill] sm:$0xff] %v8732_v45  ;;  %v8738_v18 = vld [vmem:[%s11476_s2 + $0x448] sm:$0xff]  ;;  %v8744_v1 = vld [vmem:[%s11476_s2 + $0x480] sm:$0xff] }
 0x3f8   :  { %2153 = vmatpush2.msra.mxu0 %v8726_v35  ;;  %2330 = vmatprep.subr.mxu1 %v8732_v45  ;;  %12607 = vst [vmem:[#allocation134_spill] sm:$0xff] %v8738_v18  ;;  %12608 = vst [vmem:[#allocation131_spill] sm:$0xff] %v8744_v1  ;;  %v8750_v35 = vld [vmem:[%s11476_s2 + $0x440] sm:$0xff]  ;;  %v8756_v45 = vld [vmem:[%s11476_s2 + $0x458] sm:$0xff] }
 0x3f9   :  { %2154 = vmatprep.subr.mxu0 %v8738_v18  ;;  %2331 = vmatpush2.msra.mxu1 %v8744_v1  ;;  %12609 = vst [vmem:[#allocation136_spill] sm:$0xff] %v8750_v35  ;;  %12610 = vst [vmem:[#allocation133_spill] sm:$0xff] %v8756_v45  ;;  %v8762_v18 = vld [vmem:[%s11476_s2 + $0x418] sm:$0xff]  ;;  %v8768_v1 = vld [vmem:[%s11476_s2 + $0x450] sm:$0xff] }
 0x3fa   :  { %2155 = vmatpush2.msra.mxu0 %v8750_v35  ;;  %2332 = vmatprep.subr.mxu1 %v8756_v45  ;;  %12611 = vst [vmem:[#allocation138_spill] sm:$0xff] %v8762_v18  ;;  %12612 = vst [vmem:[#allocation135_spill] sm:$0xff] %v8768_v1  ;;  %v8774_v35 = vld [vmem:[%s11476_s2 + $0x410] sm:$0xff]  ;;  %v8780_v45 = vld [vmem:[%s11476_s2 + $0x428] sm:$0xff] }
 0x3fb   :  { %2156 = vmatprep.subr.mxu0 %v8762_v18  ;;  %2333 = vmatpush2.msra.mxu1 %v8768_v1  ;;  %12613 = vst [vmem:[#allocation140_spill] sm:$0xff] %v8774_v35  ;;  %12614 = vst [vmem:[#allocation137_spill] sm:$0xff] %v8780_v45  ;;  %v8786_v18 = vld [vmem:[%s11476_s2 + $0x3e8] sm:$0xff]  ;;  %v8792_v1 = vld [vmem:[%s11476_s2 + $0x420] sm:$0xff] }
 0x3fc   :  { %2157 = vmatpush2.msra.mxu0 %v8774_v35  ;;  %2334 = vmatprep.subr.mxu1 %v8780_v45  ;;  %12615 = vst [vmem:[#allocation142_spill] sm:$0xff] %v8786_v18  ;;  %12616 = vst [vmem:[#allocation139_spill] sm:$0xff] %v8792_v1  ;;  %v8798_v35 = vld [vmem:[%s11476_s2 + $0x3e0] sm:$0xff]  ;;  %v8804_v45 = vld [vmem:[%s11476_s2 + $0x3f8] sm:$0xff] }
 0x3fd   :  { %2158 = vmatprep.subr.mxu0 %v8786_v18  ;;  %2335 = vmatpush2.msra.mxu1 %v8792_v1  ;;  %12617 = vst [vmem:[#allocation144_spill] sm:$0xff] %v8798_v35  ;;  %12618 = vst [vmem:[#allocation141_spill] sm:$0xff] %v8804_v45  ;;  %v8810_v18 = vld [vmem:[%s11476_s2 + $0x3b8] sm:$0xff]  ;;  %v8816_v1 = vld [vmem:[%s11476_s2 + $0x3f0] sm:$0xff] }
 0x3fe   :  { %2159 = vmatpush2.msra.mxu0 %v8798_v35  ;;  %2336 = vmatprep.subr.mxu1 %v8804_v45  ;;  %12619 = vst [vmem:[#allocation146_spill] sm:$0xff] %v8810_v18  ;;  %12620 = vst [vmem:[#allocation143_spill] sm:$0xff] %v8816_v1  ;;  %v8822_v35 = vld [vmem:[%s11476_s2 + $0x3b0] sm:$0xff]  ;;  %v8828_v45 = vld [vmem:[%s11476_s2 + $0x3c8] sm:$0xff] }
 0x3ff   :  { %2160 = vmatprep.subr.mxu0 %v8810_v18  ;;  %2337 = vmatpush2.msra.mxu1 %v8816_v1  ;;  %12621 = vst [vmem:[#allocation148_spill] sm:$0xff] %v8822_v35  ;;  %12622 = vst [vmem:[#allocation145_spill] sm:$0xff] %v8828_v45  ;;  %v8834_v18 = vld [vmem:[%s11476_s2 + $0x388] sm:$0xff]  ;;  %v8840_v1 = vld [vmem:[%s11476_s2 + $0x3c0] sm:$0xff] }
 0x400   :  { %2161 = vmatpush2.msra.mxu0 %v8822_v35  ;;  %2338 = vmatprep.subr.mxu1 %v8828_v45  ;;  %12623 = vst [vmem:[#allocation150_spill] sm:$0xff] %v8834_v18  ;;  %12624 = vst [vmem:[#allocation147_spill] sm:$0xff] %v8840_v1  ;;  %v8846_v35 = vld [vmem:[%s11476_s2 + $0x380] sm:$0xff]  ;;  %v8852_v45 = vld [vmem:[%s11476_s2 + $0x398] sm:$0xff] }
 0x401   :  { %2162 = vmatprep.subr.mxu0 %v8834_v18  ;;  %2339 = vmatpush2.msra.mxu1 %v8840_v1  ;;  %12625 = vst [vmem:[#allocation152_spill] sm:$0xff] %v8846_v35  ;;  %12626 = vst [vmem:[#allocation149_spill] sm:$0xff] %v8852_v45  ;;  %v8858_v18 = vld [vmem:[%s11476_s2 + $0x358] sm:$0xff]  ;;  %v8864_v1 = vld [vmem:[%s11476_s2 + $0x390] sm:$0xff] }
 0x402   :  { %2163 = vmatpush2.msra.mxu0 %v8846_v35  ;;  %2340 = vmatprep.subr.mxu1 %v8852_v45  ;;  %12627 = vst [vmem:[#allocation154_spill] sm:$0xff] %v8858_v18  ;;  %12628 = vst [vmem:[#allocation151_spill] sm:$0xff] %v8864_v1  ;;  %v8870_v35 = vld [vmem:[%s11476_s2 + $0x350] sm:$0xff]  ;;  %v8876_v45 = vld [vmem:[%s11476_s2 + $0x368] sm:$0xff] }
 0x403   :  { %2164 = vmatprep.subr.mxu0 %v8858_v18  ;;  %2341 = vmatpush2.msra.mxu1 %v8864_v1  ;;  %12629 = vst [vmem:[#allocation156_spill] sm:$0xff] %v8870_v35  ;;  %12630 = vst [vmem:[#allocation153_spill] sm:$0xff] %v8876_v45  ;;  %v8882_v18 = vld [vmem:[%s11476_s2 + $0x328] sm:$0xff]  ;;  %v8888_v1 = vld [vmem:[%s11476_s2 + $0x360] sm:$0xff] }
 0x404   :  { %2165 = vmatpush2.msra.mxu0 %v8870_v35  ;;  %2342 = vmatprep.subr.mxu1 %v8876_v45  ;;  %12631 = vst [vmem:[#allocation158_spill] sm:$0xff] %v8882_v18  ;;  %12632 = vst [vmem:[#allocation155_spill] sm:$0xff] %v8888_v1  ;;  %v8894_v35 = vld [vmem:[%s11476_s2 + $0x320] sm:$0xff]  ;;  %v8900_v45 = vld [vmem:[%s11476_s2 + $0x338] sm:$0xff] }
 0x405   :  { %2166 = vmatprep.subr.mxu0 %v8882_v18  ;;  %2343 = vmatpush2.msra.mxu1 %v8888_v1  ;;  %12633 = vst [vmem:[#allocation160_spill] sm:$0xff] %v8894_v35  ;;  %12634 = vst [vmem:[#allocation157_spill] sm:$0xff] %v8900_v45  ;;  %v8907_v1 = vld [vmem:[%s11476_s2 + $0x2e8] sm:$0xff]  ;;  %v8932_v18 = vld [vmem:[%s11476_s2 + $0x2b0] sm:$0xff] }
 0x406   :  { %2167 = vmatpush2.msra.mxu0 %v8894_v35  ;;  %2344 = vmatprep.subr.mxu1 %v8900_v45  ;;  %12635 = vst [vmem:[#allocation162_spill] sm:$0xff] %v8907_v1  ;;  %v8914_v35 = vld [vmem:[%s11476_s2 + $0x2e0] sm:$0xff]  ;;  %v8920_v45 = vld [vmem:[%s11476_s2 + $0x2b8] sm:$0xff]  ;;  %12639 = vst [vmem:[#allocation168_spill] sm:$0xff] %v8932_v18 }
 0x407   :  { %2169 = vmatmul.mubr.f32.vlgmr.msra.gmra.mxu0 %v8176_v46  ;;  %2361 = vmatprep.subr.mxu0 %v8907_v1  ;;  %12636 = vst [vmem:[#allocation159_spill] sm:$0xff] %v8914_v35  ;;  %12637 = vst [vmem:[#allocation166_spill] sm:$0xff] %v8920_v45  ;;  %v8926_v1 = vld [vmem:[%s11476_s2 + $0x330] sm:$0xff] }
 0x408   :  { %2174 = vmatprep.mubr.f32.mxu0 %v8194_v36  ;;  %2362 = vmatpush1.msra.mxu0 %v8914_v35  ;;  %12638 = vst [vmem:[#allocation161_spill] sm:$0xff] %v8926_v1  ;;  %v8938_v35 = vld [vmem:[%s11476_s2 + $0x308] sm:$0xff] }
 0x409   :  { %2363 = vmatprep.subr.mxu0 %v8920_v45  ;;  %2345 = vmatpush2.msra.mxu1 %v8926_v1  ;;  %12640 = vst [vmem:[#allocation163_spill] sm:$0xff] %v8938_v35  ;;  %v8945_v1 = vld [vmem:[%s11476_s2 + $0x288] sm:$0xff]  ;;  %v8963_v45 = vld [vmem:[%s11476_s2 + $0x258] sm:$0xff] }
 0x40a   :  { %2364 = vmatpush1.msra.mxu0 %v8932_v18  ;;  %2346 = vmatprep.subr.mxu1 %v8938_v35  ;;  %12641 = vst [vmem:[#allocation164_spill] sm:$0xff] %v8945_v1  ;;  %v8951_v18 = vld [vmem:[%s11476_s2 + $0x280] sm:$0xff]  ;;  %12644 = vst [vmem:[#allocation167_spill] sm:$0xff] %v8963_v45 }
 0x40b   :  { %2175 = vmatmul.mubr.f32.gmra.mxu0 %v8184_v40  ;;  %2365 = vmatprep.subr.mxu0 %v8945_v1  ;;  %12642 = vst [vmem:[#allocation165_spill] sm:$0xff] %v8951_v18  ;;  %v8957_v35 = vld [vmem:[%s11476_s2 + $0x300] sm:$0xff]  ;;  %v8969_v1 = vld [vmem:[%s11476_s2 + $0x2f8] sm:$0xff] }
 0x40c   :  { %2366 = vmatpush1.msra.mxu0 %v8951_v18  ;;  %12643 = vst [vmem:[#allocation171_spill] sm:$0xff] %v8957_v35  ;;  %2347 = vmatpush2.msra.mxu1 %v8957_v35  ;;  %12645 = vst [vmem:[#allocation173_spill] sm:$0xff] %v8969_v1  ;;  %v8975_v18 = vld [vmem:[%s11476_s2 + $0x250] sm:$0xff]  ;;  %v8981_v35 = vld [vmem:[%s11476_s2 + $0x228] sm:$0xff] }
 0x40d   :  { %2367 = vmatprep.subr.mxu0 %v8963_v45  ;;  %2438 = vmatprep.subr.mxu1 %v8969_v1  ;;  %12646 = vst [vmem:[#allocation169_spill] sm:$0xff] %v8975_v18  ;;  %12647 = vst [vmem:[#allocation170_spill] sm:$0xff] %v8981_v35  ;;  %v8987_v45 = vld [vmem:[%s11476_s2 + $0x220] sm:$0xff]  ;;  %v8993_v1 = vld [vmem:[%s11476_s2 + $0x1f8] sm:$0xff] }
 0x40e   :  { %2368 = vmatpush1.msra.mxu0 %v8975_v18  ;;  %12648 = vst [vmem:[#allocation175_spill] sm:$0xff] %v8987_v45  ;;  %12649 = vst [vmem:[#allocation172_spill] sm:$0xff] %v8993_v1  ;;  %v8999_v18 = vld [vmem:[%s11476_s2 + $0x1f0] sm:$0xff] }
 0x40f   :  { %2369 = vmatprep.subr.mxu0 %v8981_v35  ;;  %12650 = vst [vmem:[#allocation177_spill] sm:$0xff] %v8999_v18  ;;  %v9005_v35 = vld [vmem:[%s11476_s2 + $0x1c8] sm:$0xff] }
 0x410   :  { %2370 = vmatpush1.msra.mxu0 %v8987_v45  ;;  %12651 = vst [vmem:[#allocation174_spill] sm:$0xff] %v9005_v35  ;;  %v9011_v45 = vld [vmem:[%s11476_s2 + $0x1c0] sm:$0xff] }
 0x411   :  { %2371 = vmatprep.subr.mxu0 %v8993_v1  ;;  %12652 = vst [vmem:[#allocation176_spill] sm:$0xff] %v9011_v45  ;;  %v9017_v1 = vld [vmem:[%s11476_s2 + $0x198] sm:$0xff] }
 0x412   :  { %2372 = vmatpush1.msra.mxu0 %v8999_v18  ;;  %12653 = vst [vmem:[#allocation178_spill] sm:$0xff] %v9017_v1  ;;  %v9023_v18 = vld [vmem:[%s11476_s2 + $0x190] sm:$0xff] }
 0x413   :  { %2373 = vmatprep.subr.mxu0 %v9005_v35  ;;  %12654 = vst [vmem:[#allocation179_spill] sm:$0xff] %v9023_v18  ;;  %v9029_v35 = vld [vmem:[%s11476_s2 + $0x168] sm:$0xff] }
 0x414   :  { %2374 = vmatpush1.msra.mxu0 %v9011_v45  ;;  %12655 = vst [vmem:[#allocation180_spill] sm:$0xff] %v9029_v35  ;;  %v9035_v45 = vld [vmem:[%s11476_s2 + $0x160] sm:$0xff] }
 0x415   :  { %2375 = vmatprep.subr.mxu0 %v9017_v1  ;;  %12656 = vst [vmem:[#allocation181_spill] sm:$0xff] %v9035_v45  ;;  %v9041_v1 = vld [vmem:[%s11476_s2 + $0x138] sm:$0xff] }
 0x416   :  { %2376 = vmatpush1.msra.mxu0 %v9023_v18  ;;  %12657 = vst [vmem:[#allocation182_spill] sm:$0xff] %v9041_v1  ;;  %v9047_v18 = vld [vmem:[%s11476_s2 + $0x130] sm:$0xff] }
 0x417   :  { %2377 = vmatprep.subr.mxu0 %v9029_v35  ;;  %12658 = vst [vmem:[#allocation183_spill] sm:$0xff] %v9047_v18  ;;  %v9053_v35 = vld [vmem:[%s11476_s2 + $0x108] sm:$0xff] }
 0x418   :  { %2378 = vmatpush1.msra.mxu0 %v9035_v45  ;;  %12659 = vst [vmem:[#allocation184_spill] sm:$0xff] %v9053_v35  ;;  %v9059_v45 = vld [vmem:[%s11476_s2 + $0x100] sm:$0xff] }
 0x419   :  { %2379 = vmatprep.subr.mxu0 %v9041_v1  ;;  %12660 = vst [vmem:[#allocation185_spill] sm:$0xff] %v9059_v45  ;;  %v9065_v1 = vld [vmem:[%s11476_s2 + $0xd8] sm:$0xff] }
 0x41a   :  { %2380 = vmatpush1.msra.mxu0 %v9047_v18  ;;  %12661 = vst [vmem:[#allocation186_spill] sm:$0xff] %v9065_v1  ;;  %v9071_v18 = vld [vmem:[%s11476_s2 + $0xd0] sm:$0xff] }
 0x41b   :  { %2381 = vmatprep.subr.mxu0 %v9053_v35  ;;  %12662 = vst [vmem:[#allocation187_spill] sm:$0xff] %v9071_v18  ;;  %v9077_v35 = vld [vmem:[%s11476_s2 + $0xa8] sm:$0xff] }
 0x41c   :  { %2382 = vmatpush1.msra.mxu0 %v9059_v45  ;;  %12663 = vst [vmem:[#allocation188_spill] sm:$0xff] %v9077_v35  ;;  %v9083_v45 = vld [vmem:[%s11476_s2 + $0xa0] sm:$0xff] }
 0x41d   :  { %2383 = vmatprep.subr.mxu0 %v9065_v1  ;;  %12664 = vst [vmem:[#allocation189_spill] sm:$0xff] %v9083_v45  ;;  %v9089_v1 = vld [vmem:[%s11476_s2 + $0x78] sm:$0xff] }
 0x41e   :  { %2384 = vmatpush1.msra.mxu0 %v9071_v18  ;;  %12665 = vst [vmem:[#allocation190_spill] sm:$0xff] %v9089_v1  ;;  %v9095_v18 = vld [vmem:[%s11476_s2 + $0x70] sm:$0xff] }
 0x41f   :  { %2385 = vmatprep.subr.mxu0 %v9077_v35  ;;  %12666 = vst [vmem:[#allocation191_spill] sm:$0xff] %v9095_v18  ;;  %v9101_v35 = vld [vmem:[%s11476_s2 + $0x48] sm:$0xff] }
 0x420   :  { %2386 = vmatpush1.msra.mxu0 %v9083_v45  ;;  %12667 = vst [vmem:[#allocation192_spill] sm:$0xff] %v9101_v35  ;;  %v9107_v45 = vld [vmem:[%s11476_s2 + $0x40] sm:$0xff] }
 0x421   :  { %2387 = vmatprep.subr.mxu0 %v9089_v1  ;;  %12668 = vst [vmem:[#allocation193_spill] sm:$0xff] %v9107_v45  ;;  %v9113_v1 = vld [vmem:[%s11476_s2 + $0x18] sm:$0xff] }
 0x422   :  { %2388 = vmatpush1.msra.mxu0 %v9095_v18  ;;  %12669 = vst [vmem:[#allocation194_spill] sm:$0xff] %v9113_v1  ;;  %v9119_v18 = vld [vmem:[%s11476_s2 + $0x10] sm:$0xff] }
 0x423   :  { %2389 = vmatprep.subr.mxu0 %v9101_v35  ;;  %12670 = vst [vmem:[#allocation195_spill] sm:$0xff] %v9119_v18  ;;  %v9125_v35 = vld [vmem:[%s11476_s2 + $0x5e8] sm:$0xff] }
 0x424   :  { %2390 = vmatpush1.msra.mxu0 %v9107_v45  ;;  %12671 = vst [vmem:[#allocation196_spill] sm:$0xff] %v9125_v35  ;;  %v9131_v45 = vld [vmem:[%s11476_s2 + $0x5e0] sm:$0xff] }
 0x425   :  { %2391 = vmatprep.subr.mxu0 %v9113_v1  ;;  %12672 = vst [vmem:[#allocation197_spill] sm:$0xff] %v9131_v45  ;;  %v9137_v1 = vld [vmem:[%s11476_s2 + $0x5b8] sm:$0xff] }
 0x426   :  { %2392 = vmatpush1.msra.mxu0 %v9119_v18  ;;  %12673 = vst [vmem:[#allocation198_spill] sm:$0xff] %v9137_v1  ;;  %v9143_v18 = vld [vmem:[%s11476_s2 + $0x5b0] sm:$0xff] }
 0x427   :  { %2393 = vmatprep.subr.mxu0 %v9125_v35  ;;  %12674 = vst [vmem:[#allocation199_spill] sm:$0xff] %v9143_v18  ;;  %v9149_v35 = vld [vmem:[%s11476_s2 + $0x588] sm:$0xff] }
 0x428   :  { %2394 = vmatpush2.msra.mxu0 %v9131_v45  ;;  %12675 = vst [vmem:[#allocation200_spill] sm:$0xff] %v9149_v35  ;;  %v9155_v45 = vld [vmem:[%s11476_s2 + $0x580] sm:$0xff] }
 0x429   :  { %2395 = vmatprep.subr.mxu0 %v9137_v1  ;;  %12676 = vst [vmem:[#allocation201_spill] sm:$0xff] %v9155_v45  ;;  %v9161_v1 = vld [vmem:[%s11476_s2 + $0x558] sm:$0xff] }
 0x42a   :  { %2396 = vmatpush2.msra.mxu0 %v9143_v18  ;;  %12677 = vst [vmem:[#allocation202_spill] sm:$0xff] %v9161_v1  ;;  %v9167_v18 = vld [vmem:[%s11476_s2 + $0x550] sm:$0xff] }
 0x42b   :  { %2397 = vmatprep.subr.mxu0 %v9149_v35  ;;  %12678 = vst [vmem:[#allocation203_spill] sm:$0xff] %v9167_v18  ;;  %v9173_v35 = vld [vmem:[%s11476_s2 + $0x528] sm:$0xff] }
 0x42c   :  { %2398 = vmatpush2.msra.mxu0 %v9155_v45  ;;  %12679 = vst [vmem:[#allocation204_spill] sm:$0xff] %v9173_v35  ;;  %v9179_v45 = vld [vmem:[%s11476_s2 + $0x520] sm:$0xff] }
 0x42d   :  { %2399 = vmatprep.subr.mxu0 %v9161_v1  ;;  %12680 = vst [vmem:[#allocation205_spill] sm:$0xff] %v9179_v45  ;;  %v9185_v1 = vld [vmem:[%s11476_s2 + $0x4f8] sm:$0xff] }
 0x42e   :  { %2400 = vmatpush2.msra.mxu0 %v9167_v18  ;;  %12681 = vst [vmem:[#allocation206_spill] sm:$0xff] %v9185_v1  ;;  %v9191_v18 = vld [vmem:[%s11476_s2 + $0x4f0] sm:$0xff] }
 0x42f   :  { %2401 = vmatprep.subr.mxu0 %v9173_v35  ;;  %12682 = vst [vmem:[#allocation207_spill] sm:$0xff] %v9191_v18  ;;  %v9197_v35 = vld [vmem:[%s11476_s2 + $0x4c8] sm:$0xff] }
 0x430   :  { %2402 = vmatpush2.msra.mxu0 %v9179_v45  ;;  %12683 = vst [vmem:[#allocation208_spill] sm:$0xff] %v9197_v35  ;;  %v9203_v45 = vld [vmem:[%s11476_s2 + $0x4c0] sm:$0xff] }
 0x431   :  { %2403 = vmatprep.subr.mxu0 %v9185_v1  ;;  %12684 = vst [vmem:[#allocation209_spill] sm:$0xff] %v9203_v45  ;;  %v9209_v1 = vld [vmem:[%s11476_s2 + $0x498] sm:$0xff] }
 0x432   :  { %2404 = vmatpush2.msra.mxu0 %v9191_v18  ;;  %12685 = vst [vmem:[#allocation210_spill] sm:$0xff] %v9209_v1  ;;  %v9215_v18 = vld [vmem:[%s11476_s2 + $0x490] sm:$0xff] }
 0x433   :  { %2405 = vmatprep.subr.mxu0 %v9197_v35  ;;  %12686 = vst [vmem:[#allocation211_spill] sm:$0xff] %v9215_v18  ;;  %v9221_v35 = vld [vmem:[%s11476_s2 + $0x468] sm:$0xff] }
 0x434   :  { %2406 = vmatpush2.msra.mxu0 %v9203_v45  ;;  %12687 = vst [vmem:[#allocation212_spill] sm:$0xff] %v9221_v35  ;;  %v9227_v45 = vld [vmem:[%s11476_s2 + $0x460] sm:$0xff] }
 0x435   :  { %2407 = vmatprep.subr.mxu0 %v9209_v1  ;;  %12688 = vst [vmem:[#allocation213_spill] sm:$0xff] %v9227_v45  ;;  %v9233_v1 = vld [vmem:[%s11476_s2 + $0x438] sm:$0xff] }
 0x436   :  { %2408 = vmatpush2.msra.mxu0 %v9215_v18  ;;  %12689 = vst [vmem:[#allocation214_spill] sm:$0xff] %v9233_v1  ;;  %v9239_v18 = vld [vmem:[%s11476_s2 + $0x430] sm:$0xff] }
 0x437   :  { %2409 = vmatprep.subr.mxu0 %v9221_v35  ;;  %12690 = vst [vmem:[#allocation215_spill] sm:$0xff] %v9239_v18  ;;  %v9245_v35 = vld [vmem:[%s11476_s2 + $0x408] sm:$0xff] }
 0x438   :  { %2410 = vmatpush2.msra.mxu0 %v9227_v45  ;;  %12691 = vst [vmem:[#allocation216_spill] sm:$0xff] %v9245_v35  ;;  %v9251_v45 = vld [vmem:[%s11476_s2 + $0x400] sm:$0xff] }
 0x439   :  { %2411 = vmatprep.subr.mxu0 %v9233_v1  ;;  %12692 = vst [vmem:[#allocation217_spill] sm:$0xff] %v9251_v45  ;;  %v9257_v1 = vld [vmem:[%s11476_s2 + $0x3d8] sm:$0xff] }
 0x43a   :  { %2412 = vmatpush2.msra.mxu0 %v9239_v18  ;;  %12693 = vst [vmem:[#allocation218_spill] sm:$0xff] %v9257_v1  ;;  %v9263_v18 = vld [vmem:[%s11476_s2 + $0x3d0] sm:$0xff] }
 0x43b   :  { %2413 = vmatprep.subr.mxu0 %v9245_v35  ;;  %12694 = vst [vmem:[#allocation219_spill] sm:$0xff] %v9263_v18  ;;  %v9269_v35 = vld [vmem:[%s11476_s2 + $0x3a8] sm:$0xff] }
 0x43c   :  { %2414 = vmatpush2.msra.mxu0 %v9251_v45  ;;  %12695 = vst [vmem:[#allocation220_spill] sm:$0xff] %v9269_v35  ;;  %v9275_v45 = vld [vmem:[%s11476_s2 + $0x3a0] sm:$0xff] }
 0x43d   :  { %2415 = vmatprep.subr.mxu0 %v9257_v1  ;;  %12696 = vst [vmem:[#allocation221_spill] sm:$0xff] %v9275_v45  ;;  %v9281_v1 = vld [vmem:[%s11476_s2 + $0x378] sm:$0xff] }
 0x43e   :  { %2416 = vmatpush2.msra.mxu0 %v9263_v18  ;;  %12697 = vst [vmem:[#allocation222_spill] sm:$0xff] %v9281_v1  ;;  %v9287_v18 = vld [vmem:[%s11476_s2 + $0x370] sm:$0xff] }
 0x43f   :  { %2417 = vmatprep.subr.mxu0 %v9269_v35  ;;  %12698 = vst [vmem:[#allocation223_spill] sm:$0xff] %v9287_v18  ;;  %v9293_v35 = vld [vmem:[%s11476_s2 + $0x348] sm:$0xff] }
 0x440   :  { %2418 = vmatpush2.msra.mxu0 %v9275_v45  ;;  %12699 = vst [vmem:[#allocation224_spill] sm:$0xff] %v9293_v35  ;;  %v9299_v45 = vld [vmem:[%s11476_s2 + $0x340] sm:$0xff] }
 0x441   :  { %2419 = vmatprep.subr.mxu0 %v9281_v1  ;;  %12700 = vst [vmem:[#allocation225_spill] sm:$0xff] %v9299_v45  ;;  %v9305_v1 = vld [vmem:[%s11476_s2 + $0x318] sm:$0xff] }
 0x442   :  { %2420 = vmatpush2.msra.mxu0 %v9287_v18  ;;  %12701 = vst [vmem:[#allocation226_spill] sm:$0xff] %v9305_v1  ;;  %v9311_v18 = vld [vmem:[%s11476_s2 + $0x310] sm:$0xff] }
 0x443   :  { %2421 = vmatprep.subr.mxu0 %v9293_v35  ;;  %12702 = vst [vmem:[#allocation227_spill] sm:$0xff] %v9311_v18  ;;  %v9317_v35 = vld [vmem:[%s11476_s2 + $0x2d8] sm:$0xff] }
 0x444   :  { %2422 = vmatpush2.msra.mxu0 %v9299_v45  ;;  %12703 = vst [vmem:[#allocation228_spill] sm:$0xff] %v9317_v35 }
 0x445   :  { %2423 = vmatprep.subr.mxu0 %v9305_v1  ;;  %v12705_v1 = vld [vmem:[#allocation8_spill] sm:$0xff] }
 0x446   :  { %2424 = vmatpush2.msra.mxu0 %v9311_v18 }
 0x447   :  { %2618 = vmatprep.subr.mxu0 %v9317_v35 }
 0x486   :  { %v2016_v45 = vpop.f32.mrf.mxu0  ;;  %v2093_v23 = vpop.f32.mrf.mxu1 }
 0x487   :  { %v2181_v10 = vadd.f32 %v2016_v45, %v12704_v8 }
 0x488   :  { %v2018_v6 = vpop.f32.mrf.mxu0  ;;  %v2095_v52 = vpop.f32.mrf.mxu1 }
 0x489   :  { %v2182_v0 = vadd.f32 %v2018_v6, %v12705_v1  ;;  %v3905_v26 = vmul.f32 -1.442695, %v2181_v10  ;;  %v12709_v6 = vld [vmem:[#allocation9_spill] sm:$0xff]  ;;  %v2209_v10 = vadd.f32 %v2093_v23, %v414_v19 }
 0x48a   :  { %v416_v1 = vadd.f32 %v12709_v6, %v6702_v32 }
 0x48b   :  { %v2022_v50 = vpop.f32.mrf.mxu0  ;;  %v3906_v18 = vmul.f32 -1.442695, %v2182_v0  ;;  %4137 = vpow2.f32 %v3905_v26  ;;  %v2099_v8 = vpop.f32.mrf.mxu1  ;;  %v12711_v26 = vld [vmem:[#allocation11_spill] sm:$0xff] }
 0x48c   :  { %v2183_v9 = vadd.f32 %v2022_v50, %v12706_v25  ;;  %v12710_v25 = vld [vmem:[#allocation10_spill] sm:$0xff]  ;;  %v2210_v50 = vadd.f32 %v2095_v52, %v416_v1 }
 0x48d   :  { %v2024_v59 = vpop.f32.mrf.mxu0  ;;  %4139 = vpow2.f32 %v3906_v18  ;;  %v420_v0 = vadd.f32 %v12710_v25, %v6696_v31 }
 0x48e   :  { %v2184_v29 = vadd.f32 %v2024_v59, %v12707_v57  ;;  %v3907_v12 = vmul.f32 -1.442695, %v2183_v9  ;;  %v2101_v57 = vpop.f32.mrf.mxu1  ;;  %v422_v9 = vadd.f32 %v12711_v26, %v6702_v32  ;;  %v3910_v18 = vmul.f32 -1.442695, %v2210_v50 }
 0x48f   :  { %v2211_v59 = vadd.f32 %v2099_v8, %v420_v0 }
 0x490   :  { %v3908_v35 = vmul.f32 -1.442695, %v2184_v29  ;;  %4141 = vpow2.f32 %v3907_v12  ;;  %v3909_v29 = vmul.f32 -1.442695, %v2209_v10  ;;  %v2212_v45 = vadd.f32 %v2101_v57, %v422_v9 }
 0x491   :  { %v3911_v12 = vmul.f32 -1.442695, %v2211_v59 }
 0x492   :  { %4143 = vpow2.f32 %v3908_v35  ;;  %v3912_v13 = vmul.f32 -1.442695, %v2212_v45 }
 0x493   :  { %4145 = vpow2.f32 %v3909_v29 }
 0x494   :  { %4147 = vpow2.f32 %v3910_v18 }
 0x495   :  { %4149 = vpow2.f32 %v3911_v12 }
 0x496   :  { %4151 = vpow2.f32 %v3912_v13  ;;  %v12712_v13 = vld [vmem:[#allocation32_spill] sm:$0xff] }
 0x497   :  { %v575_v45 = vadd.f32 %v12712_v13, %v6709_v21 }
 0x498   :  { %v4138_v61 = vpop.eup %4137 }
 0x499   :  { %v2197_v6 = vadd.f32 1.0, %v4138_v61 }
 0x49a   :  { %v4140_v62 = vpop.eup %4139 }
 0x49b   :  { %v2198_v23 = vadd.f32 1.0, %v4140_v62  ;;  %4153 = vrcp.f32 %v2197_v6  ;;  %v12713_v6 = vld [vmem:[#allocation33_spill] sm:$0xff] }
 0x49d   :  { %v4142_v19 = vpop.eup %4141  ;;  %4155 = vrcp.f32 %v2198_v23 }
 0x49e   :  { %v2199_v52 = vadd.f32 1.0, %v4142_v19  ;;  %v577_v19 = vadd.f32 %v12713_v6, %v6718_v55 }
 0x49f   :  { %v4144_v35 = vpop.eup %4143 }
 0x4a0   :  { %v2200_v1 = vadd.f32 1.0, %v4144_v35  ;;  %4157 = vrcp.f32 %v2199_v52  ;;  %v4146_v8 = vpop.eup %4145 }
 0x4a1   :  { %v4148_v10 = vpop.eup %4147  ;;  %v2225_v0 = vadd.f32 1.0, %v4146_v8 }
 0x4a2   :  { %4159 = vrcp.f32 %v2200_v1  ;;  %v4150_v25 = vpop.eup %4149  ;;  %v2226_v26 = vadd.f32 1.0, %v4148_v10 }
 0x4a3   :  { %v4152_v57 = vpop.eup %4151  ;;  %v2227_v29 = vadd.f32 1.0, %v4150_v25  ;;  %4161 = vrcp.f32 %v2225_v0  ;;  %v12714_v25 = vld [vmem:[#allocation64_spill] sm:$0xff] }
 0x4a4   :  { %v2228_v23 = vadd.f32 1.0, %v4152_v57  ;;  %4163 = vrcp.f32 %v2226_v26  ;;  %v12715_v57 = vld [vmem:[#allocation34_spill] sm:$0xff] }
 0x4a5   :  { %4165 = vrcp.f32 %v2227_v29  ;;  %v583_v26 = vadd.f32 %v12715_v57, %v6718_v55 }
 0x4a8   :  { %v4154_v59 = vpop.eup %4153 }
 0x4aa   :  { %v4156_v12 = vpop.eup %4155 }
 0x4ad   :  { %v4158_v10 = vpop.eup %4157 }
 0x4af   :  { %v4160_v13 = vpop.eup %4159 }
 0x4c7   :  { %v2170_v50 = vpop.f32.mrf.mxu0 }
 0x4c8   :  { %v2237_v9 = vadd.f32 %v2170_v50, %v6706_v4  ;;  %v581_v50 = vadd.f32 %v12714_v25, %v6709_v21 }
 0x4c9   :  { %v2172_v62 = vpop.f32.mrf.mxu0 }
 0x4ca   :  { %v2241_v18 = vmul.f32 %v4154_v59, %v2237_v9  ;;  %v2238_v61 = vadd.f32 %v2172_v62, %v6715_v63 }
 0x4cb   :  { %v2176_v35 = vpop.f32.mrf.mxu0 }
 0x4cc   :  { %v2245_v52 = vadd.f32 %v2241_v18, %v575_v45  ;;  %v2242_v1 = vmul.f32 %v4156_v12, %v2238_v61  ;;  %v2239_v8 = vadd.f32 %v2176_v35, %v6706_v4  ;;  %v4162_v12 = vpop.eup %4161 }
 0x4cd   :  { %v2178_v0 = vpop.f32.mrf.mxu0  ;;  %v4164_v6 = vpop.eup %4163  ;;  %v2253_v35 = vsub.f32 1.0, %v4162_v12 }
 0x4ce   :  { %4167 = vtanh.f32 %v2245_v52  ;;  %v2246_v9 = vadd.f32 %v2242_v1, %v577_v19  ;;  %v2243_v59 = vmul.f32 %v4158_v10, %v2239_v8  ;;  %v2240_v62 = vadd.f32 %v2178_v0, %v6715_v63  ;;  %v4166_v29 = vpop.eup %4165 }
 0x4cf   :  { %4169 = vrcp.f32 %v2228_v23  ;;  %v2254_v1 = vsub.f32 1.0, %v4164_v6  ;;  %v2261_v10 = vmul.f32 %v4162_v12, %v8176_v46  ;;  %v2262_v0 = vmul.f32 %v4164_v6, %v8178_v56  ;;  %v12744_v12 = vld [vmem:[#allocation101_spill] sm:$0xff]  ;;  %v12745_v6 = vld [vmem:[#allocation106_spill] sm:$0xff] }
 0x4d0   :  { %4171 = vtanh.f32 %v2246_v9  ;;  %v2247_v45 = vadd.f32 %v2243_v59, %v581_v50  ;;  %v2244_v18 = vmul.f32 %v4160_v13, %v2240_v62  ;;  %v2255_v50 = vsub.f32 1.0, %v4166_v29 }
 0x4d2   :  { %4173 = vtanh.f32 %v2247_v45  ;;  %v2248_v61 = vadd.f32 %v2244_v18, %v583_v26  ;;  %v2263_v26 = vmul.f32 %v4166_v29, %v8184_v40  ;;  %v9364_v40 = vld [vmem:[%s11476_s2 + $0x2d0] sm:$0xff]  ;;  %v12746_v29 = vld [vmem:[#allocation103_spill] sm:$0xff] }
 0x4d4   :  { %4175 = vtanh.f32 %v2248_v61 }
 0x4db   :  { %v4168_v52 = vpop.eup %4167 }
 0x4dc   :  { %v4170_v19 = vpop.eup %4169  ;;  %v2257_v8 = vmul.f32 %v4168_v52, %v2253_v35  ;;  %v12747_v35 = vld [vmem:[#allocation108_spill] sm:$0xff]  ;;  %v12748_v52 = vld [vmem:[#allocation105_spill] sm:$0xff] }
 0x4dd   :  { %v4172_v23 = vpop.eup %4171  ;;  %v2256_v13 = vsub.f32 1.0, %v4170_v19  ;;  %v2264_v18 = vmul.f32 %v4170_v19, %v8194_v36  ;;  %v9371_v36 = vld [vmem:[%s11476_s2 + $0x2a8] sm:$0xff]  ;;  %v12749_v19 = vld [vmem:[#allocation110_spill] sm:$0xff] }
 0x4de   :  { %v2258_v25 = vmul.f32 %v4172_v23, %v2254_v1  ;;  %v9346_v9 = vadd.f32 %v2261_v10, %v2257_v8  ;;  %v12750_v1 = vld [vmem:[#allocation107_spill] sm:$0xff]  ;;  %v12751_v8 = vld [vmem:[#allocation112_spill] sm:$0xff]  ;;  %v12752_v10 = vld [vmem:[#allocation109_spill] sm:$0xff] }
 0x4df   :  { %v4174_v59 = vpop.eup %4173  ;;  %v12753_v23 = vld [vmem:[#allocation114_spill] sm:$0xff] }
 0x4e0   :  { %v9348_v62 = vadd.f32 %v2262_v0, %v2258_v25  ;;  %v2259_v57 = vmul.f32 %v4174_v59, %v2255_v50  ;;  %v12754_v25 = vld [vmem:[#allocation111_spill] sm:$0xff]  ;;  %v12755_v0 = vld [vmem:[#allocation116_spill] sm:$0xff]  ;;  %v12756_v50 = vld [vmem:[#allocation113_spill] sm:$0xff] }
 0x4e1   :  { %v4176_v45 = vpop.eup %4175  ;;  %v12757_v59 = vld [vmem:[#allocation118_spill] sm:$0xff] }
 0x4e2   :  { %2348 = vmatprep.mubr.f32.mxu1 %v9348_v62  ;;  %2425 = vmatprep.mubr.f32.mxu0 %v9348_v62  ;;  %v2260_v46 = vmul.f32 %v4176_v45, %v2256_v13  ;;  %v9354_v61 = vadd.f32 %v2263_v26, %v2259_v57  ;;  %v12758_v13 = vld [vmem:[#allocation115_spill] sm:$0xff]  ;;  %v12759_v57 = vld [vmem:[#allocation120_spill] sm:$0xff]  ;;  %v12760_v26 = vld [vmem:[#allocation117_spill] sm:$0xff] }
 0x4e3   :  { %2349 = vmatmul.mubr.f32.vlgmr.msra.gmra.mxu1 %v9346_v9  ;;  %2426 = vmatmul.mubr.f32.vlgmr.msra.gmra.mxu0 %v9346_v9  ;;  %v12761_v45 = vld [vmem:[#allocation122_spill] sm:$0xff] }
 0x4e4   :  { %2439 = vmatpush1.msra.mxu1 %v8191_v54  ;;  %v9359_v56 = vadd.f32 %v2264_v18, %v2260_v46  ;;  %2619 = vmatpush1.msra.mxu0 %v9364_v40  ;;  %v9386_v54 = vld [vmem:[%s11476_s2 + $0x2a0] sm:$0xff]  ;;  %v12763_v18 = vld [vmem:[#allocation124_spill] sm:$0xff] }
 0x4e5   :  { %2440 = vmatprep.subr.mxu1 %v8200_v7  ;;  %2620 = vmatprep.subr.mxu0 %v9371_v36  ;;  %v9393_v7 = vld [vmem:[%s11476_s2 + $0x278] sm:$0xff]  ;;  %v12762_v46 = vld [vmem:[#allocation119_spill] sm:$0xff] }
 0x4e6   :  { %2441 = vmatpush1.msra.mxu1 %v8207_v2  ;;  %2354 = vmatprep.mubr.f32.mxu1 %v9359_v56  ;;  %v9400_v2 = vld [vmem:[%s11476_s2 + $0x270] sm:$0xff] }
 0x4e7   :  { %2431 = vmatprep.mubr.f32.mxu0 %v9359_v56  ;;  %2442 = vmatprep.subr.mxu1 %v8215_v27  ;;  %v9407_v27 = vld [vmem:[%s11476_s2 + $0x248] sm:$0xff] }
 0x4e8   :  { %2355 = vmatmul.mubr.f32.gmra.mxu1 %v9354_v61  ;;  %2432 = vmatmul.mubr.f32.gmra.mxu0 %v9354_v61 }
 0x4e9   :  { %2443 = vmatpush1.msra.mxu1 %v8223_v34  ;;  %2502 = vmatprep.mubr.f32.mxu1 %v9348_v62  ;;  %v12716_v34 = vld [vmem:[#allocation75_spill] sm:$0xff] }
 0x4ea   :  { %2444 = vmatprep.subr.mxu1 %v8230_v30  ;;  %2621 = vmatpush1.msra.mxu0 %v9386_v54  ;;  %v12717_v30 = vld [vmem:[#allocation78_spill] sm:$0xff] }
 0x4eb   :  { %2445 = vmatpush1.msra.mxu1 %v8237_v11  ;;  %2622 = vmatprep.subr.mxu0 %v9393_v7  ;;  %v12718_v11 = vld [vmem:[#allocation76_spill] sm:$0xff] }
 0x4ec   :  { %2446 = vmatprep.subr.mxu1 %v8244_v49  ;;  %2623 = vmatpush1.msra.mxu0 %v9400_v2  ;;  %v12719_v49 = vld [vmem:[#allocation80_spill] sm:$0xff] }
 0x4ed   :  { %2447 = vmatpush1.msra.mxu1 %v8251_v22  ;;  %2624 = vmatprep.subr.mxu0 %v9407_v27  ;;  %v12720_v22 = vld [vmem:[#allocation77_spill] sm:$0xff] }
 0x4ee   :  { %2448 = vmatprep.subr.mxu1 %v8258_v60  ;;  %2625 = vmatpush1.msra.mxu0 %v8264_v17  ;;  %v12721_v60 = vld [vmem:[#allocation82_spill] sm:$0xff]  ;;  %v12722_v17 = vld [vmem:[#allocation79_spill] sm:$0xff] }
 0x4ef   :  { %2449 = vmatpush1.msra.mxu1 %v8270_v28  ;;  %2626 = vmatprep.subr.mxu0 %v8276_v58  ;;  %v12723_v28 = vld [vmem:[#allocation84_spill] sm:$0xff]  ;;  %v12724_v58 = vld [vmem:[#allocation81_spill] sm:$0xff] }
 0x4f0   :  { %2450 = vmatprep.subr.mxu1 %v8282_v53  ;;  %2627 = vmatpush1.msra.mxu0 %v8288_v20  ;;  %v12725_v53 = vld [vmem:[#allocation86_spill] sm:$0xff]  ;;  %v12726_v20 = vld [vmem:[#allocation83_spill] sm:$0xff] }
 0x4f1   :  { %2451 = vmatpush1.msra.mxu1 %v8294_v14  ;;  %2628 = vmatprep.subr.mxu0 %v8300_v24  ;;  %v12727_v14 = vld [vmem:[#allocation88_spill] sm:$0xff]  ;;  %v12728_v24 = vld [vmem:[#allocation85_spill] sm:$0xff] }
 0x4f2   :  { %2452 = vmatprep.subr.mxu1 %v8306_v5  ;;  %2629 = vmatpush1.msra.mxu0 %v8312_v38  ;;  %v12729_v5 = vld [vmem:[#allocation90_spill] sm:$0xff]  ;;  %v12730_v38 = vld [vmem:[#allocation87_spill] sm:$0xff] }
 0x4f3   :  { %2453 = vmatpush1.msra.mxu1 %v8318_v41  ;;  %2630 = vmatprep.subr.mxu0 %v8324_v42  ;;  %v12731_v41 = vld [vmem:[#allocation92_spill] sm:$0xff]  ;;  %v12732_v42 = vld [vmem:[#allocation89_spill] sm:$0xff] }
 0x4f4   :  { %2454 = vmatprep.subr.mxu1 %v8330_v51  ;;  %2631 = vmatpush1.msra.mxu0 %v8336_v37  ;;  %v12733_v51 = vld [vmem:[#allocation94_spill] sm:$0xff]  ;;  %v12734_v37 = vld [vmem:[#allocation91_spill] sm:$0xff] }
 0x4f5   :  { %2455 = vmatpush1.msra.mxu1 %v8342_v39  ;;  %2632 = vmatprep.subr.mxu0 %v8348_v44  ;;  %v12735_v39 = vld [vmem:[#allocation96_spill] sm:$0xff]  ;;  %v12736_v44 = vld [vmem:[#allocation93_spill] sm:$0xff] }
 0x4f6   :  { %2456 = vmatprep.subr.mxu1 %v8354_v48  ;;  %2633 = vmatpush1.msra.mxu0 %v8360_v16  ;;  %v12737_v48 = vld [vmem:[#allocation98_spill] sm:$0xff]  ;;  %v12738_v16 = vld [vmem:[#allocation95_spill] sm:$0xff] }
 0x4f7   :  { %2457 = vmatpush1.msra.mxu1 %v8366_v3  ;;  %2634 = vmatprep.subr.mxu0 %v8372_v47  ;;  %v12739_v3 = vld [vmem:[#allocation100_spill] sm:$0xff]  ;;  %v12740_v47 = vld [vmem:[#allocation97_spill] sm:$0xff] }
 0x4f8   :  { %2458 = vmatprep.subr.mxu1 %v8378_v33  ;;  %2635 = vmatpush1.msra.mxu0 %v8384_v15  ;;  %v12741_v33 = vld [vmem:[#allocation102_spill] sm:$0xff]  ;;  %v12742_v15 = vld [vmem:[#allocation99_spill] sm:$0xff] }
 0x4f9   :  { %2459 = vmatpush1.msra.mxu1 %v8390_v43  ;;  %2636 = vmatprep.subr.mxu0 %v12716_v34  ;;  %v12743_v43 = vld [vmem:[#allocation104_spill] sm:$0xff]  ;;  %v12764_v34 = vld [vmem:[#allocation121_spill] sm:$0xff] }
 0x4fa   :  { %2460 = vmatprep.subr.mxu1 %v12717_v30  ;;  %2637 = vmatpush1.msra.mxu0 %v12718_v11  ;;  %v12765_v30 = vld [vmem:[#allocation126_spill] sm:$0xff]  ;;  %v12766_v11 = vld [vmem:[#allocation123_spill] sm:$0xff] }
 0x4fb   :  { %2461 = vmatpush1.msra.mxu1 %v12719_v49  ;;  %2638 = vmatprep.subr.mxu0 %v12720_v22  ;;  %v12767_v49 = vld [vmem:[#allocation128_spill] sm:$0xff]  ;;  %v12768_v22 = vld [vmem:[#allocation125_spill] sm:$0xff] }
 0x4fc   :  { %2462 = vmatprep.subr.mxu1 %v12721_v60  ;;  %2639 = vmatpush1.msra.mxu0 %v12722_v17  ;;  %v12769_v60 = vld [vmem:[#allocation130_spill] sm:$0xff]  ;;  %v12770_v17 = vld [vmem:[#allocation127_spill] sm:$0xff] }
 0x4fd   :  { %2463 = vmatpush1.msra.mxu1 %v12723_v28  ;;  %2640 = vmatprep.subr.mxu0 %v12724_v58  ;;  %v12771_v28 = vld [vmem:[#allocation132_spill] sm:$0xff]  ;;  %v12772_v58 = vld [vmem:[#allocation129_spill] sm:$0xff] }
 0x4fe   :  { %2464 = vmatprep.subr.mxu1 %v12725_v53  ;;  %2641 = vmatpush1.msra.mxu0 %v12726_v20  ;;  %v12773_v53 = vld [vmem:[#allocation134_spill] sm:$0xff]  ;;  %v12774_v20 = vld [vmem:[#allocation131_spill] sm:$0xff] }
 0x4ff   :  { %2465 = vmatpush1.msra.mxu1 %v12727_v14  ;;  %2642 = vmatprep.subr.mxu0 %v12728_v24  ;;  %v12775_v14 = vld [vmem:[#allocation136_spill] sm:$0xff]  ;;  %v12776_v24 = vld [vmem:[#allocation133_spill] sm:$0xff] }
 0x500   :  { %2466 = vmatprep.subr.mxu1 %v12729_v5  ;;  %2643 = vmatpush1.msra.mxu0 %v12730_v38  ;;  %v12777_v5 = vld [vmem:[#allocation138_spill] sm:$0xff]  ;;  %v12778_v38 = vld [vmem:[#allocation135_spill] sm:$0xff] }
 0x501   :  { %2467 = vmatpush1.msra.mxu1 %v12731_v41  ;;  %2644 = vmatprep.subr.mxu0 %v12732_v42  ;;  %v12779_v41 = vld [vmem:[#allocation140_spill] sm:$0xff]  ;;  %v12780_v42 = vld [vmem:[#allocation137_spill] sm:$0xff] }
 0x502   :  { %2468 = vmatprep.subr.mxu1 %v12733_v51  ;;  %2645 = vmatpush1.msra.mxu0 %v12734_v37  ;;  %v12781_v51 = vld [vmem:[#allocation142_spill] sm:$0xff]  ;;  %v12782_v37 = vld [vmem:[#allocation139_spill] sm:$0xff] }
 0x503   :  { %2469 = vmatpush1.msra.mxu1 %v12735_v39  ;;  %2646 = vmatprep.subr.mxu0 %v12736_v44  ;;  %v12783_v39 = vld [vmem:[#allocation144_spill] sm:$0xff]  ;;  %v12784_v44 = vld [vmem:[#allocation141_spill] sm:$0xff] }
 0x504   :  { %2470 = vmatprep.subr.mxu1 %v12737_v48  ;;  %2647 = vmatpush1.msra.mxu0 %v12738_v16  ;;  %v12785_v48 = vld [vmem:[#allocation146_spill] sm:$0xff]  ;;  %v12786_v16 = vld [vmem:[#allocation143_spill] sm:$0xff] }
 0x505   :  { %2471 = vmatpush2.msra.mxu1 %v12739_v3  ;;  %2648 = vmatprep.subr.mxu0 %v12740_v47  ;;  %v12787_v3 = vld [vmem:[#allocation148_spill] sm:$0xff]  ;;  %v12788_v47 = vld [vmem:[#allocation145_spill] sm:$0xff] }
 0x506   :  { %2472 = vmatprep.subr.mxu1 %v12741_v33  ;;  %2649 = vmatpush1.msra.mxu0 %v12742_v15  ;;  %v12789_v33 = vld [vmem:[#allocation150_spill] sm:$0xff]  ;;  %v12790_v15 = vld [vmem:[#allocation147_spill] sm:$0xff] }
 0x507   :  { %2473 = vmatpush2.msra.mxu1 %v12743_v43  ;;  %2650 = vmatprep.subr.mxu0 %v12744_v12  ;;  %v12791_v43 = vld [vmem:[#allocation152_spill] sm:$0xff]  ;;  %v12792_v12 = vld [vmem:[#allocation149_spill] sm:$0xff] }
 0x508   :  { %2474 = vmatprep.subr.mxu1 %v12745_v6  ;;  %2651 = vmatpush2.msra.mxu0 %v12746_v29  ;;  %v12793_v6 = vld [vmem:[#allocation154_spill] sm:$0xff]  ;;  %v12794_v29 = vld [vmem:[#allocation151_spill] sm:$0xff] }
 0x509   :  { %2475 = vmatpush2.msra.mxu1 %v12747_v35  ;;  %2652 = vmatprep.subr.mxu0 %v12748_v52  ;;  %v12795_v35 = vld [vmem:[#allocation156_spill] sm:$0xff]  ;;  %v12796_v52 = vld [vmem:[#allocation153_spill] sm:$0xff] }
 0x50a   :  { %2476 = vmatprep.subr.mxu1 %v12749_v19  ;;  %2653 = vmatpush2.msra.mxu0 %v12750_v1  ;;  %v12797_v19 = vld [vmem:[#allocation158_spill] sm:$0xff]  ;;  %v12798_v1 = vld [vmem:[#allocation155_spill] sm:$0xff] }
 0x50b   :  { %2477 = vmatpush2.msra.mxu1 %v12751_v8  ;;  %2654 = vmatprep.subr.mxu0 %v12752_v10  ;;  %v12799_v8 = vld [vmem:[#allocation160_spill] sm:$0xff]  ;;  %v12800_v10 = vld [vmem:[#allocation157_spill] sm:$0xff] }
 0x50c   :  { %2478 = vmatprep.subr.mxu1 %v12753_v23  ;;  %2655 = vmatpush2.msra.mxu0 %v12754_v25  ;;  %v12801_v23 = vld [vmem:[#allocation162_spill] sm:$0xff]  ;;  %v12802_v25 = vld [vmem:[#allocation159_spill] sm:$0xff] }
 0x50d   :  { %2479 = vmatpush2.msra.mxu1 %v12755_v0  ;;  %2656 = vmatprep.subr.mxu0 %v12756_v50  ;;  %v12803_v0 = vld [vmem:[#allocation166_spill] sm:$0xff]  ;;  %v12804_v50 = vld [vmem:[#allocation161_spill] sm:$0xff] }
 0x50e   :  { %2480 = vmatprep.subr.mxu1 %v12757_v59  ;;  %2657 = vmatpush2.msra.mxu0 %v12758_v13  ;;  %v12805_v59 = vld [vmem:[#allocation168_spill] sm:$0xff]  ;;  %v12806_v13 = vld [vmem:[#allocation163_spill] sm:$0xff] }
 0x50f   :  { %2481 = vmatpush2.msra.mxu1 %v12759_v57  ;;  %2658 = vmatprep.subr.mxu0 %v12760_v26  ;;  %v12807_v57 = vld [vmem:[#allocation164_spill] sm:$0xff]  ;;  %v12808_v26 = vld [vmem:[#allocation165_spill] sm:$0xff] }
 0x510   :  { %2482 = vmatprep.subr.mxu1 %v12761_v45  ;;  %2659 = vmatpush2.msra.mxu0 %v12762_v46  ;;  %v12809_v45 = vld [vmem:[#allocation171_spill] sm:$0xff] }
 0x511   :  { %2483 = vmatpush2.msra.mxu1 %v12763_v18  ;;  %2660 = vmatprep.subr.mxu0 %v12764_v34  ;;  %v12810_v46 = vld [vmem:[#allocation167_spill] sm:$0xff]  ;;  %v12811_v18 = vld [vmem:[#allocation173_spill] sm:$0xff] }
 0x512   :  { %2484 = vmatprep.subr.mxu1 %v12765_v30  ;;  %2661 = vmatpush2.msra.mxu0 %v12766_v11  ;;  %v12812_v34 = vld [vmem:[#allocation169_spill] sm:$0xff]  ;;  %v12813_v30 = vld [vmem:[#allocation170_spill] sm:$0xff]  ;;  %v12814_v11 = vld [vmem:[#allocation175_spill] sm:$0xff] }
 0x513   :  { %2485 = vmatpush2.msra.mxu1 %v12767_v49  ;;  %2662 = vmatprep.subr.mxu0 %v12768_v22  ;;  %v12815_v49 = vld [vmem:[#allocation172_spill] sm:$0xff]  ;;  %v12816_v22 = vld [vmem:[#allocation177_spill] sm:$0xff] }
 0x514   :  { %2486 = vmatprep.subr.mxu1 %v12769_v60  ;;  %2663 = vmatpush2.msra.mxu0 %v12770_v17  ;;  %v12817_v60 = vld [vmem:[#allocation174_spill] sm:$0xff]  ;;  %v12818_v17 = vld [vmem:[#allocation176_spill] sm:$0xff] }
 0x515   :  { %2487 = vmatpush2.msra.mxu1 %v12771_v28  ;;  %2664 = vmatprep.subr.mxu0 %v12772_v58  ;;  %v12819_v28 = vld [vmem:[#allocation178_spill] sm:$0xff]  ;;  %v12820_v58 = vld [vmem:[#allocation179_spill] sm:$0xff] }
 0x516   :  { %2488 = vmatprep.subr.mxu1 %v12773_v53  ;;  %2665 = vmatpush2.msra.mxu0 %v12774_v20  ;;  %v12821_v53 = vld [vmem:[#allocation180_spill] sm:$0xff]  ;;  %v12822_v20 = vld [vmem:[#allocation181_spill] sm:$0xff] }
 0x517   :  { %2489 = vmatpush2.msra.mxu1 %v12775_v14  ;;  %2666 = vmatprep.subr.mxu0 %v12776_v24  ;;  %v12823_v14 = vld [vmem:[#allocation182_spill] sm:$0xff]  ;;  %v12824_v24 = vld [vmem:[#allocation183_spill] sm:$0xff] }
 0x518   :  { %2490 = vmatprep.subr.mxu1 %v12777_v5  ;;  %2667 = vmatpush2.msra.mxu0 %v12778_v38  ;;  %v12825_v5 = vld [vmem:[#allocation184_spill] sm:$0xff]  ;;  %v12826_v38 = vld [vmem:[#allocation185_spill] sm:$0xff] }
 0x519   :  { %2491 = vmatpush2.msra.mxu1 %v12779_v41  ;;  %2668 = vmatprep.subr.mxu0 %v12780_v42  ;;  %v12827_v41 = vld [vmem:[#allocation186_spill] sm:$0xff]  ;;  %v12828_v42 = vld [vmem:[#allocation187_spill] sm:$0xff] }
 0x51a   :  { %2492 = vmatprep.subr.mxu1 %v12781_v51  ;;  %2669 = vmatpush2.msra.mxu0 %v12782_v37  ;;  %v12829_v51 = vld [vmem:[#allocation188_spill] sm:$0xff]  ;;  %v12830_v37 = vld [vmem:[#allocation189_spill] sm:$0xff] }
 0x51b   :  { %2493 = vmatpush2.msra.mxu1 %v12783_v39  ;;  %2670 = vmatprep.subr.mxu0 %v12784_v44  ;;  %v12831_v39 = vld [vmem:[#allocation190_spill] sm:$0xff]  ;;  %v12832_v44 = vld [vmem:[#allocation191_spill] sm:$0xff] }
 0x51c   :  { %2494 = vmatprep.subr.mxu1 %v12785_v48  ;;  %2671 = vmatpush2.msra.mxu0 %v12786_v16  ;;  %v12833_v48 = vld [vmem:[#allocation192_spill] sm:$0xff]  ;;  %v12834_v16 = vld [vmem:[#allocation193_spill] sm:$0xff] }
 0x51d   :  { %2495 = vmatpush2.msra.mxu1 %v12787_v3  ;;  %2672 = vmatprep.subr.mxu0 %v12788_v47  ;;  %v12835_v3 = vld [vmem:[#allocation194_spill] sm:$0xff]  ;;  %v12836_v47 = vld [vmem:[#allocation195_spill] sm:$0xff] }
 0x51e   :  { %2496 = vmatprep.subr.mxu1 %v12789_v33  ;;  %2673 = vmatpush2.msra.mxu0 %v12790_v15  ;;  %v12837_v33 = vld [vmem:[#allocation196_spill] sm:$0xff]  ;;  %v12838_v15 = vld [vmem:[#allocation197_spill] sm:$0xff] }
 0x51f   :  { %2497 = vmatpush2.msra.mxu1 %v12791_v43  ;;  %2674 = vmatprep.subr.mxu0 %v12792_v12  ;;  %v12839_v43 = vld [vmem:[#allocation198_spill] sm:$0xff]  ;;  %v12840_v12 = vld [vmem:[#allocation199_spill] sm:$0xff] }
 0x520   :  { %2498 = vmatprep.subr.mxu1 %v12793_v6  ;;  %2675 = vmatpush2.msra.mxu0 %v12794_v29  ;;  %v12841_v6 = vld [vmem:[#allocation200_spill] sm:$0xff]  ;;  %v12842_v29 = vld [vmem:[#allocation201_spill] sm:$0xff] }
 0x521   :  { %2499 = vmatpush2.msra.mxu1 %v12795_v35  ;;  %2676 = vmatprep.subr.mxu0 %v12796_v52  ;;  %v12843_v35 = vld [vmem:[#allocation202_spill] sm:$0xff]  ;;  %v12844_v52 = vld [vmem:[#allocation203_spill] sm:$0xff] }
 0x522   :  { %2500 = vmatprep.subr.mxu1 %v12797_v19  ;;  %2677 = vmatpush2.msra.mxu0 %v12798_v1  ;;  %v12845_v19 = vld [vmem:[#allocation204_spill] sm:$0xff]  ;;  %v12846_v1 = vld [vmem:[#allocation205_spill] sm:$0xff] }
 0x523   :  { %2501 = vmatpush2.msra.mxu1 %v12799_v8  ;;  %2678 = vmatprep.subr.mxu0 %v12800_v10  ;;  %v12847_v8 = vld [vmem:[#allocation206_spill] sm:$0xff]  ;;  %v12848_v10 = vld [vmem:[#allocation207_spill] sm:$0xff] }
 0x524   :  { %2503 = vmatmul.mubr.f32.vlgmr.msra.gmra.mxu1 %v9346_v9  ;;  %2695 = vmatprep.subr.mxu1 %v12801_v23  ;;  %v12849_v23 = vld [vmem:[#allocation208_spill] sm:$0xff] }
 0x525   :  { %2508 = vmatprep.mubr.f32.mxu1 %v9359_v56  ;;  %2696 = vmatpush1.msra.mxu1 %v12802_v25  ;;  %v12850_v25 = vld [vmem:[#allocation209_spill] sm:$0xff] }
 0x526   :  { %2697 = vmatprep.subr.mxu1 %v12803_v0  ;;  %2679 = vmatpush2.msra.mxu0 %v12804_v50  ;;  %v12851_v0 = vld [vmem:[#allocation210_spill] sm:$0xff]  ;;  %v12852_v50 = vld [vmem:[#allocation211_spill] sm:$0xff] }
 0x527   :  { %2698 = vmatpush1.msra.mxu1 %v12805_v59  ;;  %2680 = vmatprep.subr.mxu0 %v12806_v13  ;;  %v12853_v59 = vld [vmem:[#allocation212_spill] sm:$0xff]  ;;  %v12854_v13 = vld [vmem:[#allocation213_spill] sm:$0xff] }
 0x528   :  { %2509 = vmatmul.mubr.f32.gmra.mxu1 %v9354_v61  ;;  %2699 = vmatprep.subr.mxu1 %v12807_v57  ;;  %v12855_v57 = vld [vmem:[#allocation214_spill] sm:$0xff] }
 0x529   :  { %2700 = vmatpush1.msra.mxu1 %v12808_v26  ;;  %2681 = vmatpush2.msra.mxu0 %v12809_v45  ;;  %v12856_v26 = vld [vmem:[#allocation215_spill] sm:$0xff]  ;;  %v12857_v45 = vld [vmem:[#allocation216_spill] sm:$0xff] }
 0x52a   :  { %2701 = vmatprep.subr.mxu1 %v12810_v46  ;;  %2772 = vmatprep.subr.mxu0 %v12811_v18  ;;  %v12858_v46 = vld [vmem:[#allocation217_spill] sm:$0xff]  ;;  %v12859_v18 = vld [vmem:[#allocation218_spill] sm:$0xff] }
 0x52b   :  { %2702 = vmatpush1.msra.mxu1 %v12812_v34  ;;  %v12860_v34 = vld [vmem:[#allocation219_spill] sm:$0xff] }
 0x52c   :  { %2703 = vmatprep.subr.mxu1 %v12813_v30  ;;  %v12861_v30 = vld [vmem:[#allocation220_spill] sm:$0xff] }
 0x52d   :  { %2704 = vmatpush1.msra.mxu1 %v12814_v11  ;;  %v12862_v11 = vld [vmem:[#allocation221_spill] sm:$0xff] }
 0x52e   :  { %2705 = vmatprep.subr.mxu1 %v12815_v49  ;;  %v12863_v49 = vld [vmem:[#allocation222_spill] sm:$0xff] }
 0x52f   :  { %2706 = vmatpush1.msra.mxu1 %v12816_v22  ;;  %v12864_v22 = vld [vmem:[#allocation223_spill] sm:$0xff] }
 0x530   :  { %2707 = vmatprep.subr.mxu1 %v12817_v60  ;;  %v12865_v60 = vld [vmem:[#allocation224_spill] sm:$0xff] }
 0x531   :  { %2708 = vmatpush1.msra.mxu1 %v12818_v17  ;;  %v12866_v17 = vld [vmem:[#allocation225_spill] sm:$0xff] }
 0x532   :  { %2709 = vmatprep.subr.mxu1 %v12819_v28  ;;  %v12867_v28 = vld [vmem:[#allocation226_spill] sm:$0xff] }
 0x533   :  { %2710 = vmatpush1.msra.mxu1 %v12820_v58  ;;  %v12868_v58 = vld [vmem:[#allocation227_spill] sm:$0xff] }
 0x534   :  { %2711 = vmatprep.subr.mxu1 %v12821_v53  ;;  %v12869_v53 = vld [vmem:[#allocation228_spill] sm:$0xff] }
 0x535   :  { %2712 = vmatpush1.msra.mxu1 %v12822_v20 }
 0x536   :  { %2713 = vmatprep.subr.mxu1 %v12823_v14 }
 0x537   :  { %2714 = vmatpush1.msra.mxu1 %v12824_v24 }
 0x538   :  { %2715 = vmatprep.subr.mxu1 %v12825_v5  ;;  %v12870_v5 = vld [vmem:[#allocation48_spill] sm:$0xff] }
 0x539   :  { %2716 = vmatpush1.msra.mxu1 %v12826_v38 }
 0x53a   :  { %2717 = vmatprep.subr.mxu1 %v12827_v41  ;;  %v12871_v41 = vld [vmem:[#allocation12_spill] sm:$0xff] }
 0x53b   :  { %2718 = vmatpush1.msra.mxu1 %v12828_v42 }
 0x53c   :  { %2719 = vmatprep.subr.mxu1 %v12829_v51 }
 0x53d   :  { %2720 = vmatpush1.msra.mxu1 %v12830_v37 }
 0x53e   :  { %2721 = vmatprep.subr.mxu1 %v12831_v39 }
 0x53f   :  { %2722 = vmatpush1.msra.mxu1 %v12832_v44  ;;  %v12872_v44 = vld [vmem:[#allocation49_spill] sm:$0xff] }
 0x540   :  { %2723 = vmatprep.subr.mxu1 %v12833_v48 }
 0x541   :  { %2724 = vmatpush1.msra.mxu1 %v12834_v16 }
 0x542   :  { %2725 = vmatprep.subr.mxu1 %v12835_v3  ;;  %v12873_v3 = vld [vmem:[#allocation50_spill] sm:$0xff] }
 0x543   :  { %2726 = vmatpush1.msra.mxu1 %v12836_v47 }
 0x544   :  { %2727 = vmatprep.subr.mxu1 %v12837_v33 }
 0x545   :  { %2728 = vmatpush2.msra.mxu1 %v12838_v15 }
 0x546   :  { %2729 = vmatprep.subr.mxu1 %v12839_v43 }
 0x547   :  { %2730 = vmatpush2.msra.mxu1 %v12840_v12  ;;  %v12874_v12 = vld [vmem:[#allocation13_spill] sm:$0xff] }
 0x548   :  { %2731 = vmatprep.subr.mxu1 %v12841_v6  ;;  %v426_v6 = vadd.f32 %v12874_v12, %v6696_v31 }
 0x549   :  { %2732 = vmatpush2.msra.mxu1 %v12842_v29 }
 0x54a   :  { %2733 = vmatprep.subr.mxu1 %v12843_v35  ;;  %v12875_v35 = vld [vmem:[#allocation14_spill] sm:$0xff] }
 0x54b   :  { %2734 = vmatpush2.msra.mxu1 %v12844_v52  ;;  %v428_v52 = vadd.f32 %v12875_v35, %v6702_v32 }
 0x54c   :  { %2735 = vmatprep.subr.mxu1 %v12845_v19 }
 0x54d   :  { %2736 = vmatpush2.msra.mxu1 %v12846_v1  ;;  %v12876_v1 = vld [vmem:[#allocation51_spill] sm:$0xff] }
 0x54e   :  { %2737 = vmatprep.subr.mxu1 %v12847_v8  ;;  %v432_v8 = vadd.f32 %v12876_v1, %v6696_v31 }
 0x54f   :  { %2738 = vmatpush2.msra.mxu1 %v12848_v10 }
 0x550   :  { %2739 = vmatprep.subr.mxu1 %v12849_v23 }
 0x551   :  { %2740 = vmatpush2.msra.mxu1 %v12850_v25  ;;  %v12877_v25 = vld [vmem:[#allocation52_spill] sm:$0xff] }
 0x552   :  { %2741 = vmatprep.subr.mxu1 %v12851_v0  ;;  %v434_v0 = vadd.f32 %v12877_v25, %v6702_v32 }
 0x553   :  { %2742 = vmatpush2.msra.mxu1 %v12852_v50 }
 0x554   :  { %2743 = vmatprep.subr.mxu1 %v12853_v59 }
 0x555   :  { %2744 = vmatpush2.msra.mxu1 %v12854_v13 }
 0x556   :  { %2745 = vmatprep.subr.mxu1 %v12855_v57 }
 0x557   :  { %2746 = vmatpush2.msra.mxu1 %v12856_v26 }
 0x558   :  { %2747 = vmatprep.subr.mxu1 %v12857_v45 }
 0x559   :  { %2748 = vmatpush2.msra.mxu1 %v12858_v46 }
 0x55a   :  { %2749 = vmatprep.subr.mxu1 %v12859_v18 }
 0x55b   :  { %2750 = vmatpush2.msra.mxu1 %v12860_v34 }
 0x55c   :  { %2751 = vmatprep.subr.mxu1 %v12861_v30 }
 0x55d   :  { %2752 = vmatpush2.msra.mxu1 %v12862_v11 }
 0x55e   :  { %2753 = vmatprep.subr.mxu1 %v12863_v49 }
 0x55f   :  { %2754 = vmatpush2.msra.mxu1 %v12864_v22 }
 0x560   :  { %2755 = vmatprep.subr.mxu1 %v12865_v60 }
 0x561   :  { %2756 = vmatpush2.msra.mxu1 %v12866_v17 }
 0x562   :  { %2757 = vmatprep.subr.mxu1 %v12867_v28 }
 0x563   :  { %2758 = vmatpush2.msra.mxu1 %v12868_v58 }
 0x564   :  { %2952 = vmatprep.subr.mxu1 %v12869_v53 }
 0x5a3   :  { %v2350_v20 = vpop.f32.mrf.mxu1  ;;  %v2427_v39 = vpop.f32.mrf.mxu0 }
 0x5a4   :  { %v2515_v38 = vadd.f32 %v2350_v20, %v12870_v5  ;;  %v2543_v19 = vadd.f32 %v2427_v39, %v426_v6 }
 0x5a5   :  { %v2352_v14 = vpop.f32.mrf.mxu1  ;;  %v2429_v33 = vpop.f32.mrf.mxu0 }
 0x5a6   :  { %v2516_v42 = vadd.f32 %v2352_v14, %v12871_v41  ;;  %v3913_v37 = vmul.f32 -1.442695, %v2515_v38  ;;  %v2544_v10 = vadd.f32 %v2429_v33, %v428_v52  ;;  %v3917_v59 = vmul.f32 -1.442695, %v2543_v19 }
 0x5a8   :  { %v2356_v24 = vpop.f32.mrf.mxu1  ;;  %v3914_v16 = vmul.f32 -1.442695, %v2516_v42  ;;  %4177 = vpow2.f32 %v3913_v37  ;;  %v2433_v29 = vpop.f32.mrf.mxu0  ;;  %v3918_v57 = vmul.f32 -1.442695, %v2544_v10 }
 0x5a9   :  { %v2517_v48 = vadd.f32 %v2356_v24, %v12872_v44  ;;  %v2545_v50 = vadd.f32 %v2433_v29, %v432_v8  ;;  %v12880_v29 = vld [vmem:[#allocation66_spill] sm:$0xff] }
 0x5aa   :  { %v2358_v51 = vpop.f32.mrf.mxu1  ;;  %4179 = vpow2.f32 %v3914_v16  ;;  %v2435_v23 = vpop.f32.mrf.mxu0  ;;  %v12879_v16 = vld [vmem:[#allocation35_spill] sm:$0xff]  ;;  %v593_v35 = vadd.f32 %v12880_v29, %v6709_v21  ;;  %v9776_v29 = vld [vmem:[%s11476_s2 + $0x1b0] sm:$0xff] }
 0x5ab   :  { %v2518_v47 = vadd.f32 %v2358_v51, %v12873_v3  ;;  %v3915_v15 = vmul.f32 -1.442695, %v2517_v48  ;;  %v2546_v13 = vadd.f32 %v2435_v23, %v434_v0  ;;  %v3919_v45 = vmul.f32 -1.442695, %v2545_v50  ;;  %v12878_v51 = vld [vmem:[#allocation65_spill] sm:$0xff]  ;;  %v12881_v23 = vld [vmem:[#allocation36_spill] sm:$0xff] }
 0x5ac   :  { %v587_v37 = vadd.f32 %v12878_v51, %v6709_v21  ;;  %v589_v3 = vadd.f32 %v12879_v16, %v6718_v55  ;;  %v595_v25 = vadd.f32 %v12881_v23, %v6718_v55  ;;  %v9670_v51 = vld [vmem:[%s11476_s2 + $0x268] sm:$0xff]  ;;  %v9728_v16 = vld [vmem:[%s11476_s2 + $0x210] sm:$0xff]  ;;  %v9818_v23 = vld [vmem:[%s11476_s2 + $0x118] sm:$0xff] }
 0x5ad   :  { %v3916_v43 = vmul.f32 -1.442695, %v2518_v47  ;;  %4181 = vpow2.f32 %v3915_v15  ;;  %v3920_v18 = vmul.f32 -1.442695, %v2546_v13 }
 0x5af   :  { %4183 = vpow2.f32 %v3916_v43 }
 0x5b0   :  { %4185 = vpow2.f32 %v3917_v59 }
 0x5b1   :  { %4187 = vpow2.f32 %v3918_v57 }
 0x5b2   :  { %4189 = vpow2.f32 %v3919_v45 }
 0x5b3   :  { %4191 = vpow2.f32 %v3920_v18 }
 0x5b5   :  { %v4178_v26 = vpop.eup %4177 }
 0x5b6   :  { %v2531_v34 = vadd.f32 1.0, %v4178_v26 }
 0x5b7   :  { %v4180_v46 = vpop.eup %4179 }
 0x5b8   :  { %v2532_v11 = vadd.f32 1.0, %v4180_v46  ;;  %4193 = vrcp.f32 %v2531_v34 }
 0x5ba   :  { %v4182_v30 = vpop.eup %4181  ;;  %4195 = vrcp.f32 %v2532_v11 }
 0x5bb   :  { %v2533_v22 = vadd.f32 1.0, %v4182_v30 }
 0x5bc   :  { %v4184_v49 = vpop.eup %4183 }
 0x5bd   :  { %v2534_v60 = vadd.f32 1.0, %v4184_v49  ;;  %4197 = vrcp.f32 %v2533_v22  ;;  %v4186_v17 = vpop.eup %4185 }
 0x5be   :  { %v4188_v28 = vpop.eup %4187  ;;  %v2559_v53 = vadd.f32 1.0, %v4186_v17 }
 0x5bf   :  { %4199 = vrcp.f32 %v2534_v60  ;;  %v4190_v58 = vpop.eup %4189  ;;  %v2560_v24 = vadd.f32 1.0, %v4188_v28 }
 0x5c0   :  { %v4192_v14 = vpop.eup %4191  ;;  %v2561_v41 = vadd.f32 1.0, %v4190_v58  ;;  %4201 = vrcp.f32 %v2559_v53 }
 0x5c1   :  { %v2562_v47 = vadd.f32 1.0, %v4192_v14  ;;  %4203 = vrcp.f32 %v2560_v24 }
 0x5c2   :  { %4205 = vrcp.f32 %v2561_v41 }
 0x5c5   :  { %v4194_v38 = vpop.eup %4193 }
 0x5c7   :  { %v4196_v48 = vpop.eup %4195 }
 0x5ca   :  { %v4198_v6 = vpop.eup %4197 }
 0x5cc   :  { %v4200_v10 = vpop.eup %4199 }
 0x5cd   :  { %v4202_v13 = vpop.eup %4201 }
 0x5ce   :  { %v4204_v57 = vpop.eup %4203  ;;  %v2587_v45 = vsub.f32 1.0, %v4202_v13  ;;  %v2595_v11 = vmul.f32 %v4202_v13, %v9346_v9  ;;  %v9848_v13 = vld [vmem:[%s11476_s2 + $0x120] sm:$0xff] }
 0x5cf   :  { %v4206_v26 = vpop.eup %4205  ;;  %v2588_v34 = vsub.f32 1.0, %v4204_v57  ;;  %v2596_v60 = vmul.f32 %v4204_v57, %v9348_v62  ;;  %v9631_v62 = vld [vmem:[%s11476_s2 + $0x2f0] sm:$0xff]  ;;  %12884 = vst [vmem:[#allocation231_spill] sm:$0xff] %v9848_v13  ;;  %v9854_v57 = vld [vmem:[%s11476_s2 + $0xe0] sm:$0xff] }
 0x5d0   :  { %v2589_v28 = vsub.f32 1.0, %v4206_v26  ;;  %v2597_v24 = vmul.f32 %v4206_v26, %v9354_v61  ;;  %12885 = vst [vmem:[#allocation232_spill] sm:$0xff] %v9854_v57  ;;  %v9860_v26 = vld [vmem:[%s11476_s2 + $0xf8] sm:$0xff] }
 0x5d1   :  { %12886 = vst [vmem:[#allocation233_spill] sm:$0xff] %v9860_v26 }
 0x5e4   :  { %v2504_v20 = vpop.f32.mrf.mxu1 }
 0x5e5   :  { %v2571_v5 = vadd.f32 %v2504_v20, %v6706_v4 }
 0x5e6   :  { %v2506_v42 = vpop.f32.mrf.mxu1 }
 0x5e7   :  { %v2575_v39 = vmul.f32 %v4194_v38, %v2571_v5  ;;  %v2572_v44 = vadd.f32 %v2506_v42, %v6715_v63  ;;  %v9647_v42 = vld [vmem:[%s11476_s2 + $0x2c0] sm:$0xff] }
 0x5e8   :  { %v2510_v33 = vpop.f32.mrf.mxu1 }
 0x5e9   :  { %v2579_v15 = vadd.f32 %v2575_v39, %v587_v37  ;;  %v2576_v43 = vmul.f32 %v4196_v48, %v2572_v44  ;;  %v2573_v12 = vadd.f32 %v2510_v33, %v6706_v4  ;;  %v9677_v37 = vld [vmem:[%s11476_s2 + $0x260] sm:$0xff]  ;;  %v9684_v39 = vld [vmem:[%s11476_s2 + $0x238] sm:$0xff]  ;;  %v9746_v33 = vld [vmem:[%s11476_s2 + $0x1a8] sm:$0xff] }
 0x5ea   :  { %v2512_v52 = vpop.f32.mrf.mxu1  ;;  %v9710_v44 = vld [vmem:[%s11476_s2 + $0x200] sm:$0xff]  ;;  %v9722_v48 = vld [vmem:[%s11476_s2 + $0x1d8] sm:$0xff] }
 0x5eb   :  { %4207 = vtanh.f32 %v2579_v15  ;;  %v2580_v19 = vadd.f32 %v2576_v43, %v589_v3  ;;  %v2577_v1 = vmul.f32 %v4198_v6, %v2573_v12  ;;  %v2574_v8 = vadd.f32 %v2512_v52, %v6715_v63  ;;  %v9734_v3 = vld [vmem:[%s11476_s2 + $0x1d0] sm:$0xff]  ;;  %v9752_v15 = vld [vmem:[%s11476_s2 + $0x1e0] sm:$0xff]  ;;  %v9764_v12 = vld [vmem:[%s11476_s2 + $0x1b8] sm:$0xff] }
 0x5ec   :  { %4209 = vrcp.f32 %v2562_v47  ;;  %v9740_v47 = vld [vmem:[%s11476_s2 + $0x1e8] sm:$0xff]  ;;  %v9758_v43 = vld [vmem:[%s11476_s2 + $0x1a0] sm:$0xff]  ;;  %v9770_v6 = vld [vmem:[%s11476_s2 + $0x178] sm:$0xff] }
 0x5ed   :  { %4211 = vtanh.f32 %v2580_v19  ;;  %v2581_v0 = vadd.f32 %v2577_v1, %v593_v35  ;;  %v2578_v50 = vmul.f32 %v4200_v10, %v2574_v8  ;;  %v9782_v35 = vld [vmem:[%s11476_s2 + $0x170] sm:$0xff]  ;;  %v9788_v52 = vld [vmem:[%s11476_s2 + $0x188] sm:$0xff]  ;;  %v9800_v1 = vld [vmem:[%s11476_s2 + $0x180] sm:$0xff] }
 0x5ee   :  { %v9794_v19 = vld [vmem:[%s11476_s2 + $0x148] sm:$0xff]  ;;  %v9806_v8 = vld [vmem:[%s11476_s2 + $0x140] sm:$0xff]  ;;  %v9812_v10 = vld [vmem:[%s11476_s2 + $0x158] sm:$0xff] }
 0x5ef   :  { %4213 = vtanh.f32 %v2581_v0  ;;  %v2582_v59 = vadd.f32 %v2578_v50, %v595_v25  ;;  %v9824_v25 = vld [vmem:[%s11476_s2 + $0x150] sm:$0xff]  ;;  %v9836_v50 = vld [vmem:[%s11476_s2 + $0x128] sm:$0xff] }
 0x5f0   :  { %v9830_v0 = vld [vmem:[%s11476_s2 + $0x110] sm:$0xff]  ;;  %12882 = vst [vmem:[#allocation229_spill] sm:$0xff] %v9836_v50 }
 0x5f1   :  { %4215 = vtanh.f32 %v2582_v59  ;;  %v9842_v59 = vld [vmem:[%s11476_s2 + $0xe8] sm:$0xff] }
 0x5f2   :  { %12883 = vst [vmem:[#allocation230_spill] sm:$0xff] %v9842_v59 }
 0x5f8   :  { %v4208_v46 = vpop.eup %4207 }
 0x5f9   :  { %v4210_v18 = vpop.eup %4209  ;;  %v2591_v30 = vmul.f32 %v4208_v46, %v2587_v45  ;;  %v9866_v45 = vld [vmem:[%s11476_s2 + $0xb8] sm:$0xff]  ;;  %v9872_v46 = vld [vmem:[%s11476_s2 + $0xf0] sm:$0xff] }
 0x5fa   :  { %v4212_v49 = vpop.eup %4211  ;;  %v2590_v20 = vsub.f32 1.0, %v4210_v18  ;;  %v2598_v38 = vmul.f32 %v4210_v18, %v9359_v56  ;;  %v9640_v56 = vld [vmem:[%s11476_s2 + $0x2c8] sm:$0xff]  ;;  %12887 = vst [vmem:[#allocation41_spill] sm:$0xff] %v9866_v45  ;;  %12888 = vst [vmem:[#allocation42_spill] sm:$0xff] %v9872_v46  ;;  %v9878_v18 = vld [vmem:[%s11476_s2 + $0xb0] sm:$0xff] }
 0x5fb   :  { %v2592_v22 = vmul.f32 %v4212_v49, %v2588_v34  ;;  %v9616_v17 = vadd.f32 %v2595_v11, %v2591_v30  ;;  %12889 = vst [vmem:[#allocation43_spill] sm:$0xff] %v9878_v18  ;;  %v9884_v34 = vld [vmem:[%s11476_s2 + $0xc8] sm:$0xff]  ;;  %v9896_v11 = vld [vmem:[%s11476_s2 + $0xc0] sm:$0xff] }
 0x5fc   :  { %v4214_v58 = vpop.eup %4213  ;;  %12890 = vst [vmem:[#allocation44_spill] sm:$0xff] %v9884_v34  ;;  %v9890_v30 = vld [vmem:[%s11476_s2 + $0x88] sm:$0xff]  ;;  %12892 = vst [vmem:[#allocation4_spill] sm:$0xff] %v9896_v11  ;;  %v9902_v49 = vld [vmem:[%s11476_s2 + $0x80] sm:$0xff] }
 0x5fd   :  { %v9618_v53 = vadd.f32 %v2596_v60, %v2592_v22  ;;  %v2593_v14 = vmul.f32 %v4214_v58, %v2589_v28  ;;  %12891 = vst [vmem:[#allocation3_spill] sm:$0xff] %v9890_v30  ;;  %12893 = vst [vmem:[#allocation5_spill] sm:$0xff] %v9902_v49  ;;  %v9908_v22 = vld [vmem:[%s11476_s2 + $0x98] sm:$0xff]  ;;  %v9920_v28 = vld [vmem:[%s11476_s2 + $0x90] sm:$0xff] }
 0x5fe   :  { %v4216_v5 = vpop.eup %4215  ;;  %12894 = vst [vmem:[#allocation6_spill] sm:$0xff] %v9908_v22  ;;  %v9914_v60 = vld [vmem:[%s11476_s2 + $0x58] sm:$0xff]  ;;  %12896 = vst [vmem:[#allocation61_spill] sm:$0xff] %v9920_v28  ;;  %v9926_v58 = vld [vmem:[%s11476_s2 + $0x50] sm:$0xff] }
 0x5ff   :  { %2682 = vmatprep.mubr.f32.mxu0 %v9618_v53  ;;  %2759 = vmatprep.mubr.f32.mxu1 %v9618_v53  ;;  %v2594_v9 = vmul.f32 %v4216_v5, %v2590_v20  ;;  %v9624_v41 = vadd.f32 %v2597_v24, %v2593_v14  ;;  %12895 = vst [vmem:[#allocation28_spill] sm:$0xff] %v9914_v60  ;;  %12897 = vst [vmem:[#allocation62_spill] sm:$0xff] %v9926_v58  ;;  %v9932_v20 = vld [vmem:[%s11476_s2 + $0x68] sm:$0xff]  ;;  %v9944_v24 = vld [vmem:[%s11476_s2 + $0x60] sm:$0xff] }
 0x600   :  { %2683 = vmatmul.mubr.f32.vlgmr.msra.gmra.mxu0 %v9616_v17  ;;  %2760 = vmatmul.mubr.f32.vlgmr.msra.gmra.mxu1 %v9616_v17  ;;  %12898 = vst [vmem:[#allocation31_spill] sm:$0xff] %v9932_v20  ;;  %v9938_v14 = vld [vmem:[%s11476_s2 + $0x28] sm:$0xff]  ;;  %12900 = vst [vmem:[#allocation8_spill] sm:$0xff] %v9944_v24  ;;  %v9950_v5 = vld [vmem:[%s11476_s2 + $0x20] sm:$0xff] }
 0x601   :  { %2773 = vmatpush1.msra.mxu0 %v9631_v62  ;;  %v9634_v61 = vadd.f32 %v2598_v38, %v2594_v9  ;;  %2953 = vmatpush1.msra.mxu1 %v9364_v40  ;;  %v9655_v40 = vld [vmem:[%s11476_s2 + $0x298] sm:$0xff]  ;;  %12899 = vst [vmem:[#allocation7_spill] sm:$0xff] %v9938_v14  ;;  %12901 = vst [vmem:[#allocation46_spill] sm:$0xff] %v9950_v5 }
 0x602   :  { %2774 = vmatprep.subr.mxu0 %v9640_v56  ;;  %2954 = vmatprep.subr.mxu1 %v9371_v36  ;;  %v9663_v36 = vld [vmem:[%s11476_s2 + $0x290] sm:$0xff]  ;;  %v9956_v9 = vld [vmem:[%s11476_s2 + $0x38] sm:$0xff] }
 0x603   :  { %2775 = vmatpush1.msra.mxu0 %v9647_v42  ;;  %2688 = vmatprep.mubr.f32.mxu0 %v9634_v61  ;;  %12902 = vst [vmem:[#allocation47_spill] sm:$0xff] %v9956_v9  ;;  %v9962_v38 = vld [vmem:[%s11476_s2 + $0x5f8] sm:$0xff] }
 0x604   :  { %2765 = vmatprep.mubr.f32.mxu1 %v9634_v61  ;;  %2776 = vmatprep.subr.mxu0 %v9655_v40  ;;  %12903 = vst [vmem:[#allocation45_spill] sm:$0xff] %v9962_v38 }
 0x605   :  { %2689 = vmatmul.mubr.f32.gmra.mxu0 %v9624_v41  ;;  %2766 = vmatmul.mubr.f32.gmra.mxu1 %v9624_v41 }
 0x606   :  { %2777 = vmatpush1.msra.mxu0 %v9663_v36  ;;  %2836 = vmatprep.mubr.f32.mxu0 %v9618_v53 }
 0x607   :  { %2778 = vmatprep.subr.mxu0 %v9670_v51  ;;  %2955 = vmatpush1.msra.mxu1 %v9386_v54  ;;  %v9691_v54 = vld [vmem:[%s11476_s2 + $0x230] sm:$0xff] }
 0x608   :  { %2779 = vmatpush1.msra.mxu0 %v9677_v37  ;;  %2956 = vmatprep.subr.mxu1 %v9393_v7  ;;  %v9698_v7 = vld [vmem:[%s11476_s2 + $0x208] sm:$0xff] }
 0x609   :  { %2780 = vmatprep.subr.mxu0 %v9684_v39  ;;  %2957 = vmatpush1.msra.mxu1 %v9400_v2  ;;  %v9704_v2 = vld [vmem:[%s11476_s2 + $0x240] sm:$0xff] }
 0x60a   :  { %2781 = vmatpush1.msra.mxu0 %v9691_v54  ;;  %2958 = vmatprep.subr.mxu1 %v9407_v27  ;;  %v9716_v27 = vld [vmem:[%s11476_s2 + $0x218] sm:$0xff] }
 0x60b   :  { %2782 = vmatprep.subr.mxu0 %v9698_v7  ;;  %2959 = vmatpush1.msra.mxu1 %v9704_v2 }
 0x60c   :  { %2783 = vmatpush1.msra.mxu0 %v9710_v44  ;;  %2960 = vmatprep.subr.mxu1 %v9716_v27 }
 0x60d   :  { %2784 = vmatprep.subr.mxu0 %v9722_v48  ;;  %2961 = vmatpush1.msra.mxu1 %v9728_v16 }
 0x60e   :  { %2785 = vmatpush1.msra.mxu0 %v9734_v3  ;;  %2962 = vmatprep.subr.mxu1 %v9740_v47 }
 0x60f   :  { %2786 = vmatprep.subr.mxu0 %v9746_v33  ;;  %2963 = vmatpush1.msra.mxu1 %v9752_v15 }
 0x610   :  { %2787 = vmatpush1.msra.mxu0 %v9758_v43  ;;  %2964 = vmatprep.subr.mxu1 %v9764_v12 }
 0x611   :  { %2788 = vmatprep.subr.mxu0 %v9770_v6  ;;  %2965 = vmatpush1.msra.mxu1 %v9776_v29 }
 0x612   :  { %2789 = vmatpush1.msra.mxu0 %v9782_v35  ;;  %2966 = vmatprep.subr.mxu1 %v9788_v52 }
 0x613   :  { %2790 = vmatprep.subr.mxu0 %v9794_v19  ;;  %2967 = vmatpush1.msra.mxu1 %v9800_v1 }
 0x614   :  { %2791 = vmatpush1.msra.mxu0 %v9806_v8  ;;  %2968 = vmatprep.subr.mxu1 %v9812_v10 }
 0x615   :  { %2792 = vmatprep.subr.mxu0 %v9818_v23  ;;  %2969 = vmatpush1.msra.mxu1 %v9824_v25 }
 0x616   :  { %2793 = vmatpush1.msra.mxu0 %v9830_v0  ;;  %2970 = vmatprep.subr.mxu1 %v9836_v50 }
 0x617   :  { %2794 = vmatprep.subr.mxu0 %v9842_v59  ;;  %2971 = vmatpush1.msra.mxu1 %v9848_v13 }
 0x618   :  { %2795 = vmatpush1.msra.mxu0 %v9854_v57  ;;  %2972 = vmatprep.subr.mxu1 %v9860_v26  ;;  %v13039_v57 = vld [vmem:[#allocation19_spill] sm:$0xff] }
 0x619   :  { %2796 = vmatprep.subr.mxu0 %v9866_v45  ;;  %2973 = vmatpush1.msra.mxu1 %v9872_v46  ;;  %v13038_v46 = vld [vmem:[#allocation18_spill] sm:$0xff]  ;;  %v438_v13 = vadd.f32 %v13039_v57, %v6696_v31 }
 0x61a   :  { %2797 = vmatpush1.msra.mxu0 %v9878_v18  ;;  %2974 = vmatprep.subr.mxu1 %v9884_v34 }
 0x61b   :  { %2798 = vmatprep.subr.mxu0 %v9890_v30  ;;  %2975 = vmatpush1.msra.mxu1 %v9896_v11  ;;  %v13037_v30 = vld [vmem:[#allocation17_spill] sm:$0xff] }
 0x61c   :  { %2799 = vmatpush1.msra.mxu0 %v9902_v49  ;;  %2976 = vmatprep.subr.mxu1 %v9908_v22 }
 0x61d   :  { %2800 = vmatprep.subr.mxu0 %v9914_v60  ;;  %2977 = vmatpush1.msra.mxu1 %v9920_v28  ;;  %v13036_v60 = vld [vmem:[#allocation16_spill] sm:$0xff] }
 0x61e   :  { %2801 = vmatpush1.msra.mxu0 %v9926_v58  ;;  %2978 = vmatprep.subr.mxu1 %v9932_v20  ;;  %v13035_v58 = vld [vmem:[#allocation15_spill] sm:$0xff] }
 0x61f   :  { %2802 = vmatprep.subr.mxu0 %v9938_v14  ;;  %2979 = vmatpush1.msra.mxu1 %v9944_v24  ;;  %v9968_v24 = vld [vmem:[%s11476_s2 + $0x30] sm:$0xff] }
 0x620   :  { %2803 = vmatpush1.msra.mxu0 %v9950_v5  ;;  %2980 = vmatprep.subr.mxu1 %v9956_v9  ;;  %12904 = vst [vmem:[#allocation9_spill] sm:$0xff] %v9968_v24  ;;  %v9974_v5 = vld [vmem:[%s11476_s2 + $0x5f0] sm:$0xff]  ;;  %v9980_v9 = vld [vmem:[%s11476_s2 + $0x8] sm:$0xff] }
 0x621   :  { %2804 = vmatprep.subr.mxu0 %v9962_v38  ;;  %2981 = vmatpush1.msra.mxu1 %v9968_v24  ;;  %12905 = vst [vmem:[#allocation10_spill] sm:$0xff] %v9974_v5  ;;  %12906 = vst [vmem:[#allocation11_spill] sm:$0xff] %v9980_v9  ;;  %v9986_v38 = vld [vmem:[%s11476_s2 + $0x5c8] sm:$0xff]  ;;  %v9992_v24 = vld [vmem:[%s11476_s2] sm:$0xff] }
 0x622   :  { %2805 = vmatpush2.msra.mxu0 %v9974_v5  ;;  %2982 = vmatprep.subr.mxu1 %v9980_v9  ;;  %12907 = vst [vmem:[#allocation32_spill] sm:$0xff] %v9986_v38  ;;  %12908 = vst [vmem:[#allocation33_spill] sm:$0xff] %v9992_v24  ;;  %v9998_v5 = vld [vmem:[%s11476_s2 + $0x5c0] sm:$0xff]  ;;  %v10004_v9 = vld [vmem:[%s11476_s2 + $0x5d8] sm:$0xff] }
 0x623   :  { %2806 = vmatprep.subr.mxu0 %v9986_v38  ;;  %2983 = vmatpush1.msra.mxu1 %v9992_v24  ;;  %12909 = vst [vmem:[#allocation64_spill] sm:$0xff] %v9998_v5  ;;  %12910 = vst [vmem:[#allocation34_spill] sm:$0xff] %v10004_v9  ;;  %v10010_v38 = vld [vmem:[%s11476_s2 + $0x598] sm:$0xff]  ;;  %v10016_v24 = vld [vmem:[%s11476_s2 + $0x5d0] sm:$0xff] }
 0x624   :  { %2807 = vmatpush2.msra.mxu0 %v9998_v5  ;;  %2984 = vmatprep.subr.mxu1 %v10004_v9  ;;  %12911 = vst [vmem:[#allocation75_spill] sm:$0xff] %v10010_v38  ;;  %12912 = vst [vmem:[#allocation78_spill] sm:$0xff] %v10016_v24  ;;  %v10022_v5 = vld [vmem:[%s11476_s2 + $0x590] sm:$0xff]  ;;  %v10028_v9 = vld [vmem:[%s11476_s2 + $0x5a8] sm:$0xff] }
 0x625   :  { %2808 = vmatprep.subr.mxu0 %v10010_v38  ;;  %2985 = vmatpush2.msra.mxu1 %v10016_v24  ;;  %12913 = vst [vmem:[#allocation76_spill] sm:$0xff] %v10022_v5  ;;  %12914 = vst [vmem:[#allocation80_spill] sm:$0xff] %v10028_v9  ;;  %v10034_v38 = vld [vmem:[%s11476_s2 + $0x568] sm:$0xff]  ;;  %v10040_v24 = vld [vmem:[%s11476_s2 + $0x5a0] sm:$0xff] }
 0x626   :  { %2809 = vmatpush2.msra.mxu0 %v10022_v5  ;;  %2986 = vmatprep.subr.mxu1 %v10028_v9  ;;  %12915 = vst [vmem:[#allocation77_spill] sm:$0xff] %v10034_v38  ;;  %12916 = vst [vmem:[#allocation82_spill] sm:$0xff] %v10040_v24  ;;  %v10046_v5 = vld [vmem:[%s11476_s2 + $0x560] sm:$0xff]  ;;  %v10052_v9 = vld [vmem:[%s11476_s2 + $0x578] sm:$0xff] }
 0x627   :  { %2810 = vmatprep.subr.mxu0 %v10034_v38  ;;  %2987 = vmatpush2.msra.mxu1 %v10040_v24  ;;  %12917 = vst [vmem:[#allocation79_spill] sm:$0xff] %v10046_v5  ;;  %12918 = vst [vmem:[#allocation84_spill] sm:$0xff] %v10052_v9  ;;  %v10058_v38 = vld [vmem:[%s11476_s2 + $0x538] sm:$0xff]  ;;  %v10064_v24 = vld [vmem:[%s11476_s2 + $0x570] sm:$0xff] }
 0x628   :  { %2811 = vmatpush2.msra.mxu0 %v10046_v5  ;;  %2988 = vmatprep.subr.mxu1 %v10052_v9  ;;  %12919 = vst [vmem:[#allocation81_spill] sm:$0xff] %v10058_v38  ;;  %12920 = vst [vmem:[#allocation86_spill] sm:$0xff] %v10064_v24  ;;  %v10070_v5 = vld [vmem:[%s11476_s2 + $0x530] sm:$0xff]  ;;  %v10076_v9 = vld [vmem:[%s11476_s2 + $0x548] sm:$0xff] }
 0x629   :  { %2812 = vmatprep.subr.mxu0 %v10058_v38  ;;  %2989 = vmatpush2.msra.mxu1 %v10064_v24  ;;  %12921 = vst [vmem:[#allocation83_spill] sm:$0xff] %v10070_v5  ;;  %12922 = vst [vmem:[#allocation88_spill] sm:$0xff] %v10076_v9  ;;  %v10082_v38 = vld [vmem:[%s11476_s2 + $0x508] sm:$0xff]  ;;  %v10088_v24 = vld [vmem:[%s11476_s2 + $0x540] sm:$0xff] }
 0x62a   :  { %2813 = vmatpush2.msra.mxu0 %v10070_v5  ;;  %2990 = vmatprep.subr.mxu1 %v10076_v9  ;;  %12923 = vst [vmem:[#allocation85_spill] sm:$0xff] %v10082_v38  ;;  %12924 = vst [vmem:[#allocation90_spill] sm:$0xff] %v10088_v24  ;;  %v10094_v5 = vld [vmem:[%s11476_s2 + $0x500] sm:$0xff]  ;;  %v10100_v9 = vld [vmem:[%s11476_s2 + $0x518] sm:$0xff] }
 0x62b   :  { %2814 = vmatprep.subr.mxu0 %v10082_v38  ;;  %2991 = vmatpush2.msra.mxu1 %v10088_v24  ;;  %12925 = vst [vmem:[#allocation87_spill] sm:$0xff] %v10094_v5  ;;  %12926 = vst [vmem:[#allocation92_spill] sm:$0xff] %v10100_v9  ;;  %v10106_v38 = vld [vmem:[%s11476_s2 + $0x4d8] sm:$0xff]  ;;  %v10112_v24 = vld [vmem:[%s11476_s2 + $0x510] sm:$0xff] }
 0x62c   :  { %2815 = vmatpush2.msra.mxu0 %v10094_v5  ;;  %2992 = vmatprep.subr.mxu1 %v10100_v9  ;;  %12927 = vst [vmem:[#allocation89_spill] sm:$0xff] %v10106_v38  ;;  %12928 = vst [vmem:[#allocation94_spill] sm:$0xff] %v10112_v24  ;;  %v10118_v5 = vld [vmem:[%s11476_s2 + $0x4d0] sm:$0xff]  ;;  %v10124_v9 = vld [vmem:[%s11476_s2 + $0x4e8] sm:$0xff] }
 0x62d   :  { %2816 = vmatprep.subr.mxu0 %v10106_v38  ;;  %2993 = vmatpush2.msra.mxu1 %v10112_v24  ;;  %12929 = vst [vmem:[#allocation91_spill] sm:$0xff] %v10118_v5  ;;  %12930 = vst [vmem:[#allocation96_spill] sm:$0xff] %v10124_v9  ;;  %v10130_v38 = vld [vmem:[%s11476_s2 + $0x4a8] sm:$0xff]  ;;  %v10136_v24 = vld [vmem:[%s11476_s2 + $0x4e0] sm:$0xff] }
 0x62e   :  { %2817 = vmatpush2.msra.mxu0 %v10118_v5  ;;  %2994 = vmatprep.subr.mxu1 %v10124_v9  ;;  %12931 = vst [vmem:[#allocation93_spill] sm:$0xff] %v10130_v38  ;;  %12932 = vst [vmem:[#allocation98_spill] sm:$0xff] %v10136_v24  ;;  %v10142_v5 = vld [vmem:[%s11476_s2 + $0x4a0] sm:$0xff]  ;;  %v10148_v9 = vld [vmem:[%s11476_s2 + $0x4b8] sm:$0xff] }
 0x62f   :  { %2818 = vmatprep.subr.mxu0 %v10130_v38  ;;  %2995 = vmatpush2.msra.mxu1 %v10136_v24  ;;  %12933 = vst [vmem:[#allocation95_spill] sm:$0xff] %v10142_v5  ;;  %12934 = vst [vmem:[#allocation100_spill] sm:$0xff] %v10148_v9  ;;  %v10154_v38 = vld [vmem:[%s11476_s2 + $0x478] sm:$0xff]  ;;  %v10160_v24 = vld [vmem:[%s11476_s2 + $0x4b0] sm:$0xff] }
 0x630   :  { %2819 = vmatpush2.msra.mxu0 %v10142_v5  ;;  %2996 = vmatprep.subr.mxu1 %v10148_v9  ;;  %12935 = vst [vmem:[#allocation97_spill] sm:$0xff] %v10154_v38  ;;  %12936 = vst [vmem:[#allocation102_spill] sm:$0xff] %v10160_v24  ;;  %v10166_v5 = vld [vmem:[%s11476_s2 + $0x470] sm:$0xff]  ;;  %v10172_v9 = vld [vmem:[%s11476_s2 + $0x488] sm:$0xff] }
 0x631   :  { %2820 = vmatprep.subr.mxu0 %v10154_v38  ;;  %2997 = vmatpush2.msra.mxu1 %v10160_v24  ;;  %12937 = vst [vmem:[#allocation99_spill] sm:$0xff] %v10166_v5  ;;  %12938 = vst [vmem:[#allocation104_spill] sm:$0xff] %v10172_v9  ;;  %v10178_v38 = vld [vmem:[%s11476_s2 + $0x448] sm:$0xff]  ;;  %v10184_v24 = vld [vmem:[%s11476_s2 + $0x480] sm:$0xff] }
 0x632   :  { %2821 = vmatpush2.msra.mxu0 %v10166_v5  ;;  %2998 = vmatprep.subr.mxu1 %v10172_v9  ;;  %12939 = vst [vmem:[#allocation101_spill] sm:$0xff] %v10178_v38  ;;  %12940 = vst [vmem:[#allocation106_spill] sm:$0xff] %v10184_v24  ;;  %v10190_v5 = vld [vmem:[%s11476_s2 + $0x440] sm:$0xff]  ;;  %v10196_v9 = vld [vmem:[%s11476_s2 + $0x458] sm:$0xff] }
 0x633   :  { %2822 = vmatprep.subr.mxu0 %v10178_v38  ;;  %2999 = vmatpush2.msra.mxu1 %v10184_v24  ;;  %12941 = vst [vmem:[#allocation103_spill] sm:$0xff] %v10190_v5  ;;  %12942 = vst [vmem:[#allocation108_spill] sm:$0xff] %v10196_v9  ;;  %v10202_v38 = vld [vmem:[%s11476_s2 + $0x418] sm:$0xff]  ;;  %v10208_v24 = vld [vmem:[%s11476_s2 + $0x450] sm:$0xff] }
 0x634   :  { %2823 = vmatpush2.msra.mxu0 %v10190_v5  ;;  %3000 = vmatprep.subr.mxu1 %v10196_v9  ;;  %12943 = vst [vmem:[#allocation105_spill] sm:$0xff] %v10202_v38  ;;  %12944 = vst [vmem:[#allocation110_spill] sm:$0xff] %v10208_v24  ;;  %v10214_v5 = vld [vmem:[%s11476_s2 + $0x410] sm:$0xff]  ;;  %v10220_v9 = vld [vmem:[%s11476_s2 + $0x428] sm:$0xff] }
 0x635   :  { %2824 = vmatprep.subr.mxu0 %v10202_v38  ;;  %3001 = vmatpush2.msra.mxu1 %v10208_v24  ;;  %12945 = vst [vmem:[#allocation107_spill] sm:$0xff] %v10214_v5  ;;  %12946 = vst [vmem:[#allocation112_spill] sm:$0xff] %v10220_v9  ;;  %v10226_v38 = vld [vmem:[%s11476_s2 + $0x3e8] sm:$0xff]  ;;  %v10232_v24 = vld [vmem:[%s11476_s2 + $0x420] sm:$0xff] }
 0x636   :  { %2825 = vmatpush2.msra.mxu0 %v10214_v5  ;;  %3002 = vmatprep.subr.mxu1 %v10220_v9  ;;  %12947 = vst [vmem:[#allocation109_spill] sm:$0xff] %v10226_v38  ;;  %12948 = vst [vmem:[#allocation114_spill] sm:$0xff] %v10232_v24  ;;  %v10238_v5 = vld [vmem:[%s11476_s2 + $0x3e0] sm:$0xff]  ;;  %v10244_v9 = vld [vmem:[%s11476_s2 + $0x3f8] sm:$0xff] }
 0x637   :  { %2826 = vmatprep.subr.mxu0 %v10226_v38  ;;  %3003 = vmatpush2.msra.mxu1 %v10232_v24  ;;  %12949 = vst [vmem:[#allocation111_spill] sm:$0xff] %v10238_v5  ;;  %12950 = vst [vmem:[#allocation116_spill] sm:$0xff] %v10244_v9  ;;  %v10250_v38 = vld [vmem:[%s11476_s2 + $0x3b8] sm:$0xff]  ;;  %v10256_v24 = vld [vmem:[%s11476_s2 + $0x3f0] sm:$0xff] }
 0x638   :  { %2827 = vmatpush2.msra.mxu0 %v10238_v5  ;;  %3004 = vmatprep.subr.mxu1 %v10244_v9  ;;  %12951 = vst [vmem:[#allocation113_spill] sm:$0xff] %v10250_v38  ;;  %12952 = vst [vmem:[#allocation118_spill] sm:$0xff] %v10256_v24  ;;  %v10262_v5 = vld [vmem:[%s11476_s2 + $0x3b0] sm:$0xff]  ;;  %v10268_v9 = vld [vmem:[%s11476_s2 + $0x3c8] sm:$0xff] }
 0x639   :  { %2828 = vmatprep.subr.mxu0 %v10250_v38  ;;  %3005 = vmatpush2.msra.mxu1 %v10256_v24  ;;  %12953 = vst [vmem:[#allocation115_spill] sm:$0xff] %v10262_v5  ;;  %12954 = vst [vmem:[#allocation120_spill] sm:$0xff] %v10268_v9  ;;  %v10274_v38 = vld [vmem:[%s11476_s2 + $0x388] sm:$0xff]  ;;  %v10280_v24 = vld [vmem:[%s11476_s2 + $0x3c0] sm:$0xff] }
 0x63a   :  { %2829 = vmatpush2.msra.mxu0 %v10262_v5  ;;  %3006 = vmatprep.subr.mxu1 %v10268_v9  ;;  %12955 = vst [vmem:[#allocation117_spill] sm:$0xff] %v10274_v38  ;;  %12956 = vst [vmem:[#allocation122_spill] sm:$0xff] %v10280_v24  ;;  %v10286_v5 = vld [vmem:[%s11476_s2 + $0x380] sm:$0xff]  ;;  %v10292_v9 = vld [vmem:[%s11476_s2 + $0x398] sm:$0xff] }
 0x63b   :  { %2830 = vmatprep.subr.mxu0 %v10274_v38  ;;  %3007 = vmatpush2.msra.mxu1 %v10280_v24  ;;  %12957 = vst [vmem:[#allocation119_spill] sm:$0xff] %v10286_v5  ;;  %12958 = vst [vmem:[#allocation124_spill] sm:$0xff] %v10292_v9  ;;  %v10298_v38 = vld [vmem:[%s11476_s2 + $0x358] sm:$0xff]  ;;  %v10304_v24 = vld [vmem:[%s11476_s2 + $0x390] sm:$0xff] }
 0x63c   :  { %2831 = vmatpush2.msra.mxu0 %v10286_v5  ;;  %3008 = vmatprep.subr.mxu1 %v10292_v9  ;;  %12959 = vst [vmem:[#allocation121_spill] sm:$0xff] %v10298_v38  ;;  %12960 = vst [vmem:[#allocation126_spill] sm:$0xff] %v10304_v24  ;;  %v10310_v5 = vld [vmem:[%s11476_s2 + $0x350] sm:$0xff]  ;;  %v10316_v9 = vld [vmem:[%s11476_s2 + $0x368] sm:$0xff] }
 0x63d   :  { %2832 = vmatprep.subr.mxu0 %v10298_v38  ;;  %3009 = vmatpush2.msra.mxu1 %v10304_v24  ;;  %12961 = vst [vmem:[#allocation123_spill] sm:$0xff] %v10310_v5  ;;  %12962 = vst [vmem:[#allocation128_spill] sm:$0xff] %v10316_v9  ;;  %v10322_v38 = vld [vmem:[%s11476_s2 + $0x328] sm:$0xff]  ;;  %v10328_v24 = vld [vmem:[%s11476_s2 + $0x360] sm:$0xff] }
 0x63e   :  { %2833 = vmatpush2.msra.mxu0 %v10310_v5  ;;  %3010 = vmatprep.subr.mxu1 %v10316_v9  ;;  %12963 = vst [vmem:[#allocation125_spill] sm:$0xff] %v10322_v38  ;;  %12964 = vst [vmem:[#allocation130_spill] sm:$0xff] %v10328_v24  ;;  %v10334_v5 = vld [vmem:[%s11476_s2 + $0x320] sm:$0xff]  ;;  %v10340_v9 = vld [vmem:[%s11476_s2 + $0x338] sm:$0xff] }
 0x63f   :  { %2834 = vmatprep.subr.mxu0 %v10322_v38  ;;  %3011 = vmatpush2.msra.mxu1 %v10328_v24  ;;  %12965 = vst [vmem:[#allocation127_spill] sm:$0xff] %v10334_v5  ;;  %12966 = vst [vmem:[#allocation132_spill] sm:$0xff] %v10340_v9  ;;  %v10347_v24 = vld [vmem:[%s11476_s2 + $0x2e8] sm:$0xff]  ;;  %v10372_v38 = vld [vmem:[%s11476_s2 + $0x2b0] sm:$0xff] }
 0x640   :  { %2835 = vmatpush2.msra.mxu0 %v10334_v5  ;;  %3012 = vmatprep.subr.mxu1 %v10340_v9  ;;  %12967 = vst [vmem:[#allocation129_spill] sm:$0xff] %v10347_v24  ;;  %v10354_v5 = vld [vmem:[%s11476_s2 + $0x2e0] sm:$0xff]  ;;  %v10360_v9 = vld [vmem:[%s11476_s2 + $0x2b8] sm:$0xff]  ;;  %12971 = vst [vmem:[#allocation133_spill] sm:$0xff] %v10372_v38 }
 0x641   :  { %2837 = vmatmul.mubr.f32.vlgmr.msra.gmra.mxu0 %v9616_v17  ;;  %3029 = vmatprep.subr.mxu0 %v10347_v24  ;;  %12968 = vst [vmem:[#allocation134_spill] sm:$0xff] %v10354_v5  ;;  %12969 = vst [vmem:[#allocation131_spill] sm:$0xff] %v10360_v9  ;;  %v10366_v24 = vld [vmem:[%s11476_s2 + $0x330] sm:$0xff] }
 0x642   :  { %2842 = vmatprep.mubr.f32.mxu0 %v9634_v61  ;;  %3030 = vmatpush1.msra.mxu0 %v10354_v5  ;;  %12970 = vst [vmem:[#allocation136_spill] sm:$0xff] %v10366_v24  ;;  %v10378_v5 = vld [vmem:[%s11476_s2 + $0x308] sm:$0xff] }
 0x643   :  { %3031 = vmatprep.subr.mxu0 %v10360_v9  ;;  %3013 = vmatpush2.msra.mxu1 %v10366_v24  ;;  %12972 = vst [vmem:[#allocation138_spill] sm:$0xff] %v10378_v5  ;;  %v10385_v24 = vld [vmem:[%s11476_s2 + $0x288] sm:$0xff]  ;;  %v10403_v9 = vld [vmem:[%s11476_s2 + $0x258] sm:$0xff] }
 0x644   :  { %3032 = vmatpush1.msra.mxu0 %v10372_v38  ;;  %3014 = vmatprep.subr.mxu1 %v10378_v5  ;;  %12973 = vst [vmem:[#allocation135_spill] sm:$0xff] %v10385_v24  ;;  %v10391_v38 = vld [vmem:[%s11476_s2 + $0x280] sm:$0xff]  ;;  %12976 = vst [vmem:[#allocation142_spill] sm:$0xff] %v10403_v9 }
 0x645   :  { %2843 = vmatmul.mubr.f32.gmra.mxu0 %v9624_v41  ;;  %3033 = vmatprep.subr.mxu0 %v10385_v24  ;;  %12974 = vst [vmem:[#allocation140_spill] sm:$0xff] %v10391_v38  ;;  %v10397_v5 = vld [vmem:[%s11476_s2 + $0x300] sm:$0xff]  ;;  %v10409_v24 = vld [vmem:[%s11476_s2 + $0x2f8] sm:$0xff] }
 0x646   :  { %3034 = vmatpush1.msra.mxu0 %v10391_v38  ;;  %12975 = vst [vmem:[#allocation137_spill] sm:$0xff] %v10397_v5  ;;  %3015 = vmatpush2.msra.mxu1 %v10397_v5  ;;  %12977 = vst [vmem:[#allocation139_spill] sm:$0xff] %v10409_v24  ;;  %v10415_v38 = vld [vmem:[%s11476_s2 + $0x250] sm:$0xff]  ;;  %v10421_v5 = vld [vmem:[%s11476_s2 + $0x228] sm:$0xff] }
 0x647   :  { %3035 = vmatprep.subr.mxu0 %v10403_v9  ;;  %3106 = vmatprep.subr.mxu1 %v10409_v24  ;;  %12978 = vst [vmem:[#allocation144_spill] sm:$0xff] %v10415_v38  ;;  %12979 = vst [vmem:[#allocation141_spill] sm:$0xff] %v10421_v5  ;;  %v10427_v9 = vld [vmem:[%s11476_s2 + $0x220] sm:$0xff]  ;;  %v10433_v24 = vld [vmem:[%s11476_s2 + $0x1f8] sm:$0xff] }
 0x648   :  { %3036 = vmatpush1.msra.mxu0 %v10415_v38  ;;  %12980 = vst [vmem:[#allocation146_spill] sm:$0xff] %v10427_v9  ;;  %12981 = vst [vmem:[#allocation143_spill] sm:$0xff] %v10433_v24  ;;  %v10439_v38 = vld [vmem:[%s11476_s2 + $0x1f0] sm:$0xff] }
 0x649   :  { %3037 = vmatprep.subr.mxu0 %v10421_v5  ;;  %12982 = vst [vmem:[#allocation148_spill] sm:$0xff] %v10439_v38  ;;  %v10445_v5 = vld [vmem:[%s11476_s2 + $0x1c8] sm:$0xff] }
 0x64a   :  { %3038 = vmatpush1.msra.mxu0 %v10427_v9  ;;  %12983 = vst [vmem:[#allocation145_spill] sm:$0xff] %v10445_v5  ;;  %v10451_v9 = vld [vmem:[%s11476_s2 + $0x1c0] sm:$0xff] }
 0x64b   :  { %3039 = vmatprep.subr.mxu0 %v10433_v24  ;;  %12984 = vst [vmem:[#allocation150_spill] sm:$0xff] %v10451_v9  ;;  %v10457_v24 = vld [vmem:[%s11476_s2 + $0x198] sm:$0xff] }
 0x64c   :  { %3040 = vmatpush1.msra.mxu0 %v10439_v38  ;;  %12985 = vst [vmem:[#allocation147_spill] sm:$0xff] %v10457_v24  ;;  %v10463_v38 = vld [vmem:[%s11476_s2 + $0x190] sm:$0xff] }
 0x64d   :  { %3041 = vmatprep.subr.mxu0 %v10445_v5  ;;  %12986 = vst [vmem:[#allocation152_spill] sm:$0xff] %v10463_v38  ;;  %v10469_v5 = vld [vmem:[%s11476_s2 + $0x168] sm:$0xff] }
 0x64e   :  { %3042 = vmatpush1.msra.mxu0 %v10451_v9  ;;  %12987 = vst [vmem:[#allocation149_spill] sm:$0xff] %v10469_v5  ;;  %v10475_v9 = vld [vmem:[%s11476_s2 + $0x160] sm:$0xff] }
 0x64f   :  { %3043 = vmatprep.subr.mxu0 %v10457_v24  ;;  %12988 = vst [vmem:[#allocation154_spill] sm:$0xff] %v10475_v9  ;;  %v10481_v24 = vld [vmem:[%s11476_s2 + $0x138] sm:$0xff] }
 0x650   :  { %3044 = vmatpush1.msra.mxu0 %v10463_v38  ;;  %12989 = vst [vmem:[#allocation151_spill] sm:$0xff] %v10481_v24  ;;  %v10487_v38 = vld [vmem:[%s11476_s2 + $0x130] sm:$0xff] }
 0x651   :  { %3045 = vmatprep.subr.mxu0 %v10469_v5  ;;  %12990 = vst [vmem:[#allocation156_spill] sm:$0xff] %v10487_v38  ;;  %v10493_v5 = vld [vmem:[%s11476_s2 + $0x108] sm:$0xff] }
 0x652   :  { %3046 = vmatpush1.msra.mxu0 %v10475_v9  ;;  %12991 = vst [vmem:[#allocation153_spill] sm:$0xff] %v10493_v5  ;;  %v10499_v9 = vld [vmem:[%s11476_s2 + $0x100] sm:$0xff] }
 0x653   :  { %3047 = vmatprep.subr.mxu0 %v10481_v24  ;;  %12992 = vst [vmem:[#allocation158_spill] sm:$0xff] %v10499_v9  ;;  %v10505_v24 = vld [vmem:[%s11476_s2 + $0xd8] sm:$0xff] }
 0x654   :  { %3048 = vmatpush1.msra.mxu0 %v10487_v38  ;;  %12993 = vst [vmem:[#allocation155_spill] sm:$0xff] %v10505_v24  ;;  %v10511_v38 = vld [vmem:[%s11476_s2 + $0xd0] sm:$0xff] }
 0x655   :  { %3049 = vmatprep.subr.mxu0 %v10493_v5  ;;  %12994 = vst [vmem:[#allocation160_spill] sm:$0xff] %v10511_v38  ;;  %v10517_v5 = vld [vmem:[%s11476_s2 + $0xa8] sm:$0xff] }
 0x656   :  { %3050 = vmatpush1.msra.mxu0 %v10499_v9  ;;  %12995 = vst [vmem:[#allocation157_spill] sm:$0xff] %v10517_v5  ;;  %v10523_v9 = vld [vmem:[%s11476_s2 + $0xa0] sm:$0xff] }
 0x657   :  { %3051 = vmatprep.subr.mxu0 %v10505_v24  ;;  %12996 = vst [vmem:[#allocation162_spill] sm:$0xff] %v10523_v9  ;;  %v10529_v24 = vld [vmem:[%s11476_s2 + $0x78] sm:$0xff] }
 0x658   :  { %3052 = vmatpush1.msra.mxu0 %v10511_v38  ;;  %12997 = vst [vmem:[#allocation159_spill] sm:$0xff] %v10529_v24  ;;  %v10535_v38 = vld [vmem:[%s11476_s2 + $0x70] sm:$0xff] }
 0x659   :  { %3053 = vmatprep.subr.mxu0 %v10517_v5  ;;  %12998 = vst [vmem:[#allocation166_spill] sm:$0xff] %v10535_v38  ;;  %v10541_v5 = vld [vmem:[%s11476_s2 + $0x48] sm:$0xff] }
 0x65a   :  { %3054 = vmatpush1.msra.mxu0 %v10523_v9  ;;  %12999 = vst [vmem:[#allocation161_spill] sm:$0xff] %v10541_v5  ;;  %v10547_v9 = vld [vmem:[%s11476_s2 + $0x40] sm:$0xff] }
 0x65b   :  { %3055 = vmatprep.subr.mxu0 %v10529_v24  ;;  %13000 = vst [vmem:[#allocation168_spill] sm:$0xff] %v10547_v9  ;;  %v10553_v24 = vld [vmem:[%s11476_s2 + $0x18] sm:$0xff] }
 0x65c   :  { %3056 = vmatpush1.msra.mxu0 %v10535_v38  ;;  %13001 = vst [vmem:[#allocation163_spill] sm:$0xff] %v10553_v24  ;;  %v10559_v38 = vld [vmem:[%s11476_s2 + $0x10] sm:$0xff] }
 0x65d   :  { %3057 = vmatprep.subr.mxu0 %v10541_v5  ;;  %13002 = vst [vmem:[#allocation164_spill] sm:$0xff] %v10559_v38  ;;  %v10565_v5 = vld [vmem:[%s11476_s2 + $0x5e8] sm:$0xff] }
 0x65e   :  { %3058 = vmatpush1.msra.mxu0 %v10547_v9  ;;  %13003 = vst [vmem:[#allocation165_spill] sm:$0xff] %v10565_v5  ;;  %v10571_v9 = vld [vmem:[%s11476_s2 + $0x5e0] sm:$0xff] }
 0x65f   :  { %3059 = vmatprep.subr.mxu0 %v10553_v24  ;;  %13004 = vst [vmem:[#allocation171_spill] sm:$0xff] %v10571_v9  ;;  %v10577_v24 = vld [vmem:[%s11476_s2 + $0x5b8] sm:$0xff] }
 0x660   :  { %3060 = vmatpush1.msra.mxu0 %v10559_v38  ;;  %13005 = vst [vmem:[#allocation167_spill] sm:$0xff] %v10577_v24  ;;  %v10583_v38 = vld [vmem:[%s11476_s2 + $0x5b0] sm:$0xff] }
 0x661   :  { %3061 = vmatprep.subr.mxu0 %v10565_v5  ;;  %13006 = vst [vmem:[#allocation173_spill] sm:$0xff] %v10583_v38  ;;  %v10589_v5 = vld [vmem:[%s11476_s2 + $0x588] sm:$0xff] }
 0x662   :  { %3062 = vmatpush2.msra.mxu0 %v10571_v9  ;;  %13007 = vst [vmem:[#allocation169_spill] sm:$0xff] %v10589_v5  ;;  %v10595_v9 = vld [vmem:[%s11476_s2 + $0x580] sm:$0xff] }
 0x663   :  { %3063 = vmatprep.subr.mxu0 %v10577_v24  ;;  %13008 = vst [vmem:[#allocation170_spill] sm:$0xff] %v10595_v9  ;;  %v10601_v24 = vld [vmem:[%s11476_s2 + $0x558] sm:$0xff] }
 0x664   :  { %3064 = vmatpush2.msra.mxu0 %v10583_v38  ;;  %13009 = vst [vmem:[#allocation175_spill] sm:$0xff] %v10601_v24  ;;  %v10607_v38 = vld [vmem:[%s11476_s2 + $0x550] sm:$0xff] }
 0x665   :  { %3065 = vmatprep.subr.mxu0 %v10589_v5  ;;  %13010 = vst [vmem:[#allocation172_spill] sm:$0xff] %v10607_v38  ;;  %v10613_v5 = vld [vmem:[%s11476_s2 + $0x528] sm:$0xff] }
 0x666   :  { %3066 = vmatpush2.msra.mxu0 %v10595_v9  ;;  %13011 = vst [vmem:[#allocation177_spill] sm:$0xff] %v10613_v5  ;;  %v10619_v9 = vld [vmem:[%s11476_s2 + $0x520] sm:$0xff] }
 0x667   :  { %3067 = vmatprep.subr.mxu0 %v10601_v24  ;;  %13012 = vst [vmem:[#allocation174_spill] sm:$0xff] %v10619_v9  ;;  %v10625_v24 = vld [vmem:[%s11476_s2 + $0x4f8] sm:$0xff] }
 0x668   :  { %3068 = vmatpush2.msra.mxu0 %v10607_v38  ;;  %13013 = vst [vmem:[#allocation176_spill] sm:$0xff] %v10625_v24  ;;  %v10631_v38 = vld [vmem:[%s11476_s2 + $0x4f0] sm:$0xff] }
 0x669   :  { %3069 = vmatprep.subr.mxu0 %v10613_v5  ;;  %13014 = vst [vmem:[#allocation178_spill] sm:$0xff] %v10631_v38  ;;  %v10637_v5 = vld [vmem:[%s11476_s2 + $0x4c8] sm:$0xff] }
 0x66a   :  { %3070 = vmatpush2.msra.mxu0 %v10619_v9  ;;  %13015 = vst [vmem:[#allocation179_spill] sm:$0xff] %v10637_v5  ;;  %v10643_v9 = vld [vmem:[%s11476_s2 + $0x4c0] sm:$0xff] }
 0x66b   :  { %3071 = vmatprep.subr.mxu0 %v10625_v24  ;;  %13016 = vst [vmem:[#allocation180_spill] sm:$0xff] %v10643_v9  ;;  %v10649_v24 = vld [vmem:[%s11476_s2 + $0x498] sm:$0xff] }
 0x66c   :  { %3072 = vmatpush2.msra.mxu0 %v10631_v38  ;;  %13017 = vst [vmem:[#allocation181_spill] sm:$0xff] %v10649_v24  ;;  %v10655_v38 = vld [vmem:[%s11476_s2 + $0x490] sm:$0xff] }
 0x66d   :  { %3073 = vmatprep.subr.mxu0 %v10637_v5  ;;  %13018 = vst [vmem:[#allocation182_spill] sm:$0xff] %v10655_v38  ;;  %v10661_v5 = vld [vmem:[%s11476_s2 + $0x468] sm:$0xff] }
 0x66e   :  { %3074 = vmatpush2.msra.mxu0 %v10643_v9  ;;  %13019 = vst [vmem:[#allocation183_spill] sm:$0xff] %v10661_v5  ;;  %v10667_v9 = vld [vmem:[%s11476_s2 + $0x460] sm:$0xff] }
 0x66f   :  { %3075 = vmatprep.subr.mxu0 %v10649_v24  ;;  %13020 = vst [vmem:[#allocation184_spill] sm:$0xff] %v10667_v9  ;;  %v10673_v24 = vld [vmem:[%s11476_s2 + $0x438] sm:$0xff] }
 0x670   :  { %3076 = vmatpush2.msra.mxu0 %v10655_v38  ;;  %13021 = vst [vmem:[#allocation185_spill] sm:$0xff] %v10673_v24  ;;  %v10679_v38 = vld [vmem:[%s11476_s2 + $0x430] sm:$0xff] }
 0x671   :  { %3077 = vmatprep.subr.mxu0 %v10661_v5  ;;  %13022 = vst [vmem:[#allocation186_spill] sm:$0xff] %v10679_v38  ;;  %v10685_v5 = vld [vmem:[%s11476_s2 + $0x408] sm:$0xff] }
 0x672   :  { %3078 = vmatpush2.msra.mxu0 %v10667_v9  ;;  %13023 = vst [vmem:[#allocation187_spill] sm:$0xff] %v10685_v5  ;;  %v10691_v9 = vld [vmem:[%s11476_s2 + $0x400] sm:$0xff] }
 0x673   :  { %3079 = vmatprep.subr.mxu0 %v10673_v24  ;;  %13024 = vst [vmem:[#allocation188_spill] sm:$0xff] %v10691_v9  ;;  %v10697_v24 = vld [vmem:[%s11476_s2 + $0x3d8] sm:$0xff] }
 0x674   :  { %3080 = vmatpush2.msra.mxu0 %v10679_v38  ;;  %13025 = vst [vmem:[#allocation189_spill] sm:$0xff] %v10697_v24  ;;  %v10703_v38 = vld [vmem:[%s11476_s2 + $0x3d0] sm:$0xff] }
 0x675   :  { %3081 = vmatprep.subr.mxu0 %v10685_v5  ;;  %13026 = vst [vmem:[#allocation190_spill] sm:$0xff] %v10703_v38  ;;  %v10709_v5 = vld [vmem:[%s11476_s2 + $0x3a8] sm:$0xff] }
 0x676   :  { %3082 = vmatpush2.msra.mxu0 %v10691_v9  ;;  %13027 = vst [vmem:[#allocation191_spill] sm:$0xff] %v10709_v5  ;;  %v10715_v9 = vld [vmem:[%s11476_s2 + $0x3a0] sm:$0xff] }
 0x677   :  { %3083 = vmatprep.subr.mxu0 %v10697_v24  ;;  %13028 = vst [vmem:[#allocation192_spill] sm:$0xff] %v10715_v9  ;;  %v10721_v24 = vld [vmem:[%s11476_s2 + $0x378] sm:$0xff] }
 0x678   :  { %3084 = vmatpush2.msra.mxu0 %v10703_v38  ;;  %13029 = vst [vmem:[#allocation193_spill] sm:$0xff] %v10721_v24  ;;  %v10727_v38 = vld [vmem:[%s11476_s2 + $0x370] sm:$0xff] }
 0x679   :  { %3085 = vmatprep.subr.mxu0 %v10709_v5  ;;  %13030 = vst [vmem:[#allocation194_spill] sm:$0xff] %v10727_v38  ;;  %v10733_v5 = vld [vmem:[%s11476_s2 + $0x348] sm:$0xff] }
 0x67a   :  { %3086 = vmatpush2.msra.mxu0 %v10715_v9  ;;  %13031 = vst [vmem:[#allocation195_spill] sm:$0xff] %v10733_v5  ;;  %v10739_v9 = vld [vmem:[%s11476_s2 + $0x340] sm:$0xff] }
 0x67b   :  { %3087 = vmatprep.subr.mxu0 %v10721_v24  ;;  %13032 = vst [vmem:[#allocation196_spill] sm:$0xff] %v10739_v9  ;;  %v10745_v24 = vld [vmem:[%s11476_s2 + $0x318] sm:$0xff] }
 0x67c   :  { %3088 = vmatpush2.msra.mxu0 %v10727_v38  ;;  %13033 = vst [vmem:[#allocation197_spill] sm:$0xff] %v10745_v24  ;;  %v10751_v38 = vld [vmem:[%s11476_s2 + $0x310] sm:$0xff] }
 0x67d   :  { %3089 = vmatprep.subr.mxu0 %v10733_v5  ;;  %13034 = vst [vmem:[#allocation198_spill] sm:$0xff] %v10751_v38  ;;  %v4913_v5 = vld [vmem:[%s11476_s2 + $0x2d8] sm:$0xff] }
 0x67e   :  { %3090 = vmatpush2.msra.mxu0 %v10739_v9 }
 0x67f   :  { %3091 = vmatprep.subr.mxu0 %v10745_v24 }
 0x680   :  { %3092 = vmatpush2.msra.mxu0 %v10751_v38 }
 0x681   :  { %3286 = vmatprep.subr.mxu0 %v4913_v5 }
 0x6c0   :  { %v2684_v9 = vpop.f32.mrf.mxu0  ;;  %v2761_v11 = vpop.f32.mrf.mxu1 }
 0x6c1   :  { %v2849_v28 = vadd.f32 %v2684_v9, %v13035_v58 }
 0x6c2   :  { %v2686_v14 = vpop.f32.mrf.mxu0  ;;  %v2763_v45 = vpop.f32.mrf.mxu1 }
 0x6c3   :  { %v2850_v22 = vadd.f32 %v2686_v14, %v13036_v60  ;;  %v3921_v49 = vmul.f32 -1.442695, %v2849_v28  ;;  %v13040_v60 = vld [vmem:[#allocation21_spill] sm:$0xff]  ;;  %v2877_v28 = vadd.f32 %v2761_v11, %v438_v13 }
 0x6c4   :  { %v440_v14 = vadd.f32 %v13040_v60, %v6702_v32 }
 0x6c5   :  { %v2690_v20 = vpop.f32.mrf.mxu0  ;;  %v3922_v18 = vmul.f32 -1.442695, %v2850_v22  ;;  %4217 = vpow2.f32 %v3921_v49  ;;  %v2767_v58 = vpop.f32.mrf.mxu1  ;;  %v13042_v49 = vld [vmem:[#allocation24_spill] sm:$0xff] }
 0x6c6   :  { %v2851_v34 = vadd.f32 %v2690_v20, %v13037_v30  ;;  %v13041_v30 = vld [vmem:[#allocation56_spill] sm:$0xff]  ;;  %v2878_v20 = vadd.f32 %v2763_v45, %v440_v14 }
 0x6c7   :  { %v2692_v24 = vpop.f32.mrf.mxu0  ;;  %4219 = vpow2.f32 %v3922_v18  ;;  %v444_v22 = vadd.f32 %v13041_v30, %v6696_v31 }
 0x6c8   :  { %v2852_v38 = vadd.f32 %v2692_v24, %v13038_v46  ;;  %v3923_v26 = vmul.f32 -1.442695, %v2851_v34  ;;  %v2769_v46 = vpop.f32.mrf.mxu1  ;;  %v446_v34 = vadd.f32 %v13042_v49, %v6702_v32  ;;  %v3925_v24 = vmul.f32 -1.442695, %v2877_v28 }
 0x6c9   :  { %v2879_v18 = vadd.f32 %v2767_v58, %v444_v22 }
 0x6ca   :  { %v3924_v5 = vmul.f32 -1.442695, %v2852_v38  ;;  %4221 = vpow2.f32 %v3923_v26  ;;  %v2880_v9 = vadd.f32 %v2769_v46, %v446_v34  ;;  %v3926_v38 = vmul.f32 -1.442695, %v2878_v20 }
 0x6cb   :  { %v3927_v26 = vmul.f32 -1.442695, %v2879_v18 }
 0x6cc   :  { %4223 = vpow2.f32 %v3924_v5  ;;  %v3928_v50 = vmul.f32 -1.442695, %v2880_v9 }
 0x6cd   :  { %4225 = vpow2.f32 %v3925_v24 }
 0x6ce   :  { %4227 = vpow2.f32 %v3926_v38 }
 0x6cf   :  { %4229 = vpow2.f32 %v3927_v26 }
 0x6d0   :  { %4231 = vpow2.f32 %v3928_v50  ;;  %v13043_v50 = vld [vmem:[#allocation37_spill] sm:$0xff] }
 0x6d1   :  { %v599_v9 = vadd.f32 %v13043_v50, %v6709_v21 }
 0x6d2   :  { %v4218_v57 = vpop.eup %4217 }
 0x6d3   :  { %v2865_v60 = vadd.f32 1.0, %v4218_v57 }
 0x6d4   :  { %v4220_v59 = vpop.eup %4219 }
 0x6d5   :  { %v2866_v11 = vadd.f32 1.0, %v4220_v59  ;;  %4233 = vrcp.f32 %v2865_v60  ;;  %v13044_v60 = vld [vmem:[#allocation38_spill] sm:$0xff] }
 0x6d7   :  { %v4222_v13 = vpop.eup %4221  ;;  %4235 = vrcp.f32 %v2866_v11 }
 0x6d8   :  { %v2867_v45 = vadd.f32 1.0, %v4222_v13  ;;  %v601_v13 = vadd.f32 %v13044_v60, %v6718_v55 }
 0x6d9   :  { %v4224_v5 = vpop.eup %4223 }
 0x6da   :  { %v2868_v14 = vadd.f32 1.0, %v4224_v5  ;;  %4237 = vrcp.f32 %v2867_v45  ;;  %v4226_v58 = vpop.eup %4225 }
 0x6db   :  { %v4228_v28 = vpop.eup %4227  ;;  %v2893_v22 = vadd.f32 1.0, %v4226_v58 }
 0x6dc   :  { %4239 = vrcp.f32 %v2868_v14  ;;  %v4230_v30 = vpop.eup %4229  ;;  %v2894_v49 = vadd.f32 1.0, %v4228_v28 }
 0x6dd   :  { %v4232_v46 = vpop.eup %4231  ;;  %v2895_v24 = vadd.f32 1.0, %v4230_v30  ;;  %4241 = vrcp.f32 %v2893_v22  ;;  %v13045_v30 = vld [vmem:[#allocation39_spill] sm:$0xff] }
 0x6de   :  { %v2896_v11 = vadd.f32 1.0, %v4232_v46  ;;  %4243 = vrcp.f32 %v2894_v49  ;;  %v13046_v46 = vld [vmem:[#allocation40_spill] sm:$0xff] }
 0x6df   :  { %4245 = vrcp.f32 %v2895_v24  ;;  %v607_v49 = vadd.f32 %v13046_v46, %v6718_v55 }
 0x6e2   :  { %v4234_v18 = vpop.eup %4233 }
 0x6e4   :  { %v4236_v26 = vpop.eup %4235 }
 0x6e7   :  { %v4238_v28 = vpop.eup %4237 }
 0x6e9   :  { %v4240_v50 = vpop.eup %4239 }
 0x701   :  { %v2838_v20 = vpop.f32.mrf.mxu0 }
 0x702   :  { %v2905_v34 = vadd.f32 %v2838_v20, %v6706_v4  ;;  %v605_v20 = vadd.f32 %v13045_v30, %v6709_v21 }
 0x703   :  { %v2840_v59 = vpop.f32.mrf.mxu0 }
 0x704   :  { %v2909_v38 = vmul.f32 %v4234_v18, %v2905_v34  ;;  %v2906_v57 = vadd.f32 %v2840_v59, %v6715_v63 }
 0x705   :  { %v2844_v5 = vpop.f32.mrf.mxu0 }
 0x706   :  { %v2913_v45 = vadd.f32 %v2909_v38, %v599_v9  ;;  %v2910_v14 = vmul.f32 %v4236_v26, %v2906_v57  ;;  %v2907_v58 = vadd.f32 %v2844_v5, %v6706_v4  ;;  %v4242_v26 = vpop.eup %4241 }
 0x707   :  { %v2846_v22 = vpop.f32.mrf.mxu0  ;;  %v4244_v60 = vpop.eup %4243  ;;  %v2921_v5 = vsub.f32 1.0, %v4242_v26 }
 0x708   :  { %4247 = vtanh.f32 %v2913_v45  ;;  %v2914_v34 = vadd.f32 %v2910_v14, %v601_v13  ;;  %v2911_v18 = vmul.f32 %v4238_v28, %v2907_v58  ;;  %v2908_v59 = vadd.f32 %v2846_v22, %v6715_v63  ;;  %v4246_v24 = vpop.eup %4245 }
 0x709   :  { %4249 = vrcp.f32 %v2896_v11  ;;  %v2922_v14 = vsub.f32 1.0, %v4244_v60  ;;  %v2929_v28 = vmul.f32 %v4242_v26, %v9616_v17  ;;  %v2930_v22 = vmul.f32 %v4244_v60, %v9618_v53  ;;  %v13075_v26 = vld [vmem:[#allocation34_spill] sm:$0xff]  ;;  %v13076_v60 = vld [vmem:[#allocation75_spill] sm:$0xff] }
 0x70a   :  { %4251 = vtanh.f32 %v2914_v34  ;;  %v2915_v9 = vadd.f32 %v2911_v18, %v605_v20  ;;  %v2912_v38 = vmul.f32 %v4240_v50, %v2908_v59  ;;  %v2923_v20 = vsub.f32 1.0, %v4246_v24 }
 0x70c   :  { %4253 = vtanh.f32 %v2915_v9  ;;  %v2916_v57 = vadd.f32 %v2912_v38, %v607_v49  ;;  %v2931_v49 = vmul.f32 %v4246_v24, %v9624_v41  ;;  %v4914_v41 = vld [vmem:[%s11476_s2 + $0x2d0] sm:$0xff]  ;;  %v13077_v24 = vld [vmem:[#allocation78_spill] sm:$0xff] }
 0x70e   :  { %4255 = vtanh.f32 %v2916_v57 }
 0x715   :  { %v4248_v45 = vpop.eup %4247 }
 0x716   :  { %v4250_v13 = vpop.eup %4249  ;;  %v2925_v58 = vmul.f32 %v4248_v45, %v2921_v5  ;;  %v13078_v5 = vld [vmem:[#allocation76_spill] sm:$0xff] }
 0x717   :  { %v4252_v11 = vpop.eup %4251  ;;  %v2924_v50 = vsub.f32 1.0, %v4250_v13  ;;  %v2932_v38 = vmul.f32 %v4250_v13, %v9634_v61  ;;  %v4915_v61 = vld [vmem:[%s11476_s2 + $0x2a8] sm:$0xff]  ;;  %v13080_v13 = vld [vmem:[#allocation77_spill] sm:$0xff] }
 0x718   :  { %v2926_v30 = vmul.f32 %v4252_v11, %v2922_v14  ;;  %v10783_v34 = vadd.f32 %v2929_v28, %v2925_v58  ;;  %v13079_v45 = vld [vmem:[#allocation80_spill] sm:$0xff]  ;;  %v13081_v14 = vld [vmem:[#allocation82_spill] sm:$0xff]  ;;  %v13082_v58 = vld [vmem:[#allocation79_spill] sm:$0xff] }
 0x719   :  { %v4254_v18 = vpop.eup %4253  ;;  %v13083_v28 = vld [vmem:[#allocation84_spill] sm:$0xff]  ;;  %v13084_v11 = vld [vmem:[#allocation81_spill] sm:$0xff] }
 0x71a   :  { %v10785_v59 = vadd.f32 %v2930_v22, %v2926_v30  ;;  %v2927_v46 = vmul.f32 %v4254_v18, %v2923_v20  ;;  %v13085_v30 = vld [vmem:[#allocation86_spill] sm:$0xff]  ;;  %v13086_v22 = vld [vmem:[#allocation83_spill] sm:$0xff]  ;;  %v13087_v20 = vld [vmem:[#allocation88_spill] sm:$0xff] }
 0x71b   :  { %v4256_v9 = vpop.eup %4255  ;;  %v13088_v18 = vld [vmem:[#allocation85_spill] sm:$0xff] }
 0x71c   :  { %3016 = vmatprep.mubr.f32.mxu1 %v10785_v59  ;;  %3093 = vmatprep.mubr.f32.mxu0 %v10785_v59  ;;  %v2928_v17 = vmul.f32 %v4256_v9, %v2924_v50  ;;  %v10791_v57 = vadd.f32 %v2931_v49, %v2927_v46  ;;  %v13089_v50 = vld [vmem:[#allocation90_spill] sm:$0xff]  ;;  %v13090_v46 = vld [vmem:[#allocation87_spill] sm:$0xff]  ;;  %v13091_v49 = vld [vmem:[#allocation92_spill] sm:$0xff] }
 0x71d   :  { %3017 = vmatmul.mubr.f32.vlgmr.msra.gmra.mxu1 %v10783_v34  ;;  %3094 = vmatmul.mubr.f32.vlgmr.msra.gmra.mxu0 %v10783_v34  ;;  %v13092_v9 = vld [vmem:[#allocation89_spill] sm:$0xff] }
 0x71e   :  { %3107 = vmatpush1.msra.mxu1 %v9631_v62  ;;  %v10796_v53 = vadd.f32 %v2932_v38, %v2928_v17  ;;  %3287 = vmatpush1.msra.mxu0 %v4914_v41  ;;  %v4916_v62 = vld [vmem:[%s11476_s2 + $0x2a0] sm:$0xff]  ;;  %v13093_v17 = vld [vmem:[#allocation94_spill] sm:$0xff]  ;;  %v13095_v41 = vld [vmem:[#allocation96_spill] sm:$0xff] }
 0x71f   :  { %3108 = vmatprep.subr.mxu1 %v9640_v56  ;;  %3288 = vmatprep.subr.mxu0 %v4915_v61  ;;  %v4917_v56 = vld [vmem:[%s11476_s2 + $0x278] sm:$0xff]  ;;  %v13094_v38 = vld [vmem:[#allocation91_spill] sm:$0xff]  ;;  %v13096_v61 = vld [vmem:[#allocation93_spill] sm:$0xff] }
 0x720   :  { %3109 = vmatpush1.msra.mxu1 %v9647_v42  ;;  %3022 = vmatprep.mubr.f32.mxu1 %v10796_v53  ;;  %v4918_v42 = vld [vmem:[%s11476_s2 + $0x270] sm:$0xff] }
 0x721   :  { %3099 = vmatprep.mubr.f32.mxu0 %v10796_v53  ;;  %3110 = vmatprep.subr.mxu1 %v9655_v40  ;;  %v4919_v40 = vld [vmem:[%s11476_s2 + $0x248] sm:$0xff] }
 0x722   :  { %3023 = vmatmul.mubr.f32.gmra.mxu1 %v10791_v57  ;;  %3100 = vmatmul.mubr.f32.gmra.mxu0 %v10791_v57 }
 0x723   :  { %3111 = vmatpush1.msra.mxu1 %v9663_v36  ;;  %3170 = vmatprep.mubr.f32.mxu1 %v10785_v59  ;;  %v13047_v36 = vld [vmem:[#allocation229_spill] sm:$0xff] }
 0x724   :  { %3112 = vmatprep.subr.mxu1 %v9670_v51  ;;  %3289 = vmatpush1.msra.mxu0 %v4916_v62  ;;  %v13048_v51 = vld [vmem:[#allocation230_spill] sm:$0xff] }
 0x725   :  { %3113 = vmatpush1.msra.mxu1 %v9677_v37  ;;  %3290 = vmatprep.subr.mxu0 %v4917_v56  ;;  %v13049_v37 = vld [vmem:[#allocation231_spill] sm:$0xff]  ;;  %v13097_v62 = vld [vmem:[#allocation98_spill] sm:$0xff] }
 0x726   :  { %3114 = vmatprep.subr.mxu1 %v9684_v39  ;;  %3291 = vmatpush1.msra.mxu0 %v4918_v42  ;;  %v13050_v39 = vld [vmem:[#allocation232_spill] sm:$0xff]  ;;  %v13098_v56 = vld [vmem:[#allocation95_spill] sm:$0xff] }
 0x727   :  { %3115 = vmatpush1.msra.mxu1 %v9691_v54  ;;  %3292 = vmatprep.subr.mxu0 %v4919_v40  ;;  %v13051_v54 = vld [vmem:[#allocation233_spill] sm:$0xff]  ;;  %v13099_v42 = vld [vmem:[#allocation100_spill] sm:$0xff] }
 0x728   :  { %3116 = vmatprep.subr.mxu1 %v9698_v7  ;;  %3293 = vmatpush1.msra.mxu0 %v9704_v2  ;;  %v13052_v7 = vld [vmem:[#allocation41_spill] sm:$0xff]  ;;  %v13053_v2 = vld [vmem:[#allocation42_spill] sm:$0xff] }
 0x729   :  { %3117 = vmatpush1.msra.mxu1 %v9710_v44  ;;  %3294 = vmatprep.subr.mxu0 %v9716_v27  ;;  %v13054_v44 = vld [vmem:[#allocation43_spill] sm:$0xff]  ;;  %v13055_v27 = vld [vmem:[#allocation44_spill] sm:$0xff]  ;;  %v13100_v40 = vld [vmem:[#allocation97_spill] sm:$0xff] }
 0x72a   :  { %3118 = vmatprep.subr.mxu1 %v9722_v48  ;;  %3295 = vmatpush1.msra.mxu0 %v9728_v16  ;;  %v13056_v48 = vld [vmem:[#allocation3_spill] sm:$0xff]  ;;  %v13057_v16 = vld [vmem:[#allocation4_spill] sm:$0xff] }
 0x72b   :  { %3119 = vmatpush1.msra.mxu1 %v9734_v3  ;;  %3296 = vmatprep.subr.mxu0 %v9740_v47  ;;  %v13058_v3 = vld [vmem:[#allocation5_spill] sm:$0xff]  ;;  %v13059_v47 = vld [vmem:[#allocation6_spill] sm:$0xff] }
 0x72c   :  { %3120 = vmatprep.subr.mxu1 %v9746_v33  ;;  %3297 = vmatpush1.msra.mxu0 %v9752_v15  ;;  %v13060_v33 = vld [vmem:[#allocation28_spill] sm:$0xff]  ;;  %v13061_v15 = vld [vmem:[#allocation61_spill] sm:$0xff] }
 0x72d   :  { %3121 = vmatpush1.msra.mxu1 %v9758_v43  ;;  %3298 = vmatprep.subr.mxu0 %v9764_v12  ;;  %v13062_v43 = vld [vmem:[#allocation62_spill] sm:$0xff]  ;;  %v13063_v12 = vld [vmem:[#allocation31_spill] sm:$0xff] }
 0x72e   :  { %3122 = vmatprep.subr.mxu1 %v9770_v6  ;;  %3299 = vmatpush1.msra.mxu0 %v9776_v29  ;;  %v13064_v6 = vld [vmem:[#allocation7_spill] sm:$0xff]  ;;  %v13065_v29 = vld [vmem:[#allocation8_spill] sm:$0xff] }
 0x72f   :  { %3123 = vmatpush1.msra.mxu1 %v9782_v35  ;;  %3300 = vmatprep.subr.mxu0 %v9788_v52  ;;  %v13066_v35 = vld [vmem:[#allocation46_spill] sm:$0xff]  ;;  %v13067_v52 = vld [vmem:[#allocation47_spill] sm:$0xff] }
 0x730   :  { %3124 = vmatprep.subr.mxu1 %v9794_v19  ;;  %3301 = vmatpush1.msra.mxu0 %v9800_v1  ;;  %v13068_v19 = vld [vmem:[#allocation45_spill] sm:$0xff] }
 0x731   :  { %3125 = vmatpush1.msra.mxu1 %v9806_v8  ;;  %3302 = vmatprep.subr.mxu0 %v9812_v10  ;;  %v13069_v1 = vld [vmem:[#allocation9_spill] sm:$0xff]  ;;  %v13070_v8 = vld [vmem:[#allocation10_spill] sm:$0xff]  ;;  %v13071_v10 = vld [vmem:[#allocation11_spill] sm:$0xff] }
 0x732   :  { %3126 = vmatprep.subr.mxu1 %v9818_v23  ;;  %3303 = vmatpush1.msra.mxu0 %v9824_v25  ;;  %v13072_v23 = vld [vmem:[#allocation32_spill] sm:$0xff]  ;;  %v13073_v25 = vld [vmem:[#allocation33_spill] sm:$0xff] }
 0x733   :  { %3127 = vmatpush1.msra.mxu1 %v9830_v0  ;;  %3304 = vmatprep.subr.mxu0 %v13047_v36  ;;  %v13074_v0 = vld [vmem:[#allocation64_spill] sm:$0xff]  ;;  %v13101_v36 = vld [vmem:[#allocation102_spill] sm:$0xff] }
 0x734   :  { %3128 = vmatprep.subr.mxu1 %v13048_v51  ;;  %3305 = vmatpush1.msra.mxu0 %v13049_v37  ;;  %v13102_v51 = vld [vmem:[#allocation99_spill] sm:$0xff]  ;;  %v13103_v37 = vld [vmem:[#allocation104_spill] sm:$0xff] }
 0x735   :  { %3129 = vmatpush1.msra.mxu1 %v13050_v39  ;;  %3306 = vmatprep.subr.mxu0 %v13051_v54  ;;  %v13104_v39 = vld [vmem:[#allocation101_spill] sm:$0xff]  ;;  %v13105_v54 = vld [vmem:[#allocation106_spill] sm:$0xff] }
 0x736   :  { %3130 = vmatprep.subr.mxu1 %v13052_v7  ;;  %3307 = vmatpush1.msra.mxu0 %v13053_v2  ;;  %v13106_v7 = vld [vmem:[#allocation103_spill] sm:$0xff]  ;;  %v13107_v2 = vld [vmem:[#allocation108_spill] sm:$0xff] }
 0x737   :  { %3131 = vmatpush1.msra.mxu1 %v13054_v44  ;;  %3308 = vmatprep.subr.mxu0 %v13055_v27  ;;  %v13108_v44 = vld [vmem:[#allocation105_spill] sm:$0xff]  ;;  %v13109_v27 = vld [vmem:[#allocation110_spill] sm:$0xff] }
 0x738   :  { %3132 = vmatprep.subr.mxu1 %v13056_v48  ;;  %3309 = vmatpush1.msra.mxu0 %v13057_v16  ;;  %v13110_v48 = vld [vmem:[#allocation107_spill] sm:$0xff]  ;;  %v13111_v16 = vld [vmem:[#allocation112_spill] sm:$0xff] }
 0x739   :  { %3133 = vmatpush1.msra.mxu1 %v13058_v3  ;;  %3310 = vmatprep.subr.mxu0 %v13059_v47  ;;  %v13112_v3 = vld [vmem:[#allocation109_spill] sm:$0xff]  ;;  %v13113_v47 = vld [vmem:[#allocation114_spill] sm:$0xff] }
 0x73a   :  { %3134 = vmatprep.subr.mxu1 %v13060_v33  ;;  %3311 = vmatpush1.msra.mxu0 %v13061_v15  ;;  %v13114_v33 = vld [vmem:[#allocation111_spill] sm:$0xff]  ;;  %v13115_v15 = vld [vmem:[#allocation116_spill] sm:$0xff] }
 0x73b   :  { %3135 = vmatpush1.msra.mxu1 %v13062_v43  ;;  %3312 = vmatprep.subr.mxu0 %v13063_v12  ;;  %v13116_v43 = vld [vmem:[#allocation113_spill] sm:$0xff]  ;;  %v13117_v12 = vld [vmem:[#allocation118_spill] sm:$0xff] }
 0x73c   :  { %3136 = vmatprep.subr.mxu1 %v13064_v6  ;;  %3313 = vmatpush1.msra.mxu0 %v13065_v29  ;;  %v13118_v6 = vld [vmem:[#allocation115_spill] sm:$0xff]  ;;  %v13119_v29 = vld [vmem:[#allocation120_spill] sm:$0xff] }
 0x73d   :  { %3137 = vmatpush1.msra.mxu1 %v13066_v35  ;;  %3314 = vmatprep.subr.mxu0 %v13067_v52  ;;  %v13120_v35 = vld [vmem:[#allocation117_spill] sm:$0xff]  ;;  %v13121_v52 = vld [vmem:[#allocation122_spill] sm:$0xff] }
 0x73e   :  { %3138 = vmatprep.subr.mxu1 %v13068_v19  ;;  %3315 = vmatpush1.msra.mxu0 %v13069_v1  ;;  %v13122_v19 = vld [vmem:[#allocation119_spill] sm:$0xff]  ;;  %v13123_v1 = vld [vmem:[#allocation124_spill] sm:$0xff] }
 0x73f   :  { %3139 = vmatpush2.msra.mxu1 %v13070_v8  ;;  %3316 = vmatprep.subr.mxu0 %v13071_v10  ;;  %v13124_v8 = vld [vmem:[#allocation121_spill] sm:$0xff]  ;;  %v13125_v10 = vld [vmem:[#allocation126_spill] sm:$0xff] }
 0x740   :  { %3140 = vmatprep.subr.mxu1 %v13072_v23  ;;  %3317 = vmatpush1.msra.mxu0 %v13073_v25  ;;  %v13126_v23 = vld [vmem:[#allocation123_spill] sm:$0xff]  ;;  %v13127_v25 = vld [vmem:[#allocation128_spill] sm:$0xff] }
 0x741   :  { %3141 = vmatpush2.msra.mxu1 %v13074_v0  ;;  %3318 = vmatprep.subr.mxu0 %v13075_v26  ;;  %v13128_v0 = vld [vmem:[#allocation125_spill] sm:$0xff]  ;;  %v13129_v26 = vld [vmem:[#allocation130_spill] sm:$0xff] }
 0x742   :  { %3142 = vmatprep.subr.mxu1 %v13076_v60  ;;  %3319 = vmatpush2.msra.mxu0 %v13077_v24  ;;  %v13130_v60 = vld [vmem:[#allocation127_spill] sm:$0xff]  ;;  %v13131_v24 = vld [vmem:[#allocation132_spill] sm:$0xff] }
 0x743   :  { %3143 = vmatpush2.msra.mxu1 %v13078_v5  ;;  %3320 = vmatprep.subr.mxu0 %v13079_v45  ;;  %v13132_v5 = vld [vmem:[#allocation129_spill] sm:$0xff]  ;;  %v13133_v45 = vld [vmem:[#allocation134_spill] sm:$0xff] }
 0x744   :  { %3144 = vmatprep.subr.mxu1 %v13080_v13  ;;  %3321 = vmatpush2.msra.mxu0 %v13081_v14  ;;  %v13134_v13 = vld [vmem:[#allocation131_spill] sm:$0xff]  ;;  %v13135_v14 = vld [vmem:[#allocation136_spill] sm:$0xff] }
 0x745   :  { %3145 = vmatpush2.msra.mxu1 %v13082_v58  ;;  %3322 = vmatprep.subr.mxu0 %v13083_v28  ;;  %v13136_v58 = vld [vmem:[#allocation133_spill] sm:$0xff]  ;;  %v13137_v28 = vld [vmem:[#allocation138_spill] sm:$0xff] }
 0x746   :  { %3146 = vmatprep.subr.mxu1 %v13084_v11  ;;  %3323 = vmatpush2.msra.mxu0 %v13085_v30  ;;  %v13138_v11 = vld [vmem:[#allocation135_spill] sm:$0xff]  ;;  %v13139_v30 = vld [vmem:[#allocation140_spill] sm:$0xff] }
 0x747   :  { %3147 = vmatpush2.msra.mxu1 %v13086_v22  ;;  %3324 = vmatprep.subr.mxu0 %v13087_v20  ;;  %v13140_v22 = vld [vmem:[#allocation137_spill] sm:$0xff]  ;;  %v13141_v20 = vld [vmem:[#allocation142_spill] sm:$0xff] }
 0x748   :  { %3148 = vmatprep.subr.mxu1 %v13088_v18  ;;  %3325 = vmatpush2.msra.mxu0 %v13089_v50  ;;  %v13142_v18 = vld [vmem:[#allocation139_spill] sm:$0xff]  ;;  %v13143_v50 = vld [vmem:[#allocation144_spill] sm:$0xff] }
 0x749   :  { %3149 = vmatpush2.msra.mxu1 %v13090_v46  ;;  %3326 = vmatprep.subr.mxu0 %v13091_v49  ;;  %v13144_v46 = vld [vmem:[#allocation141_spill] sm:$0xff]  ;;  %v13145_v49 = vld [vmem:[#allocation146_spill] sm:$0xff] }
 0x74a   :  { %3150 = vmatprep.subr.mxu1 %v13092_v9  ;;  %3327 = vmatpush2.msra.mxu0 %v13093_v17  ;;  %v13146_v9 = vld [vmem:[#allocation143_spill] sm:$0xff]  ;;  %v13147_v17 = vld [vmem:[#allocation148_spill] sm:$0xff] }
 0x74b   :  { %3151 = vmatpush2.msra.mxu1 %v13094_v38  ;;  %3328 = vmatprep.subr.mxu0 %v13095_v41  ;;  %v13148_v38 = vld [vmem:[#allocation145_spill] sm:$0xff]  ;;  %v13149_v41 = vld [vmem:[#allocation150_spill] sm:$0xff] }
 0x74c   :  { %3152 = vmatprep.subr.mxu1 %v13096_v61  ;;  %3329 = vmatpush2.msra.mxu0 %v13097_v62  ;;  %v13150_v61 = vld [vmem:[#allocation147_spill] sm:$0xff]  ;;  %v13151_v62 = vld [vmem:[#allocation152_spill] sm:$0xff] }
 0x74d   :  { %3153 = vmatpush2.msra.mxu1 %v13098_v56  ;;  %3330 = vmatprep.subr.mxu0 %v13099_v42  ;;  %v13152_v56 = vld [vmem:[#allocation149_spill] sm:$0xff]  ;;  %v13153_v42 = vld [vmem:[#allocation154_spill] sm:$0xff] }
 0x74e   :  { %3154 = vmatprep.subr.mxu1 %v13100_v40  ;;  %3331 = vmatpush2.msra.mxu0 %v13101_v36  ;;  %v13154_v40 = vld [vmem:[#allocation151_spill] sm:$0xff]  ;;  %v13155_v36 = vld [vmem:[#allocation156_spill] sm:$0xff] }
 0x74f   :  { %3155 = vmatpush2.msra.mxu1 %v13102_v51  ;;  %3332 = vmatprep.subr.mxu0 %v13103_v37  ;;  %v13156_v51 = vld [vmem:[#allocation153_spill] sm:$0xff]  ;;  %v13157_v37 = vld [vmem:[#allocation158_spill] sm:$0xff] }
 0x750   :  { %3156 = vmatprep.subr.mxu1 %v13104_v39  ;;  %3333 = vmatpush2.msra.mxu0 %v13105_v54  ;;  %v13158_v39 = vld [vmem:[#allocation155_spill] sm:$0xff]  ;;  %v13159_v54 = vld [vmem:[#allocation160_spill] sm:$0xff] }
 0x751   :  { %3157 = vmatpush2.msra.mxu1 %v13106_v7  ;;  %3334 = vmatprep.subr.mxu0 %v13107_v2  ;;  %v13160_v7 = vld [vmem:[#allocation157_spill] sm:$0xff]  ;;  %v13161_v2 = vld [vmem:[#allocation162_spill] sm:$0xff] }
 0x752   :  { %3158 = vmatprep.subr.mxu1 %v13108_v44  ;;  %3335 = vmatpush2.msra.mxu0 %v13109_v27  ;;  %v13162_v44 = vld [vmem:[#allocation159_spill] sm:$0xff]  ;;  %v13163_v27 = vld [vmem:[#allocation166_spill] sm:$0xff] }
 0x753   :  { %3159 = vmatpush2.msra.mxu1 %v13110_v48  ;;  %3336 = vmatprep.subr.mxu0 %v13111_v16  ;;  %v13164_v48 = vld [vmem:[#allocation161_spill] sm:$0xff]  ;;  %v13165_v16 = vld [vmem:[#allocation168_spill] sm:$0xff] }
 0x754   :  { %3160 = vmatprep.subr.mxu1 %v13112_v3  ;;  %3337 = vmatpush2.msra.mxu0 %v13113_v47  ;;  %v13166_v3 = vld [vmem:[#allocation163_spill] sm:$0xff]  ;;  %v13167_v47 = vld [vmem:[#allocation164_spill] sm:$0xff] }
 0x755   :  { %3161 = vmatpush2.msra.mxu1 %v13114_v33  ;;  %3338 = vmatprep.subr.mxu0 %v13115_v15  ;;  %v13168_v33 = vld [vmem:[#allocation165_spill] sm:$0xff]  ;;  %v13169_v15 = vld [vmem:[#allocation171_spill] sm:$0xff] }
 0x756   :  { %3162 = vmatprep.subr.mxu1 %v13116_v43  ;;  %3339 = vmatpush2.msra.mxu0 %v13117_v12  ;;  %v13170_v43 = vld [vmem:[#allocation167_spill] sm:$0xff]  ;;  %v13171_v12 = vld [vmem:[#allocation173_spill] sm:$0xff] }
 0x757   :  { %3163 = vmatpush2.msra.mxu1 %v13118_v6  ;;  %3340 = vmatprep.subr.mxu0 %v13119_v29  ;;  %v13172_v6 = vld [vmem:[#allocation169_spill] sm:$0xff]  ;;  %v13173_v29 = vld [vmem:[#allocation170_spill] sm:$0xff] }
 0x758   :  { %3164 = vmatprep.subr.mxu1 %v13120_v35  ;;  %3341 = vmatpush2.msra.mxu0 %v13121_v52  ;;  %v13174_v35 = vld [vmem:[#allocation175_spill] sm:$0xff]  ;;  %v13175_v52 = vld [vmem:[#allocation172_spill] sm:$0xff] }
 0x759   :  { %3165 = vmatpush2.msra.mxu1 %v13122_v19  ;;  %3342 = vmatprep.subr.mxu0 %v13123_v1  ;;  %v13176_v19 = vld [vmem:[#allocation177_spill] sm:$0xff]  ;;  %v13177_v1 = vld [vmem:[#allocation174_spill] sm:$0xff] }
 0x75a   :  { %3166 = vmatprep.subr.mxu1 %v13124_v8  ;;  %3343 = vmatpush2.msra.mxu0 %v13125_v10  ;;  %v13178_v8 = vld [vmem:[#allocation176_spill] sm:$0xff]  ;;  %v13179_v10 = vld [vmem:[#allocation178_spill] sm:$0xff] }
 0x75b   :  { %3167 = vmatpush2.msra.mxu1 %v13126_v23  ;;  %3344 = vmatprep.subr.mxu0 %v13127_v25  ;;  %v13180_v23 = vld [vmem:[#allocation179_spill] sm:$0xff]  ;;  %v13181_v25 = vld [vmem:[#allocation180_spill] sm:$0xff] }
 0x75c   :  { %3168 = vmatprep.subr.mxu1 %v13128_v0  ;;  %3345 = vmatpush2.msra.mxu0 %v13129_v26  ;;  %v13182_v0 = vld [vmem:[#allocation181_spill] sm:$0xff]  ;;  %v13183_v26 = vld [vmem:[#allocation182_spill] sm:$0xff] }
 0x75d   :  { %3169 = vmatpush2.msra.mxu1 %v13130_v60  ;;  %3346 = vmatprep.subr.mxu0 %v13131_v24  ;;  %v13184_v60 = vld [vmem:[#allocation183_spill] sm:$0xff]  ;;  %v13185_v24 = vld [vmem:[#allocation184_spill] sm:$0xff] }
 0x75e   :  { %3171 = vmatmul.mubr.f32.vlgmr.msra.gmra.mxu1 %v10783_v34  ;;  %3363 = vmatprep.subr.mxu1 %v13132_v5  ;;  %v13186_v5 = vld [vmem:[#allocation185_spill] sm:$0xff] }
 0x75f   :  { %3176 = vmatprep.mubr.f32.mxu1 %v10796_v53  ;;  %3364 = vmatpush1.msra.mxu1 %v13133_v45  ;;  %v13187_v45 = vld [vmem:[#allocation186_spill] sm:$0xff] }
 0x760   :  { %3365 = vmatprep.subr.mxu1 %v13134_v13  ;;  %3347 = vmatpush2.msra.mxu0 %v13135_v14  ;;  %v13188_v13 = vld [vmem:[#allocation187_spill] sm:$0xff]  ;;  %v13189_v14 = vld [vmem:[#allocation188_spill] sm:$0xff] }
 0x761   :  { %3366 = vmatpush1.msra.mxu1 %v13136_v58  ;;  %3348 = vmatprep.subr.mxu0 %v13137_v28  ;;  %v13190_v58 = vld [vmem:[#allocation189_spill] sm:$0xff]  ;;  %v13191_v28 = vld [vmem:[#allocation190_spill] sm:$0xff] }
 0x762   :  { %3177 = vmatmul.mubr.f32.gmra.mxu1 %v10791_v57  ;;  %3367 = vmatprep.subr.mxu1 %v13138_v11  ;;  %v13192_v11 = vld [vmem:[#allocation191_spill] sm:$0xff] }
 0x763   :  { %3368 = vmatpush1.msra.mxu1 %v13139_v30  ;;  %3349 = vmatpush2.msra.mxu0 %v13140_v22  ;;  %v13193_v30 = vld [vmem:[#allocation192_spill] sm:$0xff]  ;;  %v13194_v22 = vld [vmem:[#allocation193_spill] sm:$0xff] }
 0x764   :  { %3369 = vmatprep.subr.mxu1 %v13141_v20  ;;  %3440 = vmatprep.subr.mxu0 %v13142_v18  ;;  %v13195_v20 = vld [vmem:[#allocation194_spill] sm:$0xff]  ;;  %v13196_v18 = vld [vmem:[#allocation195_spill] sm:$0xff] }
 0x765   :  { %3370 = vmatpush1.msra.mxu1 %v13143_v50  ;;  %v13197_v50 = vld [vmem:[#allocation196_spill] sm:$0xff] }
 0x766   :  { %3371 = vmatprep.subr.mxu1 %v13144_v46  ;;  %v13198_v46 = vld [vmem:[#allocation197_spill] sm:$0xff] }
 0x767   :  { %3372 = vmatpush1.msra.mxu1 %v13145_v49  ;;  %v13199_v49 = vld [vmem:[#allocation198_spill] sm:$0xff] }
 0x768   :  { %3373 = vmatprep.subr.mxu1 %v13146_v9 }
 0x769   :  { %3374 = vmatpush1.msra.mxu1 %v13147_v17 }
 0x76a   :  { %3375 = vmatprep.subr.mxu1 %v13148_v38 }
 0x76b   :  { %3376 = vmatpush1.msra.mxu1 %v13149_v41  ;;  %v13200_v41 = vld [vmem:[#allocation53_spill] sm:$0xff] }
 0x76c   :  { %3377 = vmatprep.subr.mxu1 %v13150_v61 }
 0x76d   :  { %3378 = vmatpush1.msra.mxu1 %v13151_v62  ;;  %v13201_v62 = vld [vmem:[#allocation54_spill] sm:$0xff] }
 0x76e   :  { %3379 = vmatprep.subr.mxu1 %v13152_v56 }
 0x76f   :  { %3380 = vmatpush1.msra.mxu1 %v13153_v42 }
 0x770   :  { %3381 = vmatprep.subr.mxu1 %v13154_v40 }
 0x771   :  { %3382 = vmatpush1.msra.mxu1 %v13155_v36 }
 0x772   :  { %3383 = vmatprep.subr.mxu1 %v13156_v51  ;;  %v13202_v51 = vld [vmem:[#allocation20_spill] sm:$0xff] }
 0x773   :  { %3384 = vmatpush1.msra.mxu1 %v13157_v37 }
 0x774   :  { %3385 = vmatprep.subr.mxu1 %v13158_v39 }
 0x775   :  { %3386 = vmatpush1.msra.mxu1 %v13159_v54  ;;  %v13203_v54 = vld [vmem:[#allocation55_spill] sm:$0xff] }
 0x776   :  { %3387 = vmatprep.subr.mxu1 %v13160_v7 }
 0x777   :  { %3388 = vmatpush1.msra.mxu1 %v13161_v2 }
 0x778   :  { %3389 = vmatprep.subr.mxu1 %v13162_v44 }
 0x779   :  { %3390 = vmatpush1.msra.mxu1 %v13163_v27 }
 0x77a   :  { %3391 = vmatprep.subr.mxu1 %v13164_v48  ;;  %v13204_v48 = vld [vmem:[#allocation58_spill] sm:$0xff] }
 0x77b   :  { %3392 = vmatpush1.msra.mxu1 %v13165_v16  ;;  %v450_v16 = vadd.f32 %v13204_v48, %v6696_v31 }
 0x77c   :  { %3393 = vmatprep.subr.mxu1 %v13166_v3 }
 0x77d   :  { %3394 = vmatpush1.msra.mxu1 %v13167_v47  ;;  %v13205_v47 = vld [vmem:[#allocation26_spill] sm:$0xff] }
 0x77e   :  { %3395 = vmatprep.subr.mxu1 %v13168_v33  ;;  %v452_v33 = vadd.f32 %v13205_v47, %v6702_v32  ;;  %v13211_v47 = vld [vmem:[#allocation70_spill] sm:$0xff] }
 0x77f   :  { %3396 = vmatpush2.msra.mxu1 %v13169_v15 }
 0x780   :  { %3397 = vmatprep.subr.mxu1 %v13170_v43  ;;  %v13206_v43 = vld [vmem:[#allocation59_spill] sm:$0xff] }
 0x781   :  { %3398 = vmatpush2.msra.mxu1 %v13171_v12  ;;  %v456_v12 = vadd.f32 %v13206_v43, %v6696_v31 }
 0x782   :  { %3399 = vmatprep.subr.mxu1 %v13172_v6 }
 0x783   :  { %3400 = vmatpush2.msra.mxu1 %v13173_v29 }
 0x784   :  { %3401 = vmatprep.subr.mxu1 %v13174_v35  ;;  %v13207_v35 = vld [vmem:[#allocation27_spill] sm:$0xff] }
 0x785   :  { %3402 = vmatpush2.msra.mxu1 %v13175_v52  ;;  %v458_v52 = vadd.f32 %v13207_v35, %v6702_v32 }
 0x786   :  { %3403 = vmatprep.subr.mxu1 %v13176_v19 }
 0x787   :  { %3404 = vmatpush2.msra.mxu1 %v13177_v1 }
 0x788   :  { %3405 = vmatprep.subr.mxu1 %v13178_v8 }
 0x789   :  { %3406 = vmatpush2.msra.mxu1 %v13179_v10 }
 0x78a   :  { %3407 = vmatprep.subr.mxu1 %v13180_v23 }
 0x78b   :  { %3408 = vmatpush2.msra.mxu1 %v13181_v25 }
 0x78c   :  { %3409 = vmatprep.subr.mxu1 %v13182_v0 }
 0x78d   :  { %3410 = vmatpush2.msra.mxu1 %v13183_v26 }
 0x78e   :  { %3411 = vmatprep.subr.mxu1 %v13184_v60 }
 0x78f   :  { %3412 = vmatpush2.msra.mxu1 %v13185_v24 }
 0x790   :  { %3413 = vmatprep.subr.mxu1 %v13186_v5 }
 0x791   :  { %3414 = vmatpush2.msra.mxu1 %v13187_v45 }
 0x792   :  { %3415 = vmatprep.subr.mxu1 %v13188_v13 }
 0x793   :  { %3416 = vmatpush2.msra.mxu1 %v13189_v14 }
 0x794   :  { %3417 = vmatprep.subr.mxu1 %v13190_v58 }
 0x795   :  { %3418 = vmatpush2.msra.mxu1 %v13191_v28 }
 0x796   :  { %3419 = vmatprep.subr.mxu1 %v13192_v11 }
 0x797   :  { %3420 = vmatpush2.msra.mxu1 %v13193_v30 }
 0x798   :  { %3421 = vmatprep.subr.mxu1 %v13194_v22 }
 0x799   :  { %3422 = vmatpush2.msra.mxu1 %v13195_v20 }
 0x79a   :  { %3423 = vmatprep.subr.mxu1 %v13196_v18 }
 0x79b   :  { %3424 = vmatpush2.msra.mxu1 %v13197_v50 }
 0x79c   :  { %3425 = vmatprep.subr.mxu1 %v13198_v46 }
 0x79d   :  { %3426 = vmatpush2.msra.mxu1 %v13199_v49 }
 0x7dd   :  { %v3018_v9 = vpop.f32.mrf.mxu1  ;;  %v3095_v36 = vpop.f32.mrf.mxu0 }
 0x7de   :  { %v3183_v61 = vadd.f32 %v3018_v9, %v13200_v41  ;;  %v3211_v15 = vadd.f32 %v3095_v36, %v450_v16 }
 0x7df   :  { %v3020_v17 = vpop.f32.mrf.mxu1  ;;  %v3097_v2 = vpop.f32.mrf.mxu0 }
 0x7e0   :  { %v3184_v56 = vadd.f32 %v3020_v17, %v13201_v62  ;;  %v3929_v40 = vmul.f32 -1.442695, %v3183_v61  ;;  %v3212_v6 = vadd.f32 %v3097_v2, %v452_v33  ;;  %v3933_v1 = vmul.f32 -1.442695, %v3211_v15  ;;  %v13208_v17 = vld [vmem:[#allocation67_spill] sm:$0xff] }
 0x7e1   :  { %v619_v33 = vadd.f32 %v13211_v47, %v6718_v55  ;;  %v4949_v47 = vld [vmem:[%s11476_s2 + $0x28] sm:$0xff] }
 0x7e2   :  { %v3024_v38 = vpop.f32.mrf.mxu1  ;;  %v3930_v39 = vmul.f32 -1.442695, %v3184_v56  ;;  %4257 = vpow2.f32 %v3929_v40  ;;  %v3101_v3 = vpop.f32.mrf.mxu0  ;;  %v3934_v10 = vmul.f32 -1.442695, %v3212_v6  ;;  %v13209_v56 = vld [vmem:[#allocation68_spill] sm:$0xff] }
 0x7e3   :  { %v3185_v37 = vadd.f32 %v3024_v38, %v13202_v51  ;;  %v3213_v19 = vadd.f32 %v3101_v3, %v456_v12  ;;  %v611_v38 = vadd.f32 %v13208_v17, %v6709_v21  ;;  %v4929_v17 = vld [vmem:[%s11476_s2 + $0x208] sm:$0xff] }
 0x7e4   :  { %v3026_v42 = vpop.f32.mrf.mxu1  ;;  %4259 = vpow2.f32 %v3930_v39  ;;  %v3103_v29 = vpop.f32.mrf.mxu0 }
 0x7e5   :  { %v3186_v7 = vadd.f32 %v3026_v42, %v13203_v54  ;;  %v3931_v44 = vmul.f32 -1.442695, %v3185_v37  ;;  %v3214_v8 = vadd.f32 %v3103_v29, %v458_v52  ;;  %v3935_v25 = vmul.f32 -1.442695, %v3213_v19 }
 0x7e6   :  { %v613_v42 = vadd.f32 %v13209_v56, %v6718_v55  ;;  %v4934_v56 = vld [vmem:[%s11476_s2 + $0x1a0] sm:$0xff] }
 0x7e7   :  { %v3932_v27 = vmul.f32 -1.442695, %v3186_v7  ;;  %4261 = vpow2.f32 %v3931_v44  ;;  %v3936_v26 = vmul.f32 -1.442695, %v3214_v8  ;;  %v13210_v7 = vld [vmem:[#allocation69_spill] sm:$0xff] }
 0x7e8   :  { %v617_v2 = vadd.f32 %v13210_v7, %v6709_v21  ;;  %v4942_v7 = vld [vmem:[%s11476_s2 + $0xe0] sm:$0xff] }
 0x7e9   :  { %4263 = vpow2.f32 %v3932_v27 }
 0x7ea   :  { %4265 = vpow2.f32 %v3933_v1 }
 0x7eb   :  { %4267 = vpow2.f32 %v3934_v10 }
 0x7ec   :  { %4269 = vpow2.f32 %v3935_v25 }
 0x7ed   :  { %4271 = vpow2.f32 %v3936_v26 }
 0x7ef   :  { %v4258_v23 = vpop.eup %4257 }
 0x7f0   :  { %v3199_v60 = vadd.f32 1.0, %v4258_v23 }
 0x7f1   :  { %v4260_v0 = vpop.eup %4259 }
 0x7f2   :  { %v3200_v5 = vadd.f32 1.0, %v4260_v0  ;;  %4273 = vrcp.f32 %v3199_v60 }
 0x7f4   :  { %v4262_v24 = vpop.eup %4261  ;;  %4275 = vrcp.f32 %v3200_v5 }
 0x7f5   :  { %v3201_v13 = vadd.f32 1.0, %v4262_v24 }
 0x7f6   :  { %v4264_v45 = vpop.eup %4263 }
 0x7f7   :  { %v3202_v14 = vadd.f32 1.0, %v4264_v45  ;;  %4277 = vrcp.f32 %v3201_v13  ;;  %v4266_v58 = vpop.eup %4265 }
 0x7f8   :  { %v4268_v28 = vpop.eup %4267  ;;  %v3227_v30 = vadd.f32 1.0, %v4266_v58 }
 0x7f9   :  { %4279 = vrcp.f32 %v3202_v14  ;;  %v4270_v11 = vpop.eup %4269  ;;  %v3228_v18 = vadd.f32 1.0, %v4268_v28 }
 0x7fa   :  { %v4272_v20 = vpop.eup %4271  ;;  %v3229_v49 = vadd.f32 1.0, %v4270_v11  ;;  %4281 = vrcp.f32 %v3227_v30 }
 0x7fb   :  { %v3230_v40 = vadd.f32 1.0, %v4272_v20  ;;  %4283 = vrcp.f32 %v3228_v18  ;;  %v4923_v20 = vld [vmem:[%s11476_s2 + $0x298] sm:$0xff]  ;;  %v4924_v18 = vld [vmem:[%s11476_s2 + $0x290] sm:$0xff] }
 0x7fc   :  { %4285 = vrcp.f32 %v3229_v49  ;;  %v4927_v49 = vld [vmem:[%s11476_s2 + $0x238] sm:$0xff] }
 0x7ff   :  { %v4274_v46 = vpop.eup %4273 }
 0x801   :  { %v4276_v62 = vpop.eup %4275 }
 0x804   :  { %v4278_v54 = vpop.eup %4277 }
 0x806   :  { %v4280_v3 = vpop.eup %4279 }
 0x807   :  { %v4282_v6 = vpop.eup %4281 }
 0x808   :  { %v4284_v29 = vpop.eup %4283  ;;  %v3255_v52 = vsub.f32 1.0, %v4282_v6  ;;  %v3263_v23 = vmul.f32 %v4282_v6, %v10783_v34  ;;  %v4954_v6 = vld [vmem:[%s11476_s2 + $0x5c0] sm:$0xff] }
 0x809   :  { %v4286_v35 = vpop.eup %4285  ;;  %v3256_v8 = vsub.f32 1.0, %v4284_v29  ;;  %v3264_v26 = vmul.f32 %v4284_v29, %v10785_v59  ;;  %v4920_v59 = vld [vmem:[%s11476_s2 + $0x2f0] sm:$0xff]  ;;  %v4955_v29 = vld [vmem:[%s11476_s2 + $0x598] sm:$0xff] }
 0x80a   :  { %v3257_v24 = vsub.f32 1.0, %v4286_v35  ;;  %v3265_v58 = vmul.f32 %v4286_v35, %v10791_v57  ;;  %v4956_v35 = vld [vmem:[%s11476_s2 + $0x590] sm:$0xff] }
 0x81e   :  { %v3172_v22 = vpop.f32.mrf.mxu1 }
 0x81f   :  { %v3239_v50 = vadd.f32 %v3172_v22, %v6706_v4  ;;  %v4921_v22 = vld [vmem:[%s11476_s2 + $0x2c8] sm:$0xff] }
 0x820   :  { %v3174_v9 = vpop.f32.mrf.mxu1 }
 0x821   :  { %v3243_v41 = vmul.f32 %v4274_v46, %v3239_v50  ;;  %v3240_v61 = vadd.f32 %v3174_v9, %v6715_v63  ;;  %v4925_v50 = vld [vmem:[%s11476_s2 + $0x268] sm:$0xff]  ;;  %v4926_v46 = vld [vmem:[%s11476_s2 + $0x260] sm:$0xff]  ;;  %v4928_v9 = vld [vmem:[%s11476_s2 + $0x230] sm:$0xff] }
 0x822   :  { %v3178_v36 = vpop.f32.mrf.mxu1 }
 0x823   :  { %v3247_v51 = vadd.f32 %v3243_v41, %v611_v38  ;;  %v3244_v37 = vmul.f32 %v4276_v62, %v3240_v61  ;;  %v3241_v39 = vadd.f32 %v3178_v36, %v6706_v4  ;;  %v4930_v38 = vld [vmem:[%s11476_s2 + $0x200] sm:$0xff]  ;;  %v4931_v41 = vld [vmem:[%s11476_s2 + $0x1d8] sm:$0xff]  ;;  %v4932_v61 = vld [vmem:[%s11476_s2 + $0x1d0] sm:$0xff] }
 0x824   :  { %v3180_v44 = vpop.f32.mrf.mxu1  ;;  %v4933_v62 = vld [vmem:[%s11476_s2 + $0x1a8] sm:$0xff] }
 0x825   :  { %4287 = vtanh.f32 %v3247_v51  ;;  %v3248_v27 = vadd.f32 %v3244_v37, %v613_v42  ;;  %v3245_v48 = vmul.f32 %v4278_v54, %v3241_v39  ;;  %v3242_v16 = vadd.f32 %v3180_v44, %v6715_v63  ;;  %v4935_v42 = vld [vmem:[%s11476_s2 + $0x178] sm:$0xff]  ;;  %v4937_v36 = vld [vmem:[%s11476_s2 + $0x148] sm:$0xff]  ;;  %v4938_v51 = vld [vmem:[%s11476_s2 + $0x140] sm:$0xff] }
 0x826   :  { %4289 = vrcp.f32 %v3230_v40  ;;  %v4936_v40 = vld [vmem:[%s11476_s2 + $0x170] sm:$0xff]  ;;  %v4939_v37 = vld [vmem:[%s11476_s2 + $0x118] sm:$0xff]  ;;  %v4941_v54 = vld [vmem:[%s11476_s2 + $0xe8] sm:$0xff] }
 0x827   :  { %4291 = vtanh.f32 %v3248_v27  ;;  %v3249_v15 = vadd.f32 %v3245_v48, %v617_v2  ;;  %v3246_v43 = vmul.f32 %v4280_v3, %v3242_v16  ;;  %v4940_v39 = vld [vmem:[%s11476_s2 + $0x110] sm:$0xff]  ;;  %v4943_v2 = vld [vmem:[%s11476_s2 + $0xb8] sm:$0xff]  ;;  %v4945_v27 = vld [vmem:[%s11476_s2 + $0x88] sm:$0xff] }
 0x828   :  { %v4944_v44 = vld [vmem:[%s11476_s2 + $0xb0] sm:$0xff]  ;;  %v4946_v48 = vld [vmem:[%s11476_s2 + $0x80] sm:$0xff]  ;;  %v4947_v16 = vld [vmem:[%s11476_s2 + $0x58] sm:$0xff] }
 0x829   :  { %4293 = vtanh.f32 %v3249_v15  ;;  %v3250_v12 = vadd.f32 %v3246_v43, %v619_v33  ;;  %v4948_v3 = vld [vmem:[%s11476_s2 + $0x50] sm:$0xff]  ;;  %v4950_v33 = vld [vmem:[%s11476_s2 + $0x20] sm:$0xff]  ;;  %v4951_v15 = vld [vmem:[%s11476_s2 + $0x5f8] sm:$0xff] }
 0x82a   :  { %v4952_v43 = vld [vmem:[%s11476_s2 + $0x5f0] sm:$0xff] }
 0x82b   :  { %4295 = vtanh.f32 %v3250_v12  ;;  %v4953_v12 = vld [vmem:[%s11476_s2 + $0x5c8] sm:$0xff] }
 0x832   :  { %v4288_v19 = vpop.eup %4287 }
 0x833   :  { %v4290_v1 = vpop.eup %4289  ;;  %v3259_v10 = vmul.f32 %v4288_v19, %v3255_v52  ;;  %v4957_v52 = vld [vmem:[%s11476_s2 + $0x568] sm:$0xff]  ;;  %v4958_v19 = vld [vmem:[%s11476_s2 + $0x560] sm:$0xff] }
 0x834   :  { %v4292_v25 = vpop.eup %4291  ;;  %v3258_v13 = vsub.f32 1.0, %v4290_v1  ;;  %v3266_v11 = vmul.f32 %v4290_v1, %v10796_v53  ;;  %v4922_v53 = vld [vmem:[%s11476_s2 + $0x2c0] sm:$0xff]  ;;  %v4959_v1 = vld [vmem:[%s11476_s2 + $0x538] sm:$0xff] }
 0x835   :  { %v3260_v0 = vmul.f32 %v4292_v25, %v3256_v8  ;;  %v11034_v60 = vadd.f32 %v3263_v23, %v3259_v10  ;;  %v4960_v8 = vld [vmem:[%s11476_s2 + $0x530] sm:$0xff]  ;;  %v4961_v10 = vld [vmem:[%s11476_s2 + $0x508] sm:$0xff]  ;;  %v4962_v23 = vld [vmem:[%s11476_s2 + $0x500] sm:$0xff] }
 0x836   :  { %v4294_v5 = vpop.eup %4293  ;;  %v4963_v25 = vld [vmem:[%s11476_s2 + $0x4d8] sm:$0xff] }
 0x837   :  { %v11036_v45 = vadd.f32 %v3264_v26, %v3260_v0  ;;  %v3261_v14 = vmul.f32 %v4294_v5, %v3257_v24  ;;  %v4964_v0 = vld [vmem:[%s11476_s2 + $0x4d0] sm:$0xff]  ;;  %v4965_v26 = vld [vmem:[%s11476_s2 + $0x4a8] sm:$0xff]  ;;  %v4966_v24 = vld [vmem:[%s11476_s2 + $0x4a0] sm:$0xff] }
 0x838   :  { %v4296_v28 = vpop.eup %4295  ;;  %v4967_v5 = vld [vmem:[%s11476_s2 + $0x478] sm:$0xff] }
 0x839   :  { %3350 = vmatprep.mubr.f32.mxu0 %v11036_v45  ;;  %3427 = vmatprep.mubr.f32.mxu1 %v11036_v45  ;;  %v3262_v34 = vmul.f32 %v4296_v28, %v3258_v13  ;;  %v11042_v30 = vadd.f32 %v3265_v58, %v3261_v14  ;;  %v4968_v13 = vld [vmem:[%s11476_s2 + $0x470] sm:$0xff]  ;;  %v4969_v14 = vld [vmem:[%s11476_s2 + $0x448] sm:$0xff]  ;;  %v4970_v58 = vld [vmem:[%s11476_s2 + $0x440] sm:$0xff] }
 0x83a   :  { %3351 = vmatmul.mubr.f32.vlgmr.msra.gmra.mxu0 %v11034_v60  ;;  %3428 = vmatmul.mubr.f32.vlgmr.msra.gmra.mxu1 %v11034_v60  ;;  %v4971_v28 = vld [vmem:[%s11476_s2 + $0x418] sm:$0xff] }
 0x83b   :  { %3441 = vmatpush1.msra.mxu0 %v4920_v59  ;;  %v11049_v57 = vadd.f32 %v3266_v11, %v3262_v34  ;;  %v4972_v34 = vld [vmem:[%s11476_s2 + $0x410] sm:$0xff]  ;;  %v4973_v11 = vld [vmem:[%s11476_s2 + $0x3e8] sm:$0xff]  ;;  %v4974_v59 = vld [vmem:[%s11476_s2 + $0x3e0] sm:$0xff] }
 0x83c   :  { %3442 = vmatprep.subr.mxu0 %v4921_v22  ;;  %v4975_v22 = vld [vmem:[%s11476_s2 + $0x3b8] sm:$0xff] }
 0x83d   :  { %3443 = vmatpush1.msra.mxu0 %v4922_v53  ;;  %3356 = vmatprep.mubr.f32.mxu0 %v11049_v57  ;;  %v4976_v53 = vld [vmem:[%s11476_s2 + $0x3b0] sm:$0xff] }
 0x83e   :  { %3433 = vmatprep.mubr.f32.mxu1 %v11049_v57  ;;  %3444 = vmatprep.subr.mxu0 %v4923_v20  ;;  %v4977_v20 = vld [vmem:[%s11476_s2 + $0x388] sm:$0xff] }
 0x83f   :  { %3357 = vmatmul.mubr.f32.gmra.mxu0 %v11042_v30  ;;  %3434 = vmatmul.mubr.f32.gmra.mxu1 %v11042_v30 }
 0x840   :  { %3445 = vmatpush1.msra.mxu0 %v4924_v18  ;;  %3504 = vmatprep.mubr.f32.mxu0 %v11036_v45  ;;  %v4978_v18 = vld [vmem:[%s11476_s2 + $0x380] sm:$0xff] }
 0x841   :  { %3446 = vmatprep.subr.mxu0 %v4925_v50  ;;  %v4979_v50 = vld [vmem:[%s11476_s2 + $0x358] sm:$0xff] }
 0x842   :  { %3447 = vmatpush1.msra.mxu0 %v4926_v46  ;;  %v4980_v46 = vld [vmem:[%s11476_s2 + $0x350] sm:$0xff] }
 0x843   :  { %3448 = vmatprep.subr.mxu0 %v4927_v49  ;;  %v4981_v49 = vld [vmem:[%s11476_s2 + $0x328] sm:$0xff] }
 0x844   :  { %3449 = vmatpush1.msra.mxu0 %v4928_v9  ;;  %v4982_v9 = vld [vmem:[%s11476_s2 + $0x320] sm:$0xff] }
 0x845   :  { %3450 = vmatprep.subr.mxu0 %v4929_v17  ;;  %v3672_v17 = vld [vmem:[%s11479_s6 + $0xf8] sm:$0xff] }
 0x846   :  { %3451 = vmatpush1.msra.mxu0 %v4930_v38  ;;  %3946 = vmatprep.subr.mxu1 %v3672_v17  ;;  %v3656_v38 = vld [vmem:[%s11479_s6 + $0x78] sm:$0xff]  ;;  %v13217_v17 = vld [vmem:[#allocation29_spill] sm:$0xff] }
 0x847   :  { %3452 = vmatprep.subr.mxu0 %v4931_v41  ;;  %3947 = vmatpush3.msra.mxu1 %v3656_v38  ;;  %v3671_v41 = vld [vmem:[%s11479_s6 + $0xf0] sm:$0xff]  ;;  %v464_v38 = vadd.f32 %v13217_v17, %v6702_v32 }
 0x848   :  { %3453 = vmatpush1.msra.mxu0 %v4932_v61  ;;  %3948 = vmatprep.subr.mxu1 %v3671_v41  ;;  %v3655_v61 = vld [vmem:[%s11479_s6 + $0x70] sm:$0xff] }
 0x849   :  { %3454 = vmatprep.subr.mxu0 %v4933_v62  ;;  %3949 = vmatpush3.msra.mxu1 %v3655_v61  ;;  %v3670_v62 = vld [vmem:[%s11479_s6 + $0xe8] sm:$0xff]  ;;  %v13218_v61 = vld [vmem:[#allocation30_spill] sm:$0xff] }
 0x84a   :  { %3455 = vmatpush1.msra.mxu0 %v4934_v56  ;;  %3950 = vmatprep.subr.mxu1 %v3670_v62  ;;  %v3654_v56 = vld [vmem:[%s11479_s6 + $0x68] sm:$0xff]  ;;  %v468_v62 = vadd.f32 %v13218_v61, %v6696_v31 }
 0x84b   :  { %3456 = vmatprep.subr.mxu0 %v4935_v42  ;;  %3951 = vmatpush3.msra.mxu1 %v3654_v56  ;;  %v3669_v42 = vld [vmem:[%s11479_s6 + $0xe0] sm:$0xff] }
 0x84c   :  { %3457 = vmatpush1.msra.mxu0 %v4936_v40  ;;  %3952 = vmatprep.subr.mxu1 %v3669_v42  ;;  %v3653_v40 = vld [vmem:[%s11479_s6 + $0x60] sm:$0xff] }
 0x84d   :  { %3458 = vmatprep.subr.mxu0 %v4937_v36  ;;  %3953 = vmatpush3.msra.mxu1 %v3653_v40  ;;  %v3668_v36 = vld [vmem:[%s11479_s6 + $0xd8] sm:$0xff]  ;;  %v13219_v40 = vld [vmem:[#allocation63_spill] sm:$0xff] }
 0x84e   :  { %3459 = vmatpush1.msra.mxu0 %v4938_v51  ;;  %3954 = vmatprep.subr.mxu1 %v3668_v36  ;;  %v3652_v51 = vld [vmem:[%s11479_s6 + $0x58] sm:$0xff]  ;;  %v470_v36 = vadd.f32 %v13219_v40, %v6702_v32 }
 0x84f   :  { %3460 = vmatprep.subr.mxu0 %v4939_v37  ;;  %3955 = vmatpush3.msra.mxu1 %v3652_v51  ;;  %v3667_v37 = vld [vmem:[%s11479_s6 + $0xd0] sm:$0xff] }
 0x850   :  { %3461 = vmatpush1.msra.mxu0 %v4940_v39  ;;  %3956 = vmatprep.subr.mxu1 %v3667_v37  ;;  %v3651_v39 = vld [vmem:[%s11479_s6 + $0x50] sm:$0xff] }
 0x851   :  { %3462 = vmatprep.subr.mxu0 %v4941_v54  ;;  %3957 = vmatpush3.msra.mxu1 %v3651_v39  ;;  %v3666_v54 = vld [vmem:[%s11479_s6 + $0xc8] sm:$0xff] }
 0x852   :  { %3463 = vmatpush1.msra.mxu0 %v4942_v7  ;;  %3958 = vmatprep.subr.mxu1 %v3666_v54  ;;  %v3650_v7 = vld [vmem:[%s11479_s6 + $0x48] sm:$0xff] }
 0x853   :  { %3464 = vmatprep.subr.mxu0 %v4943_v2  ;;  %v3665_v2 = vld [vmem:[%s11479_s6 + $0xc0] sm:$0xff]  ;;  %3959 = vmatpush3.msra.mxu1 %v3650_v7 }
 0x854   :  { %3465 = vmatpush1.msra.mxu0 %v4944_v44  ;;  %v3649_v44 = vld [vmem:[%s11479_s6 + $0x40] sm:$0xff]  ;;  %3960 = vmatprep.subr.mxu1 %v3665_v2 }
 0x855   :  { %3466 = vmatprep.subr.mxu0 %v4945_v27  ;;  %v3664_v27 = vld [vmem:[%s11479_s6 + $0xb8] sm:$0xff]  ;;  %3961 = vmatpush3.msra.mxu1 %v3649_v44 }
 0x856   :  { %3467 = vmatpush1.msra.mxu0 %v4946_v48  ;;  %v3648_v48 = vld [vmem:[%s11479_s6 + $0x38] sm:$0xff]  ;;  %3962 = vmatprep.subr.mxu1 %v3664_v27 }
 0x857   :  { %3468 = vmatprep.subr.mxu0 %v4947_v16  ;;  %v3663_v16 = vld [vmem:[%s11479_s6 + $0xb0] sm:$0xff]  ;;  %3963 = vmatpush3.msra.mxu1 %v3648_v48 }
 0x858   :  { %3469 = vmatpush1.msra.mxu0 %v4948_v3  ;;  %v3647_v3 = vld [vmem:[%s11479_s6 + $0x30] sm:$0xff]  ;;  %3964 = vmatprep.subr.mxu1 %v3663_v16 }
 0x859   :  { %3470 = vmatprep.subr.mxu0 %v4949_v47  ;;  %v3662_v47 = vld [vmem:[%s11479_s6 + $0xa8] sm:$0xff]  ;;  %3965 = vmatpush3.msra.mxu1 %v3647_v3 }
 0x85a   :  { %3471 = vmatpush1.msra.mxu0 %v4950_v33  ;;  %v3646_v33 = vld [vmem:[%s11479_s6 + $0x28] sm:$0xff]  ;;  %3966 = vmatprep.subr.mxu1 %v3662_v47 }
 0x85b   :  { %3472 = vmatprep.subr.mxu0 %v4951_v15  ;;  %v3661_v15 = vld [vmem:[%s11479_s6 + $0xa0] sm:$0xff]  ;;  %3967 = vmatpush3.msra.mxu1 %v3646_v33 }
 0x85c   :  { %3473 = vmatpush2.msra.mxu0 %v4952_v43  ;;  %v3645_v43 = vld [vmem:[%s11479_s6 + $0x20] sm:$0xff]  ;;  %3968 = vmatprep.subr.mxu1 %v3661_v15 }
 0x85d   :  { %3474 = vmatprep.subr.mxu0 %v4953_v12  ;;  %v3660_v12 = vld [vmem:[%s11479_s6 + $0x98] sm:$0xff]  ;;  %3969 = vmatpush3.msra.mxu1 %v3645_v43 }
 0x85e   :  { %3475 = vmatpush2.msra.mxu0 %v4954_v6  ;;  %v3644_v6 = vld [vmem:[%s11479_s6 + $0x18] sm:$0xff]  ;;  %3970 = vmatprep.subr.mxu1 %v3660_v12 }
 0x85f   :  { %3476 = vmatprep.subr.mxu0 %v4955_v29  ;;  %v3659_v29 = vld [vmem:[%s11479_s6 + $0x90] sm:$0xff]  ;;  %3971 = vmatpush3.msra.mxu1 %v3644_v6 }
 0x860   :  { %3477 = vmatpush2.msra.mxu0 %v4956_v35  ;;  %v3643_v35 = vld [vmem:[%s11479_s6 + $0x10] sm:$0xff]  ;;  %3972 = vmatprep.subr.mxu1 %v3659_v29 }
 0x861   :  { %3478 = vmatprep.subr.mxu0 %v4957_v52  ;;  %v3658_v52 = vld [vmem:[%s11479_s6 + $0x88] sm:$0xff]  ;;  %3973 = vmatpush3.msra.mxu1 %v3643_v35 }
 0x862   :  { %3479 = vmatpush2.msra.mxu0 %v4958_v19  ;;  %v3642_v19 = vld [vmem:[%s11479_s6 + $0x8] sm:$0xff]  ;;  %3974 = vmatprep.subr.mxu1 %v3658_v52 }
 0x863   :  { %3480 = vmatprep.subr.mxu0 %v4959_v1  ;;  %v3657_v1 = vld [vmem:[%s11479_s6 + $0x80] sm:$0xff]  ;;  %3975 = vmatpush3.msra.mxu1 %v3642_v19 }
 0x864   :  { %3481 = vmatpush2.msra.mxu0 %v4960_v8  ;;  %v3641_v8 = vld [vmem:[%s11479_s6] sm:$0xff]  ;;  %3976 = vmatprep.subr.mxu1 %v3657_v1 }
 0x865   :  { %3482 = vmatprep.subr.mxu0 %v4961_v10  ;;  %3977 = vmatpush3.msra.mxu1 %v3641_v8  ;;  %v3640_v10 = vld [vmem:[%s11480_s5 + $0xf8] sm:$0xff] }
 0x866   :  { %3483 = vmatpush2.msra.mxu0 %v4962_v23  ;;  %3981 = vmatprep.subr.mxu1 %v3640_v10  ;;  %v13220_v10 = vld [vmem:[#allocation71_spill] sm:$0xff] }
 0x867   :  { %3484 = vmatprep.subr.mxu0 %v4963_v25 }
 0x868   :  { %3485 = vmatpush2.msra.mxu0 %v4964_v0 }
 0x869   :  { %3486 = vmatprep.subr.mxu0 %v4965_v26  ;;  %v13212_v26 = vld [vmem:[#allocation22_spill] sm:$0xff] }
 0x86a   :  { %3487 = vmatpush2.msra.mxu0 %v4966_v24 }
 0x86b   :  { %3488 = vmatprep.subr.mxu0 %v4967_v5  ;;  %v13213_v5 = vld [vmem:[#allocation23_spill] sm:$0xff] }
 0x86c   :  { %3489 = vmatpush2.msra.mxu0 %v4968_v13 }
 0x86d   :  { %3490 = vmatprep.subr.mxu0 %v4969_v14 }
 0x86e   :  { %3491 = vmatpush2.msra.mxu0 %v4970_v58 }
 0x86f   :  { %3492 = vmatprep.subr.mxu0 %v4971_v28 }
 0x870   :  { %3493 = vmatpush2.msra.mxu0 %v4972_v34  ;;  %v13214_v34 = vld [vmem:[#allocation57_spill] sm:$0xff] }
 0x871   :  { %3494 = vmatprep.subr.mxu0 %v4973_v11 }
 0x872   :  { %3495 = vmatpush2.msra.mxu0 %v4974_v59 }
 0x873   :  { %3496 = vmatprep.subr.mxu0 %v4975_v22  ;;  %v13215_v22 = vld [vmem:[#allocation25_spill] sm:$0xff] }
 0x874   :  { %3497 = vmatpush2.msra.mxu0 %v4976_v53 }
 0x875   :  { %3498 = vmatprep.subr.mxu0 %v4977_v20 }
 0x876   :  { %3499 = vmatpush2.msra.mxu0 %v4978_v18 }
 0x877   :  { %3500 = vmatprep.subr.mxu0 %v4979_v50 }
 0x878   :  { %3501 = vmatpush2.msra.mxu0 %v4980_v46  ;;  %v13216_v46 = vld [vmem:[#allocation60_spill] sm:$0xff] }
 0x879   :  { %3502 = vmatprep.subr.mxu0 %v4981_v49  ;;  %v462_v49 = vadd.f32 %v13216_v46, %v6696_v31 }
 0x87a   :  { %3503 = vmatpush2.msra.mxu0 %v4982_v9 }
 0x87b   :  { %3505 = vmatmul.mubr.f32.vlgmr.msra.gmra.mxu0 %v11034_v60 }
 0x87c   :  { %3510 = vmatprep.mubr.f32.mxu0 %v11049_v57 }
 0x87f   :  { %3511 = vmatmul.mubr.f32.gmra.mxu0 %v11042_v30 }
 0x8fa   :  { %v3352_v23 = vpop.f32.mrf.mxu0  ;;  %v3429_v28 = vpop.f32.mrf.mxu1 }
 0x8fb   :  { %v3517_v24 = vadd.f32 %v3352_v23, %v13212_v26  ;;  %v3545_v41 = vadd.f32 %v3429_v28, %v462_v49  ;;  %v623_v23 = vadd.f32 %v13220_v10, %v6709_v21  ;;  %v13223_v49 = vld [vmem:[#allocation74_spill] sm:$0xff]  ;;  %v3618_v10 = vld [vmem:[%s11480_s5 + $0x48] sm:$0xff] }
 0x8fc   :  { %v3354_v25 = vpop.f32.mrf.mxu0  ;;  %v3431_v20 = vpop.f32.mrf.mxu1 }
 0x8fd   :  { %v3518_v13 = vadd.f32 %v3354_v25, %v13213_v5  ;;  %v3937_v58 = vmul.f32 -1.442695, %v3517_v24  ;;  %v3546_v56 = vadd.f32 %v3431_v20, %v464_v38  ;;  %v3941_v37 = vmul.f32 -1.442695, %v3545_v41  ;;  %v13221_v24 = vld [vmem:[#allocation72_spill] sm:$0xff] }
 0x8fe   :  { %v625_v5 = vadd.f32 %v13221_v24, %v6718_v55  ;;  %v3631_v24 = vld [vmem:[%s11480_s5 + $0xb0] sm:$0xff] }
 0x8ff   :  { %v3358_v0 = vpop.f32.mrf.mxu0  ;;  %v3938_v59 = vmul.f32 -1.442695, %v3518_v13  ;;  %4297 = vpow2.f32 %v3937_v58  ;;  %v3435_v9 = vpop.f32.mrf.mxu1  ;;  %v3942_v54 = vmul.f32 -1.442695, %v3546_v56 }
 0x900   :  { %v3519_v11 = vadd.f32 %v3358_v0, %v13214_v34  ;;  %v3547_v51 = vadd.f32 %v3435_v9, %v468_v62  ;;  %v631_v9 = vadd.f32 %v13223_v49, %v6718_v55 }
 0x901   :  { %v3360_v14 = vpop.f32.mrf.mxu0  ;;  %4299 = vpow2.f32 %v3938_v59  ;;  %v3437_v42 = vpop.f32.mrf.mxu1  ;;  %v13222_v59 = vld [vmem:[#allocation73_spill] sm:$0xff] }
 0x902   :  { %v3520_v53 = vadd.f32 %v3360_v14, %v13215_v22  ;;  %v3939_v18 = vmul.f32 -1.442695, %v3519_v11  ;;  %v3548_v39 = vadd.f32 %v3437_v42, %v470_v36  ;;  %v3943_v2 = vmul.f32 -1.442695, %v3547_v51 }
 0x903   :  { %v629_v22 = vadd.f32 %v13222_v59, %v6709_v21  ;;  %v3627_v59 = vld [vmem:[%s11480_s5 + $0x90] sm:$0xff] }
 0x904   :  { %v3940_v50 = vmul.f32 -1.442695, %v3520_v53  ;;  %4301 = vpow2.f32 %v3939_v18  ;;  %v3944_v27 = vmul.f32 -1.442695, %v3548_v39 }
 0x906   :  { %4303 = vpow2.f32 %v3940_v50 }
 0x907   :  { %4305 = vpow2.f32 %v3941_v37 }
 0x908   :  { %4307 = vpow2.f32 %v3942_v54 }
 0x909   :  { %4309 = vpow2.f32 %v3943_v2 }
 0x90a   :  { %4311 = vpow2.f32 %v3944_v27 }
 0x90c   :  { %v4298_v7 = vpop.eup %4297 }
 0x90d   :  { %v3533_v48 = vadd.f32 1.0, %v4298_v7 }
 0x90e   :  { %v4300_v44 = vpop.eup %4299 }
 0x90f   :  { %v3534_v3 = vadd.f32 1.0, %v4300_v44  ;;  %4313 = vrcp.f32 %v3533_v48 }
 0x911   :  { %v4302_v16 = vpop.eup %4301  ;;  %4315 = vrcp.f32 %v3534_v3 }
 0x912   :  { %v3535_v47 = vadd.f32 1.0, %v4302_v16 }
 0x913   :  { %v4304_v31 = vpop.eup %4303 }
 0x914   :  { %v3536_v32 = vadd.f32 1.0, %v4304_v31  ;;  %4317 = vrcp.f32 %v3535_v47  ;;  %v4306_v33 = vpop.eup %4305 }
 0x915   :  { %v4308_v15 = vpop.eup %4307  ;;  %v3561_v12 = vadd.f32 1.0, %v4306_v33 }
 0x916   :  { %4319 = vrcp.f32 %v3536_v32  ;;  %v4310_v43 = vpop.eup %4309  ;;  %v3562_v35 = vadd.f32 1.0, %v4308_v15  ;;  %v3639_v15 = vld [vmem:[%s11480_s5 + $0xf0] sm:$0xff] }
 0x917   :  { %v4312_v29 = vpop.eup %4311  ;;  %v3563_v1 = vadd.f32 1.0, %v4310_v43  ;;  %4321 = vrcp.f32 %v3561_v12  ;;  %v3622_v12 = vld [vmem:[%s11480_s5 + $0x68] sm:$0xff] }
 0x918   :  { %v3564_v13 = vadd.f32 1.0, %v4312_v29  ;;  %4323 = vrcp.f32 %v3562_v35  ;;  %v3621_v29 = vld [vmem:[%s11480_s5 + $0x60] sm:$0xff]  ;;  %v3636_v35 = vld [vmem:[%s11480_s5 + $0xd8] sm:$0xff] }
 0x919   :  { %4325 = vrcp.f32 %v3563_v1  ;;  %v3619_v1 = vld [vmem:[%s11480_s5 + $0x50] sm:$0xff] }
 0x91c   :  { %v4314_v19 = vpop.eup %4313 }
 0x91e   :  { %v4316_v26 = vpop.eup %4315 }
 0x921   :  { %v4318_v11 = vpop.eup %4317 }
 0x923   :  { %v4320_v46 = vpop.eup %4319 }
 0x924   :  { %v4322_v41 = vpop.eup %4321 }
 0x925   :  { %v4324_v21 = vpop.eup %4323  ;;  %v3589_v62 = vsub.f32 1.0, %v4322_v41 }
 0x926   :  { %v4326_v61 = vpop.eup %4325  ;;  %v3590_v40 = vsub.f32 1.0, %v4324_v21  ;;  %v3598_v55 = vmul.f32 %v4324_v21, %v11036_v45  ;;  %v3624_v45 = vld [vmem:[%s11480_s5 + $0x78] sm:$0xff]  ;;  %v3945_v21 = vld [vmem:[%s11481_s7] ss:$0 sm:$0xff] }
 0x927   :  { %v3591_v37 = vsub.f32 1.0, %v4326_v61  ;;  %v3599_v27 = vmul.f32 %v4326_v61, %v11042_v30  ;;  %v3623_v30 = vld [vmem:[%s11480_s5 + $0x70] sm:$0xff] }
 0x93b   :  { %v3506_v6 = vpop.f32.mrf.mxu0 }
 0x93c   :  { %v3573_v52 = vadd.f32 %v3506_v6, %v6706_v4  ;;  %v3637_v6 = vld [vmem:[%s11480_s5 + $0xe0] sm:$0xff] }
 0x93d   :  { %v3508_v8 = vpop.f32.mrf.mxu0 }
 0x93e   :  { %v3577_v25 = vmul.f32 %v4314_v19, %v3573_v52  ;;  %v3574_v0 = vadd.f32 %v3508_v8, %v6715_v63  ;;  %v3620_v52 = vld [vmem:[%s11480_s5 + $0x58] sm:$0xff]  ;;  %v3635_v19 = vld [vmem:[%s11480_s5 + $0xd0] sm:$0xff]  ;;  %v3634_v8 = vld [vmem:[%s11480_s5 + $0xc8] sm:$0xff] }
 0x93f   :  { %v3512_v14 = vpop.f32.mrf.mxu0 }
 0x940   :  { %v3581_v58 = vadd.f32 %v3577_v25, %v623_v23  ;;  %v3578_v28 = vmul.f32 %v4316_v26, %v3574_v0  ;;  %v3575_v34 = vadd.f32 %v3512_v14, %v6706_v4  ;;  %v3633_v23 = vld [vmem:[%s11480_s5 + $0xc0] sm:$0xff]  ;;  %v3632_v0 = vld [vmem:[%s11480_s5 + $0xb8] sm:$0xff]  ;;  %v3614_v14 = vld [vmem:[%s11480_s5 + $0x28] sm:$0xff] }
 0x941   :  { %v3514_v53 = vpop.f32.mrf.mxu0  ;;  %v3617_v25 = vld [vmem:[%s11480_s5 + $0x40] sm:$0xff]  ;;  %v3616_v26 = vld [vmem:[%s11480_s5 + $0x38] sm:$0xff] }
 0x942   :  { %4327 = vtanh.f32 %v3581_v58  ;;  %v3582_v20 = vadd.f32 %v3578_v28, %v625_v5  ;;  %v3579_v18 = vmul.f32 %v4318_v11, %v3575_v34  ;;  %v3576_v50 = vadd.f32 %v3514_v53, %v6715_v63  ;;  %v3615_v5 = vld [vmem:[%s11480_s5 + $0x30] sm:$0xff]  ;;  %v3629_v58 = vld [vmem:[%s11480_s5 + $0xa0] sm:$0xff]  ;;  %v3628_v34 = vld [vmem:[%s11480_s5 + $0x98] sm:$0xff] }
 0x943   :  { %4329 = vrcp.f32 %v3564_v13  ;;  %v3597_v63 = vmul.f32 %v4322_v41, %v11034_v60  ;;  %v3630_v13 = vld [vmem:[%s11480_s5 + $0xa8] sm:$0xff]  ;;  %v3613_v28 = vld [vmem:[%s11480_s5 + $0x20] sm:$0xff]  ;;  %v3612_v11 = vld [vmem:[%s11480_s5 + $0x18] sm:$0xff] }
 0x944   :  { %4331 = vtanh.f32 %v3582_v20  ;;  %v3583_v17 = vadd.f32 %v3579_v18, %v629_v22  ;;  %v3580_v38 = vmul.f32 %v4320_v46, %v3576_v50  ;;  %v3611_v22 = vld [vmem:[%s11480_s5 + $0x10] sm:$0xff]  ;;  %v3626_v53 = vld [vmem:[%s11480_s5 + $0x88] sm:$0xff]  ;;  %v3625_v18 = vld [vmem:[%s11480_s5 + $0x80] sm:$0xff] }
 0x945   :  { %v3610_v20 = vld [vmem:[%s11480_s5 + $0x8] sm:$0xff]  ;;  %v3609_v50 = vld [vmem:[%s11480_s5] sm:$0xff] }
 0x946   :  { %4333 = vtanh.f32 %v3583_v17  ;;  %v3584_v4 = vadd.f32 %v3580_v38, %v631_v9 }
 0x948   :  { %4335 = vtanh.f32 %v3584_v4 }
 0x94f   :  { %v4328_v56 = vpop.eup %4327 }
 0x950   :  { %v4330_v42 = vpop.eup %4329  ;;  %v3593_v36 = vmul.f32 %v4328_v56, %v3589_v62 }
 0x951   :  { %v4332_v51 = vpop.eup %4331  ;;  %v3592_v2 = vsub.f32 1.0, %v4330_v42  ;;  %v3600_v31 = vmul.f32 %v4330_v42, %v11049_v57  ;;  %v3638_v57 = vld [vmem:[%s11480_s5 + $0xe8] sm:$0xff] }
 0x952   :  { %v3594_v39 = vmul.f32 %v4332_v51, %v3590_v40  ;;  %v11370_v54 = vadd.f32 %v3597_v63, %v3593_v36 }
 0x953   :  { %v4334_v7 = vpop.eup %4333 }
 0x954   :  { %v3595_v44 = vmul.f32 %v4334_v7, %v3591_v37  ;;  %v3602_v48 = vadd.f32 %v3598_v55, %v3594_v39  ;;  %v3605_v46 = vmax.f32 %v11370_v54, 0.0 }
 0x955   :  { %v4336_v16 = vpop.eup %4335 }
 0x956   :  { %v3596_v3 = vmul.f32 %v4336_v16, %v3592_v2  ;;  %v3603_v47 = vadd.f32 %v3599_v27, %v3595_v44  ;;  %v3606_v43 = vmax.f32 %v3602_v48, 0.0 }
 0x958   :  { %v3604_v32 = vadd.f32 %v3600_v31, %v3596_v3  ;;  %v3607_v33 = vmax.f32 %v3603_v47, 0.0 }
 0x95a   :  { %v3608_v60 = vmax.f32 %v3604_v32, 0.0 }
 0x95c   :  { %3737 = vmatprep.mubr.f32.mxu1 %v3608_v60 }
 0x95d   :  { %3738 = vmatmul.mubr.f32.vlgmr.msra.gmra.mxu1 %v3607_v33 }
 0x95e   :  { %3982 = vmatpush3.msra.mxu1 %v3624_v45  ;;  %3807 = vmatprep.mubr.f32.mxu1 %v3606_v43 }
 0x95f   :  { %3983 = vmatprep.subr.mxu1 %v3639_v15 }
 0x960   :  { %3984 = vmatpush3.msra.mxu1 %v3623_v30 }
 0x961   :  { %3985 = vmatprep.subr.mxu1 %v3638_v57 }
 0x962   :  { %3986 = vmatpush3.msra.mxu1 %v3622_v12 }
 0x963   :  { %3987 = vmatprep.subr.mxu1 %v3637_v6 }
 0x964   :  { %3988 = vmatpush3.msra.mxu1 %v3621_v29 }
 0x965   :  { %3989 = vmatprep.subr.mxu1 %v3636_v35 }
 0x966   :  { %3990 = vmatpush3.msra.mxu1 %v3620_v52 }
 0x967   :  { %3991 = vmatprep.subr.mxu1 %v3635_v19 }
 0x968   :  { %3992 = vmatpush3.msra.mxu1 %v3619_v1 }
 0x969   :  { %3993 = vmatprep.subr.mxu1 %v3634_v8 }
 0x96a   :  { %3994 = vmatpush3.msra.mxu1 %v3618_v10 }
 0x96b   :  { %3995 = vmatprep.subr.mxu1 %v3633_v23 }
 0x96c   :  { %3996 = vmatpush3.msra.mxu1 %v3617_v25 }
 0x96d   :  { %3997 = vmatprep.subr.mxu1 %v3632_v0 }
 0x96e   :  { %3998 = vmatpush3.msra.mxu1 %v3616_v26 }
 0x96f   :  { %3999 = vmatprep.subr.mxu1 %v3631_v24 }
 0x970   :  { %4000 = vmatpush3.msra.mxu1 %v3615_v5 }
 0x971   :  { %4001 = vmatprep.subr.mxu1 %v3630_v13 }
 0x972   :  { %4002 = vmatpush3.msra.mxu1 %v3614_v14 }
 0x973   :  { %4003 = vmatprep.subr.mxu1 %v3629_v58 }
 0x974   :  { %4004 = vmatpush3.msra.mxu1 %v3613_v28 }
 0x975   :  { %4005 = vmatprep.subr.mxu1 %v3628_v34 }
 0x976   :  { %4006 = vmatpush3.msra.mxu1 %v3612_v11 }
 0x977   :  { %4007 = vmatprep.subr.mxu1 %v3627_v59 }
 0x978   :  { %4008 = vmatpush3.msra.mxu1 %v3611_v22 }
 0x979   :  { %4009 = vmatprep.subr.mxu1 %v3626_v53 }
 0x97a   :  { %4010 = vmatpush3.msra.mxu1 %v3610_v20 }
 0x97b   :  { %4011 = vmatprep.subr.mxu1 %v3625_v18 }
 0x97c   :  { %4012 = vmatpush3.msra.mxu1 %v3609_v50 }
 0x97d   :  { %3808 = vmatmul.mubr.f32.vlgmr.msra.gmra.mxu1 %v3605_v46 }
 0xa1d   :  { %v3978_v49 = vpop.f32.mrf.mxu1 }
 0xa1f   :  { %v3979_v9 = vpop.f32.mrf.mxu1 }
 0xa20   :  { %v3980_v4 = vadd.f32 %v3979_v9, %v3978_v49 }
 0xa3d   :  { %v4013_v17 = vpop.f32.mrf.mxu1 }
 0xa3f   :  { %v4014_v38 = vpop.f32.mrf.mxu1 }
 0xa40   :  { %v4015_v41 = vadd.f32 %v4014_v38, %v4013_v17 }
 0xa42   :  { %v3810_v61 = vadd.f32 %v4015_v41, %v3980_v4 }
 0xa44   :  { %v3820_v62 = vadd.f32 %v3945_v21, %v3810_v61 }
 0xa46   :  { %3821 = vst [vmem:[%s11482_s8] sm:$0xff] %v3820_v62 }

</bundles_post_ra>
